<compile_context>
chip_gen: v5e
topology: v5e:2x2
jax: 0.10.0
libtpu: 0.0.40
codegen_flags: <defaults>
</compile_context>

<pallas_src>
import functools

import jax
import jax.numpy as jnp
from jax import lax
from jax.experimental import pallas as pl
from jax.experimental.pallas import tpu as pltpu

_PAD = 8           # stored top/left padding: interior writes start sublane-aligned
_TAP = _PAD - 2    # first conv-tap offset inside the stored array (conv padding = 2)


def _pad_hw(dim):
    # 8 on top/left (sublane-aligned interior store) and 2 (+1 to keep the padded
    # extent even so a stride-2 consumer can use the free pair-reshape) on
    # bottom/right; unread framing rows/cols stay zero and are never read.
    return (_PAD, 2 + dim % 2)


# ---------------------------------------------------------------------------
# capability / hardware probes
# ---------------------------------------------------------------------------
_BUFFERED_ONE = None


def _buffered_one_supported():
    """True iff pl.Buffered(1) (single-buffered constant operands) lowers/runs here."""
    global _BUFFERED_ONE
    if _BUFFERED_ONE is None:
        def probe_kernel(x_ref, o_ref):
            o_ref[...] = x_ref[...] + 1.0
        try:
            spec = pl.BlockSpec((8, 128), lambda i: (0, 0),
                                pipeline_mode=pl.Buffered(1))
            fn = pl.pallas_call(
                probe_kernel,
                out_shape=jax.ShapeDtypeStruct((8, 128), jnp.float32),
                grid=(2,),
                in_specs=[spec],
                out_specs=pl.BlockSpec((8, 128), lambda i: (0, 0)),
            )
            jax.block_until_ready(fn(jnp.zeros((8, 128), jnp.float32)))
            _BUFFERED_ONE = True
        except Exception:
            _BUFFERED_ONE = False
    return _BUFFERED_ONE


def _const_spec(shape):
    """BlockSpec for a grid-constant operand (weights/bias): single-buffered when
    supported, so only one copy is resident in VMEM (biggest saving on v7x 64 MiB)."""
    index_map = lambda i: (0,) * len(shape)
    if _buffered_one_supported():
        return pl.BlockSpec(shape, index_map, pipeline_mode=pl.Buffered(1))
    return pl.BlockSpec(shape, index_map)


_VMEM_LIMIT = None


def _vmem_limit_bytes():
    """Generation-aware scoped-VMEM limit (defaults are only 16/32 MiB)."""
    global _VMEM_LIMIT
    if _VMEM_LIMIT is None:
        try:
            cap = int(pltpu.get_tpu_info().vmem_capacity_bytes)
        except Exception:
            cap = 64 * 1024 * 1024                 # conservative (v7x-sized) fallback
        _VMEM_LIMIT = min(cap - cap // 4, 96 * 1024 * 1024)   # 96 MB v5e/v6e, 48 MB v7x
    return _VMEM_LIMIT


# ---------------------------------------------------------------------------
# fused 4x4 conv (+ bias + LeakyReLU) kernel
# ---------------------------------------------------------------------------
def _conv4x4_kernel(x_ref, w_ref, b_ref, o_ref, *, stride, h_out, w_out,
                    pad_out, leaky, chunks_per_dot):
    """One batch element.

    x_ref : stride 1 -> (1, Hp, Wp, Cin)              zero-padded input (bf16)
            stride 2 -> (1, Hp//2, 2, Wp//2, 2*Cin)   pair-reshaped padded input (bf16)
            (taps start at stored offset _TAP = 6; interior lives at offset _PAD = 8)
    w_ref : (16*Cin, Cout) bf16, rows ordered (dy, dx, ci)
    b_ref : (1, Cout) f32
    o_ref : pad_out -> (1, Hp_out, Wp_out, Cout): zero border strips + result written
                       into [_PAD:_PAD+h_out, _PAD:_PAD+w_out] (ready for next layer)
            else    -> (1, h_out, w_out, Cout)

    The 16 taps are consumed as accumulated MXU dots; `chunks_per_dot` natural chunks
    (Cin channels each for stride 1, 2*Cin for stride 2) are lane-concatenated per dot
    so each dot has K >= 128 where possible, without materializing the full im2col.
    """
    cout = w_ref.shape[-1]
    m = h_out * w_out
    k_chunk = x_ref.shape[-1]          # Cin (stride 1) or 2*Cin (stride 2)

    if stride == 1:
        num_chunks = 16

        def chunk(idx):                # tap (dy, dx), Cin channels
            dy, dx = divmod(idx, 4)
            return x_ref[0, _TAP + dy:_TAP + dy + h_out,
                         _TAP + dx:_TAP + dx + w_out, :]
    else:
        num_chunks = 8
        pb = _TAP // 2                 # tap base in row/col-pair units (= 3)

        def chunk(idx):                # taps (dy, 2*kx) & (dy, 2*kx+1), 2*Cin channels
            ky, rem = divmod(idx, 4)
            p, kx = divmod(rem, 2)     # dy = 2*ky + p
            return x_ref[0, pb + ky:pb + ky + h_out, p,
                         pb + kx:pb + kx + w_out, :]

    gk = chunks_per_dot * k_chunk      # K of each MXU dot
    acc = None
    for g in range(num_chunks // chunks_per_dot):
        parts = [chunk(g * chunks_per_dot + t) for t in range(chunks_per_dot)]
        lhs = parts[0] if chunks_per_dot == 1 else jnp.concatenate(parts, axis=-1)
        d = jnp.dot(lhs.reshape(m, gk), w_ref[g * gk:(g + 1) * gk, :],
                    preferred_element_type=jnp.float32)       # f32 accumulate
        acc = d if acc is None else acc + d

    acc = acc + b_ref[...]                                    # f32 bias
    if leaky:
        acc = jnp.maximum(acc, 0.2 * acc)                     # LeakyReLU(0.2)
    res = acc.reshape(h_out, w_out, cout).astype(o_ref.dtype)

    if pad_out:
        hp, wp = o_ref.shape[1], o_ref.shape[2]
        # Zero only the border strips (not the whole block): no double-store of the
        # interior, and the interior store starts at the sublane-aligned offset 8.
        o_ref[0, 0:_PAD, :, :] = jnp.zeros((_PAD, wp, cout), o_ref.dtype)
        o_ref[0, _PAD + h_out:hp, :, :] = jnp.zeros(
            (hp - _PAD - h_out, wp, cout), o_ref.dtype)
        o_ref[0, _PAD:_PAD + h_out, 0:_PAD, :] = jnp.zeros(
            (h_out, _PAD, cout), o_ref.dtype)
        o_ref[0, _PAD:_PAD + h_out, _PAD + w_out:wp, :] = jnp.zeros(
            (h_out, wp - _PAD - w_out, cout), o_ref.dtype)
        o_ref[0, _PAD:_PAD + h_out, _PAD:_PAD + w_out, :] = res
    else:
        o_ref[0] = res


def _conv4x4_layer(x_pad, w2d, b2, *, stride, h_out, w_out, pad_out, leaky,
                   out_dtype):
    n = x_pad.shape[0]
    cout = w2d.shape[1]
    if stride == 2:
        _, hp, wp, cin = x_pad.shape
        # Free (row-major-preserving) reshape: turns the stride-2 4x4 conv into
        # unit-stride taps over (row-pair, col-pair, 2*Cin); no HBM data movement.
        x_in = x_pad.reshape(n, hp // 2, 2, wp // 2, 2 * cin)
        num_chunks = 8
    else:
        x_in = x_pad
        num_chunks = 16
    k_chunk = x_in.shape[-1]

    # Chunks per MXU dot: lane-concat chunks only while K < 128; once a single chunk
    # already fills the MXU K dim, use accumulated per-chunk dots instead of
    # materializing the full (M, 16*Cin) im2col buffer.
    chunks_per_dot = 1
    while chunks_per_dot < num_chunks and chunks_per_dot * k_chunk < 128:
        chunks_per_dot *= 2

    blk = (1,) + x_in.shape[1:]
    nd = len(blk)
    x_spec = pl.BlockSpec(blk, lambda i: (i,) + (0,) * (nd - 1))
    w_spec = _const_spec(w2d.shape)      # single-buffered constants (when supported)
    b_spec = _const_spec(b2.shape)

    if pad_out:
        hp_out = h_out + sum(_pad_hw(h_out))
        wp_out = w_out + sum(_pad_hw(w_out))
        out_shape = (n, hp_out, wp_out, cout)
    else:
        out_shape = (n, h_out, w_out, cout)
    o_nd = len(out_shape)
    o_spec = pl.BlockSpec((1,) + out_shape[1:], lambda i: (i,) + (0,) * (o_nd - 1))

    kernel = functools.partial(_conv4x4_kernel, stride=stride, h_out=h_out,
                               w_out=w_out, pad_out=pad_out, leaky=leaky,
                               chunks_per_dot=chunks_per_dot)
    # TODO(synk): add an H-tile grid axis with a 3-row halo (pl.Element row offsets or
    # a manual make_async_copy halo) so the per-step working set fits v7x's 64 MiB and
    # both v7x TensorCores are busy at batch 1; unnecessary at these test shapes.
    return pl.pallas_call(
        kernel,
        out_shape=jax.ShapeDtypeStruct(out_shape, out_dtype),
        grid_spec=pltpu.PrefetchScalarGridSpec(
            num_scalar_prefetch=0,
            grid=(n,),
            in_specs=[x_spec, w_spec, b_spec],
            out_specs=o_spec,
        ),
        compiler_params=pltpu.CompilerParams(
            dimension_semantics=("parallel",),
            vmem_limit_bytes=_vmem_limit_bytes()),
    )(x_in, w2d, b2)


@functools.partial(jax.jit, static_argnames=("strides", "use_sigmoid"))
def nonorm_discriminator_pallas(x_nchw, weights, biases, strides,
                                use_sigmoid=False):
    """x_nchw: (N, Cin, H, W) f32; weights[i]: (4,4,Cin_i,Cout_i) HWIO;
    biases[i]: (Cout_i,); strides: tuple of ints. Returns (N, 1, H', W') f32."""
    n, _, h, w = x_nchw.shape
    n_layers = len(weights)

    # One-time NCHW->NHWC + pad + bf16 cast of the (tiny-channel) network input.
    x = jnp.transpose(x_nchw, (0, 2, 3, 1)).astype(jnp.bfloat16)
    x = jnp.pad(x, ((0, 0), _pad_hw(h), _pad_hw(w), (0, 0)))

    for li in range(n_layers):
        wt, bs, st = weights[li], biases[li], strides[li]
        cin, cout = wt.shape[2], wt.shape[3]
        h_out = h // st + 1            # floor((H + 2*2 - 4)/s) + 1
        w_out = w // st + 1
        last = li == n_layers - 1
        pad_out = not last             # intermediates emit ready-padded bf16 outputs
        out_dtype = jnp.float32 if last else jnp.bfloat16
        w2d = wt.astype(jnp.bfloat16).reshape(16 * cin, cout)   # rows = (dy, dx, ci)
        b2 = bs.astype(jnp.float32).reshape(1, cout)
        x = _conv4x4_layer(x, w2d, b2, stride=st, h_out=h_out, w_out=w_out,
                           pad_out=pad_out, leaky=not last, out_dtype=out_dtype)
        h, w = h_out, w_out

    if x.shape[-1] == 1:               # (N,H,W,1)->(N,1,H,W): free since C == 1
        out = x.reshape(n, 1, h, w)
    else:
        out = jnp.transpose(x, (0, 3, 1, 2))
    if use_sigmoid:
        out = jax.nn.sigmoid(out)
    return out


def nonorm_discriminator_reference(x_nchw, weights, biases, strides,
                                   use_sigmoid=False):
    """Pure-JAX reference with the same bf16-operand / f32-accumulate semantics
    as the kernel (PyTorch Conv2d == cross-correlation, kw=4, pad=2)."""
    x = jnp.transpose(x_nchw, (0, 2, 3, 1))
    dn = ("NHWC", "HWIO", "NHWC")
    n_layers = len(weights)
    for li in range(n_layers):
        y = lax.conv_general_dilated(
            x.astype(jnp.bfloat16), weights[li].astype(jnp.bfloat16),
            window_strides=(strides[li], strides[li]),
            padding=((2, 2), (2, 2)), dimension_numbers=dn,
            preferred_element_type=jnp.float32)
        y = y + biases[li][None, None, None, :]
        if li < n_layers - 1:
            y = jnp.maximum(y, 0.2 * y)
        x = y
    out = jnp.transpose(x, (0, 3, 1, 2))
    if use_sigmoid:
        out = jax.nn.sigmoid(out)
    return out


if __name__ == "__main__":
    N, INPUT_NC, NDF, N_LAYERS = 2, 4, 8, 3
    H = W = 16

    # Layer plan of NoNormDiscriminator(input_nc=4, ndf=8, n_layers=3, use_sigmoid=False)
    cfg = [(INPUT_NC, NDF, 2)]
    nf_mult = 1
    for nl in range(1, N_LAYERS):
        nf_prev, nf_mult = nf_mult, min(2 ** nl, 8)
        cfg.append((NDF * nf_prev, NDF * nf_mult, 2))
    nf_prev, nf_mult = nf_mult, min(2 ** N_LAYERS, 8)
    cfg.append((NDF * nf_prev, NDF * nf_mult, 1))
    cfg.append((NDF * nf_mult, 1, 1))

    key = jax.random.PRNGKey(0)
    key, kx = jax.random.split(key)
    x = jax.random.normal(kx, (N, INPUT_NC, H, W), jnp.float32)

    weights, biases, strides = [], [], []
    for cin, cout, st in cfg:
        key, kw_, kb_ = jax.random.split(key, 3)
        weights.append(jax.random.normal(kw_, (4, 4, cin, cout), jnp.float32) * 0.1)
        biases.append(jax.random.normal(kb_, (cout,), jnp.float32) * 0.1)
        strides.append(st)
    weights, biases, strides = tuple(weights), tuple(biases), tuple(strides)

    out = jax.block_until_ready(
        nonorm_discriminator_pallas(x, weights, biases, strides=strides))
    ref = jax.block_until_ready(
        nonorm_discriminator_reference(x, weights, biases, strides))

    assert out.shape == ref.shape == (N, 1, 5, 5), (out.shape, ref.shape)
    err = float(jnp.max(jnp.abs(out - ref)))
    assert err < 5e-2, err
    print("KERNEL_OK")
</pallas_src>

<mosaic_0001>
module attributes {stable_mosaic.version = 11 : i64} {
  func.func @_conv4x4_kernel(%arg0: i32, %arg1: memref<1x13x2x13x8xbf16, #tpu.memory_space<vmem>>, %arg2: memref<64x8xbf16, #tpu.memory_space<vmem>>, %arg3: memref<1x8xf32, #tpu.memory_space<vmem>>, %arg4: memref<1x20x20x8xbf16, #tpu.memory_space<vmem>>) attributes {dimension_semantics = [#tpu.dimension_semantics<parallel>], iteration_bounds = array<i64: 2>, scalar_prefetch = 0 : i64, scratch_operands = 0 : i64, tpu.core_type = #tpu.core_type<tc>, window_params = [{transform_indices = @transform_0, window_bounds = array<i64: 1, 13, 2, 13, 8>}, {pipeline_mode = #tpu.pipeline_mode<synchronous>, transform_indices = @transform_1, window_bounds = array<i64: 64, 8>}, {pipeline_mode = #tpu.pipeline_mode<synchronous>, transform_indices = @transform_2, window_bounds = array<i64: 1, 8>}, {transform_indices = @transform_3, window_bounds = array<i64: 1, 20, 20, 8>}]} {
    %c0 = arith.constant 0 : index
    %c3 = arith.constant 3 : index
    %c0_0 = arith.constant 0 : index
    %c3_1 = arith.constant 3 : index
    %c0_2 = arith.constant 0 : index
    %0 = vector.load %arg1[%c0, %c3, %c0_0, %c3_1, %c0_2] : memref<1x13x2x13x8xbf16, #tpu.memory_space<vmem>>, vector<1x9x1x9x8xbf16>
    %1 = vector.shape_cast %0 : vector<1x9x1x9x8xbf16> to vector<9x9x8xbf16>
    %c0_3 = arith.constant 0 : index
    %c3_4 = arith.constant 3 : index
    %c0_5 = arith.constant 0 : index
    %c4 = arith.constant 4 : index
    %c0_6 = arith.constant 0 : index
    %2 = vector.load %arg1[%c0_3, %c3_4, %c0_5, %c4, %c0_6] : memref<1x13x2x13x8xbf16, #tpu.memory_space<vmem>>, vector<1x9x1x9x8xbf16>
    %3 = vector.shape_cast %2 : vector<1x9x1x9x8xbf16> to vector<9x9x8xbf16>
    %c0_7 = arith.constant 0 : index
    %c3_8 = arith.constant 3 : index
    %c1 = arith.constant 1 : index
    %c3_9 = arith.constant 3 : index
    %c0_10 = arith.constant 0 : index
    %4 = vector.load %arg1[%c0_7, %c3_8, %c1, %c3_9, %c0_10] : memref<1x13x2x13x8xbf16, #tpu.memory_space<vmem>>, vector<1x9x1x9x8xbf16>
    %5 = vector.shape_cast %4 : vector<1x9x1x9x8xbf16> to vector<9x9x8xbf16>
    %c0_11 = arith.constant 0 : index
    %c3_12 = arith.constant 3 : index
    %c1_13 = arith.constant 1 : index
    %c4_14 = arith.constant 4 : index
    %c0_15 = arith.constant 0 : index
    %6 = vector.load %arg1[%c0_11, %c3_12, %c1_13, %c4_14, %c0_15] : memref<1x13x2x13x8xbf16, #tpu.memory_space<vmem>>, vector<1x9x1x9x8xbf16>
    %7 = vector.shape_cast %6 : vector<1x9x1x9x8xbf16> to vector<9x9x8xbf16>
    %c0_16 = arith.constant 0 : index
    %c4_17 = arith.constant 4 : index
    %c0_18 = arith.constant 0 : index
    %c3_19 = arith.constant 3 : index
    %c0_20 = arith.constant 0 : index
    %8 = vector.load %arg1[%c0_16, %c4_17, %c0_18, %c3_19, %c0_20] : memref<1x13x2x13x8xbf16, #tpu.memory_space<vmem>>, vector<1x9x1x9x8xbf16>
    %9 = vector.shape_cast %8 : vector<1x9x1x9x8xbf16> to vector<9x9x8xbf16>
    %c0_21 = arith.constant 0 : index
    %c4_22 = arith.constant 4 : index
    %c0_23 = arith.constant 0 : index
    %c4_24 = arith.constant 4 : index
    %c0_25 = arith.constant 0 : index
    %10 = vector.load %arg1[%c0_21, %c4_22, %c0_23, %c4_24, %c0_25] : memref<1x13x2x13x8xbf16, #tpu.memory_space<vmem>>, vector<1x9x1x9x8xbf16>
    %11 = vector.shape_cast %10 : vector<1x9x1x9x8xbf16> to vector<9x9x8xbf16>
    %c0_26 = arith.constant 0 : index
    %c4_27 = arith.constant 4 : index
    %c1_28 = arith.constant 1 : index
    %c3_29 = arith.constant 3 : index
    %c0_30 = arith.constant 0 : index
    %12 = vector.load %arg1[%c0_26, %c4_27, %c1_28, %c3_29, %c0_30] : memref<1x13x2x13x8xbf16, #tpu.memory_space<vmem>>, vector<1x9x1x9x8xbf16>
    %13 = vector.shape_cast %12 : vector<1x9x1x9x8xbf16> to vector<9x9x8xbf16>
    %c0_31 = arith.constant 0 : index
    %c4_32 = arith.constant 4 : index
    %c1_33 = arith.constant 1 : index
    %c4_34 = arith.constant 4 : index
    %c0_35 = arith.constant 0 : index
    %14 = vector.load %arg1[%c0_31, %c4_32, %c1_33, %c4_34, %c0_35] : memref<1x13x2x13x8xbf16, #tpu.memory_space<vmem>>, vector<1x9x1x9x8xbf16>
    %15 = vector.shape_cast %14 : vector<1x9x1x9x8xbf16> to vector<9x9x8xbf16>
    %16 = tpu.concatenate %1, %3, %5, %7, %9, %11, %13, %15 in 2 : vector<9x9x8xbf16>, vector<9x9x8xbf16>, vector<9x9x8xbf16>, vector<9x9x8xbf16>, vector<9x9x8xbf16>, vector<9x9x8xbf16>, vector<9x9x8xbf16>, vector<9x9x8xbf16> -> vector<9x9x64xbf16>
    %17 = vector.shape_cast %16 : vector<9x9x64xbf16> to vector<81x64xbf16>
    %c0_36 = arith.constant 0 : index
    %c0_37 = arith.constant 0 : index
    %18 = vector.load %arg2[%c0_36, %c0_37] : memref<64x8xbf16, #tpu.memory_space<vmem>>, vector<64x8xbf16>
    %cst = arith.constant dense<0.000000e+00> : vector<81x8xf32>
    %19 = tpu.matmul %17, %18, %cst {dimension_numbers = #tpu.dot_dimension_numbers<[1], [0], [0], [1], [0, 0, 1, 1], [], []>} : vector<81x64xbf16>, vector<64x8xbf16>, vector<81x8xf32> -> vector<81x8xf32>
    %c0_38 = arith.constant 0 : index
    %c0_39 = arith.constant 0 : index
    %20 = vector.load %arg3[%c0_38, %c0_39] : memref<1x8xf32, #tpu.memory_space<vmem>>, vector<1x8xf32>
    %21 = vector.broadcast %20 : vector<1x8xf32> to vector<81x8xf32>
    %22 = arith.addf %19, %21 : vector<81x8xf32>
    %cst_40 = arith.constant 2.000000e-01 : f32
    %23 = vector.broadcast %cst_40 : f32 to vector<81x8xf32>
    %24 = arith.mulf %23, %22 : vector<81x8xf32>
    %25 = arith.maximumf %22, %24 : vector<81x8xf32>
    %26 = vector.shape_cast %25 : vector<81x8xf32> to vector<9x9x8xf32>
    %27 = arith.truncf %26 : vector<9x9x8xf32> to vector<9x9x8xbf16>
    %cst_41 = arith.constant 0.000000e+00 : bf16
    %28 = vector.broadcast %cst_41 : bf16 to vector<8x20x8xbf16>
    %c0_42 = arith.constant 0 : index
    %c0_43 = arith.constant 0 : index
    %c0_44 = arith.constant 0 : index
    %c0_45 = arith.constant 0 : index
    %29 = vector.load %arg4[%c0_42, %c0_43, %c0_44, %c0_45] : memref<1x20x20x8xbf16, #tpu.memory_space<vmem>>, vector<1x8x20x8xbf16>
    %30 = vector.shape_cast %29 : vector<1x8x20x8xbf16> to vector<8x20x8xbf16>
    %31 = vector.shape_cast %28 : vector<8x20x8xbf16> to vector<1x8x20x8xbf16>
    tpu.vector_store %arg4[%c0_42, %c0_43, %c0_44, %c0_45], %31 {strides = array<i32>} : memref<1x20x20x8xbf16, #tpu.memory_space<vmem>>, vector<1x8x20x8xbf16>,
    %cst_46 = arith.constant 0.000000e+00 : bf16
    %32 = vector.broadcast %cst_46 : bf16 to vector<3x20x8xbf16>
    %c0_47 = arith.constant 0 : index
    %c17 = arith.constant 17 : index
    %c0_48 = arith.constant 0 : index
    %c0_49 = arith.constant 0 : index
    %33 = vector.load %arg4[%c0_47, %c17, %c0_48, %c0_49] : memref<1x20x20x8xbf16, #tpu.memory_space<vmem>>, vector<1x3x20x8xbf16>
    %34 = vector.shape_cast %33 : vector<1x3x20x8xbf16> to vector<3x20x8xbf16>
    %35 = vector.shape_cast %32 : vector<3x20x8xbf16> to vector<1x3x20x8xbf16>
    tpu.vector_store %arg4[%c0_47, %c17, %c0_48, %c0_49], %35 {strides = array<i32>} : memref<1x20x20x8xbf16, #tpu.memory_space<vmem>>, vector<1x3x20x8xbf16>,
    %cst_50 = arith.constant 0.000000e+00 : bf16
    %36 = vector.broadcast %cst_50 : bf16 to vector<9x8x8xbf16>
    %c0_51 = arith.constant 0 : index
    %c8 = arith.constant 8 : index
    %c0_52 = arith.constant 0 : index
    %c0_53 = arith.constant 0 : index
    %37 = vector.load %arg4[%c0_51, %c8, %c0_52, %c0_53] : memref<1x20x20x8xbf16, #tpu.memory_space<vmem>>, vector<1x9x8x8xbf16>
    %38 = vector.shape_cast %37 : vector<1x9x8x8xbf16> to vector<9x8x8xbf16>
    %39 = vector.shape_cast %36 : vector<9x8x8xbf16> to vector<1x9x8x8xbf16>
    tpu.vector_store %arg4[%c0_51, %c8, %c0_52, %c0_53], %39 {strides = array<i32>} : memref<1x20x20x8xbf16, #tpu.memory_space<vmem>>, vector<1x9x8x8xbf16>,
    %cst_54 = arith.constant 0.000000e+00 : bf16
    %40 = vector.broadcast %cst_54 : bf16 to vector<9x3x8xbf16>
    %c0_55 = arith.constant 0 : index
    %c8_56 = arith.constant 8 : index
    %c17_57 = arith.constant 17 : index
    %c0_58 = arith.constant 0 : index
    %41 = vector.load %arg4[%c0_55, %c8_56, %c17_57, %c0_58] : memref<1x20x20x8xbf16, #tpu.memory_space<vmem>>, vector<1x9x3x8xbf16>
    %42 = vector.shape_cast %41 : vector<1x9x3x8xbf16> to vector<9x3x8xbf16>
    %43 = vector.shape_cast %40 : vector<9x3x8xbf16> to vector<1x9x3x8xbf16>
    tpu.vector_store %arg4[%c0_55, %c8_56, %c17_57, %c0_58], %43 {strides = array<i32>} : memref<1x20x20x8xbf16, #tpu.memory_space<vmem>>, vector<1x9x3x8xbf16>,
    %c0_59 = arith.constant 0 : index
    %c8_60 = arith.constant 8 : index
    %c8_61 = arith.constant 8 : index
    %c0_62 = arith.constant 0 : index
    %44 = vector.load %arg4[%c0_59, %c8_60, %c8_61, %c0_62] : memref<1x20x20x8xbf16, #tpu.memory_space<vmem>>, vector<1x9x9x8xbf16>
    %45 = vector.shape_cast %44 : vector<1x9x9x8xbf16> to vector<9x9x8xbf16>
    %46 = vector.shape_cast %27 : vector<9x9x8xbf16> to vector<1x9x9x8xbf16>
    tpu.vector_store %arg4[%c0_59, %c8_60, %c8_61, %c0_62], %46 {strides = array<i32>} : memref<1x20x20x8xbf16, #tpu.memory_space<vmem>>, vector<1x9x9x8xbf16>,
    return
  }
  func.func @transform_0(%arg0: i32) -> (i32, i32, i32, i32, i32) {
    %c0_i32 = arith.constant 0 : i32
    %c0_i32_0 = arith.constant 0 : i32
    %c0_i32_1 = arith.constant 0 : i32
    %c0_i32_2 = arith.constant 0 : i32
    %c0_i32_3 = arith.constant 0 : i32
    return %arg0, %c0_i32, %c0_i32_0, %c0_i32_1, %c0_i32_2 : i32, i32, i32, i32, i32
  }
  func.func @transform_1(%arg0: i32) -> (i32, i32) {
    %c0_i32 = arith.constant 0 : i32
    %c0_i32_0 = arith.constant 0 : i32
    %c0_i32_1 = arith.constant 0 : i32
    return %c0_i32, %c0_i32_0 : i32, i32
  }
  func.func @transform_2(%arg0: i32) -> (i32, i32) {
    %c0_i32 = arith.constant 0 : i32
    %c0_i32_0 = arith.constant 0 : i32
    %c0_i32_1 = arith.constant 0 : i32
    return %c0_i32, %c0_i32_0 : i32, i32
  }
  func.func @transform_3(%arg0: i32) -> (i32, i32, i32, i32) {
    %c0_i32 = arith.constant 0 : i32
    %c0_i32_0 = arith.constant 0 : i32
    %c0_i32_1 = arith.constant 0 : i32
    %c0_i32_2 = arith.constant 0 : i32
    return %arg0, %c0_i32, %c0_i32_0, %c0_i32_1 : i32, i32, i32, i32
  }
}

module attributes {stable_mosaic.version = 11 : i64} {
  func.func @_conv4x4_kernel(%arg0: i32, %arg1: memref<1x10x2x10x16xbf16, #tpu.memory_space<vmem>>, %arg2: memref<128x16xbf16, #tpu.memory_space<vmem>>, %arg3: memref<1x16xf32, #tpu.memory_space<vmem>>, %arg4: memref<1x16x16x16xbf16, #tpu.memory_space<vmem>>) attributes {dimension_semantics = [#tpu.dimension_semantics<parallel>], iteration_bounds = array<i64: 2>, scalar_prefetch = 0 : i64, scratch_operands = 0 : i64, tpu.core_type = #tpu.core_type<tc>, window_params = [{transform_indices = @transform_0, window_bounds = array<i64: 1, 10, 2, 10, 16>}, {pipeline_mode = #tpu.pipeline_mode<synchronous>, transform_indices = @transform_1, window_bounds = array<i64: 128, 16>}, {pipeline_mode = #tpu.pipeline_mode<synchronous>, transform_indices = @transform_2, window_bounds = array<i64: 1, 16>}, {transform_indices = @transform_3, window_bounds = array<i64: 1, 16, 16, 16>}]} {
    %c0 = arith.constant 0 : index
    %c3 = arith.constant 3 : index
    %c0_0 = arith.constant 0 : index
    %c3_1 = arith.constant 3 : index
    %c0_2 = arith.constant 0 : index
    %0 = vector.load %arg1[%c0, %c3, %c0_0, %c3_1, %c0_2] : memref<1x10x2x10x16xbf16, #tpu.memory_space<vmem>>, vector<1x5x1x5x16xbf16>
    %1 = vector.shape_cast %0 : vector<1x5x1x5x16xbf16> to vector<5x5x16xbf16>
    %c0_3 = arith.constant 0 : index
    %c3_4 = arith.constant 3 : index
    %c0_5 = arith.constant 0 : index
    %c4 = arith.constant 4 : index
    %c0_6 = arith.constant 0 : index
    %2 = vector.load %arg1[%c0_3, %c3_4, %c0_5, %c4, %c0_6] : memref<1x10x2x10x16xbf16, #tpu.memory_space<vmem>>, vector<1x5x1x5x16xbf16>
    %3 = vector.shape_cast %2 : vector<1x5x1x5x16xbf16> to vector<5x5x16xbf16>
    %c0_7 = arith.constant 0 : index
    %c3_8 = arith.constant 3 : index
    %c1 = arith.constant 1 : index
    %c3_9 = arith.constant 3 : index
    %c0_10 = arith.constant 0 : index
    %4 = vector.load %arg1[%c0_7, %c3_8, %c1, %c3_9, %c0_10] : memref<1x10x2x10x16xbf16, #tpu.memory_space<vmem>>, vector<1x5x1x5x16xbf16>
    %5 = vector.shape_cast %4 : vector<1x5x1x5x16xbf16> to vector<5x5x16xbf16>
    %c0_11 = arith.constant 0 : index
    %c3_12 = arith.constant 3 : index
    %c1_13 = arith.constant 1 : index
    %c4_14 = arith.constant 4 : index
    %c0_15 = arith.constant 0 : index
    %6 = vector.load %arg1[%c0_11, %c3_12, %c1_13, %c4_14, %c0_15] : memref<1x10x2x10x16xbf16, #tpu.memory_space<vmem>>, vector<1x5x1x5x16xbf16>
    %7 = vector.shape_cast %6 : vector<1x5x1x5x16xbf16> to vector<5x5x16xbf16>
    %c0_16 = arith.constant 0 : index
    %c4_17 = arith.constant 4 : index
    %c0_18 = arith.constant 0 : index
    %c3_19 = arith.constant 3 : index
    %c0_20 = arith.constant 0 : index
    %8 = vector.load %arg1[%c0_16, %c4_17, %c0_18, %c3_19, %c0_20] : memref<1x10x2x10x16xbf16, #tpu.memory_space<vmem>>, vector<1x5x1x5x16xbf16>
    %9 = vector.shape_cast %8 : vector<1x5x1x5x16xbf16> to vector<5x5x16xbf16>
    %c0_21 = arith.constant 0 : index
    %c4_22 = arith.constant 4 : index
    %c0_23 = arith.constant 0 : index
    %c4_24 = arith.constant 4 : index
    %c0_25 = arith.constant 0 : index
    %10 = vector.load %arg1[%c0_21, %c4_22, %c0_23, %c4_24, %c0_25] : memref<1x10x2x10x16xbf16, #tpu.memory_space<vmem>>, vector<1x5x1x5x16xbf16>
    %11 = vector.shape_cast %10 : vector<1x5x1x5x16xbf16> to vector<5x5x16xbf16>
    %c0_26 = arith.constant 0 : index
    %c4_27 = arith.constant 4 : index
    %c1_28 = arith.constant 1 : index
    %c3_29 = arith.constant 3 : index
    %c0_30 = arith.constant 0 : index
    %12 = vector.load %arg1[%c0_26, %c4_27, %c1_28, %c3_29, %c0_30] : memref<1x10x2x10x16xbf16, #tpu.memory_space<vmem>>, vector<1x5x1x5x16xbf16>
    %13 = vector.shape_cast %12 : vector<1x5x1x5x16xbf16> to vector<5x5x16xbf16>
    %c0_31 = arith.constant 0 : index
    %c4_32 = arith.constant 4 : index
    %c1_33 = arith.constant 1 : index
    %c4_34 = arith.constant 4 : index
    %c0_35 = arith.constant 0 : index
    %14 = vector.load %arg1[%c0_31, %c4_32, %c1_33, %c4_34, %c0_35] : memref<1x10x2x10x16xbf16, #tpu.memory_space<vmem>>, vector<1x5x1x5x16xbf16>
    %15 = vector.shape_cast %14 : vector<1x5x1x5x16xbf16> to vector<5x5x16xbf16>
    %16 = tpu.concatenate %1, %3, %5, %7, %9, %11, %13, %15 in 2 : vector<5x5x16xbf16>, vector<5x5x16xbf16>, vector<5x5x16xbf16>, vector<5x5x16xbf16>, vector<5x5x16xbf16>, vector<5x5x16xbf16>, vector<5x5x16xbf16>, vector<5x5x16xbf16> -> vector<5x5x128xbf16>
    %17 = vector.shape_cast %16 : vector<5x5x128xbf16> to vector<25x128xbf16>
    %c0_36 = arith.constant 0 : index
    %c0_37 = arith.constant 0 : index
    %18 = vector.load %arg2[%c0_36, %c0_37] : memref<128x16xbf16, #tpu.memory_space<vmem>>, vector<128x16xbf16>
    %cst = arith.constant dense<0.000000e+00> : vector<25x16xf32>
    %19 = tpu.matmul %17, %18, %cst {dimension_numbers = #tpu.dot_dimension_numbers<[1], [0], [0], [1], [0, 0, 1, 1], [], []>} : vector<25x128xbf16>, vector<128x16xbf16>, vector<25x16xf32> -> vector<25x16xf32>
    %c0_38 = arith.constant 0 : index
    %c0_39 = arith.constant 0 : index
    %20 = vector.load %arg3[%c0_38, %c0_39] : memref<1x16xf32, #tpu.memory_space<vmem>>, vector<1x16xf32>
    %21 = vector.broadcast %20 : vector<1x16xf32> to vector<25x16xf32>
    %22 = arith.addf %19, %21 : vector<25x16xf32>
    %cst_40 = arith.constant 2.000000e-01 : f32
    %23 = vector.broadcast %cst_40 : f32 to vector<25x16xf32>
    %24 = arith.mulf %23, %22 : vector<25x16xf32>
    %25 = arith.maximumf %22, %24 : vector<25x16xf32>
    %26 = vector.shape_cast %25 : vector<25x16xf32> to vector<5x5x16xf32>
    %27 = arith.truncf %26 : vector<5x5x16xf32> to vector<5x5x16xbf16>
    %cst_41 = arith.constant 0.000000e+00 : bf16
    %28 = vector.broadcast %cst_41 : bf16 to vector<8x16x16xbf16>
    %c0_42 = arith.constant 0 : index
    %c0_43 = arith.constant 0 : index
    %c0_44 = arith.constant 0 : index
    %c0_45 = arith.constant 0 : index
    %29 = vector.load %arg4[%c0_42, %c0_43, %c0_44, %c0_45] : memref<1x16x16x16xbf16, #tpu.memory_space<vmem>>, vector<1x8x16x16xbf16>
    %30 = vector.shape_cast %29 : vector<1x8x16x16xbf16> to vector<8x16x16xbf16>
    %31 = vector.shape_cast %28 : vector<8x16x16xbf16> to vector<1x8x16x16xbf16>
    tpu.vector_store %arg4[%c0_42, %c0_43, %c0_44, %c0_45], %31 {strides = array<i32>} : memref<1x16x16x16xbf16, #tpu.memory_space<vmem>>, vector<1x8x16x16xbf16>,
    %cst_46 = arith.constant 0.000000e+00 : bf16
    %32 = vector.broadcast %cst_46 : bf16 to vector<3x16x16xbf16>
    %c0_47 = arith.constant 0 : index
    %c13 = arith.constant 13 : index
    %c0_48 = arith.constant 0 : index
    %c0_49 = arith.constant 0 : index
    %33 = vector.load %arg4[%c0_47, %c13, %c0_48, %c0_49] : memref<1x16x16x16xbf16, #tpu.memory_space<vmem>>, vector<1x3x16x16xbf16>
    %34 = vector.shape_cast %33 : vector<1x3x16x16xbf16> to vector<3x16x16xbf16>
    %35 = vector.shape_cast %32 : vector<3x16x16xbf16> to vector<1x3x16x16xbf16>
    tpu.vector_store %arg4[%c0_47, %c13, %c0_48, %c0_49], %35 {strides = array<i32>} : memref<1x16x16x16xbf16, #tpu.memory_space<vmem>>, vector<1x3x16x16xbf16>,
    %cst_50 = arith.constant 0.000000e+00 : bf16
    %36 = vector.broadcast %cst_50 : bf16 to vector<5x8x16xbf16>
    %c0_51 = arith.constant 0 : index
    %c8 = arith.constant 8 : index
    %c0_52 = arith.constant 0 : index
    %c0_53 = arith.constant 0 : index
    %37 = vector.load %arg4[%c0_51, %c8, %c0_52, %c0_53] : memref<1x16x16x16xbf16, #tpu.memory_space<vmem>>, vector<1x5x8x16xbf16>
    %38 = vector.shape_cast %37 : vector<1x5x8x16xbf16> to vector<5x8x16xbf16>
    %39 = vector.shape_cast %36 : vector<5x8x16xbf16> to vector<1x5x8x16xbf16>
    tpu.vector_store %arg4[%c0_51, %c8, %c0_52, %c0_53], %39 {strides = array<i32>} : memref<1x16x16x16xbf16, #tpu.memory_space<vmem>>, vector<1x5x8x16xbf16>,
    %cst_54 = arith.constant 0.000000e+00 : bf16
    %40 = vector.broadcast %cst_54 : bf16 to vector<5x3x16xbf16>
    %c0_55 = arith.constant 0 : index
    %c8_56 = arith.constant 8 : index
    %c13_57 = arith.constant 13 : index
    %c0_58 = arith.constant 0 : index
    %41 = vector.load %arg4[%c0_55, %c8_56, %c13_57, %c0_58] : memref<1x16x16x16xbf16, #tpu.memory_space<vmem>>, vector<1x5x3x16xbf16>
    %42 = vector.shape_cast %41 : vector<1x5x3x16xbf16> to vector<5x3x16xbf16>
    %43 = vector.shape_cast %40 : vector<5x3x16xbf16> to vector<1x5x3x16xbf16>
    tpu.vector_store %arg4[%c0_55, %c8_56, %c13_57, %c0_58], %43 {strides = array<i32>} : memref<1x16x16x16xbf16, #tpu.memory_space<vmem>>, vector<1x5x3x16xbf16>,
    %c0_59 = arith.constant 0 : index
    %c8_60 = arith.constant 8 : index
    %c8_61 = arith.constant 8 : index
    %c0_62 = arith.constant 0 : index
    %44 = vector.load %arg4[%c0_59, %c8_60, %c8_61, %c0_62] : memref<1x16x16x16xbf16, #tpu.memory_space<vmem>>, vector<1x5x5x16xbf16>
    %45 = vector.shape_cast %44 : vector<1x5x5x16xbf16> to vector<5x5x16xbf16>
    %46 = vector.shape_cast %27 : vector<5x5x16xbf16> to vector<1x5x5x16xbf16>
    tpu.vector_store %arg4[%c0_59, %c8_60, %c8_61, %c0_62], %46 {strides = array<i32>} : memref<1x16x16x16xbf16, #tpu.memory_space<vmem>>, vector<1x5x5x16xbf16>,
    return
  }
  func.func @transform_0(%arg0: i32) -> (i32, i32, i32, i32, i32) {
    %c0_i32 = arith.constant 0 : i32
    %c0_i32_0 = arith.constant 0 : i32
    %c0_i32_1 = arith.constant 0 : i32
    %c0_i32_2 = arith.constant 0 : i32
    %c0_i32_3 = arith.constant 0 : i32
    return %arg0, %c0_i32, %c0_i32_0, %c0_i32_1, %c0_i32_2 : i32, i32, i32, i32, i32
  }
  func.func @transform_1(%arg0: i32) -> (i32, i32) {
    %c0_i32 = arith.constant 0 : i32
    %c0_i32_0 = arith.constant 0 : i32
    %c0_i32_1 = arith.constant 0 : i32
    return %c0_i32, %c0_i32_0 : i32, i32
  }
  func.func @transform_2(%arg0: i32) -> (i32, i32) {
    %c0_i32 = arith.constant 0 : i32
    %c0_i32_0 = arith.constant 0 : i32
    %c0_i32_1 = arith.constant 0 : i32
    return %c0_i32, %c0_i32_0 : i32, i32
  }
  func.func @transform_3(%arg0: i32) -> (i32, i32, i32, i32) {
    %c0_i32 = arith.constant 0 : i32
    %c0_i32_0 = arith.constant 0 : i32
    %c0_i32_1 = arith.constant 0 : i32
    %c0_i32_2 = arith.constant 0 : i32
    return %arg0, %c0_i32, %c0_i32_0, %c0_i32_1 : i32, i32, i32, i32
  }
}

module attributes {stable_mosaic.version = 11 : i64} {
  func.func @_conv4x4_kernel(%arg0: i32, %arg1: memref<1x8x2x8x32xbf16, #tpu.memory_space<vmem>>, %arg2: memref<256x32xbf16, #tpu.memory_space<vmem>>, %arg3: memref<1x32xf32, #tpu.memory_space<vmem>>, %arg4: memref<1x14x14x32xbf16, #tpu.memory_space<vmem>>) attributes {dimension_semantics = [#tpu.dimension_semantics<parallel>], iteration_bounds = array<i64: 2>, scalar_prefetch = 0 : i64, scratch_operands = 0 : i64, tpu.core_type = #tpu.core_type<tc>, window_params = [{transform_indices = @transform_0, window_bounds = array<i64: 1, 8, 2, 8, 32>}, {pipeline_mode = #tpu.pipeline_mode<synchronous>, transform_indices = @transform_1, window_bounds = array<i64: 256, 32>}, {pipeline_mode = #tpu.pipeline_mode<synchronous>, transform_indices = @transform_2, window_bounds = array<i64: 1, 32>}, {transform_indices = @transform_3, window_bounds = array<i64: 1, 14, 14, 32>}]} {
    %c0 = arith.constant 0 : index
    %c3 = arith.constant 3 : index
    %c0_0 = arith.constant 0 : index
    %c3_1 = arith.constant 3 : index
    %c0_2 = arith.constant 0 : index
    %0 = vector.load %arg1[%c0, %c3, %c0_0, %c3_1, %c0_2] : memref<1x8x2x8x32xbf16, #tpu.memory_space<vmem>>, vector<1x3x1x3x32xbf16>
    %1 = vector.shape_cast %0 : vector<1x3x1x3x32xbf16> to vector<3x3x32xbf16>
    %c0_3 = arith.constant 0 : index
    %c3_4 = arith.constant 3 : index
    %c0_5 = arith.constant 0 : index
    %c4 = arith.constant 4 : index
    %c0_6 = arith.constant 0 : index
    %2 = vector.load %arg1[%c0_3, %c3_4, %c0_5, %c4, %c0_6] : memref<1x8x2x8x32xbf16, #tpu.memory_space<vmem>>, vector<1x3x1x3x32xbf16>
    %3 = vector.shape_cast %2 : vector<1x3x1x3x32xbf16> to vector<3x3x32xbf16>
    %c0_7 = arith.constant 0 : index
    %c3_8 = arith.constant 3 : index
    %c1 = arith.constant 1 : index
    %c3_9 = arith.constant 3 : index
    %c0_10 = arith.constant 0 : index
    %4 = vector.load %arg1[%c0_7, %c3_8, %c1, %c3_9, %c0_10] : memref<1x8x2x8x32xbf16, #tpu.memory_space<vmem>>, vector<1x3x1x3x32xbf16>
    %5 = vector.shape_cast %4 : vector<1x3x1x3x32xbf16> to vector<3x3x32xbf16>
    %c0_11 = arith.constant 0 : index
    %c3_12 = arith.constant 3 : index
    %c1_13 = arith.constant 1 : index
    %c4_14 = arith.constant 4 : index
    %c0_15 = arith.constant 0 : index
    %6 = vector.load %arg1[%c0_11, %c3_12, %c1_13, %c4_14, %c0_15] : memref<1x8x2x8x32xbf16, #tpu.memory_space<vmem>>, vector<1x3x1x3x32xbf16>
    %7 = vector.shape_cast %6 : vector<1x3x1x3x32xbf16> to vector<3x3x32xbf16>
    %8 = tpu.concatenate %1, %3, %5, %7 in 2 : vector<3x3x32xbf16>, vector<3x3x32xbf16>, vector<3x3x32xbf16>, vector<3x3x32xbf16> -> vector<3x3x128xbf16>
    %9 = vector.shape_cast %8 : vector<3x3x128xbf16> to vector<9x128xbf16>
    %c0_16 = arith.constant 0 : index
    %c0_17 = arith.constant 0 : index
    %10 = vector.load %arg2[%c0_16, %c0_17] : memref<256x32xbf16, #tpu.memory_space<vmem>>, vector<128x32xbf16>
    %cst = arith.constant dense<0.000000e+00> : vector<9x32xf32>
    %11 = tpu.matmul %9, %10, %cst {dimension_numbers = #tpu.dot_dimension_numbers<[1], [0], [0], [1], [0, 0, 1, 1], [], []>} : vector<9x128xbf16>, vector<128x32xbf16>, vector<9x32xf32> -> vector<9x32xf32>
    %c0_18 = arith.constant 0 : index
    %c4_19 = arith.constant 4 : index
    %c0_20 = arith.constant 0 : index
    %c3_21 = arith.constant 3 : index
    %c0_22 = arith.constant 0 : index
    %12 = vector.load %arg1[%c0_18, %c4_19, %c0_20, %c3_21, %c0_22] : memref<1x8x2x8x32xbf16, #tpu.memory_space<vmem>>, vector<1x3x1x3x32xbf16>
    %13 = vector.shape_cast %12 : vector<1x3x1x3x32xbf16> to vector<3x3x32xbf16>
    %c0_23 = arith.constant 0 : index
    %c4_24 = arith.constant 4 : index
    %c0_25 = arith.constant 0 : index
    %c4_26 = arith.constant 4 : index
    %c0_27 = arith.constant 0 : index
    %14 = vector.load %arg1[%c0_23, %c4_24, %c0_25, %c4_26, %c0_27] : memref<1x8x2x8x32xbf16, #tpu.memory_space<vmem>>, vector<1x3x1x3x32xbf16>
    %15 = vector.shape_cast %14 : vector<1x3x1x3x32xbf16> to vector<3x3x32xbf16>
    %c0_28 = arith.constant 0 : index
    %c4_29 = arith.constant 4 : index
    %c1_30 = arith.constant 1 : index
    %c3_31 = arith.constant 3 : index
    %c0_32 = arith.constant 0 : index
    %16 = vector.load %arg1[%c0_28, %c4_29, %c1_30, %c3_31, %c0_32] : memref<1x8x2x8x32xbf16, #tpu.memory_space<vmem>>, vector<1x3x1x3x32xbf16>
    %17 = vector.shape_cast %16 : vector<1x3x1x3x32xbf16> to vector<3x3x32xbf16>
    %c0_33 = arith.constant 0 : index
    %c4_34 = arith.constant 4 : index
    %c1_35 = arith.constant 1 : index
    %c4_36 = arith.constant 4 : index
    %c0_37 = arith.constant 0 : index
    %18 = vector.load %arg1[%c0_33, %c4_34, %c1_35, %c4_36, %c0_37] : memref<1x8x2x8x32xbf16, #tpu.memory_space<vmem>>, vector<1x3x1x3x32xbf16>
    %19 = vector.shape_cast %18 : vector<1x3x1x3x32xbf16> to vector<3x3x32xbf16>
    %20 = tpu.concatenate %13, %15, %17, %19 in 2 : vector<3x3x32xbf16>, vector<3x3x32xbf16>, vector<3x3x32xbf16>, vector<3x3x32xbf16> -> vector<3x3x128xbf16>
    %21 = vector.shape_cast %20 : vector<3x3x128xbf16> to vector<9x128xbf16>
    %c128 = arith.constant 128 : index
    %c0_38 = arith.constant 0 : index
    %22 = vector.load %arg2[%c128, %c0_38] : memref<256x32xbf16, #tpu.memory_space<vmem>>, vector<128x32xbf16>
    %cst_39 = arith.constant dense<0.000000e+00> : vector<9x32xf32>
    %23 = tpu.matmul %21, %22, %cst_39 {dimension_numbers = #tpu.dot_dimension_numbers<[1], [0], [0], [1], [0, 0, 1, 1], [], []>} : vector<9x128xbf16>, vector<128x32xbf16>, vector<9x32xf32> -> vector<9x32xf32>
    %24 = arith.addf %11, %23 : vector<9x32xf32>
    %c0_40 = arith.constant 0 : index
    %c0_41 = arith.constant 0 : index
    %25 = vector.load %arg3[%c0_40, %c0_41] : memref<1x32xf32, #tpu.memory_space<vmem>>, vector<1x32xf32>
    %26 = vector.broadcast %25 : vector<1x32xf32> to vector<9x32xf32>
    %27 = arith.addf %24, %26 : vector<9x32xf32>
    %cst_42 = arith.constant 2.000000e-01 : f32
    %28 = vector.broadcast %cst_42 : f32 to vector<9x32xf32>
    %29 = arith.mulf %28, %27 : vector<9x32xf32>
    %30 = arith.maximumf %27, %29 : vector<9x32xf32>
    %31 = vector.shape_cast %30 : vector<9x32xf32> to vector<3x3x32xf32>
    %32 = arith.truncf %31 : vector<3x3x32xf32> to vector<3x3x32xbf16>
    %cst_43 = arith.constant 0.000000e+00 : bf16
    %33 = vector.broadcast %cst_43 : bf16 to vector<8x14x32xbf16>
    %c0_44 = arith.constant 0 : index
    %c0_45 = arith.constant 0 : index
    %c0_46 = arith.constant 0 : index
    %c0_47 = arith.constant 0 : index
    %34 = vector.load %arg4[%c0_44, %c0_45, %c0_46, %c0_47] : memref<1x14x14x32xbf16, #tpu.memory_space<vmem>>, vector<1x8x14x32xbf16>
    %35 = vector.shape_cast %34 : vector<1x8x14x32xbf16> to vector<8x14x32xbf16>
    %36 = vector.shape_cast %33 : vector<8x14x32xbf16> to vector<1x8x14x32xbf16>
    tpu.vector_store %arg4[%c0_44, %c0_45, %c0_46, %c0_47], %36 {strides = array<i32>} : memref<1x14x14x32xbf16, #tpu.memory_space<vmem>>, vector<1x8x14x32xbf16>,
    %cst_48 = arith.constant 0.000000e+00 : bf16
    %37 = vector.broadcast %cst_48 : bf16 to vector<3x14x32xbf16>
    %c0_49 = arith.constant 0 : index
    %c11 = arith.constant 11 : index
    %c0_50 = arith.constant 0 : index
    %c0_51 = arith.constant 0 : index
    %38 = vector.load %arg4[%c0_49, %c11, %c0_50, %c0_51] : memref<1x14x14x32xbf16, #tpu.memory_space<vmem>>, vector<1x3x14x32xbf16>
    %39 = vector.shape_cast %38 : vector<1x3x14x32xbf16> to vector<3x14x32xbf16>
    %40 = vector.shape_cast %37 : vector<3x14x32xbf16> to vector<1x3x14x32xbf16>
    tpu.vector_store %arg4[%c0_49, %c11, %c0_50, %c0_51], %40 {strides = array<i32>} : memref<1x14x14x32xbf16, #tpu.memory_space<vmem>>, vector<1x3x14x32xbf16>,
    %cst_52 = arith.constant 0.000000e+00 : bf16
    %41 = vector.broadcast %cst_52 : bf16 to vector<3x8x32xbf16>
    %c0_53 = arith.constant 0 : index
    %c8 = arith.constant 8 : index
    %c0_54 = arith.constant 0 : index
    %c0_55 = arith.constant 0 : index
    %42 = vector.load %arg4[%c0_53, %c8, %c0_54, %c0_55] : memref<1x14x14x32xbf16, #tpu.memory_space<vmem>>, vector<1x3x8x32xbf16>
    %43 = vector.shape_cast %42 : vector<1x3x8x32xbf16> to vector<3x8x32xbf16>
    %44 = vector.shape_cast %41 : vector<3x8x32xbf16> to vector<1x3x8x32xbf16>
    tpu.vector_store %arg4[%c0_53, %c8, %c0_54, %c0_55], %44 {strides = array<i32>} : memref<1x14x14x32xbf16, #tpu.memory_space<vmem>>, vector<1x3x8x32xbf16>,
    %cst_56 = arith.constant 0.000000e+00 : bf16
    %45 = vector.broadcast %cst_56 : bf16 to vector<3x3x32xbf16>
    %c0_57 = arith.constant 0 : index
    %c8_58 = arith.constant 8 : index
    %c11_59 = arith.constant 11 : index
    %c0_60 = arith.constant 0 : index
    %46 = vector.load %arg4[%c0_57, %c8_58, %c11_59, %c0_60] : memref<1x14x14x32xbf16, #tpu.memory_space<vmem>>, vector<1x3x3x32xbf16>
    %47 = vector.shape_cast %46 : vector<1x3x3x32xbf16> to vector<3x3x32xbf16>
    %48 = vector.shape_cast %45 : vector<3x3x32xbf16> to vector<1x3x3x32xbf16>
    tpu.vector_store %arg4[%c0_57, %c8_58, %c11_59, %c0_60], %48 {strides = array<i32>} : memref<1x14x14x32xbf16, #tpu.memory_space<vmem>>, vector<1x3x3x32xbf16>,
    %c0_61 = arith.constant 0 : index
    %c8_62 = arith.constant 8 : index
    %c8_63 = arith.constant 8 : index
    %c0_64 = arith.constant 0 : index
    %49 = vector.load %arg4[%c0_61, %c8_62, %c8_63, %c0_64] : memref<1x14x14x32xbf16, #tpu.memory_space<vmem>>, vector<1x3x3x32xbf16>
    %50 = vector.shape_cast %49 : vector<1x3x3x32xbf16> to vector<3x3x32xbf16>
    %51 = vector.shape_cast %32 : vector<3x3x32xbf16> to vector<1x3x3x32xbf16>
    tpu.vector_store %arg4[%c0_61, %c8_62, %c8_63, %c0_64], %51 {strides = array<i32>} : memref<1x14x14x32xbf16, #tpu.memory_space<vmem>>, vector<1x3x3x32xbf16>,
    return
  }
  func.func @transform_0(%arg0: i32) -> (i32, i32, i32, i32, i32) {
    %c0_i32 = arith.constant 0 : i32
    %c0_i32_0 = arith.constant 0 : i32
    %c0_i32_1 = arith.constant 0 : i32
    %c0_i32_2 = arith.constant 0 : i32
    %c0_i32_3 = arith.constant 0 : i32
    return %arg0, %c0_i32, %c0_i32_0, %c0_i32_1, %c0_i32_2 : i32, i32, i32, i32, i32
  }
  func.func @transform_1(%arg0: i32) -> (i32, i32) {
    %c0_i32 = arith.constant 0 : i32
    %c0_i32_0 = arith.constant 0 : i32
    %c0_i32_1 = arith.constant 0 : i32
    return %c0_i32, %c0_i32_0 : i32, i32
  }
  func.func @transform_2(%arg0: i32) -> (i32, i32) {
    %c0_i32 = arith.constant 0 : i32
    %c0_i32_0 = arith.constant 0 : i32
    %c0_i32_1 = arith.constant 0 : i32
    return %c0_i32, %c0_i32_0 : i32, i32
  }
  func.func @transform_3(%arg0: i32) -> (i32, i32, i32, i32) {
    %c0_i32 = arith.constant 0 : i32
    %c0_i32_0 = arith.constant 0 : i32
    %c0_i32_1 = arith.constant 0 : i32
    %c0_i32_2 = arith.constant 0 : i32
    return %arg0, %c0_i32, %c0_i32_0, %c0_i32_1 : i32, i32, i32, i32
  }
}

module attributes {stable_mosaic.version = 11 : i64} {
  func.func @_conv4x4_kernel(%arg0: i32, %arg1: memref<1x14x14x32xbf16, #tpu.memory_space<vmem>>, %arg2: memref<512x64xbf16, #tpu.memory_space<vmem>>, %arg3: memref<1x64xf32, #tpu.memory_space<vmem>>, %arg4: memref<1x14x14x64xbf16, #tpu.memory_space<vmem>>) attributes {dimension_semantics = [#tpu.dimension_semantics<parallel>], iteration_bounds = array<i64: 2>, scalar_prefetch = 0 : i64, scratch_operands = 0 : i64, tpu.core_type = #tpu.core_type<tc>, window_params = [{transform_indices = @transform_0, window_bounds = array<i64: 1, 14, 14, 32>}, {pipeline_mode = #tpu.pipeline_mode<synchronous>, transform_indices = @transform_1, window_bounds = array<i64: 512, 64>}, {pipeline_mode = #tpu.pipeline_mode<synchronous>, transform_indices = @transform_2, window_bounds = array<i64: 1, 64>}, {transform_indices = @transform_3, window_bounds = array<i64: 1, 14, 14, 64>}]} {
    %c0 = arith.constant 0 : index
    %c6 = arith.constant 6 : index
    %c6_0 = arith.constant 6 : index
    %c0_1 = arith.constant 0 : index
    %0 = vector.load %arg1[%c0, %c6, %c6_0, %c0_1] : memref<1x14x14x32xbf16, #tpu.memory_space<vmem>>, vector<1x4x4x32xbf16>
    %1 = vector.shape_cast %0 : vector<1x4x4x32xbf16> to vector<4x4x32xbf16>
    %c0_2 = arith.constant 0 : index
    %c6_3 = arith.constant 6 : index
    %c7 = arith.constant 7 : index
    %c0_4 = arith.constant 0 : index
    %2 = vector.load %arg1[%c0_2, %c6_3, %c7, %c0_4] : memref<1x14x14x32xbf16, #tpu.memory_space<vmem>>, vector<1x4x4x32xbf16>
    %3 = vector.shape_cast %2 : vector<1x4x4x32xbf16> to vector<4x4x32xbf16>
    %c0_5 = arith.constant 0 : index
    %c6_6 = arith.constant 6 : index
    %c8 = arith.constant 8 : index
    %c0_7 = arith.constant 0 : index
    %4 = vector.load %arg1[%c0_5, %c6_6, %c8, %c0_7] : memref<1x14x14x32xbf16, #tpu.memory_space<vmem>>, vector<1x4x4x32xbf16>
    %5 = vector.shape_cast %4 : vector<1x4x4x32xbf16> to vector<4x4x32xbf16>
    %c0_8 = arith.constant 0 : index
    %c6_9 = arith.constant 6 : index
    %c9 = arith.constant 9 : index
    %c0_10 = arith.constant 0 : index
    %6 = vector.load %arg1[%c0_8, %c6_9, %c9, %c0_10] : memref<1x14x14x32xbf16, #tpu.memory_space<vmem>>, vector<1x4x4x32xbf16>
    %7 = vector.shape_cast %6 : vector<1x4x4x32xbf16> to vector<4x4x32xbf16>
    %8 = tpu.concatenate %1, %3, %5, %7 in 2 : vector<4x4x32xbf16>, vector<4x4x32xbf16>, vector<4x4x32xbf16>, vector<4x4x32xbf16> -> vector<4x4x128xbf16>
    %9 = vector.shape_cast %8 : vector<4x4x128xbf16> to vector<16x128xbf16>
    %c0_11 = arith.constant 0 : index
    %c0_12 = arith.constant 0 : index
    %10 = vector.load %arg2[%c0_11, %c0_12] : memref<512x64xbf16, #tpu.memory_space<vmem>>, vector<128x64xbf16>
    %cst = arith.constant dense<0.000000e+00> : vector<16x64xf32>
    %11 = tpu.matmul %9, %10, %cst {dimension_numbers = #tpu.dot_dimension_numbers<[1], [0], [0], [1], [0, 0, 1, 1], [], []>} : vector<16x128xbf16>, vector<128x64xbf16>, vector<16x64xf32> -> vector<16x64xf32>
    %c0_13 = arith.constant 0 : index
    %c7_14 = arith.constant 7 : index
    %c6_15 = arith.constant 6 : index
    %c0_16 = arith.constant 0 : index
    %12 = vector.load %arg1[%c0_13, %c7_14, %c6_15, %c0_16] : memref<1x14x14x32xbf16, #tpu.memory_space<vmem>>, vector<1x4x4x32xbf16>
    %13 = vector.shape_cast %12 : vector<1x4x4x32xbf16> to vector<4x4x32xbf16>
    %c0_17 = arith.constant 0 : index
    %c7_18 = arith.constant 7 : index
    %c7_19 = arith.constant 7 : index
    %c0_20 = arith.constant 0 : index
    %14 = vector.load %arg1[%c0_17, %c7_18, %c7_19, %c0_20] : memref<1x14x14x32xbf16, #tpu.memory_space<vmem>>, vector<1x4x4x32xbf16>
    %15 = vector.shape_cast %14 : vector<1x4x4x32xbf16> to vector<4x4x32xbf16>
    %c0_21 = arith.constant 0 : index
    %c7_22 = arith.constant 7 : index
    %c8_23 = arith.constant 8 : index
    %c0_24 = arith.constant 0 : index
    %16 = vector.load %arg1[%c0_21, %c7_22, %c8_23, %c0_24] : memref<1x14x14x32xbf16, #tpu.memory_space<vmem>>, vector<1x4x4x32xbf16>
    %17 = vector.shape_cast %16 : vector<1x4x4x32xbf16> to vector<4x4x32xbf16>
    %c0_25 = arith.constant 0 : index
    %c7_26 = arith.constant 7 : index
    %c9_27 = arith.constant 9 : index
    %c0_28 = arith.constant 0 : index
    %18 = vector.load %arg1[%c0_25, %c7_26, %c9_27, %c0_28] : memref<1x14x14x32xbf16, #tpu.memory_space<vmem>>, vector<1x4x4x32xbf16>
    %19 = vector.shape_cast %18 : vector<1x4x4x32xbf16> to vector<4x4x32xbf16>
    %20 = tpu.concatenate %13, %15, %17, %19 in 2 : vector<4x4x32xbf16>, vector<4x4x32xbf16>, vector<4x4x32xbf16>, vector<4x4x32xbf16> -> vector<4x4x128xbf16>
    %21 = vector.shape_cast %20 : vector<4x4x128xbf16> to vector<16x128xbf16>
    %c128 = arith.constant 128 : index
    %c0_29 = arith.constant 0 : index
    %22 = vector.load %arg2[%c128, %c0_29] : memref<512x64xbf16, #tpu.memory_space<vmem>>, vector<128x64xbf16>
    %cst_30 = arith.constant dense<0.000000e+00> : vector<16x64xf32>
    %23 = tpu.matmul %21, %22, %cst_30 {dimension_numbers = #tpu.dot_dimension_numbers<[1], [0], [0], [1], [0, 0, 1, 1], [], []>} : vector<16x128xbf16>, vector<128x64xbf16>, vector<16x64xf32> -> vector<16x64xf32>
    %24 = arith.addf %11, %23 : vector<16x64xf32>
    %c0_31 = arith.constant 0 : index
    %c8_32 = arith.constant 8 : index
    %c6_33 = arith.constant 6 : index
    %c0_34 = arith.constant 0 : index
    %25 = vector.load %arg1[%c0_31, %c8_32, %c6_33, %c0_34] : memref<1x14x14x32xbf16, #tpu.memory_space<vmem>>, vector<1x4x4x32xbf16>
    %26 = vector.shape_cast %25 : vector<1x4x4x32xbf16> to vector<4x4x32xbf16>
    %c0_35 = arith.constant 0 : index
    %c8_36 = arith.constant 8 : index
    %c7_37 = arith.constant 7 : index
    %c0_38 = arith.constant 0 : index
    %27 = vector.load %arg1[%c0_35, %c8_36, %c7_37, %c0_38] : memref<1x14x14x32xbf16, #tpu.memory_space<vmem>>, vector<1x4x4x32xbf16>
    %28 = vector.shape_cast %27 : vector<1x4x4x32xbf16> to vector<4x4x32xbf16>
    %c0_39 = arith.constant 0 : index
    %c8_40 = arith.constant 8 : index
    %c8_41 = arith.constant 8 : index
    %c0_42 = arith.constant 0 : index
    %29 = vector.load %arg1[%c0_39, %c8_40, %c8_41, %c0_42] : memref<1x14x14x32xbf16, #tpu.memory_space<vmem>>, vector<1x4x4x32xbf16>
    %30 = vector.shape_cast %29 : vector<1x4x4x32xbf16> to vector<4x4x32xbf16>
    %c0_43 = arith.constant 0 : index
    %c8_44 = arith.constant 8 : index
    %c9_45 = arith.constant 9 : index
    %c0_46 = arith.constant 0 : index
    %31 = vector.load %arg1[%c0_43, %c8_44, %c9_45, %c0_46] : memref<1x14x14x32xbf16, #tpu.memory_space<vmem>>, vector<1x4x4x32xbf16>
    %32 = vector.shape_cast %31 : vector<1x4x4x32xbf16> to vector<4x4x32xbf16>
    %33 = tpu.concatenate %26, %28, %30, %32 in 2 : vector<4x4x32xbf16>, vector<4x4x32xbf16>, vector<4x4x32xbf16>, vector<4x4x32xbf16> -> vector<4x4x128xbf16>
    %34 = vector.shape_cast %33 : vector<4x4x128xbf16> to vector<16x128xbf16>
    %c256 = arith.constant 256 : index
    %c0_47 = arith.constant 0 : index
    %35 = vector.load %arg2[%c256, %c0_47] : memref<512x64xbf16, #tpu.memory_space<vmem>>, vector<128x64xbf16>
    %cst_48 = arith.constant dense<0.000000e+00> : vector<16x64xf32>
    %36 = tpu.matmul %34, %35, %cst_48 {dimension_numbers = #tpu.dot_dimension_numbers<[1], [0], [0], [1], [0, 0, 1, 1], [], []>} : vector<16x128xbf16>, vector<128x64xbf16>, vector<16x64xf32> -> vector<16x64xf32>
    %37 = arith.addf %24, %36 : vector<16x64xf32>
    %c0_49 = arith.constant 0 : index
    %c9_50 = arith.constant 9 : index
    %c6_51 = arith.constant 6 : index
    %c0_52 = arith.constant 0 : index
    %38 = vector.load %arg1[%c0_49, %c9_50, %c6_51, %c0_52] : memref<1x14x14x32xbf16, #tpu.memory_space<vmem>>, vector<1x4x4x32xbf16>
    %39 = vector.shape_cast %38 : vector<1x4x4x32xbf16> to vector<4x4x32xbf16>
    %c0_53 = arith.constant 0 : index
    %c9_54 = arith.constant 9 : index
    %c7_55 = arith.constant 7 : index
    %c0_56 = arith.constant 0 : index
    %40 = vector.load %arg1[%c0_53, %c9_54, %c7_55, %c0_56] : memref<1x14x14x32xbf16, #tpu.memory_space<vmem>>, vector<1x4x4x32xbf16>
    %41 = vector.shape_cast %40 : vector<1x4x4x32xbf16> to vector<4x4x32xbf16>
    %c0_57 = arith.constant 0 : index
    %c9_58 = arith.constant 9 : index
    %c8_59 = arith.constant 8 : index
    %c0_60 = arith.constant 0 : index
    %42 = vector.load %arg1[%c0_57, %c9_58, %c8_59, %c0_60] : memref<1x14x14x32xbf16, #tpu.memory_space<vmem>>, vector<1x4x4x32xbf16>
    %43 = vector.shape_cast %42 : vector<1x4x4x32xbf16> to vector<4x4x32xbf16>
    %c0_61 = arith.constant 0 : index
    %c9_62 = arith.constant 9 : index
    %c9_63 = arith.constant 9 : index
    %c0_64 = arith.constant 0 : index
    %44 = vector.load %arg1[%c0_61, %c9_62, %c9_63, %c0_64] : memref<1x14x14x32xbf16, #tpu.memory_space<vmem>>, vector<1x4x4x32xbf16>
    %45 = vector.shape_cast %44 : vector<1x4x4x32xbf16> to vector<4x4x32xbf16>
    %46 = tpu.concatenate %39, %41, %43, %45 in 2 : vector<4x4x32xbf16>, vector<4x4x32xbf16>, vector<4x4x32xbf16>, vector<4x4x32xbf16> -> vector<4x4x128xbf16>
    %47 = vector.shape_cast %46 : vector<4x4x128xbf16> to vector<16x128xbf16>
    %c384 = arith.constant 384 : index
    %c0_65 = arith.constant 0 : index
    %48 = vector.load %arg2[%c384, %c0_65] : memref<512x64xbf16, #tpu.memory_space<vmem>>, vector<128x64xbf16>
    %cst_66 = arith.constant dense<0.000000e+00> : vector<16x64xf32>
    %49 = tpu.matmul %47, %48, %cst_66 {dimension_numbers = #tpu.dot_dimension_numbers<[1], [0], [0], [1], [0, 0, 1, 1], [], []>} : vector<16x128xbf16>, vector<128x64xbf16>, vector<16x64xf32> -> vector<16x64xf32>
    %50 = arith.addf %37, %49 : vector<16x64xf32>
    %c0_67 = arith.constant 0 : index
    %c0_68 = arith.constant 0 : index
    %51 = vector.load %arg3[%c0_67, %c0_68] : memref<1x64xf32, #tpu.memory_space<vmem>>, vector<1x64xf32>
    %52 = vector.broadcast %51 : vector<1x64xf32> to vector<16x64xf32>
    %53 = arith.addf %50, %52 : vector<16x64xf32>
    %cst_69 = arith.constant 2.000000e-01 : f32
    %54 = vector.broadcast %cst_69 : f32 to vector<16x64xf32>
    %55 = arith.mulf %54, %53 : vector<16x64xf32>
    %56 = arith.maximumf %53, %55 : vector<16x64xf32>
    %57 = vector.shape_cast %56 : vector<16x64xf32> to vector<4x4x64xf32>
    %58 = arith.truncf %57 : vector<4x4x64xf32> to vector<4x4x64xbf16>
    %cst_70 = arith.constant 0.000000e+00 : bf16
    %59 = vector.broadcast %cst_70 : bf16 to vector<8x14x64xbf16>
    %c0_71 = arith.constant 0 : index
    %c0_72 = arith.constant 0 : index
    %c0_73 = arith.constant 0 : index
    %c0_74 = arith.constant 0 : index
    %60 = vector.load %arg4[%c0_71, %c0_72, %c0_73, %c0_74] : memref<1x14x14x64xbf16, #tpu.memory_space<vmem>>, vector<1x8x14x64xbf16>
    %61 = vector.shape_cast %60 : vector<1x8x14x64xbf16> to vector<8x14x64xbf16>
    %62 = vector.shape_cast %59 : vector<8x14x64xbf16> to vector<1x8x14x64xbf16>
    tpu.vector_store %arg4[%c0_71, %c0_72, %c0_73, %c0_74], %62 {strides = array<i32>} : memref<1x14x14x64xbf16, #tpu.memory_space<vmem>>, vector<1x8x14x64xbf16>,
    %cst_75 = arith.constant 0.000000e+00 : bf16
    %63 = vector.broadcast %cst_75 : bf16 to vector<2x14x64xbf16>
    %c0_76 = arith.constant 0 : index
    %c12 = arith.constant 12 : index
    %c0_77 = arith.constant 0 : index
    %c0_78 = arith.constant 0 : index
    %64 = vector.load %arg4[%c0_76, %c12, %c0_77, %c0_78] : memref<1x14x14x64xbf16, #tpu.memory_space<vmem>>, vector<1x2x14x64xbf16>
    %65 = vector.shape_cast %64 : vector<1x2x14x64xbf16> to vector<2x14x64xbf16>
    %66 = vector.shape_cast %63 : vector<2x14x64xbf16> to vector<1x2x14x64xbf16>
    tpu.vector_store %arg4[%c0_76, %c12, %c0_77, %c0_78], %66 {strides = array<i32>} : memref<1x14x14x64xbf16, #tpu.memory_space<vmem>>, vector<1x2x14x64xbf16>,
    %cst_79 = arith.constant 0.000000e+00 : bf16
    %67 = vector.broadcast %cst_79 : bf16 to vector<4x8x64xbf16>
    %c0_80 = arith.constant 0 : index
    %c8_81 = arith.constant 8 : index
    %c0_82 = arith.constant 0 : index
    %c0_83 = arith.constant 0 : index
    %68 = vector.load %arg4[%c0_80, %c8_81, %c0_82, %c0_83] : memref<1x14x14x64xbf16, #tpu.memory_space<vmem>>, vector<1x4x8x64xbf16>
    %69 = vector.shape_cast %68 : vector<1x4x8x64xbf16> to vector<4x8x64xbf16>
    %70 = vector.shape_cast %67 : vector<4x8x64xbf16> to vector<1x4x8x64xbf16>
    tpu.vector_store %arg4[%c0_80, %c8_81, %c0_82, %c0_83], %70 {strides = array<i32>} : memref<1x14x14x64xbf16, #tpu.memory_space<vmem>>, vector<1x4x8x64xbf16>,
    %cst_84 = arith.constant 0.000000e+00 : bf16
    %71 = vector.broadcast %cst_84 : bf16 to vector<4x2x64xbf16>
    %c0_85 = arith.constant 0 : index
    %c8_86 = arith.constant 8 : index
    %c12_87 = arith.constant 12 : index
    %c0_88 = arith.constant 0 : index
    %72 = vector.load %arg4[%c0_85, %c8_86, %c12_87, %c0_88] : memref<1x14x14x64xbf16, #tpu.memory_space<vmem>>, vector<1x4x2x64xbf16>
    %73 = vector.shape_cast %72 : vector<1x4x2x64xbf16> to vector<4x2x64xbf16>
    %74 = vector.shape_cast %71 : vector<4x2x64xbf16> to vector<1x4x2x64xbf16>
    tpu.vector_store %arg4[%c0_85, %c8_86, %c12_87, %c0_88], %74 {strides = array<i32>} : memref<1x14x14x64xbf16, #tpu.memory_space<vmem>>, vector<1x4x2x64xbf16>,
    %c0_89 = arith.constant 0 : index
    %c8_90 = arith.constant 8 : index
    %c8_91 = arith.constant 8 : index
    %c0_92 = arith.constant 0 : index
    %75 = vector.load %arg4[%c0_89, %c8_90, %c8_91, %c0_92] : memref<1x14x14x64xbf16, #tpu.memory_space<vmem>>, vector<1x4x4x64xbf16>
    %76 = vector.shape_cast %75 : vector<1x4x4x64xbf16> to vector<4x4x64xbf16>
    %77 = vector.shape_cast %58 : vector<4x4x64xbf16> to vector<1x4x4x64xbf16>
    tpu.vector_store %arg4[%c0_89, %c8_90, %c8_91, %c0_92], %77 {strides = array<i32>} : memref<1x14x14x64xbf16, #tpu.memory_space<vmem>>, vector<1x4x4x64xbf16>,
    return
  }
  func.func @transform_0(%arg0: i32) -> (i32, i32, i32, i32) {
    %c0_i32 = arith.constant 0 : i32
    %c0_i32_0 = arith.constant 0 : i32
    %c0_i32_1 = arith.constant 0 : i32
    %c0_i32_2 = arith.constant 0 : i32
    return %arg0, %c0_i32, %c0_i32_0, %c0_i32_1 : i32, i32, i32, i32
  }
  func.func @transform_1(%arg0: i32) -> (i32, i32) {
    %c0_i32 = arith.constant 0 : i32
    %c0_i32_0 = arith.constant 0 : i32
    %c0_i32_1 = arith.constant 0 : i32
    return %c0_i32, %c0_i32_0 : i32, i32
  }
  func.func @transform_2(%arg0: i32) -> (i32, i32) {
    %c0_i32 = arith.constant 0 : i32
    %c0_i32_0 = arith.constant 0 : i32
    %c0_i32_1 = arith.constant 0 : i32
    return %c0_i32, %c0_i32_0 : i32, i32
  }
  func.func @transform_3(%arg0: i32) -> (i32, i32, i32, i32) {
    %c0_i32 = arith.constant 0 : i32
    %c0_i32_0 = arith.constant 0 : i32
    %c0_i32_1 = arith.constant 0 : i32
    %c0_i32_2 = arith.constant 0 : i32
    return %arg0, %c0_i32, %c0_i32_0, %c0_i32_1 : i32, i32, i32, i32
  }
}

module attributes {stable_mosaic.version = 11 : i64} {
  func.func @_conv4x4_kernel(%arg0: i32, %arg1: memref<1x14x14x64xbf16, #tpu.memory_space<vmem>>, %arg2: memref<1024x1xbf16, #tpu.memory_space<vmem>>, %arg3: memref<1x1xf32, #tpu.memory_space<vmem>>, %arg4: memref<1x5x5x1xf32, #tpu.memory_space<vmem>>) attributes {dimension_semantics = [#tpu.dimension_semantics<parallel>], iteration_bounds = array<i64: 2>, scalar_prefetch = 0 : i64, scratch_operands = 0 : i64, tpu.core_type = #tpu.core_type<tc>, window_params = [{transform_indices = @transform_0, window_bounds = array<i64: 1, 14, 14, 64>}, {pipeline_mode = #tpu.pipeline_mode<synchronous>, transform_indices = @transform_1, window_bounds = array<i64: 1024, 1>}, {pipeline_mode = #tpu.pipeline_mode<synchronous>, transform_indices = @transform_2, window_bounds = array<i64: 1, 1>}, {transform_indices = @transform_3, window_bounds = array<i64: 1, 5, 5, 1>}]} {
    %c0 = arith.constant 0 : index
    %c6 = arith.constant 6 : index
    %c6_0 = arith.constant 6 : index
    %c0_1 = arith.constant 0 : index
    %0 = vector.load %arg1[%c0, %c6, %c6_0, %c0_1] : memref<1x14x14x64xbf16, #tpu.memory_space<vmem>>, vector<1x5x5x64xbf16>
    %1 = vector.shape_cast %0 : vector<1x5x5x64xbf16> to vector<5x5x64xbf16>
    %c0_2 = arith.constant 0 : index
    %c6_3 = arith.constant 6 : index
    %c7 = arith.constant 7 : index
    %c0_4 = arith.constant 0 : index
    %2 = vector.load %arg1[%c0_2, %c6_3, %c7, %c0_4] : memref<1x14x14x64xbf16, #tpu.memory_space<vmem>>, vector<1x5x5x64xbf16>
    %3 = vector.shape_cast %2 : vector<1x5x5x64xbf16> to vector<5x5x64xbf16>
    %4 = tpu.concatenate %1, %3 in 2 : vector<5x5x64xbf16>, vector<5x5x64xbf16> -> vector<5x5x128xbf16>
    %5 = vector.shape_cast %4 : vector<5x5x128xbf16> to vector<25x128xbf16>
    %c0_5 = arith.constant 0 : index
    %c0_6 = arith.constant 0 : index
    %6 = vector.load %arg2[%c0_5, %c0_6] : memref<1024x1xbf16, #tpu.memory_space<vmem>>, vector<128x1xbf16>
    %cst = arith.constant dense<0.000000e+00> : vector<25x1xf32>
    %7 = tpu.matmul %5, %6, %cst {dimension_numbers = #tpu.dot_dimension_numbers<[1], [0], [0], [1], [0, 0, 1, 1], [], []>} : vector<25x128xbf16>, vector<128x1xbf16>, vector<25x1xf32> -> vector<25x1xf32>
    %c0_7 = arith.constant 0 : index
    %c6_8 = arith.constant 6 : index
    %c8 = arith.constant 8 : index
    %c0_9 = arith.constant 0 : index
    %8 = vector.load %arg1[%c0_7, %c6_8, %c8, %c0_9] : memref<1x14x14x64xbf16, #tpu.memory_space<vmem>>, vector<1x5x5x64xbf16>
    %9 = vector.shape_cast %8 : vector<1x5x5x64xbf16> to vector<5x5x64xbf16>
    %c0_10 = arith.constant 0 : index
    %c6_11 = arith.constant 6 : index
    %c9 = arith.constant 9 : index
    %c0_12 = arith.constant 0 : index
    %10 = vector.load %arg1[%c0_10, %c6_11, %c9, %c0_12] : memref<1x14x14x64xbf16, #tpu.memory_space<vmem>>, vector<1x5x5x64xbf16>
    %11 = vector.shape_cast %10 : vector<1x5x5x64xbf16> to vector<5x5x64xbf16>
    %12 = tpu.concatenate %9, %11 in 2 : vector<5x5x64xbf16>, vector<5x5x64xbf16> -> vector<5x5x128xbf16>
    %13 = vector.shape_cast %12 : vector<5x5x128xbf16> to vector<25x128xbf16>
    %c128 = arith.constant 128 : index
    %c0_13 = arith.constant 0 : index
    %14 = vector.load %arg2[%c128, %c0_13] : memref<1024x1xbf16, #tpu.memory_space<vmem>>, vector<128x1xbf16>
    %cst_14 = arith.constant dense<0.000000e+00> : vector<25x1xf32>
    %15 = tpu.matmul %13, %14, %cst_14 {dimension_numbers = #tpu.dot_dimension_numbers<[1], [0], [0], [1], [0, 0, 1, 1], [], []>} : vector<25x128xbf16>, vector<128x1xbf16>, vector<25x1xf32> -> vector<25x1xf32>
    %16 = arith.addf %7, %15 : vector<25x1xf32>
    %c0_15 = arith.constant 0 : index
    %c7_16 = arith.constant 7 : index
    %c6_17 = arith.constant 6 : index
    %c0_18 = arith.constant 0 : index
    %17 = vector.load %arg1[%c0_15, %c7_16, %c6_17, %c0_18] : memref<1x14x14x64xbf16, #tpu.memory_space<vmem>>, vector<1x5x5x64xbf16>
    %18 = vector.shape_cast %17 : vector<1x5x5x64xbf16> to vector<5x5x64xbf16>
    %c0_19 = arith.constant 0 : index
    %c7_20 = arith.constant 7 : index
    %c7_21 = arith.constant 7 : index
    %c0_22 = arith.constant 0 : index
    %19 = vector.load %arg1[%c0_19, %c7_20, %c7_21, %c0_22] : memref<1x14x14x64xbf16, #tpu.memory_space<vmem>>, vector<1x5x5x64xbf16>
    %20 = vector.shape_cast %19 : vector<1x5x5x64xbf16> to vector<5x5x64xbf16>
    %21 = tpu.concatenate %18, %20 in 2 : vector<5x5x64xbf16>, vector<5x5x64xbf16> -> vector<5x5x128xbf16>
    %22 = vector.shape_cast %21 : vector<5x5x128xbf16> to vector<25x128xbf16>
    %c256 = arith.constant 256 : index
    %c0_23 = arith.constant 0 : index
    %23 = vector.load %arg2[%c256, %c0_23] : memref<1024x1xbf16, #tpu.memory_space<vmem>>, vector<128x1xbf16>
    %cst_24 = arith.constant dense<0.000000e+00> : vector<25x1xf32>
    %24 = tpu.matmul %22, %23, %cst_24 {dimension_numbers = #tpu.dot_dimension_numbers<[1], [0], [0], [1], [0, 0, 1, 1], [], []>} : vector<25x128xbf16>, vector<128x1xbf16>, vector<25x1xf32> -> vector<25x1xf32>
    %25 = arith.addf %16, %24 : vector<25x1xf32>
    %c0_25 = arith.constant 0 : index
    %c7_26 = arith.constant 7 : index
    %c8_27 = arith.constant 8 : index
    %c0_28 = arith.constant 0 : index
    %26 = vector.load %arg1[%c0_25, %c7_26, %c8_27, %c0_28] : memref<1x14x14x64xbf16, #tpu.memory_space<vmem>>, vector<1x5x5x64xbf16>
    %27 = vector.shape_cast %26 : vector<1x5x5x64xbf16> to vector<5x5x64xbf16>
    %c0_29 = arith.constant 0 : index
    %c7_30 = arith.constant 7 : index
    %c9_31 = arith.constant 9 : index
    %c0_32 = arith.constant 0 : index
    %28 = vector.load %arg1[%c0_29, %c7_30, %c9_31, %c0_32] : memref<1x14x14x64xbf16, #tpu.memory_space<vmem>>, vector<1x5x5x64xbf16>
    %29 = vector.shape_cast %28 : vector<1x5x5x64xbf16> to vector<5x5x64xbf16>
    %30 = tpu.concatenate %27, %29 in 2 : vector<5x5x64xbf16>, vector<5x5x64xbf16> -> vector<5x5x128xbf16>
    %31 = vector.shape_cast %30 : vector<5x5x128xbf16> to vector<25x128xbf16>
    %c384 = arith.constant 384 : index
    %c0_33 = arith.constant 0 : index
    %32 = vector.load %arg2[%c384, %c0_33] : memref<1024x1xbf16, #tpu.memory_space<vmem>>, vector<128x1xbf16>
    %cst_34 = arith.constant dense<0.000000e+00> : vector<25x1xf32>
    %33 = tpu.matmul %31, %32, %cst_34 {dimension_numbers = #tpu.dot_dimension_numbers<[1], [0], [0], [1], [0, 0, 1, 1], [], []>} : vector<25x128xbf16>, vector<128x1xbf16>, vector<25x1xf32> -> vector<25x1xf32>
    %34 = arith.addf %25, %33 : vector<25x1xf32>
    %c0_35 = arith.constant 0 : index
    %c8_36 = arith.constant 8 : index
    %c6_37 = arith.constant 6 : index
    %c0_38 = arith.constant 0 : index
    %35 = vector.load %arg1[%c0_35, %c8_36, %c6_37, %c0_38] : memref<1x14x14x64xbf16, #tpu.memory_space<vmem>>, vector<1x5x5x64xbf16>
    %36 = vector.shape_cast %35 : vector<1x5x5x64xbf16> to vector<5x5x64xbf16>
    %c0_39 = arith.constant 0 : index
    %c8_40 = arith.constant 8 : index
    %c7_41 = arith.constant 7 : index
    %c0_42 = arith.constant 0 : index
    %37 = vector.load %arg1[%c0_39, %c8_40, %c7_41, %c0_42] : memref<1x14x14x64xbf16, #tpu.memory_space<vmem>>, vector<1x5x5x64xbf16>
    %38 = vector.shape_cast %37 : vector<1x5x5x64xbf16> to vector<5x5x64xbf16>
    %39 = tpu.concatenate %36, %38 in 2 : vector<5x5x64xbf16>, vector<5x5x64xbf16> -> vector<5x5x128xbf16>
    %40 = vector.shape_cast %39 : vector<5x5x128xbf16> to vector<25x128xbf16>
    %c512 = arith.constant 512 : index
    %c0_43 = arith.constant 0 : index
    %41 = vector.load %arg2[%c512, %c0_43] : memref<1024x1xbf16, #tpu.memory_space<vmem>>, vector<128x1xbf16>
    %cst_44 = arith.constant dense<0.000000e+00> : vector<25x1xf32>
    %42 = tpu.matmul %40, %41, %cst_44 {dimension_numbers = #tpu.dot_dimension_numbers<[1], [0], [0], [1], [0, 0, 1, 1], [], []>} : vector<25x128xbf16>, vector<128x1xbf16>, vector<25x1xf32> -> vector<25x1xf32>
    %43 = arith.addf %34, %42 : vector<25x1xf32>
    %c0_45 = arith.constant 0 : index
    %c8_46 = arith.constant 8 : index
    %c8_47 = arith.constant 8 : index
    %c0_48 = arith.constant 0 : index
    %44 = vector.load %arg1[%c0_45, %c8_46, %c8_47, %c0_48] : memref<1x14x14x64xbf16, #tpu.memory_space<vmem>>, vector<1x5x5x64xbf16>
    %45 = vector.shape_cast %44 : vector<1x5x5x64xbf16> to vector<5x5x64xbf16>
    %c0_49 = arith.constant 0 : index
    %c8_50 = arith.constant 8 : index
    %c9_51 = arith.constant 9 : index
    %c0_52 = arith.constant 0 : index
    %46 = vector.load %arg1[%c0_49, %c8_50, %c9_51, %c0_52] : memref<1x14x14x64xbf16, #tpu.memory_space<vmem>>, vector<1x5x5x64xbf16>
    %47 = vector.shape_cast %46 : vector<1x5x5x64xbf16> to vector<5x5x64xbf16>
    %48 = tpu.concatenate %45, %47 in 2 : vector<5x5x64xbf16>, vector<5x5x64xbf16> -> vector<5x5x128xbf16>
    %49 = vector.shape_cast %48 : vector<5x5x128xbf16> to vector<25x128xbf16>
    %c640 = arith.constant 640 : index
    %c0_53 = arith.constant 0 : index
    %50 = vector.load %arg2[%c640, %c0_53] : memref<1024x1xbf16, #tpu.memory_space<vmem>>, vector<128x1xbf16>
    %cst_54 = arith.constant dense<0.000000e+00> : vector<25x1xf32>
    %51 = tpu.matmul %49, %50, %cst_54 {dimension_numbers = #tpu.dot_dimension_numbers<[1], [0], [0], [1], [0, 0, 1, 1], [], []>} : vector<25x128xbf16>, vector<128x1xbf16>, vector<25x1xf32> -> vector<25x1xf32>
    %52 = arith.addf %43, %51 : vector<25x1xf32>
    %c0_55 = arith.constant 0 : index
    %c9_56 = arith.constant 9 : index
    %c6_57 = arith.constant 6 : index
    %c0_58 = arith.constant 0 : index
    %53 = vector.load %arg1[%c0_55, %c9_56, %c6_57, %c0_58] : memref<1x14x14x64xbf16, #tpu.memory_space<vmem>>, vector<1x5x5x64xbf16>
    %54 = vector.shape_cast %53 : vector<1x5x5x64xbf16> to vector<5x5x64xbf16>
    %c0_59 = arith.constant 0 : index
    %c9_60 = arith.constant 9 : index
    %c7_61 = arith.constant 7 : index
    %c0_62 = arith.constant 0 : index
    %55 = vector.load %arg1[%c0_59, %c9_60, %c7_61, %c0_62] : memref<1x14x14x64xbf16, #tpu.memory_space<vmem>>, vector<1x5x5x64xbf16>
    %56 = vector.shape_cast %55 : vector<1x5x5x64xbf16> to vector<5x5x64xbf16>
    %57 = tpu.concatenate %54, %56 in 2 : vector<5x5x64xbf16>, vector<5x5x64xbf16> -> vector<5x5x128xbf16>
    %58 = vector.shape_cast %57 : vector<5x5x128xbf16> to vector<25x128xbf16>
    %c768 = arith.constant 768 : index
    %c0_63 = arith.constant 0 : index
    %59 = vector.load %arg2[%c768, %c0_63] : memref<1024x1xbf16, #tpu.memory_space<vmem>>, vector<128x1xbf16>
    %cst_64 = arith.constant dense<0.000000e+00> : vector<25x1xf32>
    %60 = tpu.matmul %58, %59, %cst_64 {dimension_numbers = #tpu.dot_dimension_numbers<[1], [0], [0], [1], [0, 0, 1, 1], [], []>} : vector<25x128xbf16>, vector<128x1xbf16>, vector<25x1xf32> -> vector<25x1xf32>
    %61 = arith.addf %52, %60 : vector<25x1xf32>
    %c0_65 = arith.constant 0 : index
    %c9_66 = arith.constant 9 : index
    %c8_67 = arith.constant 8 : index
    %c0_68 = arith.constant 0 : index
    %62 = vector.load %arg1[%c0_65, %c9_66, %c8_67, %c0_68] : memref<1x14x14x64xbf16, #tpu.memory_space<vmem>>, vector<1x5x5x64xbf16>
    %63 = vector.shape_cast %62 : vector<1x5x5x64xbf16> to vector<5x5x64xbf16>
    %c0_69 = arith.constant 0 : index
    %c9_70 = arith.constant 9 : index
    %c9_71 = arith.constant 9 : index
    %c0_72 = arith.constant 0 : index
    %64 = vector.load %arg1[%c0_69, %c9_70, %c9_71, %c0_72] : memref<1x14x14x64xbf16, #tpu.memory_space<vmem>>, vector<1x5x5x64xbf16>
    %65 = vector.shape_cast %64 : vector<1x5x5x64xbf16> to vector<5x5x64xbf16>
    %66 = tpu.concatenate %63, %65 in 2 : vector<5x5x64xbf16>, vector<5x5x64xbf16> -> vector<5x5x128xbf16>
    %67 = vector.shape_cast %66 : vector<5x5x128xbf16> to vector<25x128xbf16>
    %c896 = arith.constant 896 : index
    %c0_73 = arith.constant 0 : index
    %68 = vector.load %arg2[%c896, %c0_73] : memref<1024x1xbf16, #tpu.memory_space<vmem>>, vector<128x1xbf16>
    %cst_74 = arith.constant dense<0.000000e+00> : vector<25x1xf32>
    %69 = tpu.matmul %67, %68, %cst_74 {dimension_numbers = #tpu.dot_dimension_numbers<[1], [0], [0], [1], [0, 0, 1, 1], [], []>} : vector<25x128xbf16>, vector<128x1xbf16>, vector<25x1xf32> -> vector<25x1xf32>
    %70 = arith.addf %61, %69 : vector<25x1xf32>
    %c0_75 = arith.constant 0 : index
    %c0_76 = arith.constant 0 : index
    %71 = vector.load %arg3[%c0_75, %c0_76] : memref<1x1xf32, #tpu.memory_space<vmem>>, vector<1x1xf32>
    %72 = vector.broadcast %71 : vector<1x1xf32> to vector<25x1xf32>
    %73 = arith.addf %70, %72 : vector<25x1xf32>
    %74 = vector.shape_cast %73 : vector<25x1xf32> to vector<5x5x1xf32>
    %c0_77 = arith.constant 0 : index
    %c0_78 = arith.constant 0 : index
    %c0_79 = arith.constant 0 : index
    %c0_80 = arith.constant 0 : index
    %75 = vector.load %arg4[%c0_77, %c0_78, %c0_79, %c0_80] : memref<1x5x5x1xf32, #tpu.memory_space<vmem>>, vector<1x5x5x1xf32>
    %76 = vector.shape_cast %75 : vector<1x5x5x1xf32> to vector<5x5x1xf32>
    %77 = vector.shape_cast %74 : vector<5x5x1xf32> to vector<1x5x5x1xf32>
    tpu.vector_store %arg4[%c0_77, %c0_78, %c0_79, %c0_80], %77 {strides = array<i32>} : memref<1x5x5x1xf32, #tpu.memory_space<vmem>>, vector<1x5x5x1xf32>,
    return
  }
  func.func @transform_0(%arg0: i32) -> (i32, i32, i32, i32) {
    %c0_i32 = arith.constant 0 : i32
    %c0_i32_0 = arith.constant 0 : i32
    %c0_i32_1 = arith.constant 0 : i32
    %c0_i32_2 = arith.constant 0 : i32
    return %arg0, %c0_i32, %c0_i32_0, %c0_i32_1 : i32, i32, i32, i32
  }
  func.func @transform_1(%arg0: i32) -> (i32, i32) {
    %c0_i32 = arith.constant 0 : i32
    %c0_i32_0 = arith.constant 0 : i32
    %c0_i32_1 = arith.constant 0 : i32
    return %c0_i32, %c0_i32_0 : i32, i32
  }
  func.func @transform_2(%arg0: i32) -> (i32, i32) {
    %c0_i32 = arith.constant 0 : i32
    %c0_i32_0 = arith.constant 0 : i32
    %c0_i32_1 = arith.constant 0 : i32
    return %c0_i32, %c0_i32_0 : i32, i32
  }
  func.func @transform_3(%arg0: i32) -> (i32, i32, i32, i32) {
    %c0_i32 = arith.constant 0 : i32
    %c0_i32_0 = arith.constant 0 : i32
    %c0_i32_1 = arith.constant 0 : i32
    %c0_i32_2 = arith.constant 0 : i32
    return %arg0, %c0_i32, %c0_i32_0, %c0_i32_1 : i32, i32, i32, i32
  }
}

</mosaic_0001>

<bundles_post_ra>
// kernel: nonorm_discriminator_pallas.7
= control target key start
LH: loop header
LB: loop body
LE: loop exit
PB: predicated region body
PF: predicated region fallthrough
CT: control target
= control target key end

     0   :  { %s1002_s12 = smov 0   ;;  %s1244_s0 = inlined_call_operand.vmem [shape: bf16[2,8,2,8,32], index: 0, kind: input, shape index: {}]   ;;  %s1245_s1 = inlined_call_operand.vmem [shape: bf16[256,32], index: 1, kind: input, shape index: {}]   ;;  %s1246_s2 = inlined_call_operand.vmem [shape: f32[1,32], index: 2, kind: input, shape index: {}]   ;;  %s1247_s3 = inlined_call_operand.vmem [shape: bf16[2,14,14,32], index: 3, kind: output, shape index: {}]  }
   0x1 LB: > { %s816_s13 = sadd.s32 4294967295, %s976_s12   ;;  %p820_p0 = scmp.ge.s32.totalorder %s976_s12, 1  ;;  %s976_s12 = sphi %s1002_s12, %s13_s12  }
   0x2   : > { %p137_p1 = scmp.lt.s32.totalorder %s976_s12, 3 }
   0x4   : > { %p138_p2 = pnand %p820_p0, %p137_p1 }
   0x5   : > { %p161_p3 = scmp.lt.s32.totalorder (!%p138_p2), %s816_s13, 1  ;;  %s979_s22 = smov (!%p138_p2), 64  }
   0x6   : > { %141 = sbr.rel (%p138_p2) target bundleno = 396 (0x18c), region = 32  ;;  %s980_s23 = smov (!%p138_p2), 96  }
   0x7   : > { %s981_s24 = smov (!%p138_p2), 32  }
   0xb   : > { %s1251_s13 = smov (!%p161_p3, %s816_s13), 1  ;;  %vm708_vm0 = vcmask 257024   ;;  %vm710_vm1 = vcmask 256000   ;;  %v978_v4 = vmov 0   ;;  %vm273_vm2 = vcmask 261120  }
   0xc   : > { %s939_s14 = sshll.u32 %s1251_s13, 6  ;;  %s956_s15 = smul.u32 112, %s1251_s13  ;;  %vm283_vm3 = vcmask 523264   ;;  %vm290_vm4 = vcmask 785408   ;;  %vm737_vm5 = vcmask 256001   ;;  %vm749_vm8 = vcmask 254976  }
   0xd   : > { %s1013_s18 = scalar_lea.vmem %s1244_s0, %s939_s14  ;;  %vm738_vm6 = vsmask.f32 7942  ;;  %vm750_vm9 = vsmask.f32 1280 }
   0xe   : > { %s1018_s21 = scalar_lea.vmem %s1247_s3, %s956_s15  ;;  %v833_v0 = vld [vmem:[%s1013_s18 + $0x1c] sm:$0xc]  ;;  %v827_v1 = vld [vmem:[%s1013_s18 + $0x18] sm:$0xc]  ;;  %v828_v2 = vld [vmem:[%s1013_s18 + $0x20] sm:$0xc] }
   0xf   : > { %v240_v3 = vunpack.c.l.b16 %v833_v0  ;;  %709 = vst.msk [vmem:[%s1018_s21] sm:$0xf] %vm708_vm0, %v978_v4  ;;  %v189_v5 = vunpack.c.l.b16 %v827_v1  ;;  %v190_v6 = vunpack.c.l.b16 %v828_v2  ;;  %v831_v7 = vld [vmem:[%s1013_s18 + $0x24] sm:$0x6]  ;;  %v829_v11 = vld [vmem:[%s1013_s18 + $0x28] sm:$0xc]  ;;  %vm739_vm7 = vmand %vm737_vm5, %vm738_vm6 }
  0x10   : > { %711 = vst.msk [vmem:[%s1018_s21 + $0x4] sm:$0x7] %vm710_vm1, %v978_v4  ;;  %v226_v12 = vunpack.c.l.b16 %v831_v7  ;;  %v830_v17 = vld [vmem:[%s1013_s18 + $0x1c] sm:$0x6]  ;;  %v191_v18 = vunpack.c.l.b16 %v829_v11  ;;  %v834_v19 = vld [vmem:[%s1013_s18 + $0x24] sm:$0xc]  ;;  %vm1225_vm10 = vmand %vm749_vm8, %vm750_vm9 }
  0x11   : > { %v243_v8 = vpack.c.b16 %v240_v3, %v240_v3  ;;  %712 = vst.msk [vmem:[%s1018_s21 + $0x8] sm:$0xf] %vm708_vm0, %v978_v4  ;;  %v192_v9 = vpack.c.b16 %v189_v5, %v189_v5  ;;  %v193_v10 = vpack.c.b16 %v190_v6, %v190_v6  ;;  %v241_v26 = vunpack.c.l.b16 %v834_v19  ;;  %v839_v32 = vld [vmem:[%s1013_s18 + $0x20] sm:$0xc]  ;;  %v832_v38 = vld [vmem:[%s1013_s18 + $0x2c] sm:$0x6] }
  0x12   : > { %713 = vst.msk [vmem:[%s1018_s21 + $0xc] sm:$0x7] %vm710_vm1, %v978_v4  ;;  %v229_v23 = vpack.c.b16 %v226_v12, %v226_v12  ;;  %v225_v27 = vunpack.c.l.b16 %v830_v17  ;;  %v194_v30 = vpack.c.b16 %v191_v18, %v191_v18  ;;  %v356_v39 = vunpack.c.l.b16 %v839_v32  ;;  %v835_v42 = vld [vmem:[%s1013_s18 + $0x2c] sm:$0xc]  ;;  %v840_v48 = vld [vmem:[%s1013_s18 + $0x28] sm:$0xc] }
  0x13   : > { %v247_v13 = vshrl.u32 %v243_v8, 16  ;;  %v249_v14 = vshll.u32 %v243_v8, 16  ;;  %714 = vst.msk [vmem:[%s1018_s21 + $0x10] sm:$0xf] %vm708_vm0, %v978_v4  ;;  %v196_v15 = vshrl.u32 %v192_v9, 16  ;;  %v198_v16 = vshll.u32 %v192_v9, 16 }
  0x14   : > { %715 = vst.msk [vmem:[%s1018_s21 + $0x14] sm:$0x7] %vm710_vm1, %v978_v4  ;;  %v205_v22 = vshll.u32 %v193_v10, 16  ;;  %233 = vrot.lane.b32.xlu2 %v229_v23, %s979_s22  ;;  %v203_v28 = vshrl.u32 %v193_v10, 16  ;;  %v244_v31 = vpack.c.b16 %v241_v26, %v241_v26  ;;  %v228_v35 = vpack.c.b16 %v225_v27, %v225_v27  ;;  %v845_v50 = vld [vmem:[%s1013_s18 + $0x24] sm:$0xc] }
  0x15   : > { %v251_v20 = vrot.slane %v249_v14, 1  ;;  %716 = vst.msk [vmem:[%s1018_s21 + $0x18] sm:$0xf] %vm708_vm0, %v978_v4  ;;  %v200_v21 = vrot.slane %v198_v16, 1  ;;  %v212_v37 = vshll.u32 %v194_v30, 16  ;;  %v227_v43 = vunpack.c.l.b16 %v832_v38 }
  0x16   : > { %717 = vst.msk [vmem:[%s1018_s21 + $0x1c] sm:$0x7] %vm710_vm1, %v978_v4  ;;  %v207_v29 = vrot.slane %v205_v22, 1  ;;  %v254_v33 = vshrl.u32 %v244_v31, 16  ;;  %v256_v34 = vshll.u32 %v244_v31, 16  ;;  %v242_v44 = vunpack.c.l.b16 %v835_v42 }
  0x17   : > { %v252_v24 = vor.u32 %v251_v20, %v247_v13  ;;  %718 = vst.msk [vmem:[%s1018_s21 + $0x20] sm:$0xf] %vm708_vm0, %v978_v4  ;;  %v201_v25 = vor.u32 %v200_v21, %v196_v15  ;;  %v210_v45 = vshrl.u32 %v194_v30, 16  ;;  %v214_v46 = vrot.slane %v212_v37, 1  ;;  %v846_v52 = vld [vmem:[%s1013_s18 + $0x2c] sm:$0xc] }
  0x18   : > { %719 = vst.msk [vmem:[%s1018_s21 + $0x24] sm:$0x7] %vm710_vm1, %v978_v4  ;;  %v208_v36 = vor.u32 %v207_v29, %v203_v28  ;;  %v258_v40 = vrot.slane %v256_v34, 1  ;;  %v359_v47 = vpack.c.b16 %v356_v39, %v356_v39  ;;  %v245_v49 = vpack.c.b16 %v242_v44, %v242_v44  ;;  %v842_v60 = vld [vmem:[%s1013_s18 + $0x24] sm:$0x6] }
  0x19   : > { %720 = vst.msk [vmem:[%s1018_s21 + $0x28] sm:$0xf] %vm708_vm0, %v978_v4  ;;  %267 = vrot.lane.b32.xlu1 %v252_v24, %s980_s23  ;;  %216 = vrot.lane.b32.xlu0 %v201_v25, %s981_s24  ;;  %v407_v51 = vunpack.c.l.b16 %v845_v50  ;;  %v230_v53 = vpack.c.b16 %v227_v43, %v227_v43  ;;  %v215_v56 = vor.u32 %v214_v46, %v210_v45  ;;  %v357_v58 = vunpack.c.l.b16 %v840_v48  ;;  %v841_v6 = vld [vmem:[%s1013_s18 + $0x30] sm:$0xc] }
  0x1a   : > { %721 = vst.msk [vmem:[%s1018_s21 + $0x2c] sm:$0x7] %vm710_vm1, %v978_v4  ;;  %v259_v41 = vor.u32 %v258_v40, %v254_v33  ;;  %v261_v54 = vshrl.u32 %v245_v49, 16  ;;  %v263_v55 = vshll.u32 %v245_v49, 16  ;;  %v365_v57 = vshll.u32 %v359_v47, 16  ;;  %v955_v43 = vld [vmem:[%s1245_s1 + $0x78] sm:$0xff] }
  0x1b   : > { %722 = vst.msk [vmem:[%s1018_s21 + $0x30] sm:$0xf] %vm708_vm0, %v978_v4  ;;  %v410_v59 = vpack.c.b16 %v407_v51, %v407_v51  ;;  %v408_v62 = vunpack.c.l.b16 %v846_v52  ;;  %v363_v1 = vshrl.u32 %v359_v47, 16  ;;  %v392_v3 = vunpack.c.l.b16 %v842_v60  ;;  %v847_v10 = vld [vmem:[%s1013_s18 + $0x34] sm:$0xc]  ;;  %572 = vmatpush.bf16.msra.mxu0 %v955_v43 }
  0x1c   : > { %723 = vst.msk [vmem:[%s1018_s21 + $0x34] sm:$0x7] %vm710_vm1, %v978_v4  ;;  %269 = vrot.lane.b32.xlu2 %v259_v41, %s980_s23  ;;  %v265_v61 = vrot.slane %v263_v55, 1  ;;  %v367_v2 = vrot.slane %v365_v57, 1  ;;  %v360_v5 = vpack.c.b16 %v357_v58, %v357_v58  ;;  %v358_v13 = vunpack.c.l.b16 %v841_v6  ;;  %v843_v14 = vld [vmem:[%s1013_s18 + $0x2c] sm:$0x6] }
  0x1d   : > { %724 = vst.msk [vmem:[%s1018_s21 + $0x38] sm:$0xf] %vm708_vm0, %v978_v4  ;;  %v416_v63 = vshll.u32 %v410_v59, 16  ;;  %v414_v7 = vshrl.u32 %v410_v59, 16  ;;  %v411_v9 = vpack.c.b16 %v408_v62, %v408_v62  ;;  %v409_v17 = vunpack.c.l.b16 %v847_v10  ;;  %v844_v28 = vld [vmem:[%s1013_s18 + $0x34] sm:$0x6] }
  0x1e   : > { %725 = vst.msk [vmem:[%s1018_s21 + $0x3c] sm:$0x7] %vm710_vm1, %v978_v4  ;;  %v266_v0 = vor.u32 %v265_v61, %v261_v54  ;;  %v368_v11 = vor.u32 %v367_v2, %v363_v1  ;;  %v372_v12 = vshll.u32 %v360_v5, 16  ;;  %v370_v18 = vshrl.u32 %v360_v5, 16  ;;  %v824_v42 = vld [vmem:[%s1013_s18 + $0x18] sm:$0x6] }
  0x1f   : > { %916 = vst.msk [vmem:[%s1018_s21 + $0x58] sm:$0xf] %vm708_vm0, %v978_v4  ;;  %v418_v8 = vrot.slane %v416_v63, 1  ;;  %v423_v16 = vshll.u32 %v411_v9, 16  ;;  %v393_v20 = vunpack.c.l.b16 %v843_v14  ;;  %v361_v21 = vpack.c.b16 %v358_v13, %v358_v13  ;;  %v825_v48 = vld [vmem:[%s1013_s18 + $0x20] sm:$0x6] }
  0x20   : > { %917 = vst.msk [vmem:[%s1018_s21 + $0x5c] sm:$0x7] %vm710_vm1, %v978_v4  ;;  %v374_v19 = vrot.slane %v372_v12, 1  ;;  %v421_v22 = vshrl.u32 %v411_v9, 16  ;;  %v412_v24 = vpack.c.b16 %v409_v17, %v409_v17  ;;  %v394_v33 = vunpack.c.l.b16 %v844_v28  ;;  %v954_v51 = vld [vmem:[%s1245_s1 + $0x70] sm:$0xff]  ;;  %v947_v54 = vld [vmem:[%s1245_s1 + $0x38] sm:$0xff] }
  0x21   : > { %918 = vst.msk [vmem:[%s1018_s21 + $0x60] sm:$0xf] %vm708_vm0, %v978_v4  ;;  %218 = vrot.lane.b32.xlu1 %v208_v36, %s981_s24  ;;  %231 = vrot.lane.b32.xlu0 %v228_v35, %s979_s22  ;;  %v419_v15 = vor.u32 %v418_v8, %v414_v7  ;;  %v425_v23 = vrot.slane %v423_v16, 1  ;;  %v396_v26 = vpack.c.b16 %v393_v20, %v393_v20  ;;  %v379_v27 = vshll.u32 %v361_v21, 16  ;;  %v946_v1 = vld [vmem:[%s1245_s1 + $0x30] sm:$0xff] }
  0x22   : > { %919 = vst.msk [vmem:[%s1018_s21 + $0x64] sm:$0x7] %vm710_vm1, %v978_v4  ;;  %v375_v25 = vor.u32 %v374_v19, %v370_v18  ;;  %v430_v30 = vshll.u32 %v412_v24, 16  ;;  %v377_v31 = vshrl.u32 %v361_v21, 16  ;;  %v428_v34 = vshrl.u32 %v412_v24, 16  ;;  %573 = vmatpush.bf16.msra.mxu0 %v954_v51  ;;  %655 = vmatpush.bf16.msra.mxu1 %v947_v54  ;;  %v951_v5 = vld [vmem:[%s1245_s1 + $0x58] sm:$0xff] }
  0x23   : > { %920 = vst.msk [vmem:[%s1018_s21 + $0x68] sm:$0xf] %vm708_vm0, %v978_v4  ;;  %v426_v29 = vor.u32 %v425_v23, %v421_v22  ;;  %v381_v32 = vrot.slane %v379_v27, 1  ;;  %v397_v37 = vpack.c.b16 %v394_v33, %v394_v33  ;;  %v945_v6 = vld [vmem:[%s1245_s1 + $0x28] sm:$0xff]  ;;  %v950_v13 = vld [vmem:[%s1245_s1 + $0x50] sm:$0xff]  ;;  %v944_v14 = vld [vmem:[%s1245_s1 + $0x20] sm:$0xff] }
  0x24   : > { %921 = vst.msk [vmem:[%s1018_s21 + $0x6c] sm:$0x7] %vm710_vm1, %v978_v4  ;;  %271 = vrot.lane.b32.xlu2 %v266_v0, %s980_s23  ;;  %v432_v35 = vrot.slane %v430_v30, 1  ;;  %v952_v0 = vld [vmem:[%s1245_s1 + $0x60] sm:$0xff]  ;;  %v837_v16 = vld [vmem:[%s1013_s18 + $0x28] sm:$0x6] }
  0x25   : > { %922 = vst.msk [vmem:[%s1018_s21 + $0x40] sm:$0xf] %vm708_vm0, %v978_v4  ;;  %v382_v36 = vor.u32 %v381_v32, %v377_v31  ;;  %v949_v17 = vld [vmem:[%s1245_s1 + $0x48] sm:$0xff]  ;;  %v943_v18 = vld [vmem:[%s1245_s1 + $0x18] sm:$0xff]  ;;  %v948_v22 = vld [vmem:[%s1245_s1 + $0x40] sm:$0xff] }
  0x26   : > { %923 = vst.msk [vmem:[%s1018_s21 + $0x48] sm:$0xf] %vm708_vm0, %v978_v4  ;;  %v433_v38 = vor.u32 %v432_v35, %v428_v34  ;;  %656 = vmatpush.bf16.msra.mxu1 %v946_v1  ;;  %v942_v23 = vld [vmem:[%s1245_s1 + $0x10] sm:$0xff]  ;;  %v941_v32 = vld [vmem:[%s1245_s1 + $0x8] sm:$0xff] }
  0x27   : > { %924 = vst.msk [vmem:[%s1018_s21 + $0x50] sm:$0xf] %vm708_vm0, %v978_v4  ;;  %v395_v4 = vpack.c.b16 %v392_v3, %v392_v3  ;;  %v836_v3 = vld [vmem:[%s1013_s18 + $0x20] sm:$0x6] }
  0x29   : > { %220 = vrot.lane.b32.xlu0 %v215_v56, %s981_s24  ;;  %235 = vrot.lane.b32.xlu1 %v230_v53, %s979_s22  ;;  %v953_v53 = vld [vmem:[%s1245_s1 + $0x68] sm:$0xff] }
  0x2a   : > { %v826_v56 = vld [vmem:[%s1013_s18 + $0x28] sm:$0x6]  ;;  %574 = vmatpush.bf16.msra.mxu0 %v953_v53  ;;  %657 = vmatpush.bf16.msra.mxu1 %v945_v6 }
  0x2c   : > { %434 = vrot.lane.b32.xlu2 %v419_v15, %s980_s23 }
  0x2e   : > { %575 = vmatpush.bf16.msra.mxu0 %v952_v0  ;;  %658 = vmatpush.bf16.msra.mxu1 %v944_v14 }
  0x31   : > { %383 = vrot.lane.b32.xlu0 %v368_v11, %s981_s24  ;;  %398 = vrot.lane.b32.xlu1 %v395_v4, %s979_s22 }
  0x32   : > { %576 = vmatpush.bf16.msra.mxu0 %v951_v5  ;;  %659 = vmatpush.bf16.msra.mxu1 %v943_v18  ;;  %v929_v5 = vld [vmem:[%s1018_s21 + $0x54] sm:$0x6] }
  0x34   : > { %436 = vrot.lane.b32.xlu2 %v426_v29, %s980_s23  ;;  %v838_v29 = vld [vmem:[%s1013_s18 + $0x30] sm:$0x6] }
  0x36   : > { %577 = vmatpush.bf16.msra.mxu0 %v950_v13  ;;  %660 = vmatpush.bf16.msra.mxu1 %v942_v23 }
  0x39   : > { %385 = vrot.lane.b32.xlu0 %v375_v25, %s981_s24  ;;  %400 = vrot.lane.b32.xlu1 %v396_v26, %s979_s22 }
  0x3a   : > { %578 = vmatpush.bf16.msra.mxu0 %v949_v17  ;;  %661 = vmatpush.bf16.msra.mxu1 %v941_v32 }
  0x3c   : > { %438 = vrot.lane.b32.xlu2 %v433_v38, %s980_s23 }
  0x3e   : > { %579 = vmatpush.bf16.msra.mxu0 %v948_v22 }
  0x41   : > { %387 = vrot.lane.b32.xlu0 %v382_v36, %s981_s24  ;;  %402 = vrot.lane.b32.xlu1 %v397_v37, %s979_s22  ;;  %v940_v37 = vld [vmem:[%s1245_s1] sm:$0xff] }
  0x42   : > { %662 = vmatpush.bf16.msra.mxu1 %v940_v37 }
  0x6e   : > { %v234_v39 = vpop.permute.xlu2 %233 }
  0x76   : > { %v270_v44 = vpop.permute.xlu2 %269 }
  0x7e   : > { %v272_v57 = vpop.permute.xlu2 %271 }
  0x86   : > { %v435_v10 = vpop.permute.xlu2 %434 }
  0x8b   : > { %v268_v40 = vpop.permute.xlu1 %267  ;;  %v217_v41 = vpop.permute.xlu0 %216 }
  0x8c   : > { %v276_v45 = vsel %vm273_vm2, %v824_v42, %v217_v41 }
  0x8e   : > { %v437_v27 = vpop.permute.xlu2 %436 }
  0x93   : > { %v219_v46 = vpop.permute.xlu1 %218  ;;  %v232_v47 = vpop.permute.xlu0 %231 }
  0x94   : > { %v285_v49 = vsel %vm283_vm3, %v276_v45, %v232_v47  ;;  %v279_v52 = vsel %vm273_vm2, %v825_v48, %v219_v46 }
  0x95   : > { %v292_v50 = vsel %vm290_vm4, %v285_v49, %v268_v40  ;;  %v287_v55 = vsel %vm283_vm3, %v279_v52, %v234_v39 }
  0x96   : > { %297 = vst [vmem:[#allocation1] sm:$0xff] %v292_v50  ;;  %v294_v61 = vsel %vm290_vm4, %v287_v55, %v270_v44  ;;  %v439_v39 = vpop.permute.xlu2 %438 }
  0x9b   : > { %v221_v58 = vpop.permute.xlu0 %220  ;;  %v236_v59 = vpop.permute.xlu1 %235 }
  0x9c   : > { %v282_v63 = vsel %vm273_vm2, %v826_v56, %v221_v58 }
  0x9d   : > { %v1151_v60 = vld [vmem:[#allocation1 + $0x2] ss:$9 sm:$0xff]  ;;  %v289_v2 = vsel %vm283_vm3, %v282_v63, %v236_v59 }
  0x9e   : > { %v1154_v62 = vld [vmem:[#allocation1 + $0x1] ss:$9 sm:$0xff]  ;;  %v296_v7 = vsel %vm290_vm4, %v289_v2, %v272_v57  ;;  %v316_v54 = vunpack.i.h.s16 %v1151_v60 }
  0x9f   : > { %304 = vst [vmem:[#allocation1] sm:$0xff] %v294_v61  ;;  %v314_v56 = vunpack.i.h.s16 %v1154_v62  ;;  %v925_v62 = vld [vmem:[%s1018_s21 + $0x44] sm:$0x6]  ;;  %v927_v2 = vld [vmem:[%s1018_s21 + $0x4c] sm:$0x6] }
  0xa0   : > { %v741_v1 = vsel %vm739_vm7, 0, %v925_v62 }
  0xa1   : > { %v882_v61 = vpack.i.b16 %v1151_v60, %v314_v56  ;;  %926 = vst [vmem:[%s1018_s21 + $0x44] sm:$0x6] %v741_v1  ;;  %v969_v60 = vld [vmem:[%s1246_s2] ss:$0 sm:$0xff] }
  0xa3   : > { %v384_v8 = vpop.permute.xlu0 %383  ;;  %v399_v9 = vpop.permute.xlu1 %398 }
  0xa4   : > { %v442_v12 = vsel %vm273_vm2, %v836_v3, %v384_v8  ;;  %v744_v3 = vsel %vm739_vm7, 0, %v927_v2  ;;  %v747_v8 = vsel %vm739_vm7, 0, %v929_v5 }
  0xa5   : > { %v450_v15 = vsel %vm283_vm3, %v442_v12, %v399_v9  ;;  %928 = vst [vmem:[%s1018_s21 + $0x4c] sm:$0x6] %v744_v3 }
  0xa6   : > { %v1172_v11 = vld [vmem:[#allocation1 + $0x1] ss:$9 sm:$0xff]  ;;  %v456_v19 = vsel %vm290_vm4, %v450_v15, %v435_v10  ;;  %930 = vst [vmem:[%s1018_s21 + $0x54] sm:$0x6] %v747_v8 }
  0xa7   : > { %v1174_v4 = vld [vmem:[#allocation1 + $0x2] ss:$9 sm:$0xff]  ;;  %v317_v53 = vunpack.i.h.s16 %v1172_v11 }
  0xa8   : > { %309 = vst [vmem:[#allocation1] sm:$0xff] %v296_v7 }
  0xa9   : > { %v587_v57 = vpack.i.b16 %v317_v53, %v316_v54 }
  0xab   : > { %v386_v20 = vpop.permute.xlu0 %385  ;;  %v401_v21 = vpop.permute.xlu1 %400 }
  0xac   : > { %v445_v26 = vsel %vm273_vm2, %v837_v16, %v386_v20 }
  0xad   : > { %v452_v28 = vsel %vm283_vm3, %v445_v26, %v401_v21  ;;  %v931_v21 = vld [vmem:[%s1018_s21 + $0x44] sm:$0x3] }
  0xae   : > { %v458_v30 = vsel %vm290_vm4, %v452_v28, %v437_v27 }
  0xaf   : > { %v310_v24 = vld [vmem:[#allocation1 + $0x1] ss:$9 sm:$0xff] }
  0xb0   : > { %v312_v25 = vld [vmem:[#allocation1 + $0x2] ss:$9 sm:$0xff]  ;;  %v320_v55 = vunpack.i.h.s16 %v310_v24 }
  0xb1   : > { %461 = vst [vmem:[#allocation1] sm:$0xff] %v456_v19  ;;  %v322_v63 = vunpack.i.h.s16 %v312_v25 }
  0xb2   : > { %v883_v59 = vpack.i.b16 %v312_v25, %v320_v55 }
  0xb3   : > { %v388_v31 = vpop.permute.xlu0 %387  ;;  %v403_v36 = vpop.permute.xlu1 %402 }
  0xb4   : > { %v448_v35 = vsel %vm273_vm2, %v838_v29, %v388_v31 }
  0xb5   : > { %v454_v38 = vsel %vm283_vm3, %v448_v35, %v403_v36  ;;  %v935_v35 = vld [vmem:[%s1018_s21 + $0x54] sm:$0x3] }
  0xb6   : > { %v460_v41 = vsel %vm290_vm4, %v454_v38, %v439_v39 }
  0xb8   : > { %v463_v33 = vld [vmem:[#allocation1 + $0x1] ss:$9 sm:$0xff] }
  0xb9   : > { %v466_v34 = vld [vmem:[#allocation1 + $0x2] ss:$9 sm:$0xff]  ;;  %v478_v40 = vunpack.i.h.s16 %v463_v33 }
  0xba   : > { %468 = vst [vmem:[#allocation1] sm:$0xff] %v458_v30  ;;  %v480_v46 = vunpack.i.h.s16 %v466_v34  ;;  %v933_v30 = vld [vmem:[%s1018_s21 + $0x4c] sm:$0x3] }
  0xbb   : > { %v848_v42 = vpack.i.b16 %v466_v34, %v478_v40 }
  0xc1   : > { %v469_v43 = vld [vmem:[#allocation1 + $0x1] ss:$9 sm:$0xff] }
  0xc2   : > { %v471_v44 = vld [vmem:[#allocation1 + $0x2] ss:$9 sm:$0xff]  ;;  %v481_v45 = vunpack.i.h.s16 %v469_v43 }
  0xc3   : > { %473 = vst [vmem:[#allocation1] sm:$0xff] %v460_v41 }
  0xc4   : > { %509 = vst [vmem:[#allocation1] ss:$9 sm:$0xff] %v848_v42  ;;  %v504_v47 = vpack.i.b16 %v481_v45, %v480_v46 }
  0xca   : > { %v474_v48 = vld [vmem:[#allocation1 + $0x1] ss:$9 sm:$0xff] }
  0xcb   : > { %v476_v49 = vld [vmem:[#allocation1 + $0x2] ss:$9 sm:$0xff]  ;;  %v484_v50 = vunpack.i.h.s16 %v474_v48  ;;  %512 = vst [vmem:[#allocation1 + $0x1] ss:$9 sm:$0xff] %v504_v47 }
  0xcc   : > { %v486_v51 = vunpack.i.h.s16 %v476_v49  ;;  %515 = vst [vmem:[#allocation1 + $0x2] ss:$9 sm:$0xff] %v471_v44 }
  0xcd   : > { %v849_v52 = vpack.i.b16 %v476_v49, %v484_v50 }
  0xce   : > { %521 = vst [vmem:[#allocation1 + $0x4] ss:$9 sm:$0xff] %v486_v51 }
  0xcf   : > { %518 = vst [vmem:[#allocation1 + $0x3] ss:$9 sm:$0xff] %v849_v52 }
  0xd6   : > { %v522_v58 = vld [vmem:[#allocation1] sm:$0xff] }
  0xd7   : > { %580 = vmatmul.bf16.vlgmr.msra.gmra.mxu0 %v522_v58  ;;  %595 = vst [vmem:[#allocation1 + $0x1] ss:$9 sm:$0xff] %v587_v57 }
  0xd8   : > { %598 = vst [vmem:[#allocation1 + $0x2] ss:$9 sm:$0xff] %v1174_v4 }
  0xd9   : > { %601 = vst [vmem:[#allocation1 + $0x3] ss:$9 sm:$0xff] %v883_v59 }
  0xda   : > { %592 = vst [vmem:[#allocation1] ss:$9 sm:$0xff] %v882_v61 }
  0xdb   : > { %604 = vst [vmem:[#allocation1 + $0x4] ss:$9 sm:$0xff] %v322_v63 }
  0xe2   : > { %v605_v0 = vld [vmem:[#allocation1] sm:$0xff] }
  0xe3   : > { %663 = vmatmul.bf16.vlgmr.msra.gmra.mxu1 %v605_v0 }
 0x154   : > { %v581_v6 = vpop.f32.mrf.mxu0 }
 0x15c   : > { %v583_v15 = vpop.f32.mrf.mxu0 }
 0x160   : > { %v664_v7 = vpop.f32.mrf.mxu1 }
 0x161   : > { %v665_v9 = vadd.f32 %v664_v7, %v581_v6 }
 0x163   : > { %v673_v10 = vadd.f32 %v969_v60, %v665_v9 }
 0x165   : > { %v675_v11 = vmul.f32 0.2, %v673_v10 }
 0x167   : > { %v677_v4 = vmax.f32 %v673_v10, %v675_v11 }
 0x168   : > { %v666_v14 = vpop.f32.mrf.mxu1 }
 0x169   : > { %v681_v12 = vrot.slane %v677_v4, 1  ;;  %v682_v13 = vrot.slane %v677_v4, 2  ;;  %688 = vst [vmem:[#allocation1] ss:$9 sm:$0xff] %v677_v4  ;;  %v683_v16 = vrot.slane %v677_v4, 3  ;;  %v667_v17 = vadd.f32 %v666_v14, %v583_v15 }
 0x16a   : > { %v684_v18 = vrot.slane %v677_v4, 4  ;;  %v685_v22 = vrot.slane %v677_v4, 5  ;;  %v686_v27 = vrot.slane %v677_v4, 6  ;;  %v687_v28 = vrot.slane %v677_v4, 7 }
 0x16b   : > { %690 = vst [vmem:[#allocation1 + $0x1] ss:$9 sm:$0xff] %v681_v12  ;;  %v674_v25 = vadd.f32 %v969_v60, %v667_v17 }
 0x16c   : > { %692 = vst [vmem:[#allocation1 + $0x2] ss:$9 sm:$0xff] %v682_v13 }
 0x16d   : > { %v676_v26 = vmul.f32 0.2, %v674_v25 }
 0x16f   : > { %v678_v32 = vmax.f32 %v674_v25, %v676_v26 }
 0x173   : > { %v693_v19 = vld [vmem:[#allocation1] sm:$0xff] }
 0x174   : > { %694 = vst [vmem:[#allocation1] ss:$9 sm:$0xff] %v683_v16  ;;  %v705_v23 = vpack.c.bf16 %v693_v19, %v693_v19 }
 0x175   : > { %695 = vst [vmem:[#allocation1 + $0x1] ss:$9 sm:$0xff] %v684_v18 }
 0x176   : > { %696 = vst [vmem:[#allocation1 + $0x2] ss:$9 sm:$0xff] %v685_v22  ;;  %v753_v24 = vsel %vm1225_vm10, %v705_v23, %v931_v21 }
 0x177   : > { %932 = vst [vmem:[%s1018_s21 + $0x44] sm:$0x3] %v753_v24 }
 0x17d   : > { %v697_v29 = vld [vmem:[#allocation1] sm:$0xff] }
 0x17e   : > { %698 = vst [vmem:[#allocation1] ss:$9 sm:$0xff] %v686_v27  ;;  %v706_v31 = vpack.c.bf16 %v697_v29, %v697_v29 }
 0x17f   : > { %699 = vst [vmem:[#allocation1 + $0x1] ss:$9 sm:$0xff] %v687_v28 }
 0x180   : > { %v756_v33 = vsel %vm1225_vm10, %v706_v31, %v933_v30  ;;  %700 = vst [vmem:[#allocation1 + $0x2] ss:$9 sm:$0xff] %v678_v32 }
 0x181   : > { %934 = vst [vmem:[%s1018_s21 + $0x4c] sm:$0x3] %v756_v33 }
 0x187   : > { %v701_v34 = vld [vmem:[#allocation1] sm:$0xff] }
 0x188   : > { %v707_v36 = vpack.c.bf16 %v701_v34, %v701_v34 }
 0x18a   : > { %v759_v37 = vsel %vm1225_vm10, %v707_v36, %v935_v35 }
 0x18b   : > { %936 = vst [vmem:[%s1018_s21 + $0x54] sm:$0x3] %v759_v37 }
 0x18c PF: > { %s13_s12 = sadd.s32 1, %s976_s12  }
 0x18d   : > { %p10_p4 = scmp.ge.s32.totalorder %s13_s12, 4  }
 0x18f   :  { %12 = sbr.rel (!%p10_p4) target bundleno = 1 (0x1), region = 82 }

// kernel: nonorm_discriminator_pallas.5
= control target key start
LH: loop header
LB: loop body
LE: loop exit
PB: predicated region body
PF: predicated region fallthrough
CT: control target
= control target key end

     0   :  { %s2712_s12 = smov 0   ;;  %s3452_s0 = inlined_call_operand.vmem [shape: bf16[2,13,2,13,8], index: 0, kind: input, shape index: {}]   ;;  %s3453_s1 = inlined_call_operand.vmem [shape: bf16[64,8], index: 1, kind: input, shape index: {}]   ;;  %s3454_s2 = inlined_call_operand.vmem [shape: f32[1,8], index: 2, kind: input, shape index: {}]   ;;  %s3455_s3 = inlined_call_operand.vmem [shape: bf16[2,20,20,8], index: 3, kind: output, shape index: {}]  }
   0x1 LB: > { %s2023_s13 = sadd.s32 4294967295, %s2682_s12   ;;  %p2027_p0 = scmp.ge.s32.totalorder %s2682_s12, 1  ;;  %s2682_s12 = sphi %s2712_s12, %s13_s12  }
   0x2   : > { %p137_p1 = scmp.lt.s32.totalorder %s2682_s12, 3 }
   0x4   : > { %p138_p2 = pnand %p2027_p0, %p137_p1 }
   0x5   : > { %p161_p3 = scmp.lt.s32.totalorder (!%p138_p2), %s2023_s13, 1  ;;  %s2684_s18 = smov (!%p138_p2), 32  }
   0x6   : > { %141 = sbr.rel (%p138_p2) target bundleno = 662 (0x296), region = 32  ;;  %s2685_s19 = smov (!%p138_p2), 16  }
   0x7   : > { %s2686_s20 = smov (!%p138_p2), 48   ;;  %s2687_s21 = smov (!%p138_p2), 24  }
   0x8   : > { %s2688_s22 = smov (!%p138_p2), 8   ;;  %s2689_s23 = smov (!%p138_p2), 56  }
   0x9   : > { %s2690_s24 = smov (!%p138_p2), 40  }
   0xb   : > { %s3461_s13 = smov (!%p161_p3, %s2023_s13), 1  ;;  %vm1058_vm0 = vcmask 64512   ;;  %vm1086_vm1 = vcmask 130048   ;;  %vm1105_vm2 = vcmask 195584   ;;  %vm1124_vm3 = vcmask 261120  }
   0xc   : > { %s2657_s14 = smul.u32 208, %s3461_s13  ;;  %vm1143_vm4 = vcmask 326656   ;;  %vm1162_vm5 = vcmask 392192   ;;  %vm1181_vm6 = vcmask 457728   ;;  %vm1557_vm7 = vcmask 523264  }
   0xd   : > { %s2658_s8 = smul.u32 240, %s3461_s13  ;;  %vm1853_vm8 = vcmask 60416   ;;  %vm1856_vm9 = vcmask 58368   ;;  %vm1900_vm10 = vsmask.f32 7938  ;;  %vm1930_vm12 = vcmask 57344  }
   0xe   : > { %s2726_s17 = scalar_lea.vmem %s3452_s0, %s2657_s14  ;;  %vm3206_vm11 = vmand %vm1856_vm9, %vm1900_vm10  ;;  %vm1931_vm13 = vsmask.f32 256 }
   0xf   : > { %v2320_v0 = vld [vmem:[%s2726_s17 + $0x40] sm:$0xe]  ;;  %v2605_v1 = vld [vmem:[%s2726_s17 + $0x40] sm:$0x30]  ;;  %v2248_v2 = vld [vmem:[%s2726_s17 + $0x38] sm:$0xe]  ;;  %s3200_s11 = scalar_lea.vmem %s3455_s3, %s2658_s8 }
  0x10   : > { %v2321_v3 = vor.u32 %v2605_v1, %v2320_v0  ;;  %v2587_v4 = vld [vmem:[%s2726_s17 + $0x38] sm:$0x30]  ;;  %v2284_v5 = vld [vmem:[%s2726_s17 + $0x38] sm:$0xc]  ;;  %v2212_v9 = vld [vmem:[%s2726_s17 + $0x30] sm:$0xc] }
  0x11   : > { %v2596_v6 = vld [vmem:[%s2726_s17 + $0x38] sm:$0x70]  ;;  %v2249_v7 = vor.u32 %v2587_v4, %v2248_v2  ;;  %v2578_v10 = vld [vmem:[%s2726_s17 + $0x30] sm:$0x70]  ;;  %v2216_v11 = vld [vmem:[%s2726_s17 + $0x40] sm:$0xc] }
  0x12   : > { %v2285_v8 = vor.u32 %v2596_v6, %v2284_v5  ;;  %725 = vrot.lane.b32.xlu1 %v2321_v3, %s2684_s18  ;;  %v2213_v12 = vor.u32 %v2578_v10, %v2212_v9  ;;  %v2579_v13 = vld [vmem:[%s2726_s17 + $0x40] sm:$0x70]  ;;  %v2428_v14 = vld [vmem:[%s2726_s17 + $0x48] sm:$0xc]  ;;  %v2632_v15 = vld [vmem:[%s2726_s17 + $0x48] sm:$0x70] }
  0x13   : > { %536 = vrot.lane.b32.xlu0 %v2249_v7, %s2685_s19  ;;  %v2217_v18 = vor.u32 %v2579_v13, %v2216_v11  ;;  %v2429_v19 = vor.u32 %v2632_v15, %v2428_v14  ;;  %v2392_v20 = vld [vmem:[%s2726_s17 + $0x48] sm:$0xe]  ;;  %v2623_v21 = vld [vmem:[%s2726_s17 + $0x48] sm:$0x30]  ;;  %v2356_v35 = vld [vmem:[%s2726_s17 + $0x40] sm:$0xc] }
  0x14   : > { %v600_v16 = vshrl.u32 %v2285_v8, 16  ;;  %v602_v17 = vshll.u32 %v2285_v8, 16  ;;  %v411_v22 = vshrl.u32 %v2213_v12, 16  ;;  %v413_v23 = vshll.u32 %v2213_v12, 16  ;;  %v2252_v30 = vld [vmem:[%s2726_s17 + $0x48] sm:$0xe]  ;;  %vm3217_vm14 = vmand %vm1930_vm12, %vm1931_vm13 }
  0x15   : > { %v2393_v24 = vor.u32 %v2623_v21, %v2392_v20  ;;  %v420_v27 = vshll.u32 %v2217_v18, 16  ;;  %v980_v29 = vshll.u32 %v2429_v19, 16  ;;  %v2588_v31 = vld [vmem:[%s2726_s17 + $0x48] sm:$0x30]  ;;  %v2288_v33 = vld [vmem:[%s2726_s17 + $0x48] sm:$0xc] }
  0x16   : > { %v604_v25 = vrot.slane %v602_v17, 1  ;;  %v415_v26 = vrot.slane %v413_v23, 1  ;;  %v2597_v34 = vld [vmem:[%s2726_s17 + $0x48] sm:$0x70]  ;;  %v418_v36 = vshrl.u32 %v2217_v18, 16  ;;  %v2253_v38 = vor.u32 %v2588_v31, %v2252_v30 }
  0x17   : > { %914 = vrot.lane.b32.xlu2 %v2393_v24, %s2686_s20  ;;  %v422_v37 = vrot.slane %v420_v27, 1  ;;  %v2614_v39 = vld [vmem:[%s2726_s17 + $0x40] sm:$0x70]  ;;  %v978_v40 = vshrl.u32 %v2429_v19, 16  ;;  %v982_v41 = vrot.slane %v980_v29, 1  ;;  %v2289_v42 = vor.u32 %v2597_v34, %v2288_v33 }
  0x18   : > { %v605_v28 = vor.u32 %v604_v25, %v600_v16  ;;  %v416_v32 = vor.u32 %v415_v26, %v411_v22  ;;  %v2357_v43 = vor.u32 %v2614_v39, %v2356_v35  ;;  %v2360_v45 = vld [vmem:[%s2726_s17 + $0x50] sm:$0xc]  ;;  %v2615_v46 = vld [vmem:[%s2726_s17 + $0x50] sm:$0x70]  ;;  %v2432_v52 = vld [vmem:[%s2726_s17 + $0x58] sm:$0xc] }
  0x19   : > { %v423_v47 = vor.u32 %v422_v37, %v418_v36  ;;  %v2361_v49 = vor.u32 %v2615_v46, %v2360_v45  ;;  %v983_v50 = vor.u32 %v982_v41, %v978_v40  ;;  %v609_v51 = vshll.u32 %v2289_v42, 16  ;;  %v2633_v53 = vld [vmem:[%s2726_s17 + $0x58] sm:$0x70]  ;;  %v2324_v55 = vld [vmem:[%s2726_s17 + $0x50] sm:$0xe] }
  0x1a   : > { %662 = vrot.lane.b32.xlu1 %v605_v28, %s2687_s21  ;;  %v791_v44 = vshll.u32 %v2357_v43, 16  ;;  %v789_v48 = vshrl.u32 %v2357_v43, 16  ;;  %v2606_v56 = vld [vmem:[%s2726_s17 + $0x50] sm:$0x30]  ;;  %v2433_v57 = vor.u32 %v2633_v53, %v2432_v52  ;;  %v607_v60 = vshrl.u32 %v2289_v42, 16 }
  0x1b   : > { %473 = vrot.lane.b32.xlu0 %v416_v32, %s2688_s22  ;;  %v798_v59 = vshll.u32 %v2361_v49, 16  ;;  %v611_v61 = vrot.slane %v609_v51, 1  ;;  %v2220_v62 = vld [vmem:[%s2726_s17 + $0x50] sm:$0xc]  ;;  %v2580_v63 = vld [vmem:[%s2726_s17 + $0x50] sm:$0x70]  ;;  %v2325_v0 = vor.u32 %v2606_v56, %v2324_v55 }
  0x1c   : > { %v793_v54 = vrot.slane %v791_v44, 1  ;;  %v987_v1 = vshll.u32 %v2433_v57, 16  ;;  %v796_v2 = vshrl.u32 %v2361_v49, 16  ;;  %v2221_v4 = vor.u32 %v2580_v63, %v2220_v62  ;;  %v2292_v6 = vld [vmem:[%s2726_s17 + $0x58] sm:$0xc] }
  0x1d   : > { %v800_v3 = vrot.slane %v798_v59, 1  ;;  %v612_v5 = vor.u32 %v611_v61, %v607_v60  ;;  %v2598_v7 = vld [vmem:[%s2726_s17 + $0x58] sm:$0x70]  ;;  %v985_v8 = vshrl.u32 %v2433_v57, 16  ;;  %v2396_v13 = vld [vmem:[%s2726_s17 + $0x58] sm:$0xe] }
  0x1e   : > { %v794_v58 = vor.u32 %v793_v54, %v789_v48  ;;  %v989_v9 = vrot.slane %v987_v1, 1  ;;  %v2293_v10 = vor.u32 %v2598_v7, %v2292_v6  ;;  %v427_v12 = vshll.u32 %v2221_v4, 16  ;;  %v2624_v14 = vld [vmem:[%s2726_s17 + $0x58] sm:$0x30]  ;;  %v2364_v20 = vld [vmem:[%s2726_s17 + $0x60] sm:$0xc] }
  0x1f   : > { %538 = vrot.lane.b32.xlu2 %v2253_v38, %s2685_s19  ;;  %v801_v11 = vor.u32 %v800_v3, %v796_v2  ;;  %v425_v17 = vshrl.u32 %v2221_v4, 16  ;;  %v2397_v19 = vor.u32 %v2624_v14, %v2396_v13  ;;  %v2616_v21 = vld [vmem:[%s2726_s17 + $0x60] sm:$0x70]  ;;  %v2256_v25 = vld [vmem:[%s2726_s17 + $0x58] sm:$0xe] }
  0x20   : > { %v990_v15 = vor.u32 %v989_v9, %v985_v8  ;;  %v616_v16 = vshll.u32 %v2293_v10, 16  ;;  %v429_v18 = vrot.slane %v427_v12, 1  ;;  %v614_v22 = vshrl.u32 %v2293_v10, 16  ;;  %v2589_v27 = vld [vmem:[%s2726_s17 + $0x58] sm:$0x30] }
  0x21   : > { %v2365_v26 = vor.u32 %v2616_v21, %v2364_v20  ;;  %v2436_v28 = vld [vmem:[%s2726_s17 + $0x68] sm:$0xc]  ;;  %v2634_v29 = vld [vmem:[%s2726_s17 + $0x68] sm:$0x70]  ;;  %v2257_v32 = vor.u32 %v2589_v27, %v2256_v25  ;;  %v2328_v34 = vld [vmem:[%s2726_s17 + $0x60] sm:$0xe] }
  0x22   : > { %475 = vrot.lane.b32.xlu1 %v423_v47, %s2688_s22  ;;  %v618_v23 = vrot.slane %v616_v16, 1  ;;  %v430_v24 = vor.u32 %v429_v18, %v425_v17  ;;  %v2437_v31 = vor.u32 %v2634_v29, %v2436_v28  ;;  %v2607_v35 = vld [vmem:[%s2726_s17 + $0x60] sm:$0x30]  ;;  %v2224_v36 = vld [vmem:[%s2726_s17 + $0x60] sm:$0xc] }
  0x23   : > { %1040 = vrot.lane.b32.xlu0 %v983_v50, %s2689_s23  ;;  %v805_v33 = vshll.u32 %v2365_v26, 16  ;;  %v2581_v37 = vld [vmem:[%s2726_s17 + $0x60] sm:$0x70]  ;;  %v2329_v38 = vor.u32 %v2607_v35, %v2328_v34  ;;  %v803_v40 = vshrl.u32 %v2365_v26, 16  ;;  %v2400_v42 = vld [vmem:[%s2726_s17 + $0x68] sm:$0xe] }
  0x24   : > { %v619_v30 = vor.u32 %v618_v23, %v614_v22  ;;  %v994_v39 = vshll.u32 %v2437_v31, 16  ;;  %v2625_v43 = vld [vmem:[%s2726_s17 + $0x68] sm:$0x30]  ;;  %v2225_v44 = vor.u32 %v2581_v37, %v2224_v36  ;;  %v2296_v45 = vld [vmem:[%s2726_s17 + $0x68] sm:$0xc]  ;;  %v992_v48 = vshrl.u32 %v2437_v31, 16 }
  0x25   : > { %v807_v41 = vrot.slane %v805_v33, 1  ;;  %v2599_v46 = vld [vmem:[%s2726_s17 + $0x68] sm:$0x70]  ;;  %v2401_v47 = vor.u32 %v2625_v43, %v2400_v42  ;;  %v2368_v53 = vld [vmem:[%s2726_s17 + $0x70] sm:$0xc] }
  0x26   : > { %v996_v49 = vrot.slane %v994_v39, 1  ;;  %v2297_v50 = vor.u32 %v2599_v46, %v2296_v45  ;;  %v434_v52 = vshll.u32 %v2225_v44, 16  ;;  %v2617_v54 = vld [vmem:[%s2726_s17 + $0x70] sm:$0x70]  ;;  %v2260_v60 = vld [vmem:[%s2726_s17 + $0x68] sm:$0xe] }
  0x27   : > { %851 = vrot.lane.b32.xlu2 %v794_v58, %s2690_s24  ;;  %v808_v51 = vor.u32 %v807_v41, %v803_v40  ;;  %v2369_v55 = vor.u32 %v2617_v54, %v2368_v53  ;;  %v432_v58 = vshrl.u32 %v2225_v44, 16  ;;  %v2590_v61 = vld [vmem:[%s2726_s17 + $0x68] sm:$0x30]  ;;  %v2635_v4 = vld [vmem:[%s2726_s17 + $0x78] sm:$0x70] }
  0x28   : > { %v997_v56 = vor.u32 %v996_v49, %v992_v48  ;;  %v623_v57 = vshll.u32 %v2297_v50, 16  ;;  %v436_v59 = vrot.slane %v434_v52, 1  ;;  %v2261_v62 = vor.u32 %v2590_v61, %v2260_v60  ;;  %v2582_v6 = vld [vmem:[%s2726_s17 + $0x70] sm:$0x70]  ;;  %v2332_v12 = vld [vmem:[%s2726_s17 + $0x70] sm:$0xe] }
  0x29   : > { %v812_v63 = vshll.u32 %v2369_v55, 16  ;;  %v621_v1 = vshrl.u32 %v2297_v50, 16  ;;  %v810_v7 = vshrl.u32 %v2369_v55, 16  ;;  %v2608_v13 = vld [vmem:[%s2726_s17 + $0x70] sm:$0x30] }
  0x2a   : > { %727 = vrot.lane.b32.xlu1 %v2325_v0, %s2684_s18  ;;  %v2440_v0 = vld [vmem:[%s2726_s17 + $0x78] sm:$0xc]  ;;  %v625_v2 = vrot.slane %v623_v57, 1  ;;  %v437_v3 = vor.u32 %v436_v59, %v432_v58  ;;  %v2333_v18 = vor.u32 %v2608_v13, %v2332_v12  ;;  %v2626_v21 = vld [vmem:[%s2726_s17 + $0x78] sm:$0x30] }
  0x2b   : > { %664 = vrot.lane.b32.xlu0 %v612_v5, %s2687_s21  ;;  %v2228_v5 = vld [vmem:[%s2726_s17 + $0x70] sm:$0xc]  ;;  %v814_v8 = vrot.slane %v812_v63, 1  ;;  %v2441_v9 = vor.u32 %v2635_v4, %v2440_v0  ;;  %v2300_v17 = vld [vmem:[%s2726_s17 + $0x78] sm:$0xc] }
  0x2c   : > { %v2229_v10 = vor.u32 %v2582_v6, %v2228_v5  ;;  %v2404_v20 = vld [vmem:[%s2726_s17 + $0x78] sm:$0xe]  ;;  %v2372_v28 = vld [vmem:[%s2726_s17 + $0x80] sm:$0xc]  ;;  %v2618_v29 = vld [vmem:[%s2726_s17 + $0x80] sm:$0x70] }
  0x2d   : > { %v815_v14 = vor.u32 %v814_v8, %v810_v7  ;;  %v2405_v25 = vor.u32 %v2626_v21, %v2404_v20  ;;  %v999_v26 = vshrl.u32 %v2441_v9, 16  ;;  %v2373_v33 = vor.u32 %v2618_v29, %v2372_v28  ;;  %v2636_v35 = vld [vmem:[%s2726_s17 + $0x88] sm:$0x70]  ;;  %v2264_v36 = vld [vmem:[%s2726_s17 + $0x78] sm:$0xe] }
  0x2e   : > { %v441_v16 = vshll.u32 %v2229_v10, 16  ;;  %v439_v22 = vshrl.u32 %v2229_v10, 16  ;;  %v2591_v37 = vld [vmem:[%s2726_s17 + $0x78] sm:$0x30]  ;;  %v2609_v39 = vld [vmem:[%s2726_s17 + $0x80] sm:$0x30] }
  0x2f   : > { %853 = vrot.lane.b32.xlu2 %v801_v11, %s2690_s24  ;;  %v626_v11 = vor.u32 %v625_v2, %v621_v1  ;;  %v2265_v41 = vor.u32 %v2591_v37, %v2264_v36  ;;  %v819_v42 = vshll.u32 %v2373_v33, 16  ;;  %v2232_v45 = vld [vmem:[%s2726_s17 + $0x80] sm:$0xc]  ;;  %v2583_v46 = vld [vmem:[%s2726_s17 + $0x80] sm:$0x70]  ;;  %v817_v49 = vshrl.u32 %v2373_v33, 16 }
  0x30   : > { %v443_v23 = vrot.slane %v441_v16, 1  ;;  %v2304_v53 = vld [vmem:[%s2726_s17 + $0x88] sm:$0xc]  ;;  %v2601_v54 = vld [vmem:[%s2726_s17 + $0x88] sm:$0x70] }
  0x31   : > { %v821_v50 = vrot.slane %v819_v42, 1  ;;  %v2305_v57 = vor.u32 %v2601_v54, %v2304_v53  ;;  %v2408_v60 = vld [vmem:[%s2726_s17 + $0x88] sm:$0xe]  ;;  %v2627_v61 = vld [vmem:[%s2726_s17 + $0x88] sm:$0x30] }
  0x32   : > { %1042 = vrot.lane.b32.xlu1 %v990_v15, %s2689_s23  ;;  %v1001_v15 = vshll.u32 %v2441_v9, 16  ;;  %v2409_v2 = vor.u32 %v2627_v61, %v2408_v60  ;;  %v2619_v4 = vld [vmem:[%s2726_s17 + $0x90] sm:$0x70]  ;;  %v2268_v9 = vld [vmem:[%s2726_s17 + $0x88] sm:$0xe] }
  0x33   : > { %916 = vrot.lane.b32.xlu0 %v2397_v19, %s2686_s20  ;;  %v2600_v19 = vld [vmem:[%s2726_s17 + $0x78] sm:$0x70]  ;;  %v822_v58 = vor.u32 %v821_v50, %v817_v49  ;;  %v637_v63 = vshll.u32 %v2305_v57, 16  ;;  %v635_v5 = vshrl.u32 %v2305_v57, 16  ;;  %v2592_v10 = vld [vmem:[%s2726_s17 + $0x88] sm:$0x30] }
  0x34   : > { %v1003_v27 = vrot.slane %v1001_v15, 1  ;;  %v2637_v12 = vld [vmem:[%s2726_s17 + $0x98] sm:$0x70]  ;;  %v2269_v15 = vor.u32 %v2592_v10, %v2268_v9  ;;  %v2236_v20 = vld [vmem:[%s2726_s17 + $0x90] sm:$0xc] }
  0x35   : > { %v639_v6 = vrot.slane %v637_v63, 1  ;;  %v2584_v21 = vld [vmem:[%s2726_s17 + $0x90] sm:$0x70]  ;;  %v2308_v29 = vld [vmem:[%s2726_s17 + $0x98] sm:$0xc] }
  0x36   : > { %v1004_v34 = vor.u32 %v1003_v27, %v999_v26  ;;  %v2412_v26 = vld [vmem:[%s2726_s17 + $0x98] sm:$0xe]  ;;  %v2628_v27 = vld [vmem:[%s2726_s17 + $0x98] sm:$0x30]  ;;  %v2237_v28 = vor.u32 %v2584_v21, %v2236_v20  ;;  %v2380_v37 = vld [vmem:[%s2726_s17 + $0xa0] sm:$0xc] }
  0x37   : > { %477 = vrot.lane.b32.xlu2 %v430_v24, %s2688_s22  ;;  %v2301_v24 = vor.u32 %v2600_v19, %v2300_v17  ;;  %v640_v13 = vor.u32 %v639_v6, %v635_v5  ;;  %v2340_v17 = vld [vmem:[%s2726_s17 + $0x90] sm:$0xe]  ;;  %v2585_v53 = vld [vmem:[%s2726_s17 + $0xa0] sm:$0x70]  ;;  %v2344_v63 = vld [vmem:[%s2726_s17 + $0xa0] sm:$0xe] }
  0x38   : > { %v455_v36 = vshll.u32 %v2237_v28, 16  ;;  %v2629_v9 = vld [vmem:[%s2726_s17 + $0xa8] sm:$0x30]  ;;  %v2312_v10 = vld [vmem:[%s2726_s17 + $0xa8] sm:$0xc] }
  0x39   : > { %v630_v31 = vshll.u32 %v2301_v24, 16  ;;  %v628_v43 = vshrl.u32 %v2301_v24, 16 }
  0x3a   : > { %666 = vrot.lane.b32.xlu1 %v619_v30, %s2687_s21  ;;  %v444_v30 = vor.u32 %v443_v23, %v439_v22 }
  0x3b   : > { %540 = vrot.lane.b32.xlu0 %v2257_v32, %s2685_s19  ;;  %v2444_v32 = vld [vmem:[%s2726_s17 + $0x88] sm:$0xc]  ;;  %v632_v44 = vrot.slane %v630_v31, 1  ;;  %v2413_v31 = vor.u32 %v2628_v27, %v2412_v26  ;;  %v2456_v27 = vld [vmem:[%s2726_s17 + $0xb8] sm:$0xc] }
  0x3c   : > { %v2445_v40 = vor.u32 %v2636_v35, %v2444_v32 }
  0x3d   : > { %v633_v52 = vor.u32 %v632_v44, %v628_v43  ;;  %v453_v43 = vshrl.u32 %v2237_v28, 16  ;;  %v457_v44 = vrot.slane %v455_v36, 1  ;;  %v2639_v28 = vld [vmem:[%s2726_s17 + $0xb8] sm:$0x70] }
  0x3e   : > { %v1008_v48 = vshll.u32 %v2445_v40, 16  ;;  %v1006_v55 = vshrl.u32 %v2445_v40, 16 }
  0x3f   : > { %729 = vrot.lane.b32.xlu2 %v2329_v38, %s2684_s18  ;;  %v2336_v38 = vld [vmem:[%s2726_s17 + $0x80] sm:$0xe] }
  0x42   : > { %918 = vrot.lane.b32.xlu1 %v2401_v47, %s2686_s20  ;;  %v2337_v47 = vor.u32 %v2609_v39, %v2336_v38  ;;  %v2620_v38 = vld [vmem:[%s2726_s17 + $0xa0] sm:$0x70] }
  0x43   : > { %855 = vrot.lane.b32.xlu0 %v808_v51, %s2690_s24  ;;  %v2233_v51 = vor.u32 %v2583_v46, %v2232_v45  ;;  %v2381_v40 = vor.u32 %v2620_v38, %v2380_v37  ;;  %v2272_v45 = vld [vmem:[%s2726_s17 + $0x98] sm:$0xe]  ;;  %v2593_v46 = vld [vmem:[%s2726_s17 + $0x98] sm:$0x30]  ;;  %v2457_v38 = vor.u32 %v2639_v28, %v2456_v27 }
  0x44   : > { %v2280_v27 = vld [vmem:[%s2726_s17 + $0xb8] sm:$0xe]  ;;  %v2595_v28 = vld [vmem:[%s2726_s17 + $0xb8] sm:$0x30] }
  0x45   : > { %v448_v59 = vshll.u32 %v2233_v51, 16  ;;  %v446_v0 = vshrl.u32 %v2233_v51, 16  ;;  %v458_v51 = vor.u32 %v457_v44, %v453_v43  ;;  %v831_v57 = vshrl.u32 %v2381_v40, 16 }
  0x47   : > { %1044 = vrot.lane.b32.xlu2 %v997_v56, %s2689_s23  ;;  %v1010_v56 = vrot.slane %v1008_v48, 1  ;;  %v450_v1 = vrot.slane %v448_v59, 1  ;;  %v833_v48 = vshll.u32 %v2381_v40, 16 }
  0x49   : > { %v451_v7 = vor.u32 %v450_v1, %v446_v0  ;;  %v2611_v0 = vld [vmem:[%s2726_s17 + $0xa0] sm:$0x30] }
  0x4a   : > { %542 = vrot.lane.b32.xlu1 %v2261_v62, %s2685_s19  ;;  %v1011_v62 = vor.u32 %v1010_v56, %v1006_v55  ;;  %v2452_v55 = vld [vmem:[%s2726_s17 + $0xa8] sm:$0xc]  ;;  %v2638_v56 = vld [vmem:[%s2726_s17 + $0xa8] sm:$0x70]  ;;  %v2345_v6 = vor.u32 %v2611_v0, %v2344_v63  ;;  %v2604_v63 = vld [vmem:[%s2726_s17 + $0xb8] sm:$0x70] }
  0x4b   : > { %479 = vrot.lane.b32.xlu0 %v437_v3, %s2688_s22  ;;  %v2376_v3 = vld [vmem:[%s2726_s17 + $0x90] sm:$0xc]  ;;  %v2453_v61 = vor.u32 %v2638_v56, %v2452_v55  ;;  %v2586_v55 = vld [vmem:[%s2726_s17 + $0xb0] sm:$0x70]  ;;  %v1027_v0 = vshrl.u32 %v2457_v38, 16 }
  0x4c   : > { %v2377_v8 = vor.u32 %v2619_v4, %v2376_v3  ;;  %v2176_v3 = vld [vmem:[%s2726_s17 + $0x30] sm:$0xe]  ;;  %v2569_v4 = vld [vmem:[%s2726_s17 + $0x30] sm:$0x30] }
  0x4e   : > { %v826_v16 = vshll.u32 %v2377_v8, 16  ;;  %v824_v24 = vshrl.u32 %v2377_v8, 16  ;;  %v2416_v8 = vld [vmem:[%s2726_s17 + $0xa8] sm:$0xe] }
  0x4f   : > { %668 = vrot.lane.b32.xlu2 %v626_v11, %s2687_s21  ;;  %v2448_v11 = vld [vmem:[%s2726_s17 + $0x98] sm:$0xc] }
  0x52   : > { %857 = vrot.lane.b32.xlu1 %v815_v14, %s2690_s24  ;;  %v2449_v14 = vor.u32 %v2637_v12, %v2448_v11  ;;  %v2603_v11 = vld [vmem:[%s2726_s17 + $0xa8] sm:$0x70] }
  0x53   : > { %731 = vrot.lane.b32.xlu0 %v2333_v18, %s2684_s18  ;;  %v2610_v18 = vld [vmem:[%s2726_s17 + $0x90] sm:$0x30]  ;;  %v2313_v20 = vor.u32 %v2603_v11, %v2312_v10  ;;  %v2388_v11 = vld [vmem:[%s2726_s17 + $0xc0] sm:$0xc] }
  0x54   : > { %v2341_v22 = vor.u32 %v2610_v18, %v2340_v17  ;;  %v1015_v23 = vshll.u32 %v2449_v14, 16  ;;  %v1013_v32 = vshrl.u32 %v2449_v14, 16  ;;  %v1020_v17 = vshrl.u32 %v2453_v61, 16 }
  0x56   : > { %v1017_v33 = vrot.slane %v1015_v23, 1  ;;  %v2384_v23 = vld [vmem:[%s2726_s17 + $0xb0] sm:$0xc] }
  0x57   : > { %920 = vrot.lane.b32.xlu2 %v2405_v25, %s2686_s20  ;;  %v828_v25 = vrot.slane %v826_v16, 1  ;;  %v2417_v16 = vor.u32 %v2629_v9, %v2416_v8  ;;  %v2630_v8 = vld [vmem:[%s2726_s17 + $0xb8] sm:$0x30] }
  0x59   : > { %v829_v35 = vor.u32 %v828_v25, %v824_v24  ;;  %v2621_v24 = vld [vmem:[%s2726_s17 + $0xb0] sm:$0x70] }
  0x5a   : > { %481 = vrot.lane.b32.xlu1 %v444_v30, %s2688_s22  ;;  %v2602_v30 = vld [vmem:[%s2726_s17 + $0x98] sm:$0x70] }
  0x5b   : > { %1046 = vrot.lane.b32.xlu0 %v1004_v34, %s2689_s23  ;;  %v2309_v34 = vor.u32 %v2602_v30, %v2308_v29  ;;  %v2385_v29 = vor.u32 %v2621_v24, %v2384_v23 }
  0x5d   : > { %v644_v42 = vshll.u32 %v2309_v34, 16  ;;  %v642_v49 = vshrl.u32 %v2309_v34, 16  ;;  %v2594_v34 = vld [vmem:[%s2726_s17 + $0xa8] sm:$0x30]  ;;  %v840_v44 = vshll.u32 %v2385_v29, 16 }
  0x5f   : > { %544 = vrot.lane.b32.xlu2 %v2265_v41, %s2685_s19  ;;  %v1018_v41 = vor.u32 %v1017_v33, %v1013_v32  ;;  %v646_v50 = vrot.slane %v644_v42, 1  ;;  %v651_v32 = vshll.u32 %v2313_v20, 16  ;;  %v2276_v33 = vld [vmem:[%s2726_s17 + $0xa8] sm:$0xe]  ;;  %v2612_v42 = vld [vmem:[%s2726_s17 + $0xb0] sm:$0x30] }
  0x60   : > { %v2277_v43 = vor.u32 %v2594_v34, %v2276_v33  ;;  %v2184_v33 = vld [vmem:[%s2726_s17 + $0x50] sm:$0xe]  ;;  %v2571_v34 = vld [vmem:[%s2726_s17 + $0x50] sm:$0x30] }
  0x61   : > { %v647_v60 = vor.u32 %v646_v50, %v642_v49  ;;  %v2570_v49 = vld [vmem:[%s2726_s17 + $0x40] sm:$0x30] }
  0x62   : > { %733 = vrot.lane.b32.xlu1 %v2337_v47, %s2684_s18  ;;  %v2273_v47 = vor.u32 %v2593_v46, %v2272_v45  ;;  %v649_v45 = vshrl.u32 %v2313_v20, 16  ;;  %v653_v46 = vrot.slane %v651_v32, 1 }
  0x63   : > { %670 = vrot.lane.b32.xlu0 %v633_v52, %s2687_s21  ;;  %v2240_v52 = vld [vmem:[%s2726_s17 + $0xa0] sm:$0xc] }
  0x64   : > { %v2241_v59 = vor.u32 %v2585_v53, %v2240_v52  ;;  %v1029_v53 = vshll.u32 %v2457_v38, 16 }
  0x66   : > { %v462_v5 = vshll.u32 %v2241_v59, 16  ;;  %v460_v14 = vshrl.u32 %v2241_v59, 16 }
  0x67   : > { %859 = vrot.lane.b32.xlu2 %v822_v58, %s2690_s24  ;;  %v835_v58 = vrot.slane %v833_v48, 1  ;;  %v2180_v48 = vld [vmem:[%s2726_s17 + $0x40] sm:$0xe] }
  0x6a   : > { %1048 = vrot.lane.b32.xlu1 %v1011_v62, %s2689_s23 }
  0x6b   : > { %922 = vrot.lane.b32.xlu0 %v2409_v2, %s2686_s20  ;;  %v836_v2 = vor.u32 %v835_v58, %v831_v57  ;;  %v838_v57 = vshrl.u32 %v2385_v29, 16  ;;  %v842_v58 = vrot.slane %v840_v44, 1 }
  0x6f   : > { %483 = vrot.lane.b32.xlu2 %v451_v7, %s2688_s22  ;;  %v1022_v7 = vshll.u32 %v2453_v61, 16  ;;  %v654_v61 = vor.u32 %v653_v46, %v649_v45  ;;  %v2281_v46 = vor.u32 %v2595_v28, %v2280_v27 }
  0x71   : > { %v2846_v19 = vpop.permute.xlu2 %914  ;;  %v1024_v18 = vrot.slane %v1022_v7, 1  ;;  %v2420_v7 = vld [vmem:[%s2726_s17 + $0xb8] sm:$0xe] }
  0x72   : > { %672 = vrot.lane.b32.xlu1 %v640_v13, %s2687_s21  ;;  %v2177_v13 = vor.u32 %v2569_v4, %v2176_v3  ;;  %v843_v3 = vor.u32 %v842_v58, %v838_v57  ;;  %v2421_v20 = vor.u32 %v2630_v8, %v2420_v7 }
  0x73   : > { %546 = vrot.lane.b32.xlu0 %v2269_v15, %s2685_s19  ;;  %v464_v15 = vrot.slane %v462_v5, 1 }
  0x75   : > { %v465_v26 = vor.u32 %v464_v15, %v460_v14 }
  0x77   : > { %735 = vrot.lane.b32.xlu2 %v2341_v22, %s2684_s18 }
  0x79   : > { %v2859_v39 = vpop.permute.xlu2 %538 }
  0x7a   : > { %924 = vrot.lane.b32.xlu1 %v2413_v31, %s2686_s20  ;;  %v1025_v31 = vor.u32 %v1024_v18, %v1020_v17 }
  0x7b   : > { %861 = vrot.lane.b32.xlu0 %v829_v35, %s2690_s24 }
  0x7f   : > { %1050 = vrot.lane.b32.xlu2 %v1018_v41, %s2689_s23  ;;  %v2348_v41 = vld [vmem:[%s2726_s17 + $0xb0] sm:$0xe] }
  0x80   : > { %v2349_v52 = vor.u32 %v2612_v42, %v2348_v41 }
  0x81   : > { %v852_v54 = vpop.permute.xlu2 %851 }
  0x82   : > { %548 = vrot.lane.b32.xlu1 %v2273_v47, %s2685_s19 }
  0x83   : > { %485 = vrot.lane.b32.xlu0 %v458_v51, %s2688_s22 }
  0x84   : > { %v726_v62 = vpop.permute.xlu1 %725 }
  0x85   : > { %v537_v1 = vpop.permute.xlu0 %536 }
  0x87   : > { %674 = vrot.lane.b32.xlu2 %v647_v60, %s2687_s21  ;;  %v2181_v60 = vor.u32 %v2570_v49, %v2180_v48  ;;  %v2613_v48 = vld [vmem:[%s2726_s17 + $0xc0] sm:$0x30] }
  0x89   : > { %v2881_v12 = vpop.permute.xlu2 %853 }
  0x8a   : > { %863 = vrot.lane.b32.xlu1 %v836_v2, %s2690_s24 }
  0x8b   : > { %737 = vrot.lane.b32.xlu0 %v2345_v6, %s2684_s18 }
  0x8c   : > { %v663_v21 = vpop.permute.xlu1 %662 }
  0x8d   : > { %v474_v22 = vpop.permute.xlu0 %473 }
  0x8e   : > { %v1061_v25 = vsel %vm1058_vm0, %v2177_v13, %v474_v22  ;;  %v2622_v13 = vld [vmem:[%s2726_s17 + $0xc0] sm:$0x70] }
  0x8f   : > { %926 = vrot.lane.b32.xlu2 %v2417_v16, %s2686_s20  ;;  %v1088_v30 = vsel %vm1086_vm1, %v1061_v25, %v537_v1  ;;  %v1031_v1 = vrot.slane %v1029_v53, 1 }
  0x90   : > { %v1107_v35 = vsel %vm1105_vm2, %v1088_v30, %v663_v21  ;;  %v2389_v21 = vor.u32 %v2622_v13, %v2388_v11 }
  0x91   : > { %v2895_v36 = vpop.permute.xlu2 %477  ;;  %v1126_v37 = vsel %vm1124_vm3, %v1107_v35, %v726_v62  ;;  %v2316_v62 = vld [vmem:[%s2726_s17 + $0xb8] sm:$0xc]  ;;  %v1032_v10 = vor.u32 %v1031_v1, %v1027_v0  ;;  %v2460_v35 = vld [vmem:[%s2726_s17 + $0xc8] sm:$0xc] }
  0x92   : > { %v1145_v40 = vsel %vm1143_vm4, %v1126_v37, %v852_v54  ;;  %487 = vrot.lane.b32.xlu1 %v465_v26, %s2688_s22  ;;  %v2244_v54 = vld [vmem:[%s2726_s17 + $0xb0] sm:$0xc]  ;;  %v2317_v2 = vor.u32 %v2604_v63, %v2316_v62  ;;  %v847_v29 = vshll.u32 %v2389_v21, 16  ;;  %v2640_v37 = vld [vmem:[%s2726_s17 + $0xc8] sm:$0x70]  ;;  %v845_v53 = vshrl.u32 %v2389_v21, 16 }
  0x93   : > { %1052 = vrot.lane.b32.xlu0 %v1025_v31, %s2689_s23  ;;  %v1164_v51 = vsel %vm1162_vm5, %v1145_v40, %v2846_v19  ;;  %v2245_v59 = vor.u32 %v2586_v55, %v2244_v54  ;;  %v2424_v55 = vld [vmem:[%s2726_s17 + $0xc8] sm:$0xe] }
  0x94   : > { %v476_v47 = vpop.permute.xlu1 %475  ;;  %v658_v15 = vshll.u32 %v2317_v2, 16  ;;  %v849_v54 = vrot.slane %v847_v29, 1 }
  0x95   : > { %v1041_v50 = vpop.permute.xlu0 %1040  ;;  %v469_v4 = vshll.u32 %v2245_v59, 16  ;;  %v1064_v5 = vsel %vm1058_vm0, %v2181_v60, %v476_v47  ;;  %v467_v16 = vshrl.u32 %v2245_v59, 16  ;;  %v2352_v47 = vld [vmem:[%s2726_s17 + $0xc0] sm:$0xe] }
  0x96   : > { %v1183_v56 = vsel %vm1181_vm6, %v1164_v51, %v1041_v50  ;;  %v1090_v14 = vsel %vm1086_vm1, %v1064_v5, %v2859_v39  ;;  %v656_v39 = vshrl.u32 %v2317_v2, 16  ;;  %v660_v24 = vrot.slane %v658_v15, 1  ;;  %v2188_v15 = vld [vmem:[%s2726_s17 + $0x60] sm:$0xe] }
  0x97   : > { %550 = vrot.lane.b32.xlu2 %v2277_v43, %s2685_s19  ;;  %1200 = vst [vmem:[#allocation1] sm:$0xff] %v1183_v56  ;;  %v471_v17 = vrot.slane %v469_v4, 1  ;;  %v2185_v50 = vor.u32 %v2571_v34, %v2184_v33  ;;  %v2353_v51 = vor.u32 %v2613_v48, %v2352_v47  ;;  %v2631_v56 = vld [vmem:[%s2726_s17 + $0xc8] sm:$0x30]  ;;  %v850_v0 = vor.u32 %v849_v54, %v845_v53 }
  0x98   : > { %v661_v43 = vor.u32 %v660_v24, %v656_v39  ;;  %v2425_v60 = vor.u32 %v2631_v56, %v2424_v55 }
  0x99   : > { %v2913_v19 = vpop.permute.xlu2 %729  ;;  %v472_v25 = vor.u32 %v471_v17, %v467_v16  ;;  %v1067_v59 = vsel %vm1058_vm0, %v2185_v50, %v2895_v36  ;;  %v2572_v16 = vld [vmem:[%s2726_s17 + $0x60] sm:$0x30] }
  0x9a   : > { %739 = vrot.lane.b32.xlu1 %v2349_v52, %s2684_s18  ;;  %v2189_v17 = vor.u32 %v2572_v16, %v2188_v15 }
  0x9b   : > { %676 = vrot.lane.b32.xlu0 %v654_v61, %s2687_s21 }
  0x9c   : > { %v728_v6 = vpop.permute.xlu1 %727 }
  0x9d   : > { %v665_v9 = vpop.permute.xlu0 %664 }
  0x9e   : > { %v1109_v18 = vsel %vm1105_vm2, %v1090_v14, %v665_v9  ;;  %v2933_v30 = vld [vmem:[#allocation1 + $0x1] ss:$9 sm:$0xff]  ;;  %v2943_v40 = vld [vmem:[#allocation1 + $0x3] ss:$9 sm:$0xff] }
  0x9f   : > { %865 = vrot.lane.b32.xlu2 %v843_v3, %s2690_s24  ;;  %v1128_v23 = vsel %vm1124_vm3, %v1109_v18, %v728_v6  ;;  %v2941_v38 = vld [vmem:[#allocation1 + $0x2] ss:$9 sm:$0xff]  ;;  %v2945_v41 = vld [vmem:[#allocation1 + $0x4] ss:$9 sm:$0xff] }
  0xa0   : > { %v1147_v31 = vsel %vm1143_vm4, %v1128_v23, %v2881_v12  ;;  %v2461_v12 = vor.u32 %v2640_v37, %v2460_v35  ;;  %v2949_v44 = vld [vmem:[#allocation1 + $0x5] ss:$9 sm:$0xff] }
  0xa1   : > { %v2926_v22 = vpop.permute.xlu2 %1044 }
  0xa2   : > { %1054 = vrot.lane.b32.xlu1 %v1032_v10, %s2689_s23  ;;  %v1036_v52 = vshll.u32 %v2461_v12, 16  ;;  %v1034_v61 = vshrl.u32 %v2461_v12, 16 }
  0xa3   : > { %928 = vrot.lane.b32.xlu0 %v2421_v20, %s2686_s20 }
  0xa4   : > { %v1043_v26 = vpop.permute.xlu1 %1042  ;;  %v1038_v62 = vrot.slane %v1036_v52, 1 }
  0xa5   : > { %v917_v32 = vpop.permute.xlu0 %916 }
  0xa6   : > { %v1166_v42 = vsel %vm1162_vm5, %v1147_v31, %v917_v32  ;;  %v1039_v3 = vor.u32 %v1038_v62, %v1034_v61  ;;  %v2192_v31 = vld [vmem:[%s2726_s17 + $0x70] sm:$0xe]  ;;  %v2573_v32 = vld [vmem:[%s2726_s17 + $0x70] sm:$0x30]  ;;  %v2574_v61 = vld [vmem:[%s2726_s17 + $0x80] sm:$0x30] }
  0xa7   : > { %489 = vrot.lane.b32.xlu2 %v472_v25, %s2688_s22  ;;  %v1185_v45 = vsel %vm1181_vm6, %v1166_v42, %v1043_v26 }
  0xa8   : > { %1216 = vst [vmem:[#allocation1] sm:$0xff] %v1185_v45 }
  0xa9   : > { %v669_v49 = vpop.permute.xlu2 %668 }
  0xaa   : > { %678 = vrot.lane.b32.xlu1 %v661_v43, %s2687_s21 }
  0xab   : > { %552 = vrot.lane.b32.xlu0 %v2281_v46, %s2685_s19  ;;  %v2193_v46 = vor.u32 %v2573_v32, %v2192_v31 }
  0xac   : > { %v667_v57 = vpop.permute.xlu1 %666 }
  0xad   : > { %v541_v58 = vpop.permute.xlu0 %540 }
  0xae   : > { %v1092_v63 = vsel %vm1086_vm1, %v1067_v59, %v541_v58 }
  0xaf   : > { %741 = vrot.lane.b32.xlu2 %v2353_v51, %s2684_s18  ;;  %v1111_v2 = vsel %vm1105_vm2, %v1092_v63, %v667_v57  ;;  %v2969_v7 = vld [vmem:[#allocation1 + $0x1] ss:$9 sm:$0xff]  ;;  %v2974_v10 = vld [vmem:[#allocation1 + $0x3] ss:$9 sm:$0xff] }
  0xb0   : > { %v1130_v36 = vsel %vm1124_vm3, %v1111_v2, %v2913_v19  ;;  %v2971_v8 = vld [vmem:[#allocation1 + $0x2] ss:$9 sm:$0xff]  ;;  %v2976_v11 = vld [vmem:[#allocation1 + $0x4] ss:$9 sm:$0xff] }
  0xb1   : > { %v921_v1 = vpop.permute.xlu2 %920  ;;  %v2978_v13 = vld [vmem:[#allocation1 + $0x5] ss:$9 sm:$0xff]  ;;  %v2196_v57 = vld [vmem:[%s2726_s17 + $0x80] sm:$0xe] }
  0xb2   : > { %930 = vrot.lane.b32.xlu1 %v2425_v60, %s2686_s20 }
  0xb3   : > { %867 = vrot.lane.b32.xlu0 %v850_v0, %s2690_s24 }
  0xb4   : > { %v919_v4 = vpop.permute.xlu1 %918 }
  0xb5   : > { %v856_v5 = vpop.permute.xlu0 %855 }
  0xb6   : > { %v1149_v6 = vsel %vm1143_vm4, %v1130_v36, %v856_v5 }
  0xb7   : > { %1056 = vrot.lane.b32.xlu2 %v1039_v3, %s2689_s23  ;;  %v1168_v9 = vsel %vm1162_vm5, %v1149_v6, %v919_v4  ;;  %v2197_v3 = vor.u32 %v2574_v61, %v2196_v57 }
  0xb8   : > { %v1187_v19 = vsel %vm1181_vm6, %v1168_v9, %v2926_v22 }
  0xb9   : > { %v545_v14 = vpop.permute.xlu2 %544  ;;  %1227 = vst [vmem:[#allocation1] sm:$0xff] %v1187_v19 }
  0xbc   : > { %v543_v18 = vpop.permute.xlu1 %542 }
  0xbd   : > { %v480_v20 = vpop.permute.xlu0 %479 }
  0xbe   : > { %v1070_v21 = vsel %vm1058_vm0, %v2189_v17, %v480_v20 }
  0xbf   : > { %v1094_v39 = vsel %vm1086_vm1, %v1070_v21, %v543_v18 }
  0xc0   : > { %v1113_v26 = vsel %vm1105_vm2, %v1094_v39, %v669_v49  ;;  %v2991_v33 = vld [vmem:[#allocation1 + $0x1] ss:$9 sm:$0xff]  ;;  %v2996_v42 = vld [vmem:[#allocation1 + $0x3] ss:$9 sm:$0xff] }
  0xc1   : > { %v860_v23 = vpop.permute.xlu2 %859  ;;  %v2993_v34 = vld [vmem:[#allocation1 + $0x2] ss:$9 sm:$0xff]  ;;  %v2998_v43 = vld [vmem:[#allocation1 + $0x4] ss:$9 sm:$0xff] }
  0xc2   : > { %v3000_v12 = vld [vmem:[#allocation1 + $0x5] ss:$9 sm:$0xff] }
  0xc4   : > { %v858_v24 = vpop.permute.xlu1 %857 }
  0xc5   : > { %v732_v25 = vpop.permute.xlu0 %731 }
  0xc6   : > { %v1132_v22 = vsel %vm1124_vm3, %v1113_v26, %v732_v25  ;;  %v2200_v26 = vld [vmem:[%s2726_s17 + $0x90] sm:$0xe] }
  0xc7   : > { %v1151_v27 = vsel %vm1143_vm4, %v1132_v22, %v858_v24  ;;  %v2575_v22 = vld [vmem:[%s2726_s17 + $0x90] sm:$0x30] }
  0xc8   : > { %v1170_v35 = vsel %vm1162_vm5, %v1151_v27, %v921_v1 }
  0xc9   : > { %v484_v28 = vpop.permute.xlu2 %483 }
  0xca   : > { %v1076_v5 = vsel %vm1058_vm0, %v2197_v3, %v484_v28  ;;  %v2201_v28 = vor.u32 %v2575_v22, %v2200_v26 }
  0xcc   : > { %v482_v29 = vpop.permute.xlu1 %481 }
  0xcd   : > { %v1047_v37 = vpop.permute.xlu0 %1046  ;;  %v1073_v47 = vsel %vm1058_vm0, %v2193_v46, %v482_v29 }
  0xce   : > { %v1189_v45 = vsel %vm1181_vm6, %v1170_v35, %v1047_v37  ;;  %v1096_v51 = vsel %vm1086_vm1, %v1073_v47, %v545_v14 }
  0xcf   : > { %1238 = vst [vmem:[#allocation1] sm:$0xff] %v1189_v45 }
  0xd1   : > { %v736_v50 = vpop.permute.xlu2 %735 }
  0xd4   : > { %v734_v48 = vpop.permute.xlu1 %733 }
  0xd5   : > { %v671_v49 = vpop.permute.xlu0 %670 }
  0xd6   : > { %v1115_v52 = vsel %vm1105_vm2, %v1096_v51, %v671_v49  ;;  %v3009_v58 = vld [vmem:[#allocation1 + $0x1] ss:$9 sm:$0xff]  ;;  %v3015_v62 = vld [vmem:[#allocation1 + $0x3] ss:$9 sm:$0xff] }
  0xd7   : > { %v1134_v53 = vsel %vm1124_vm3, %v1115_v52, %v734_v48  ;;  %v3011_v59 = vld [vmem:[#allocation1 + $0x2] ss:$9 sm:$0xff]  ;;  %v3017_v63 = vld [vmem:[#allocation1 + $0x4] ss:$9 sm:$0xff] }
  0xd8   : > { %v1153_v55 = vsel %vm1143_vm4, %v1134_v53, %v860_v23  ;;  %v3019_v0 = vld [vmem:[#allocation1 + $0x5] ss:$9 sm:$0xff]  ;;  %v2204_v51 = vld [vmem:[%s2726_s17 + $0xa0] sm:$0xe] }
  0xd9   : > { %v1051_v2 = vpop.permute.xlu2 %1050  ;;  %v2576_v52 = vld [vmem:[%s2726_s17 + $0xa0] sm:$0x30] }
  0xdc   : > { %v1049_v54 = vpop.permute.xlu1 %1048 }
  0xdd   : > { %v923_v56 = vpop.permute.xlu0 %922 }
  0xde   : > { %v1172_v60 = vsel %vm1162_vm5, %v1153_v55, %v923_v56 }
  0xdf   : > { %v1191_v1 = vsel %vm1181_vm6, %v1172_v60, %v1049_v54 }
  0xe0   : > { %1249 = vst [vmem:[#allocation1] sm:$0xff] %v1191_v1 }
  0xe1   : > { %v675_v9 = vpop.permute.xlu2 %674 }
  0xe4   : > { %v673_v4 = vpop.permute.xlu1 %672 }
  0xe5   : > { %v547_v36 = vpop.permute.xlu0 %546 }
  0xe6   : > { %v1098_v6 = vsel %vm1086_vm1, %v1076_v5, %v547_v36 }
  0xe7   : > { %v1117_v19 = vsel %vm1105_vm2, %v1098_v6, %v673_v4  ;;  %v3027_v18 = vld [vmem:[#allocation1 + $0x1] ss:$9 sm:$0xff]  ;;  %v3032_v23 = vld [vmem:[#allocation1 + $0x3] ss:$9 sm:$0xff] }
  0xe8   : > { %v1136_v15 = vsel %vm1124_vm3, %v1117_v19, %v736_v50  ;;  %v3029_v20 = vld [vmem:[#allocation1 + $0x2] ss:$9 sm:$0xff]  ;;  %v3034_v39 = vld [vmem:[#allocation1 + $0x4] ss:$9 sm:$0xff] }
  0xe9   : > { %v3036_v24 = vld [vmem:[#allocation1 + $0x5] ss:$9 sm:$0xff]  ;;  %v927_v27 = vpop.permute.xlu2 %926 }
  0xec   : > { %v925_v14 = vpop.permute.xlu1 %924 }
  0xed   : > { %v862_v16 = vpop.permute.xlu0 %861 }
  0xee   : > { %v1155_v17 = vsel %vm1143_vm4, %v1136_v15, %v862_v16 }
  0xef   : > { %v1174_v21 = vsel %vm1162_vm5, %v1155_v17, %v925_v14 }
  0xf0   : > { %v1193_v25 = vsel %vm1181_vm6, %v1174_v21, %v1051_v2  ;;  %v2205_v2 = vor.u32 %v2576_v52, %v2204_v51  ;;  %v2208_v21 = vld [vmem:[%s2726_s17 + $0xb0] sm:$0xe] }
  0xf1   : > { %1260 = vst [vmem:[#allocation1] sm:$0xff] %v1193_v25  ;;  %v551_v46 = vpop.permute.xlu2 %550 }
  0xf4   : > { %v549_v29 = vpop.permute.xlu1 %548 }
  0xf5   : > { %v486_v31 = vpop.permute.xlu0 %485 }
  0xf6   : > { %v1079_v32 = vsel %vm1058_vm0, %v2201_v28, %v486_v31 }
  0xf7   : > { %v1100_v35 = vsel %vm1086_vm1, %v1079_v32, %v549_v29 }
  0xf8   : > { %v1119_v47 = vsel %vm1105_vm2, %v1100_v35, %v675_v9  ;;  %v3048_v53 = vld [vmem:[#allocation1 + $0x1] ss:$9 sm:$0xff]  ;;  %v3053_v57 = vld [vmem:[#allocation1 + $0x3] ss:$9 sm:$0xff] }
  0xf9   : > { %v3050_v54 = vld [vmem:[#allocation1 + $0x2] ss:$9 sm:$0xff]  ;;  %v3055_v60 = vld [vmem:[#allocation1 + $0x4] ss:$9 sm:$0xff]  ;;  %v866_v3 = vpop.permute.xlu2 %865 }
  0xfa   : > { %v3057_v61 = vld [vmem:[#allocation1 + $0x5] ss:$9 sm:$0xff] }
  0xfc   : > { %v864_v37 = vpop.permute.xlu1 %863 }
  0xfd   : > { %v738_v45 = vpop.permute.xlu0 %737 }
  0xfe   : > { %v1138_v48 = vsel %vm1124_vm3, %v1119_v47, %v738_v45 }
  0xff   : > { %v1157_v49 = vsel %vm1143_vm4, %v1138_v48, %v864_v37 }
 0x100   : > { %v1176_v55 = vsel %vm1162_vm5, %v1157_v49, %v927_v27  ;;  %v2577_v27 = vld [vmem:[%s2726_s17 + $0xb0] sm:$0x30] }
 0x101   : > { %v490_v19 = vpop.permute.xlu2 %489  ;;  %v2209_v35 = vor.u32 %v2577_v27, %v2208_v21  ;;  %v1313_v21 = vunpack.i.h.s16 %v2969_v7 }
 0x103   : > { %v1085_v47 = vsel %vm1058_vm0, %v2209_v35, %v490_v19  ;;  %v2644_v19 = vld [vmem:[%s3453_s1 + $0x18] sm:$0xff] }
 0x104   : > { %v488_v50 = vpop.permute.xlu1 %487  ;;  %1574 = vmatpush.bf16.msra.mxu0 %v2644_v19  ;;  %2645 = vmatpush.bf16.msra.mxu1 %v2644_v19 }
 0x105   : > { %v1053_v56 = vpop.permute.xlu0 %1052  ;;  %v1082_v4 = vsel %vm1058_vm0, %v2205_v2, %v488_v50  ;;  %v1304_v50 = vunpack.i.h.s16 %v2933_v30  ;;  %2646 = vmatpush.bf16.msra.mxu2 %v2644_v19  ;;  %2647 = vmatpush.bf16.msra.mxu3 %v2644_v19 }
 0x106   : > { %v1195_v1 = vsel %vm1181_vm6, %v1176_v55, %v1053_v56  ;;  %v1102_v6 = vsel %vm1086_vm1, %v1082_v4, %v551_v46 }
 0x107   : > { %1271 = vst [vmem:[#allocation1] sm:$0xff] %v1195_v1 }
 0x109   : > { %v742_v37 = vpop.permute.xlu2 %741 }
 0x10c   : > { %v740_v36 = vpop.permute.xlu1 %739 }
 0x10d   : > { %v677_v5 = vpop.permute.xlu0 %676 }
 0x10e   : > { %v1121_v9 = vsel %vm1105_vm2, %v1102_v6, %v677_v5  ;;  %v3066_v25 = vld [vmem:[#allocation1 + $0x1] ss:$9 sm:$0xff]  ;;  %v3072_v28 = vld [vmem:[#allocation1 + $0x3] ss:$9 sm:$0xff]  ;;  %v2462_v5 = vpack.i.b16 %v2941_v38, %v1304_v50  ;;  %v1331_v50 = vunpack.i.h.s16 %v3009_v58 }
 0x10f   : > { %v1140_v14 = vsel %vm1124_vm3, %v1121_v9, %v740_v36  ;;  %v3068_v26 = vld [vmem:[#allocation1 + $0x2] ss:$9 sm:$0xff]  ;;  %v3074_v29 = vld [vmem:[#allocation1 + $0x4] ss:$9 sm:$0xff] }
 0x110   : > { %v1159_v16 = vsel %vm1143_vm4, %v1140_v14, %v866_v3  ;;  %v3076_v31 = vld [vmem:[#allocation1 + $0x5] ss:$9 sm:$0xff]  ;;  %v1306_v14 = vunpack.i.h.s16 %v2941_v38 }
 0x111   : > { %v1057_v56 = vpop.permute.xlu2 %1056 }
 0x112   : > { %v2463_v38 = vpack.i.b16 %v2943_v40, %v1306_v14 }
 0x114   : > { %v1055_v15 = vpop.permute.xlu1 %1054 }
 0x115   : > { %v929_v17 = vpop.permute.xlu0 %928 }
 0x116   : > { %v1178_v22 = vsel %vm1162_vm5, %v1159_v16, %v929_v17  ;;  %v2643_v16 = vld [vmem:[%s3453_s1 + $0x10] sm:$0xff]  ;;  %v1310_v17 = vunpack.i.h.s16 %v2945_v41 }
 0x117   : > { %v1197_v32 = vsel %vm1181_vm6, %v1178_v22, %v1055_v15  ;;  %v1308_v15 = vunpack.i.h.s16 %v2943_v40  ;;  %1575 = vmatpush.bf16.msra.mxu0 %v2643_v16  ;;  %2648 = vmatpush.bf16.msra.mxu1 %v2643_v16  ;;  %v1312_v22 = vunpack.i.h.s16 %v2949_v44  ;;  %v2642_v40 = vld [vmem:[%s3453_s1 + $0x8] sm:$0xff] }
 0x118   : > { %1282 = vst [vmem:[#allocation1] sm:$0xff] %v1197_v32  ;;  %2649 = vmatpush.bf16.msra.mxu2 %v2643_v16  ;;  %2650 = vmatpush.bf16.msra.mxu3 %v2643_v16  ;;  %v2465_v35 = vpack.i.b16 %v2949_v44, %v1310_v17  ;;  %v1322_v44 = vunpack.i.h.s16 %v2991_v33  ;;  %v1330_v33 = vunpack.i.h.s16 %v3000_v12 }
 0x119   : > { %v1401_v7 = vpack.i.b16 %v1313_v21, %v1312_v22 }
 0x11b   : > { %1576 = vmatpush.bf16.msra.mxu0 %v2642_v40  ;;  %2651 = vmatpush.bf16.msra.mxu1 %v2642_v40 }
 0x11c   : > { %v679_v45 = vpop.permute.xlu1 %678  ;;  %2652 = vmatpush.bf16.msra.mxu2 %v2642_v40  ;;  %2653 = vmatpush.bf16.msra.mxu3 %v2642_v40 }
 0x11d   : > { %v553_v46 = vpop.permute.xlu0 %552 }
 0x11e   : > { %v1104_v48 = vsel %vm1086_vm1, %v1085_v47, %v553_v46  ;;  %v1324_v46 = vunpack.i.h.s16 %v2993_v34  ;;  %v1326_v47 = vunpack.i.h.s16 %v2996_v42 }
 0x11f   : > { %v1123_v49 = vsel %vm1105_vm2, %v1104_v48, %v679_v45  ;;  %v3085_v2 = vld [vmem:[#allocation1 + $0x1] ss:$9 sm:$0xff]  ;;  %v3089_v4 = vld [vmem:[#allocation1 + $0x3] ss:$9 sm:$0xff]  ;;  %v1328_v48 = vunpack.i.h.s16 %v2998_v43 }
 0x120   : > { %v1142_v52 = vsel %vm1124_vm3, %v1123_v49, %v742_v37  ;;  %v3087_v3 = vld [vmem:[#allocation1 + $0x2] ss:$9 sm:$0xff]  ;;  %v3093_v6 = vld [vmem:[#allocation1 + $0x4] ss:$9 sm:$0xff]  ;;  %v2466_v49 = vpack.i.b16 %v2993_v34, %v1322_v44  ;;  %v1342_v34 = vunpack.i.h.s16 %v3029_v20 }
 0x121   : > { %v3095_v30 = vld [vmem:[#allocation1 + $0x5] ss:$9 sm:$0xff] }
 0x124   : > { %v931_v51 = vpop.permute.xlu1 %930 }
 0x125   : > { %v868_v55 = vpop.permute.xlu0 %867 }
 0x126   : > { %v1161_v1 = vsel %vm1143_vm4, %v1142_v52, %v868_v55  ;;  %v2468_v52 = vpack.i.b16 %v2998_v43, %v1326_v47  ;;  %v2469_v55 = vpack.i.b16 %v3000_v12, %v1328_v48  ;;  %v1346_v43 = vunpack.i.h.s16 %v3034_v39 }
 0x127   : > { %v1180_v36 = vsel %vm1162_vm5, %v1161_v1, %v931_v51  ;;  %v2467_v51 = vpack.i.b16 %v2996_v42, %v1324_v46  ;;  %v1344_v42 = vunpack.i.h.s16 %v3032_v23  ;;  %v1349_v1 = vunpack.i.h.s16 %v3048_v53 }
 0x128   : > { %v1199_v9 = vsel %vm1181_vm6, %v1180_v36, %v1057_v56  ;;  %v1410_v56 = vpack.i.b16 %v1331_v50, %v1330_v33  ;;  %v2473_v36 = vpack.i.b16 %v3036_v24, %v1346_v43  ;;  %v1364_v53 = vunpack.i.h.s16 %v3074_v29  ;;  %v2522_v43 = vld [vmem:[%s3200_s11 + $0x68] sm:$0x3] }
 0x129   : > { %1293 = vst [vmem:[#allocation1] sm:$0xff] %v1199_v9 }
 0x12a   : > { %1439 = vst [vmem:[#allocation1] ss:$9 sm:$0xff] %v2462_v5  ;;  %v2477_v19 = vpack.i.b16 %v3076_v31, %v1364_v53 }
 0x12b   : > { %1457 = vst [vmem:[#allocation1 + $0x6] ss:$9 sm:$0xff] %v2974_v10  ;;  %v2464_v10 = vpack.i.b16 %v2945_v41, %v1308_v15  ;;  %v2641_v41 = vld [vmem:[%s3453_s1] sm:$0xff] }
 0x12c   : > { %1460 = vst [vmem:[#allocation1 + $0x7] ss:$9 sm:$0xff] %v2976_v11  ;;  %1577 = vmatpush.bf16.msra.mxu0 %v2641_v41  ;;  %2654 = vmatpush.bf16.msra.mxu1 %v2641_v41 }
 0x12d   : > { %2655 = vmatpush.bf16.msra.mxu2 %v2641_v41  ;;  %2656 = vmatpush.bf16.msra.mxu3 %v2641_v41 }
 0x130   : > { %v3113_v27 = vld [vmem:[#allocation1 + $0x1] ss:$9 sm:$0xff]  ;;  %v3117_v32 = vld [vmem:[#allocation1 + $0x3] ss:$9 sm:$0xff] }
 0x131   : > { %v3115_v11 = vld [vmem:[#allocation1 + $0x2] ss:$9 sm:$0xff]  ;;  %v3120_v37 = vld [vmem:[#allocation1 + $0x4] ss:$9 sm:$0xff]  ;;  %1442 = vst [vmem:[#allocation1 + $0x1] ss:$9 sm:$0xff] %v2463_v38 }
 0x132   : > { %v3122_v45 = vld [vmem:[#allocation1 + $0x5] ss:$9 sm:$0xff]  ;;  %1445 = vst [vmem:[#allocation1 + $0x2] ss:$9 sm:$0xff] %v2464_v10 }
 0x133   : > { %1448 = vst [vmem:[#allocation1 + $0x3] ss:$9 sm:$0xff] %v2465_v35 }
 0x134   : > { %1451 = vst [vmem:[#allocation1 + $0x4] ss:$9 sm:$0xff] %v1401_v7 }
 0x135   : > { %1454 = vst [vmem:[#allocation1 + $0x5] ss:$9 sm:$0xff] %v2971_v8 }
 0x13c   : > { %v1461_v8 = vld [vmem:[#allocation1] sm:$0xff] }
 0x13d   : > { %1463 = vst [vmem:[#allocation1] ss:$9 sm:$0xff] %v2978_v13  ;;  %2498 = vmatmul.msk.bf16.vlgmr.msra.gmra.mxu0 %vm1557_vm7, %v1461_v8  ;;  %v1340_v13 = vunpack.i.h.s16 %v3027_v18  ;;  %v2472_v18 = vpack.i.b16 %v3034_v39, %v1344_v42 }
 0x13e   : > { %1465 = vst [vmem:[#allocation1 + $0x1] ss:$9 sm:$0xff] %v2466_v49 }
 0x13f   : > { %1467 = vst [vmem:[#allocation1 + $0x2] ss:$9 sm:$0xff] %v2467_v51  ;;  %v2470_v12 = vpack.i.b16 %v3029_v20, %v1340_v13  ;;  %v1360_v20 = vunpack.i.h.s16 %v3068_v26 }
 0x140   : > { %1469 = vst [vmem:[#allocation1 + $0x3] ss:$9 sm:$0xff] %v2468_v52 }
 0x141   : > { %1471 = vst [vmem:[#allocation1 + $0x4] ss:$9 sm:$0xff] %v2469_v55 }
 0x142   : > { %1473 = vst [vmem:[#allocation1 + $0x5] ss:$9 sm:$0xff] %v1410_v56 }
 0x143   : > { %1475 = vst [vmem:[#allocation1 + $0x6] ss:$9 sm:$0xff] %v3011_v59  ;;  %v2471_v59 = vpack.i.b16 %v3032_v23, %v1342_v34 }
 0x144   : > { %1477 = vst [vmem:[#allocation1 + $0x7] ss:$9 sm:$0xff] %v3015_v62  ;;  %v1348_v62 = vunpack.i.h.s16 %v3036_v24  ;;  %v1367_v24 = vunpack.i.h.s16 %v3085_v2 }
 0x146   : > { %v1419_v5 = vpack.i.b16 %v1349_v1, %v1348_v62 }
 0x14b   : > { %v1478_v58 = vld [vmem:[#allocation1] sm:$0xff] }
 0x14c   : > { %1480 = vst [vmem:[#allocation1] ss:$9 sm:$0xff] %v3017_v63  ;;  %2499 = vmatmul.msk.bf16.vlgmr.msra.gmra.mxu1 %vm1557_vm7, %v1478_v58  ;;  %v1358_v63 = vunpack.i.h.s16 %v3066_v25  ;;  %v1366_v25 = vunpack.i.h.s16 %v3076_v31  ;;  %v1903_v58 = vsel %vm3206_vm11, 0, %v2522_v43 }
 0x14d   : > { %1482 = vst [vmem:[#allocation1 + $0x1] ss:$9 sm:$0xff] %v3019_v0  ;;  %v1362_v0 = vunpack.i.h.s16 %v3072_v28 }
 0x14e   : > { %1484 = vst [vmem:[#allocation1 + $0x2] ss:$9 sm:$0xff] %v2470_v12  ;;  %v2474_v39 = vpack.i.b16 %v3068_v26, %v1358_v63  ;;  %v1378_v26 = vunpack.i.h.s16 %v3115_v11 }
 0x14f   : > { %1486 = vst [vmem:[#allocation1 + $0x3] ss:$9 sm:$0xff] %v2471_v59  ;;  %v2476_v9 = vpack.i.b16 %v3074_v29, %v1362_v0 }
 0x150   : > { %1488 = vst [vmem:[#allocation1 + $0x4] ss:$9 sm:$0xff] %v2472_v18  ;;  %v2479_v31 = vpack.i.b16 %v3117_v32, %v1378_v26 }
 0x151   : > { %1490 = vst [vmem:[#allocation1 + $0x5] ss:$9 sm:$0xff] %v2473_v36 }
 0x152   : > { %1492 = vst [vmem:[#allocation1 + $0x6] ss:$9 sm:$0xff] %v1419_v5 }
 0x153   : > { %1494 = vst [vmem:[#allocation1 + $0x7] ss:$9 sm:$0xff] %v3050_v54  ;;  %v2475_v54 = vpack.i.b16 %v3072_v28, %v1360_v20  ;;  %v1380_v28 = vunpack.i.h.s16 %v3117_v32 }
 0x154   : > { %2523 = vst [vmem:[%s3200_s11 + $0x68] sm:$0x3] %v1903_v58 }
 0x155   : > { %v2480_v14 = vpack.i.b16 %v3120_v37, %v1380_v28 }
 0x15a   : > { %v1495_v23 = vld [vmem:[#allocation1] sm:$0xff] }
 0x15b   : > { %1497 = vst [vmem:[#allocation1] ss:$9 sm:$0xff] %v3053_v57  ;;  %v1428_v57 = vpack.i.b16 %v1367_v24, %v1366_v25  ;;  %v2541_v20 = vld [vmem:[%s3200_s11 + $0x68] sm:$0x1] }
 0x15c   : > { %1499 = vst [vmem:[#allocation1 + $0x1] ss:$9 sm:$0xff] %v3055_v60  ;;  %2500 = vmatmul.msk.bf16.gmra.mxu1 %vm1557_vm7, %v1495_v23  ;;  %v1376_v60 = vunpack.i.h.s16 %v3113_v27 }
 0x15d   : > { %1501 = vst [vmem:[#allocation1 + $0x2] ss:$9 sm:$0xff] %v3057_v61  ;;  %v1382_v61 = vunpack.i.h.s16 %v3120_v37 }
 0x15e   : > { %1503 = vst [vmem:[#allocation1 + $0x3] ss:$9 sm:$0xff] %v2474_v39  ;;  %v2478_v29 = vpack.i.b16 %v3115_v11, %v1376_v60  ;;  %v2524_v60 = vld [vmem:[%s3200_s11 + $0x74] sm:$0x3] }
 0x15f   : > { %1505 = vst [vmem:[#allocation1 + $0x4] ss:$9 sm:$0xff] %v2475_v54  ;;  %v2481_v15 = vpack.i.b16 %v3122_v45, %v1382_v61  ;;  %v1906_v26 = vsel %vm3206_vm11, 0, %v2524_v60 }
 0x160   : > { %1507 = vst [vmem:[#allocation1 + $0x5] ss:$9 sm:$0xff] %v2476_v9 }
 0x161   : > { %1509 = vst [vmem:[#allocation1 + $0x6] ss:$9 sm:$0xff] %v2477_v19 }
 0x162   : > { %1511 = vst [vmem:[#allocation1 + $0x7] ss:$9 sm:$0xff] %v1428_v57 }
 0x163   : > { %2525 = vst [vmem:[%s3200_s11 + $0x74] sm:$0x3] %v1906_v26 }
 0x169   : > { %v1512_v2 = vld [vmem:[#allocation1] sm:$0xff] }
 0x16a   : > { %1514 = vst [vmem:[#allocation1] ss:$9 sm:$0xff] %v3087_v3  ;;  %2501 = vmatmul.msk.bf16.vlgmr.msra.gmra.mxu2 %vm1557_vm7, %v1512_v2  ;;  %v1384_v3 = vunpack.i.h.s16 %v3122_v45 }
 0x16b   : > { %1516 = vst [vmem:[#allocation1 + $0x1] ss:$9 sm:$0xff] %v3089_v4 }
 0x16c   : > { %1518 = vst [vmem:[#allocation1 + $0x2] ss:$9 sm:$0xff] %v3093_v6  ;;  %v3192_v6 = vld [vmem:[%s3454_s2] ss:$0 sm:$0xff] }
 0x16d   : > { %1520 = vst [vmem:[#allocation1 + $0x3] ss:$9 sm:$0xff] %v3095_v30 }
 0x16e   : > { %1522 = vst [vmem:[#allocation1 + $0x4] ss:$9 sm:$0xff] %v2478_v29 }
 0x16f   : > { %1524 = vst [vmem:[#allocation1 + $0x5] ss:$9 sm:$0xff] %v2479_v31 }
 0x170   : > { %1526 = vst [vmem:[#allocation1 + $0x6] ss:$9 sm:$0xff] %v2480_v14 }
 0x171   : > { %1528 = vst [vmem:[#allocation1 + $0x7] ss:$9 sm:$0xff] %v2481_v15  ;;  %v2544_v15 = vld [vmem:[%s3200_s11 + $0x74] sm:$0x1] }
 0x178   : > { %v1529_v16 = vld [vmem:[#allocation1] sm:$0xff] }
 0x179   : > { %1531 = vst [vmem:[#allocation1] ss:$9 sm:$0xff] %v1384_v3  ;;  %2502 = vmatmul.msk.bf16.vlgmr.msra.gmra.mxu3 %vm1557_vm7, %v1529_v16 }
 0x180   : > { %v1532_v4 = vld [vmem:[#allocation1] sm:$0xff] }
 0x189   : > { %2503 = vmatmul.msk.bf16.gmra.mxu3 %vm1557_vm7, %v1532_v4  ;;  %v2526_v4 = vld [vmem:[%s3200_s11 + $0x80] sm:$0x3] }
 0x1ba   : > { %v1579_v30 = vpop.f32.mrf.mxu0 }
 0x1bb   : > { %v1580_v17 = vadd.f32 %v3192_v6, %v1579_v30 }
 0x1bd   : > { %v1608_v21 = vmul.f32 0.2, %v1580_v17 }
 0x1bf   : > { %v1619_v38 = vmax.f32 %v1580_v17, %v1608_v21  ;;  %v1909_v17 = vsel %vm3206_vm11, 0, %v2526_v4 }
 0x1c0   : > { %2527 = vst [vmem:[%s3200_s11 + $0x80] sm:$0x3] %v1909_v17 }
 0x1c1   : > { %v1641_v10 = vrot.slane %v1619_v38, 1  ;;  %v1642_v22 = vrot.slane %v1619_v38, 2  ;;  %v1643_v27 = vrot.slane %v1619_v38, 3  ;;  %1711 = vst [vmem:[#allocation1] ss:$9 sm:$0xff] %v1619_v38  ;;  %v1644_v11 = vrot.slane %v1619_v38, 4 }
 0x1c2   : > { %v1645_v32 = vrot.slane %v1619_v38, 5  ;;  %v1646_v35 = vrot.slane %v1619_v38, 6  ;;  %v1581_v37 = vpop.f32.mrf.mxu0  ;;  %v1647_v7 = vrot.slane %v1619_v38, 7 }
 0x1c3   : > { %1713 = vst [vmem:[#allocation1 + $0x1] ss:$9 sm:$0xff] %v1641_v10  ;;  %v1582_v45 = vadd.f32 %v3192_v6, %v1581_v37 }
 0x1c4   : > { %1715 = vst [vmem:[#allocation1 + $0x2] ss:$9 sm:$0xff] %v1642_v22 }
 0x1c5   : > { %1717 = vst [vmem:[#allocation1 + $0x3] ss:$9 sm:$0xff] %v1643_v27  ;;  %v1609_v40 = vmul.f32 0.2, %v1582_v45 }
 0x1c6   : > { %1719 = vst [vmem:[#allocation1 + $0x4] ss:$9 sm:$0xff] %v1644_v11 }
 0x1c7   : > { %1721 = vst [vmem:[#allocation1 + $0x5] ss:$9 sm:$0xff] %v1645_v32  ;;  %v1620_v41 = vmax.f32 %v1582_v45, %v1609_v40 }
 0x1c8   : > { %1723 = vst [vmem:[#allocation1 + $0x6] ss:$9 sm:$0xff] %v1646_v35 }
 0x1c9   : > { %1725 = vst [vmem:[#allocation1 + $0x7] ss:$9 sm:$0xff] %v1647_v7  ;;  %v1584_v47 = vpop.f32.mrf.mxu1  ;;  %v1648_v49 = vrot.slane %v1620_v41, 1  ;;  %v1654_v50 = vrot.slane %v1620_v41, 7  ;;  %v1649_v51 = vrot.slane %v1620_v41, 2  ;;  %v1650_v33 = vrot.slane %v1620_v41, 3 }
 0x1ca   : > { %v1585_v48 = vadd.f32 %v3192_v6, %v1584_v47  ;;  %v1651_v55 = vrot.slane %v1620_v41, 4  ;;  %v1652_v56 = vrot.slane %v1620_v41, 5  ;;  %v1653_v13 = vrot.slane %v1620_v41, 6  ;;  %v2547_v7 = vld [vmem:[%s3200_s11 + $0x80] sm:$0x1] }
 0x1cc   : > { %v1610_v52 = vmul.f32 0.2, %v1585_v48 }
 0x1ce   : > { %v1621_v34 = vmax.f32 %v1585_v48, %v1610_v52 }
 0x1d0   : > { %v1726_v44 = vld [vmem:[#allocation1] sm:$0xff]  ;;  %v1655_v12 = vrot.slane %v1621_v34, 1  ;;  %v1656_v0 = vrot.slane %v1621_v34, 2  ;;  %v1657_v53 = vrot.slane %v1621_v34, 3  ;;  %v1658_v24 = vrot.slane %v1621_v34, 4 }
 0x1d1   : > { %v1835_v46 = vpack.c.bf16 %v1726_v44, %v1726_v44  ;;  %1727 = vst [vmem:[#allocation1] ss:$9 sm:$0xff] %v1620_v41  ;;  %v1586_v1 = vpop.f32.mrf.mxu1  ;;  %v1659_v54 = vrot.slane %v1621_v34, 5  ;;  %v1660_v9 = vrot.slane %v1621_v34, 6  ;;  %v1661_v19 = vrot.slane %v1621_v34, 7 }
 0x1d2   : > { %v1587_v18 = vadd.f32 %v3192_v6, %v1586_v1  ;;  %v2528_v44 = vld [vmem:[%s3200_s11 + $0x8c] sm:$0x3] }
 0x1d3   : > { %2540 = vst.msk [vmem:[%s3200_s11 + $0x64] sm:$0xf] %vm1853_vm8, %v1835_v46  ;;  %v1912_v48 = vsel %vm3206_vm11, 0, %v2528_v44 }
 0x1d4   : > { %v1611_v5 = vmul.f32 0.2, %v1587_v18  ;;  %2529 = vst [vmem:[%s3200_s11 + $0x8c] sm:$0x3] %v1912_v48  ;;  %v2536_v48 = vld [vmem:[%s3200_s11 + $0xbc] sm:$0x3] }
 0x1d6   : > { %v1622_v25 = vmax.f32 %v1587_v18, %v1611_v5 }
 0x1d8   : > { %v1728_v8 = vld [vmem:[#allocation1] sm:$0xff]  ;;  %v1662_v57 = vrot.slane %v1622_v25, 1  ;;  %v1663_v61 = vrot.slane %v1622_v25, 2  ;;  %v1664_v30 = vrot.slane %v1622_v25, 3  ;;  %v1665_v21 = vrot.slane %v1622_v25, 4 }
 0x1d9   : > { %1729 = vst [vmem:[#allocation1] ss:$9 sm:$0xff] %v1648_v49  ;;  %v1836_v36 = vpack.c.bf16 %v1728_v8, %v1728_v8  ;;  %v1589_v2 = vpop.f32.mrf.mxu1  ;;  %v1666_v10 = vrot.slane %v1622_v25, 5  ;;  %v1667_v27 = vrot.slane %v1622_v25, 6  ;;  %v1668_v11 = vrot.slane %v1622_v25, 7 }
 0x1da   : > { %1735 = vst [vmem:[#allocation1 + $0x6] ss:$9 sm:$0xff] %v1654_v50  ;;  %v1590_v14 = vadd.f32 %v3192_v6, %v1589_v2 }
 0x1db   : > { %1730 = vst [vmem:[#allocation1 + $0x1] ss:$9 sm:$0xff] %v1649_v51  ;;  %v1934_v23 = vsel %vm3217_vm14, %v1836_v36, %v2541_v20  ;;  %v2550_v58 = vld [vmem:[%s3200_s11 + $0x8c] sm:$0x1] }
 0x1dc   : > { %1731 = vst [vmem:[#allocation1 + $0x2] ss:$9 sm:$0xff] %v1650_v33  ;;  %v1612_v16 = vmul.f32 0.2, %v1590_v14 }
 0x1dd   : > { %1732 = vst [vmem:[#allocation1 + $0x3] ss:$9 sm:$0xff] %v1651_v55 }
 0x1de   : > { %1733 = vst [vmem:[#allocation1 + $0x4] ss:$9 sm:$0xff] %v1652_v56  ;;  %v1623_v22 = vmax.f32 %v1590_v14, %v1612_v16 }
 0x1df   : > { %1734 = vst [vmem:[#allocation1 + $0x5] ss:$9 sm:$0xff] %v1653_v13 }
 0x1e0   : > { %1736 = vst [vmem:[#allocation1 + $0x7] ss:$9 sm:$0xff] %v1621_v34  ;;  %v1669_v35 = vrot.slane %v1623_v22, 1  ;;  %v1670_v37 = vrot.slane %v1623_v22, 2  ;;  %v1671_v41 = vrot.slane %v1623_v22, 3  ;;  %v1672_v51 = vrot.slane %v1623_v22, 4 }
 0x1e1   : > { %2542 = vst [vmem:[%s3200_s11 + $0x68] sm:$0x1] %v1934_v23  ;;  %v1591_v40 = vpop.f32.mrf.mxu1  ;;  %v1673_v33 = vrot.slane %v1623_v22, 5  ;;  %v1674_v56 = vrot.slane %v1623_v22, 6  ;;  %v1675_v13 = vrot.slane %v1623_v22, 7 }
 0x1e2   : > { %v1592_v47 = vadd.f32 %v3192_v6, %v1591_v40 }
 0x1e4   : > { %v1613_v8 = vmul.f32 0.2, %v1592_v47 }
 0x1e6   : > { %v1624_v55 = vmax.f32 %v1592_v47, %v1613_v8 }
 0x1e7   : > { %v1737_v59 = vld [vmem:[#allocation1] sm:$0xff] }
 0x1e8   : > { %1738 = vst [vmem:[#allocation1] ss:$9 sm:$0xff] %v1655_v12  ;;  %v1837_v62 = vpack.c.bf16 %v1737_v59, %v1737_v59  ;;  %v1676_v43 = vrot.slane %v1624_v55, 1  ;;  %v1677_v12 = vrot.slane %v1624_v55, 2  ;;  %v1678_v59 = vrot.slane %v1624_v55, 3 }
 0x1e9   : > { %v1679_v23 = vrot.slane %v1624_v55, 4  ;;  %v1682_v60 = vrot.slane %v1624_v55, 7 }
 0x1ea   : > { %2543 = vst.msk [vmem:[%s3200_s11 + $0x70] sm:$0xf] %vm1853_vm8, %v1837_v62  ;;  %v2530_v62 = vld [vmem:[%s3200_s11 + $0x98] sm:$0x3] }
 0x1eb   : > { %v1915_v36 = vsel %vm3206_vm11, 0, %v2530_v62 }
 0x1ec   : > { %2531 = vst [vmem:[%s3200_s11 + $0x98] sm:$0x3] %v1915_v36 }
 0x1ed   : > { %v1594_v5 = vpop.f32.mrf.mxu2 }
 0x1ef   : > { %v1739_v39 = vld [vmem:[#allocation1] sm:$0xff] }
 0x1f0   : > { %1740 = vst [vmem:[#allocation1] ss:$9 sm:$0xff] %v1656_v0  ;;  %v1838_v28 = vpack.c.bf16 %v1739_v39, %v1739_v39  ;;  %v1595_v0 = vadd.f32 %v3192_v6, %v1594_v5 }
 0x1f1   : > { %1741 = vst [vmem:[#allocation1 + $0x1] ss:$9 sm:$0xff] %v1657_v53 }
 0x1f2   : > { %1742 = vst [vmem:[#allocation1 + $0x2] ss:$9 sm:$0xff] %v1658_v24  ;;  %v1938_v3 = vsel %vm3217_vm14, %v1838_v28, %v2544_v15  ;;  %v1614_v24 = vmul.f32 0.2, %v1595_v0  ;;  %v2532_v28 = vld [vmem:[%s3200_s11 + $0xa4] sm:$0x3] }
 0x1f3   : > { %1743 = vst [vmem:[#allocation1 + $0x3] ss:$9 sm:$0xff] %v1659_v54  ;;  %v1918_v15 = vsel %vm3206_vm11, 0, %v2532_v28 }
 0x1f4   : > { %1744 = vst [vmem:[#allocation1 + $0x4] ss:$9 sm:$0xff] %v1660_v9  ;;  %v1680_v9 = vrot.slane %v1624_v55, 5 }
 0x1f5   : > { %1745 = vst [vmem:[#allocation1 + $0x5] ss:$9 sm:$0xff] %v1661_v19  ;;  %v1681_v19 = vrot.slane %v1624_v55, 6  ;;  %v1596_v16 = vpop.f32.mrf.mxu2 }
 0x1f6   : > { %1746 = vst [vmem:[#allocation1 + $0x6] ss:$9 sm:$0xff] %v1622_v25  ;;  %v1625_v25 = vmax.f32 %v1595_v0, %v1614_v24  ;;  %v1597_v4 = vadd.f32 %v3192_v6, %v1596_v16 }
 0x1f7   : > { %1747 = vst [vmem:[#allocation1 + $0x7] ss:$9 sm:$0xff] %v1662_v57 }
 0x1f8   : > { %2545 = vst [vmem:[%s3200_s11 + $0x74] sm:$0x1] %v1938_v3  ;;  %v1683_v26 = vrot.slane %v1625_v25, 1  ;;  %v1686_v14 = vrot.slane %v1625_v25, 4 }
 0x1f9   : > { %2533 = vst [vmem:[%s3200_s11 + $0xa4] sm:$0x3] %v1918_v15 }
 0x1fc   : > { %v3251_v50 = vpop.f32.mrf.mxu3 }
 0x1fd   : > { %v1600_v8 = vadd.f32 %v3192_v6, %v3251_v50 }
 0x1fe   : > { %v1748_v29 = vld [vmem:[#allocation1] sm:$0xff] }
 0x1ff   : > { %1749 = vst [vmem:[#allocation1] ss:$9 sm:$0xff] %v1663_v61  ;;  %v1839_v31 = vpack.c.bf16 %v1748_v29, %v1748_v29  ;;  %v1684_v61 = vrot.slane %v1625_v25, 2  ;;  %v2553_v29 = vld [vmem:[%s3200_s11 + $0x98] sm:$0x1] }
 0x200   : > { %v2556_v40 = vld [vmem:[%s3200_s11 + $0xa4] sm:$0x1] }
 0x201   : > { %2546 = vst.msk [vmem:[%s3200_s11 + $0x7c] sm:$0xf] %vm1853_vm8, %v1839_v31  ;;  %v1685_v31 = vrot.slane %v1625_v25, 3 }
 0x204   : > { %v3254_v1 = vpop.f32.mrf.mxu3 }
 0x205   : > { %v1602_v0 = vadd.f32 %v3192_v6, %v3254_v1 }
 0x206   : > { %v1750_v38 = vld [vmem:[#allocation1] sm:$0xff] }
 0x207   : > { %1751 = vst [vmem:[#allocation1] ss:$9 sm:$0xff] %v1664_v30  ;;  %v1840_v32 = vpack.c.bf16 %v1750_v38, %v1750_v38  ;;  %v1687_v30 = vrot.slane %v1625_v25, 5  ;;  %v2534_v38 = vld [vmem:[%s3200_s11 + $0xb0] sm:$0x3] }
 0x208   : > { %1752 = vst [vmem:[#allocation1 + $0x1] ss:$9 sm:$0xff] %v1665_v21 }
 0x209   : > { %1753 = vst [vmem:[#allocation1 + $0x2] ss:$9 sm:$0xff] %v1666_v10  ;;  %v1942_v45 = vsel %vm3217_vm14, %v1840_v32, %v2547_v7  ;;  %v1615_v10 = vmul.f32 0.2, %v1597_v4  ;;  %v1689_v32 = vrot.slane %v1625_v25, 7 }
 0x20a   : > { %1754 = vst [vmem:[#allocation1 + $0x3] ss:$9 sm:$0xff] %v1667_v27 }
 0x20b   : > { %1755 = vst [vmem:[#allocation1 + $0x4] ss:$9 sm:$0xff] %v1668_v11  ;;  %v1626_v27 = vmax.f32 %v1597_v4, %v1615_v10  ;;  %v1688_v11 = vrot.slane %v1625_v25, 6 }
 0x20c   : > { %1756 = vst [vmem:[#allocation1 + $0x5] ss:$9 sm:$0xff] %v1623_v22  ;;  %v3263_v20 = vpop.f32.mrf.mxu3  ;;  %v1921_v22 = vsel %vm3206_vm11, 0, %v2534_v38 }
 0x20d   : > { %1757 = vst [vmem:[#allocation1 + $0x6] ss:$9 sm:$0xff] %v1669_v35  ;;  %v1693_v44 = vrot.slane %v1626_v27, 4  ;;  %v1696_v50 = vrot.slane %v1626_v27, 7  ;;  %v1605_v15 = vadd.f32 %v3192_v6, %v3263_v20 }
 0x20e   : > { %1758 = vst [vmem:[#allocation1 + $0x7] ss:$9 sm:$0xff] %v1670_v37  ;;  %v1690_v37 = vrot.slane %v1626_v27, 1 }
 0x20f   : > { %2548 = vst [vmem:[%s3200_s11 + $0x80] sm:$0x1] %v1942_v45  ;;  %v1691_v45 = vrot.slane %v1626_v27, 2  ;;  %v1618_v16 = vmul.f32 0.2, %v1605_v15 }
 0x210   : > { %2535 = vst [vmem:[%s3200_s11 + $0xb0] sm:$0x3] %v1921_v22 }
 0x211   : > { %v1629_v4 = vmax.f32 %v1605_v15, %v1618_v16 }
 0x214   : > { %v1606_v54 = vpop.f32.mrf.mxu3 }
 0x215   : > { %v1759_v46 = vld [vmem:[#allocation1] sm:$0xff] }
 0x216   : > { %1760 = vst [vmem:[#allocation1] ss:$9 sm:$0xff] %v1671_v41  ;;  %v1841_v49 = vpack.c.bf16 %v1759_v46, %v1759_v46  ;;  %v1692_v41 = vrot.slane %v1626_v27, 3  ;;  %v1694_v46 = vrot.slane %v1626_v27, 5 }
 0x217   : > { %v2559_v1 = vld [vmem:[%s3200_s11 + $0xb0] sm:$0x1] }
 0x218   : > { %2549 = vst.msk [vmem:[%s3200_s11 + $0x88] sm:$0xf] %vm1853_vm8, %v1841_v49  ;;  %v1924_v49 = vsel %vm3206_vm11, 0, %v2536_v48 }
 0x219   : > { %2537 = vst [vmem:[%s3200_s11 + $0xbc] sm:$0x3] %v1924_v49 }
 0x21d   : > { %v1761_v52 = vld [vmem:[#allocation1] sm:$0xff] }
 0x21e   : > { %1762 = vst [vmem:[#allocation1] ss:$9 sm:$0xff] %v1672_v51  ;;  %v1842_v34 = vpack.c.bf16 %v1761_v52, %v1761_v52  ;;  %v1695_v51 = vrot.slane %v1626_v27, 6 }
 0x21f   : > { %1763 = vst [vmem:[#allocation1 + $0x1] ss:$9 sm:$0xff] %v1673_v33 }
 0x220   : > { %1764 = vst [vmem:[#allocation1 + $0x2] ss:$9 sm:$0xff] %v1674_v56  ;;  %v1946_v18 = vsel %vm3217_vm14, %v1842_v34, %v2550_v58  ;;  %v2691_v56 = vmov 0   ;;  %v2562_v54 = vld [vmem:[%s3200_s11 + $0xbc] sm:$0x1] }
 0x221   : > { %1765 = vst [vmem:[#allocation1 + $0x3] ss:$9 sm:$0xff] %v1675_v13 }
 0x222   : > { %1766 = vst [vmem:[#allocation1 + $0x4] ss:$9 sm:$0xff] %v1624_v55  ;;  %v1616_v55 = vmul.f32 0.2, %v1600_v8 }
 0x223   : > { %1767 = vst [vmem:[#allocation1 + $0x5] ss:$9 sm:$0xff] %v1676_v43 }
 0x224   : > { %1768 = vst [vmem:[#allocation1 + $0x6] ss:$9 sm:$0xff] %v1677_v12  ;;  %v1627_v13 = vmax.f32 %v1600_v8, %v1616_v55 }
 0x225   : > { %1769 = vst [vmem:[#allocation1 + $0x7] ss:$9 sm:$0xff] %v1678_v59 }
 0x226   : > { %2551 = vst [vmem:[%s3200_s11 + $0x8c] sm:$0x1] %v1946_v18  ;;  %v1697_v43 = vrot.slane %v1627_v13, 1  ;;  %v1698_v58 = vrot.slane %v1627_v13, 2  ;;  %v1699_v12 = vrot.slane %v1627_v13, 3  ;;  %v1700_v59 = vrot.slane %v1627_v13, 4 }
 0x227   : > { %1854 = vst.msk [vmem:[%s3200_s11] sm:$0xf] %vm1853_vm8, %v2691_v56  ;;  %v1701_v62 = vrot.slane %v1627_v13, 5  ;;  %v1702_v18 = vrot.slane %v1627_v13, 6  ;;  %v1703_v36 = vrot.slane %v1627_v13, 7 }
 0x228   : > { %1855 = vst.msk [vmem:[%s3200_s11 + $0x4] sm:$0xf] %vm1853_vm8, %v2691_v56 }
 0x229   : > { %1857 = vst.msk [vmem:[%s3200_s11 + $0x8] sm:$0x3] %vm1856_vm9, %v2691_v56 }
 0x22a   : > { %1858 = vst.msk [vmem:[%s3200_s11 + $0xc] sm:$0xf] %vm1853_vm8, %v2691_v56 }
 0x22b   : > { %1859 = vst.msk [vmem:[%s3200_s11 + $0x10] sm:$0xf] %vm1853_vm8, %v2691_v56 }
 0x22c   : > { %v1770_v53 = vld [vmem:[#allocation1] sm:$0xff]  ;;  %1860 = vst.msk [vmem:[%s3200_s11 + $0x14] sm:$0x3] %vm1856_vm9, %v2691_v56 }
 0x22d   : > { %1771 = vst [vmem:[#allocation1] ss:$9 sm:$0xff] %v1679_v23  ;;  %v1843_v39 = vpack.c.bf16 %v1770_v53, %v1770_v53 }
 0x22e   : > { %1861 = vst.msk [vmem:[%s3200_s11 + $0x18] sm:$0xf] %vm1853_vm8, %v2691_v56 }
 0x22f   : > { %2552 = vst.msk [vmem:[%s3200_s11 + $0x94] sm:$0xf] %vm1853_vm8, %v1843_v39  ;;  %v1617_v39 = vmul.f32 0.2, %v1602_v0 }
 0x230   : > { %1862 = vst.msk [vmem:[%s3200_s11 + $0x1c] sm:$0xf] %vm1853_vm8, %v2691_v56 }
 0x231   : > { %1863 = vst.msk [vmem:[%s3200_s11 + $0x20] sm:$0x3] %vm1856_vm9, %v2691_v56 }
 0x232   : > { %1864 = vst.msk [vmem:[%s3200_s11 + $0x24] sm:$0xf] %vm1853_vm8, %v2691_v56 }
 0x233   : > { %1865 = vst.msk [vmem:[%s3200_s11 + $0x28] sm:$0xf] %vm1853_vm8, %v2691_v56 }
 0x234   : > { %v1772_v57 = vld [vmem:[#allocation1] sm:$0xff]  ;;  %1866 = vst.msk [vmem:[%s3200_s11 + $0x2c] sm:$0x3] %vm1856_vm9, %v2691_v56 }
 0x235   : > { %1773 = vst [vmem:[#allocation1] ss:$9 sm:$0xff] %v1680_v9  ;;  %v1844_v2 = vpack.c.bf16 %v1772_v57, %v1772_v57 }
 0x236   : > { %1774 = vst [vmem:[#allocation1 + $0x1] ss:$9 sm:$0xff] %v1681_v19  ;;  %v1628_v19 = vmax.f32 %v1602_v0, %v1617_v39 }
 0x237   : > { %1775 = vst [vmem:[#allocation1 + $0x2] ss:$9 sm:$0xff] %v1682_v60  ;;  %v1950_v3 = vsel %vm3217_vm14, %v1844_v2, %v2553_v29 }
 0x238   : > { %1776 = vst [vmem:[#allocation1 + $0x3] ss:$9 sm:$0xff] %v1625_v25  ;;  %v1704_v60 = vrot.slane %v1628_v19, 1  ;;  %v1706_v2 = vrot.slane %v1628_v19, 3  ;;  %v1707_v28 = vrot.slane %v1628_v19, 4  ;;  %v1708_v29 = vrot.slane %v1628_v19, 5 }
 0x239   : > { %1777 = vst [vmem:[#allocation1 + $0x4] ss:$9 sm:$0xff] %v1683_v26  ;;  %v1705_v26 = vrot.slane %v1628_v19, 2 }
 0x23a   : > { %1778 = vst [vmem:[#allocation1 + $0x5] ss:$9 sm:$0xff] %v1684_v61  ;;  %v2538_v61 = vld [vmem:[%s3200_s11 + $0xc8] sm:$0x3] }
 0x23b   : > { %1779 = vst [vmem:[#allocation1 + $0x6] ss:$9 sm:$0xff] %v1685_v31  ;;  %v1709_v31 = vrot.slane %v1628_v19, 6 }
 0x23c   : > { %1780 = vst [vmem:[#allocation1 + $0x7] ss:$9 sm:$0xff] %v1686_v14  ;;  %v1710_v14 = vrot.slane %v1628_v19, 7 }
 0x23d   : > { %2554 = vst [vmem:[%s3200_s11 + $0x98] sm:$0x1] %v1950_v3  ;;  %v1927_v3 = vsel %vm3206_vm11, 0, %v2538_v61 }
 0x23e   : > { %1867 = vst.msk [vmem:[%s3200_s11 + $0x30] sm:$0xf] %vm1853_vm8, %v2691_v56 }
 0x23f   : > { %1868 = vst.msk [vmem:[%s3200_s11 + $0x34] sm:$0xf] %vm1853_vm8, %v2691_v56 }
 0x240   : > { %1869 = vst.msk [vmem:[%s3200_s11 + $0x38] sm:$0x3] %vm1856_vm9, %v2691_v56 }
 0x241   : > { %1870 = vst.msk [vmem:[%s3200_s11 + $0x3c] sm:$0xf] %vm1853_vm8, %v2691_v56 }
 0x242   : > { %1871 = vst.msk [vmem:[%s3200_s11 + $0x40] sm:$0xf] %vm1853_vm8, %v2691_v56 }
 0x243   : > { %v1781_v17 = vld [vmem:[#allocation1] sm:$0xff]  ;;  %1872 = vst.msk [vmem:[%s3200_s11 + $0x44] sm:$0x3] %vm1856_vm9, %v2691_v56 }
 0x244   : > { %1782 = vst [vmem:[#allocation1] ss:$9 sm:$0xff] %v1687_v30  ;;  %v1845_v21 = vpack.c.bf16 %v1781_v17, %v1781_v17 }
 0x245   : > { %1873 = vst.msk [vmem:[%s3200_s11 + $0x48] sm:$0xf] %vm1853_vm8, %v2691_v56 }
 0x246   : > { %2555 = vst.msk [vmem:[%s3200_s11 + $0xa0] sm:$0xf] %vm1853_vm8, %v1845_v21 }
 0x247   : > { %1874 = vst.msk [vmem:[%s3200_s11 + $0x4c] sm:$0xf] %vm1853_vm8, %v2691_v56 }
 0x248   : > { %1875 = vst.msk [vmem:[%s3200_s11 + $0x50] sm:$0x3] %vm1856_vm9, %v2691_v56 }
 0x249   : > { %1876 = vst.msk [vmem:[%s3200_s11 + $0x54] sm:$0xf] %vm1853_vm8, %v2691_v56 }
 0x24a   : > { %1877 = vst.msk [vmem:[%s3200_s11 + $0x58] sm:$0xf] %vm1853_vm8, %v2691_v56 }
 0x24b   : > { %v1783_v35 = vld [vmem:[#allocation1] sm:$0xff]  ;;  %1878 = vst.msk [vmem:[%s3200_s11 + $0x5c] sm:$0x3] %vm1856_vm9, %v2691_v56 }
 0x24c   : > { %1784 = vst [vmem:[#allocation1] ss:$9 sm:$0xff] %v1688_v11  ;;  %v1846_v7 = vpack.c.bf16 %v1783_v35, %v1783_v35 }
 0x24d   : > { %1785 = vst [vmem:[#allocation1 + $0x1] ss:$9 sm:$0xff] %v1689_v32 }
 0x24e   : > { %1786 = vst [vmem:[#allocation1 + $0x2] ss:$9 sm:$0xff] %v1626_v27  ;;  %v1954_v47 = vsel %vm3217_vm14, %v1846_v7, %v2556_v40 }
 0x24f   : > { %1787 = vst [vmem:[#allocation1 + $0x3] ss:$9 sm:$0xff] %v1690_v37 }
 0x250   : > { %1788 = vst [vmem:[#allocation1 + $0x4] ss:$9 sm:$0xff] %v1691_v45 }
 0x251   : > { %1789 = vst [vmem:[#allocation1 + $0x5] ss:$9 sm:$0xff] %v1692_v41 }
 0x252   : > { %1790 = vst [vmem:[#allocation1 + $0x6] ss:$9 sm:$0xff] %v1693_v44 }
 0x253   : > { %1791 = vst [vmem:[#allocation1 + $0x7] ss:$9 sm:$0xff] %v1694_v46 }
 0x254   : > { %2557 = vst [vmem:[%s3200_s11 + $0xa4] sm:$0x1] %v1954_v47 }
 0x255   : > { %2504 = vst.msk [vmem:[%s3200_s11 + $0xcc] sm:$0xf] %vm1853_vm8, %v2691_v56 }
 0x256   : > { %2505 = vst.msk [vmem:[%s3200_s11 + $0xd0] sm:$0xf] %vm1853_vm8, %v2691_v56 }
 0x257   : > { %2506 = vst.msk [vmem:[%s3200_s11 + $0xd4] sm:$0x3] %vm1856_vm9, %v2691_v56 }
 0x258   : > { %2507 = vst.msk [vmem:[%s3200_s11 + $0xd8] sm:$0xf] %vm1853_vm8, %v2691_v56 }
 0x259   : > { %2508 = vst.msk [vmem:[%s3200_s11 + $0xdc] sm:$0xf] %vm1853_vm8, %v2691_v56 }
 0x25a   : > { %v1792_v33 = vld [vmem:[#allocation1] sm:$0xff]  ;;  %2509 = vst.msk [vmem:[%s3200_s11 + $0xe0] sm:$0x3] %vm1856_vm9, %v2691_v56 }
 0x25b   : > { %1793 = vst [vmem:[#allocation1] ss:$9 sm:$0xff] %v1695_v51  ;;  %v1847_v52 = vpack.c.bf16 %v1792_v33, %v1792_v33 }
 0x25c   : > { %2510 = vst.msk [vmem:[%s3200_s11 + $0xe4] sm:$0xf] %vm1853_vm8, %v2691_v56 }
 0x25d   : > { %2558 = vst.msk [vmem:[%s3200_s11 + $0xac] sm:$0xf] %vm1853_vm8, %v1847_v52 }
 0x25e   : > { %2511 = vst.msk [vmem:[%s3200_s11 + $0xe8] sm:$0xf] %vm1853_vm8, %v2691_v56 }
 0x25f   : > { %2512 = vst.msk [vmem:[%s3200_s11 + $0xec] sm:$0x3] %vm1856_vm9, %v2691_v56 }
 0x260   : > { %2513 = vst.msk [vmem:[%s3200_s11 + $0x60] sm:$0xf] %vm1853_vm8, %v2691_v56 }
 0x261   : > { %2514 = vst.msk [vmem:[%s3200_s11 + $0x6c] sm:$0xf] %vm1853_vm8, %v2691_v56 }
 0x262   : > { %v3310_v34 = vld [vmem:[#allocation1] sm:$0xff]  ;;  %2515 = vst.msk [vmem:[%s3200_s11 + $0x78] sm:$0xf] %vm1853_vm8, %v2691_v56 }
 0x263   : > { %1795 = vst [vmem:[#allocation1] ss:$9 sm:$0xff] %v1696_v50  ;;  %v1848_v53 = vpack.c.bf16 %v3310_v34, %v3310_v34 }
 0x264   : > { %1796 = vst [vmem:[#allocation1 + $0x1] ss:$9 sm:$0xff] %v1627_v13 }
 0x265   : > { %1797 = vst [vmem:[#allocation1 + $0x2] ss:$9 sm:$0xff] %v1697_v43  ;;  %v1958_v9 = vsel %vm3217_vm14, %v1848_v53, %v2559_v1 }
 0x266   : > { %1798 = vst [vmem:[#allocation1 + $0x3] ss:$9 sm:$0xff] %v1698_v58 }
 0x267   : > { %1799 = vst [vmem:[#allocation1 + $0x4] ss:$9 sm:$0xff] %v1699_v12 }
 0x268   : > { %1800 = vst [vmem:[#allocation1 + $0x5] ss:$9 sm:$0xff] %v1700_v59 }
 0x269   : > { %1801 = vst [vmem:[#allocation1 + $0x6] ss:$9 sm:$0xff] %v1701_v62 }
 0x26a   : > { %1802 = vst [vmem:[#allocation1 + $0x7] ss:$9 sm:$0xff] %v1702_v18 }
 0x26b   : > { %2516 = vst.msk [vmem:[%s3200_s11 + $0x84] sm:$0xf] %vm1853_vm8, %v2691_v56 }
 0x26c   : > { %2517 = vst.msk [vmem:[%s3200_s11 + $0x90] sm:$0xf] %vm1853_vm8, %v2691_v56 }
 0x26d   : > { %2518 = vst.msk [vmem:[%s3200_s11 + $0x9c] sm:$0xf] %vm1853_vm8, %v2691_v56 }
 0x26e   : > { %2519 = vst.msk [vmem:[%s3200_s11 + $0xa8] sm:$0xf] %vm1853_vm8, %v2691_v56 }
 0x26f   : > { %2520 = vst.msk [vmem:[%s3200_s11 + $0xb4] sm:$0xf] %vm1853_vm8, %v2691_v56 }
 0x270   : > { %2521 = vst.msk [vmem:[%s3200_s11 + $0xc0] sm:$0xf] %vm1853_vm8, %v2691_v56 }
 0x271   : > { %v1803_v5 = vld [vmem:[#allocation1] sm:$0xff]  ;;  %2560 = vst [vmem:[%s3200_s11 + $0xb0] sm:$0x1] %v1958_v9 }
 0x272   : > { %1804 = vst [vmem:[#allocation1] ss:$9 sm:$0xff] %v1703_v36  ;;  %v1849_v25 = vpack.c.bf16 %v1803_v5, %v1803_v5 }
 0x273   : > { %2539 = vst [vmem:[%s3200_s11 + $0xc8] sm:$0x3] %v1927_v3 }
 0x274   : > { %2561 = vst.msk [vmem:[%s3200_s11 + $0xb8] sm:$0xf] %vm1853_vm8, %v1849_v25 }
 0x279   : > { %v1805_v23 = vld [vmem:[#allocation1] sm:$0xff] }
 0x27a   : > { %v1850_v24 = vpack.c.bf16 %v1805_v23, %v1805_v23  ;;  %1806 = vst [vmem:[#allocation1] ss:$9 sm:$0xff] %v1628_v19  ;;  %v2565_v38 = vld [vmem:[%s3200_s11 + $0xc8] sm:$0x1] }
 0x27b   : > { %1807 = vst [vmem:[#allocation1 + $0x1] ss:$9 sm:$0xff] %v1704_v60 }
 0x27c   : > { %v1962_v57 = vsel %vm3217_vm14, %v1850_v24, %v2562_v54  ;;  %1808 = vst [vmem:[#allocation1 + $0x2] ss:$9 sm:$0xff] %v1705_v26 }
 0x27d   : > { %2563 = vst [vmem:[%s3200_s11 + $0xbc] sm:$0x1] %v1962_v57 }
 0x27e   : > { %1809 = vst [vmem:[#allocation1 + $0x3] ss:$9 sm:$0xff] %v1706_v2 }
 0x27f   : > { %1810 = vst [vmem:[#allocation1 + $0x4] ss:$9 sm:$0xff] %v1707_v28 }
 0x280   : > { %1811 = vst [vmem:[#allocation1 + $0x5] ss:$9 sm:$0xff] %v1708_v29 }
 0x281   : > { %1812 = vst [vmem:[#allocation1 + $0x6] ss:$9 sm:$0xff] %v1709_v31 }
 0x282   : > { %1813 = vst [vmem:[#allocation1 + $0x7] ss:$9 sm:$0xff] %v1710_v14 }
 0x289   : > { %v1814_v30 = vld [vmem:[#allocation1] sm:$0xff] }
 0x28a   : > { %v1851_v17 = vpack.c.bf16 %v1814_v30, %v1814_v30  ;;  %1815 = vst [vmem:[#allocation1] ss:$9 sm:$0xff] %v1629_v4 }
 0x28c   : > { %2564 = vst.msk [vmem:[%s3200_s11 + $0xc4] sm:$0xf] %vm1853_vm8, %v1851_v17 }
 0x291   : > { %v1816_v21 = vld [vmem:[#allocation1] sm:$0xff] }
 0x292   : > { %v1852_v10 = vpack.c.bf16 %v1816_v21, %v1816_v21 }
 0x294   : > { %v1966_v22 = vsel %vm3217_vm14, %v1852_v10, %v2565_v38 }
 0x295   : > { %2566 = vst [vmem:[%s3200_s11 + $0xc8] sm:$0x1] %v1966_v22 }
 0x296 PF: > { %s13_s12 = sadd.s32 1, %s2682_s12  }
 0x297   : > { %p10_p4 = scmp.ge.s32.totalorder %s13_s12, 4  }
 0x299   :  { %12 = sbr.rel (!%p10_p4) target bundleno = 1 (0x1), region = 87 }

// kernel: nonorm_discriminator_pallas.6
= control target key start
LH: loop header
LB: loop body
LE: loop exit
PB: predicated region body
PF: predicated region fallthrough
CT: control target
= control target key end

     0   :  { %s1381_s12 = smov 0   ;;  %s1695_s0 = inlined_call_operand.vmem [shape: bf16[2,10,2,10,16], index: 0, kind: input, shape index: {}]   ;;  %s1696_s1 = inlined_call_operand.vmem [shape: bf16[128,16], index: 1, kind: input, shape index: {}]   ;;  %s1697_s2 = inlined_call_operand.vmem [shape: f32[1,16], index: 2, kind: input, shape index: {}]   ;;  %s1698_s3 = inlined_call_operand.vmem [shape: bf16[2,16,16,16], index: 3, kind: output, shape index: {}]  }
   0x1 LB: > { %s1071_s13 = sadd.s32 4294967295, %s1351_s12   ;;  %p1075_p0 = scmp.ge.s32.totalorder %s1351_s12, 1  ;;  %s1351_s12 = sphi %s1381_s12, %s13_s12  }
   0x2   : > { %p137_p1 = scmp.lt.s32.totalorder %s1351_s12, 3 }
   0x4   : > { %p138_p2 = pnand %p1075_p0, %p137_p1 }
   0x5   : > { %p161_p3 = scmp.lt.s32.totalorder (!%p138_p2), %s1071_s13, 1  ;;  %s1353_s18 = smov (!%p138_p2), 64  }
   0x6   : > { %141 = sbr.rel (%p138_p2) target bundleno = 440 (0x1b8), region = 32  ;;  %s1354_s19 = smov (!%p138_p2), 32  }
   0x7   : > { %s1355_s20 = smov (!%p138_p2), 96   ;;  %s1356_s21 = smov (!%p138_p2), 48  }
   0x8   : > { %s1357_s22 = smov (!%p138_p2), 16   ;;  %s1358_s23 = smov (!%p138_p2), 112  }
   0x9   : > { %s1359_s24 = smov (!%p138_p2), 80  }
   0xb   : > { %s1704_s13 = smov (!%p161_p3, %s1071_s13), 1  ;;  %vm591_vm0 = vcmask 130048   ;;  %vm607_vm1 = vcmask 261120   ;;  %vm618_vm2 = vcmask 392192   ;;  %vm629_vm3 = vcmask 523264  }
   0xc   : > { %s1327_s14 = smul.u32 160, %s1704_s13  ;;  %vm640_vm4 = vcmask 654336   ;;  %vm651_vm5 = vcmask 785408   ;;  %vm662_vm6 = vcmask 916480   ;;  %s1290_s16 = sshll.u32 %s1704_s13, 7  ;;  %vm980_vm7 = vcmask 125954  }
   0xd   : > { %vm981_vm8 = vsmask.f32 7946  ;;  %vm998_vm10 = vcmask 124928   ;;  %vm999_vm11 = vsmask.f32 2304  ;;  %vm950_vm13 = vcmask 125952  }
   0xe   : > { %s1395_s17 = scalar_lea.vmem %s1695_s0, %s1327_s14  ;;  %vm1582_vm9 = vmand %vm980_vm7, %vm981_vm8 }
   0xf   : > { %v1109_v0 = vld [vmem:[%s1395_s17 + $0x40] sm:$0xe]  ;;  %v1094_v1 = vld [vmem:[%s1395_s17 + $0x38] sm:$0xe]  ;;  %v1296_v5 = vld [vmem:[%s1395_s17 + $0x38] sm:$0x10] }
  0x10   : > { %v1161_v2 = vld [vmem:[%s1395_s17 + $0x38] sm:$0xc]  ;;  %v406_v3 = vunpack.c.l.b16 %v1109_v0  ;;  %v311_v4 = vunpack.c.l.b16 %v1094_v1  ;;  %v1141_v6 = vld [vmem:[%s1395_s17 + $0x30] sm:$0xc]  ;;  %v1291_v7 = vld [vmem:[%s1395_s17 + $0x30] sm:$0x10] }
  0x11   : > { %v1162_v8 = vor.u32 %v1296_v5, %v1161_v2  ;;  %v1142_v9 = vor.u32 %v1291_v7, %v1141_v6  ;;  %v1145_v10 = vld [vmem:[%s1395_s17 + $0x40] sm:$0xc]  ;;  %v1292_v11 = vld [vmem:[%s1395_s17 + $0x40] sm:$0x10]  ;;  %v1201_v12 = vld [vmem:[%s1395_s17 + $0x48] sm:$0xc] }
  0x12   : > { %v411_v13 = vpack.c.b16 %v406_v3, %v406_v3  ;;  %v316_v14 = vpack.c.b16 %v311_v4, %v311_v4  ;;  %v1306_v15 = vld [vmem:[%s1395_s17 + $0x48] sm:$0x10]  ;;  %v1124_v16 = vld [vmem:[%s1395_s17 + $0x48] sm:$0xe]  ;;  %v1146_v19 = vor.u32 %v1292_v11, %v1145_v10  ;;  %v1181_v29 = vld [vmem:[%s1395_s17 + $0x40] sm:$0xc] }
  0x13   : > { %v359_v17 = vshll.u32 %v1162_v8, 16  ;;  %v264_v18 = vshll.u32 %v1142_v9, 16  ;;  %v357_v20 = vshrl.u32 %v1162_v8, 16  ;;  %v262_v21 = vshrl.u32 %v1142_v9, 16  ;;  %v1095_v26 = vld [vmem:[%s1395_s17 + $0x48] sm:$0xe]  ;;  %vm1600_vm12 = vmand %vm998_vm10, %vm999_vm11 }
  0x14   : > { %416 = vrot.lane.b32.xlu1 %v411_v13, %s1353_s18  ;;  %321 = vrot.lane.b32.xlu0 %v316_v14, %s1354_s19  ;;  %v1202_v22 = vor.u32 %v1306_v15, %v1201_v12  ;;  %v501_v23 = vunpack.c.l.b16 %v1124_v16  ;;  %v271_v28 = vshll.u32 %v1146_v19, 16  ;;  %v1301_v30 = vld [vmem:[%s1395_s17 + $0x40] sm:$0x10]  ;;  %v1165_v34 = vld [vmem:[%s1395_s17 + $0x48] sm:$0xc]  ;;  %v312_v36 = vunpack.c.l.b16 %v1095_v26 }
  0x15   : > { %v361_v24 = vrot.slane %v359_v17, 1  ;;  %v266_v25 = vrot.slane %v264_v18, 1  ;;  %v1297_v35 = vld [vmem:[%s1395_s17 + $0x48] sm:$0x10]  ;;  %v1182_v37 = vor.u32 %v1301_v30, %v1181_v29  ;;  %v269_v38 = vshrl.u32 %v1146_v19, 16 }
  0x16   : > { %v506_v27 = vpack.c.b16 %v501_v23, %v501_v23  ;;  %v549_v33 = vshll.u32 %v1202_v22, 16  ;;  %v273_v39 = vrot.slane %v271_v28, 1  ;;  %v1166_v40 = vor.u32 %v1297_v35, %v1165_v34  ;;  %v1185_v45 = vld [vmem:[%s1395_s17 + $0x50] sm:$0xc]  ;;  %v1302_v46 = vld [vmem:[%s1395_s17 + $0x50] sm:$0x10] }
  0x17   : > { %v362_v31 = vor.u32 %v361_v24, %v357_v20  ;;  %v267_v32 = vor.u32 %v266_v25, %v262_v21  ;;  %v547_v41 = vshrl.u32 %v1202_v22, 16  ;;  %v317_v43 = vpack.c.b16 %v312_v36, %v312_v36  ;;  %v1110_v50 = vld [vmem:[%s1395_s17 + $0x50] sm:$0xe]  ;;  %v1205_v54 = vld [vmem:[%s1395_s17 + $0x58] sm:$0xc] }
  0x18   : > { %511 = vrot.lane.b32.xlu2 %v506_v27, %s1355_s20  ;;  %v551_v42 = vrot.slane %v549_v33, 1  ;;  %v454_v44 = vshll.u32 %v1182_v37, 16  ;;  %v274_v47 = vor.u32 %v273_v39, %v269_v38  ;;  %v366_v48 = vshll.u32 %v1166_v40, 16  ;;  %v1307_v55 = vld [vmem:[%s1395_s17 + $0x58] sm:$0x10] }
  0x19   : > { %v452_v51 = vshrl.u32 %v1182_v37, 16  ;;  %v1186_v53 = vor.u32 %v1302_v46, %v1185_v45  ;;  %v364_v56 = vshrl.u32 %v1166_v40, 16  ;;  %v407_v58 = vunpack.c.l.b16 %v1110_v50  ;;  %v1149_v62 = vld [vmem:[%s1395_s17 + $0x50] sm:$0xc]  ;;  %v1293_v63 = vld [vmem:[%s1395_s17 + $0x50] sm:$0x10] }
  0x1a   : > { %v552_v49 = vor.u32 %v551_v42, %v547_v41  ;;  %v456_v52 = vrot.slane %v454_v44, 1  ;;  %v368_v57 = vrot.slane %v366_v48, 1  ;;  %v1206_v59 = vor.u32 %v1307_v55, %v1205_v54  ;;  %v1125_v2 = vld [vmem:[%s1395_s17 + $0x58] sm:$0xe]  ;;  %v1298_v5 = vld [vmem:[%s1395_s17 + $0x58] sm:$0x10] }
  0x1b   : > { %v461_v61 = vshll.u32 %v1186_v53, 16  ;;  %v412_v1 = vpack.c.b16 %v407_v58, %v407_v58  ;;  %v1169_v3 = vld [vmem:[%s1395_s17 + $0x58] sm:$0xc]  ;;  %v459_v6 = vshrl.u32 %v1186_v53, 16  ;;  %v1150_v8 = vor.u32 %v1293_v63, %v1149_v62  ;;  %v1189_v16 = vld [vmem:[%s1395_s17 + $0x60] sm:$0xc] }
  0x1c   : > { %391 = vrot.lane.b32.xlu1 %v362_v31, %s1356_s21  ;;  %296 = vrot.lane.b32.xlu0 %v267_v32, %s1357_s22  ;;  %v457_v60 = vor.u32 %v456_v52, %v452_v51  ;;  %v369_v0 = vor.u32 %v368_v57, %v364_v56  ;;  %v556_v4 = vshll.u32 %v1206_v59, 16  ;;  %v502_v9 = vunpack.c.l.b16 %v1125_v2  ;;  %v1303_v19 = vld [vmem:[%s1395_s17 + $0x60] sm:$0x10]  ;;  %v1096_v22 = vld [vmem:[%s1395_s17 + $0x58] sm:$0xe] }
  0x1d   : > { %v463_v7 = vrot.slane %v461_v61, 1  ;;  %v1170_v10 = vor.u32 %v1298_v5, %v1169_v3  ;;  %v554_v11 = vshrl.u32 %v1206_v59, 16  ;;  %v278_v14 = vshll.u32 %v1150_v8, 16  ;;  %v1111_v28 = vld [vmem:[%s1395_s17 + $0x60] sm:$0xe] }
  0x1e   : > { %v558_v12 = vrot.slane %v556_v4, 1  ;;  %v507_v15 = vpack.c.b16 %v502_v9, %v502_v9  ;;  %v276_v20 = vshrl.u32 %v1150_v8, 16  ;;  %v1190_v23 = vor.u32 %v1303_v19, %v1189_v16  ;;  %v1209_v29 = vld [vmem:[%s1395_s17 + $0x68] sm:$0xc]  ;;  %v1308_v30 = vld [vmem:[%s1395_s17 + $0x68] sm:$0x10] }
  0x1f   : > { %v464_v13 = vor.u32 %v463_v7, %v459_v6  ;;  %v373_v18 = vshll.u32 %v1170_v10, 16  ;;  %v280_v21 = vrot.slane %v278_v14, 1  ;;  %v313_v24 = vunpack.c.l.b16 %v1096_v22  ;;  %v1153_v34 = vld [vmem:[%s1395_s17 + $0x60] sm:$0xc]  ;;  %v1294_v35 = vld [vmem:[%s1395_s17 + $0x60] sm:$0x10] }
  0x20   : > { %323 = vrot.lane.b32.xlu2 %v317_v43, %s1354_s19  ;;  %v559_v17 = vor.u32 %v558_v12, %v554_v11  ;;  %v371_v25 = vshrl.u32 %v1170_v10, 16  ;;  %v468_v31 = vshll.u32 %v1190_v23, 16  ;;  %v408_v36 = vunpack.c.l.b16 %v1111_v28  ;;  %v1126_v38 = vld [vmem:[%s1395_s17 + $0x68] sm:$0xe]  ;;  %v1299_v46 = vld [vmem:[%s1395_s17 + $0x68] sm:$0x10] }
  0x21   : > { %v375_v26 = vrot.slane %v373_v18, 1  ;;  %v281_v27 = vor.u32 %v280_v21, %v276_v20  ;;  %v318_v32 = vpack.c.b16 %v313_v24, %v313_v24  ;;  %v1210_v37 = vor.u32 %v1308_v30, %v1209_v29  ;;  %v1173_v45 = vld [vmem:[%s1395_s17 + $0x68] sm:$0xc]  ;;  %v1193_v54 = vld [vmem:[%s1395_s17 + $0x70] sm:$0xc] }
  0x22   : > { %v466_v39 = vshrl.u32 %v1190_v23, 16  ;;  %v470_v40 = vrot.slane %v468_v31, 1  ;;  %v1154_v41 = vor.u32 %v1294_v35, %v1153_v34  ;;  %v503_v42 = vunpack.c.l.b16 %v1126_v38  ;;  %v1097_v53 = vld [vmem:[%s1395_s17 + $0x68] sm:$0xe]  ;;  %v1304_v55 = vld [vmem:[%s1395_s17 + $0x70] sm:$0x10] }
  0x23   : > { %v376_v33 = vor.u32 %v375_v26, %v371_v25  ;;  %v413_v43 = vpack.c.b16 %v408_v36, %v408_v36  ;;  %v563_v44 = vshll.u32 %v1210_v37, 16  ;;  %v561_v50 = vshrl.u32 %v1210_v37, 16  ;;  %v1112_v63 = vld [vmem:[%s1395_s17 + $0x70] sm:$0xe]  ;;  %v1213_v2 = vld [vmem:[%s1395_s17 + $0x78] sm:$0xc] }
  0x24   : > { %298 = vrot.lane.b32.xlu1 %v274_v47, %s1357_s22  ;;  %581 = vrot.lane.b32.xlu0 %v552_v49, %s1358_s23  ;;  %v471_v47 = vor.u32 %v470_v40, %v466_v39  ;;  %v285_v48 = vshll.u32 %v1154_v41, 16  ;;  %v508_v49 = vpack.c.b16 %v503_v42, %v503_v42  ;;  %v1174_v52 = vor.u32 %v1299_v46, %v1173_v45  ;;  %v1309_v5 = vld [vmem:[%s1395_s17 + $0x78] sm:$0x10]  ;;  %v1157_v6 = vld [vmem:[%s1395_s17 + $0x70] sm:$0xc] }
  0x25   : > { %v565_v51 = vrot.slane %v563_v44, 1  ;;  %v283_v56 = vshrl.u32 %v1154_v41, 16  ;;  %v314_v58 = vunpack.c.l.b16 %v1097_v53  ;;  %v1194_v59 = vor.u32 %v1304_v55, %v1193_v54  ;;  %v1295_v7 = vld [vmem:[%s1395_s17 + $0x70] sm:$0x10]  ;;  %v1127_v14 = vld [vmem:[%s1395_s17 + $0x78] sm:$0xe] }
  0x26   : > { %v287_v57 = vrot.slane %v285_v48, 1  ;;  %v380_v61 = vshll.u32 %v1174_v52, 16  ;;  %v378_v3 = vshrl.u32 %v1174_v52, 16  ;;  %v409_v8 = vunpack.c.l.b16 %v1112_v63  ;;  %v1177_v19 = vld [vmem:[%s1395_s17 + $0x78] sm:$0xc] }
  0x27   : > { %v473_v9 = vshrl.u32 %v1194_v59, 16  ;;  %v1214_v11 = vor.u32 %v1309_v5, %v1213_v2  ;;  %v1158_v12 = vor.u32 %v1295_v7, %v1157_v6  ;;  %v1300_v20 = vld [vmem:[%s1395_s17 + $0x78] sm:$0x10]  ;;  %v504_v21 = vunpack.c.l.b16 %v1127_v14  ;;  %v1098_v28 = vld [vmem:[%s1395_s17 + $0x78] sm:$0xe] }
  0x28   : > { %486 = vrot.lane.b32.xlu2 %v457_v60, %s1359_s24  ;;  %v566_v60 = vor.u32 %v565_v51, %v561_v50  ;;  %v288_v62 = vor.u32 %v287_v57, %v283_v56  ;;  %v382_v4 = vrot.slane %v380_v61, 1  ;;  %v1178_v23 = vor.u32 %v1300_v20, %v1177_v19  ;;  %v1197_v29 = vld [vmem:[%s1395_s17 + $0x80] sm:$0xc]  ;;  %v1305_v30 = vld [vmem:[%s1395_s17 + $0x80] sm:$0x10] }
  0x29   : > { %v292_v18 = vshll.u32 %v1158_v12, 16  ;;  %v568_v22 = vshrl.u32 %v1214_v11, 16  ;;  %v290_v25 = vshrl.u32 %v1158_v12, 16  ;;  %v315_v34 = vunpack.c.l.b16 %v1098_v28  ;;  %v1113_v36 = vld [vmem:[%s1395_s17 + $0x80] sm:$0xe] }
  0x2a   : > { %v387_v31 = vshll.u32 %v1178_v23, 16  ;;  %v1198_v35 = vor.u32 %v1305_v30, %v1197_v29  ;;  %v1217_v37 = vld [vmem:[%s1395_s17 + $0x88] sm:$0xc]  ;;  %v1310_v38 = vld [vmem:[%s1395_s17 + $0x88] sm:$0x10]  ;;  %v385_v39 = vshrl.u32 %v1178_v23, 16  ;;  %v410_v41 = vunpack.c.l.b16 %v1113_v36 }
  0x2b   : > { %v294_v26 = vrot.slane %v292_v18, 1  ;;  %v1218_v42 = vor.u32 %v1310_v38, %v1217_v37  ;;  %v1128_v50 = vld [vmem:[%s1395_s17 + $0x88] sm:$0xe]  ;;  %v1081_v28 = vld [vmem:[%s1395_s17 + $0x50] sm:$0xe] }
  0x2c   : > { %393 = vrot.lane.b32.xlu0 %v369_v0, %s1356_s21  ;;  %418 = vrot.lane.b32.xlu1 %v412_v1, %s1353_s18  ;;  %v319_v0 = vpack.c.b16 %v314_v58, %v314_v58  ;;  %v475_v1 = vshll.u32 %v1194_v59, 16  ;;  %v389_v40 = vrot.slane %v387_v31, 1  ;;  %v482_v44 = vshll.u32 %v1198_v35, 16  ;;  %v1317_v36 = vld [vmem:[%s1696_s1 + $0x30] sm:$0xff] }
  0x2d   : > { %v415_v46 = vpack.c.b16 %v410_v41, %v410_v41  ;;  %v480_v48 = vshrl.u32 %v1198_v35, 16  ;;  %v505_v51 = vunpack.c.l.b16 %v1128_v50  ;;  %v575_v52 = vshrl.u32 %v1218_v42, 16  ;;  %v1082_v50 = vld [vmem:[%s1395_s17 + $0x60] sm:$0xe] }
  0x2e   : > { %v477_v10 = vrot.slane %v475_v1, 1  ;;  %v390_v45 = vor.u32 %v389_v40, %v385_v39 }
  0x2f   : > { %v510_v55 = vpack.c.b16 %v505_v51, %v505_v51 }
  0x30   : > { %488 = vrot.lane.b32.xlu2 %v464_v13, %s1359_s24  ;;  %v383_v13 = vor.u32 %v382_v4, %v378_v3  ;;  %v478_v16 = vor.u32 %v477_v10, %v473_v9 }
  0x34   : > { %513 = vrot.lane.b32.xlu0 %v507_v15, %s1355_s20  ;;  %583 = vrot.lane.b32.xlu1 %v559_v17, %s1358_s23  ;;  %v414_v15 = vpack.c.b16 %v409_v8, %v409_v8  ;;  %v570_v17 = vshll.u32 %v1214_v11, 16  ;;  %v1080_v11 = vld [vmem:[%s1395_s17 + $0x40] sm:$0xe] }
  0x36   : > { %v572_v24 = vrot.slane %v570_v17, 1 }
  0x38   : > { %300 = vrot.lane.b32.xlu2 %v281_v27, %s1357_s22  ;;  %v509_v27 = vpack.c.b16 %v504_v21, %v504_v21 }
  0x3c   : > { %325 = vrot.lane.b32.xlu0 %v318_v32, %s1354_s19  ;;  %395 = vrot.lane.b32.xlu1 %v376_v33, %s1356_s21  ;;  %v573_v32 = vor.u32 %v572_v24, %v568_v22  ;;  %v295_v33 = vor.u32 %v294_v26, %v290_v25 }
  0x40   : > { %420 = vrot.lane.b32.xlu2 %v413_v43, %s1353_s18  ;;  %v320_v43 = vpack.c.b16 %v315_v34, %v315_v34  ;;  %v1318_v34 = vld [vmem:[%s1696_s1 + $0x38] sm:$0xff] }
  0x41   : > { %854 = vmatpush.bf16.msra.mxu0 %v1318_v34  ;;  %1319 = vmatpush.bf16.msra.mxu1 %v1318_v34 }
  0x44   : > { %490 = vrot.lane.b32.xlu0 %v471_v47, %s1359_s24  ;;  %515 = vrot.lane.b32.xlu1 %v508_v49, %s1355_s20  ;;  %v577_v47 = vshll.u32 %v1218_v42, 16  ;;  %v484_v49 = vrot.slane %v482_v44, 1  ;;  %v1316_v42 = vld [vmem:[%s1696_s1 + $0x28] sm:$0xff] }
  0x45   : > { %855 = vmatpush.bf16.msra.mxu0 %v1317_v36  ;;  %1320 = vmatpush.bf16.msra.mxu1 %v1317_v36 }
  0x46   : > { %v579_v53 = vrot.slane %v577_v47, 1  ;;  %v485_v54 = vor.u32 %v484_v49, %v480_v48  ;;  %v1315_v48 = vld [vmem:[%s1696_s1 + $0x20] sm:$0xff] }
  0x48   : > { %585 = vrot.lane.b32.xlu2 %v566_v60, %s1358_s23  ;;  %v580_v56 = vor.u32 %v579_v53, %v575_v52 }
  0x49   : > { %856 = vmatpush.bf16.msra.mxu0 %v1316_v42  ;;  %1321 = vmatpush.bf16.msra.mxu1 %v1316_v42 }
  0x4c   : > { %302 = vrot.lane.b32.xlu0 %v288_v62, %s1357_s22  ;;  %327 = vrot.lane.b32.xlu1 %v319_v0, %s1354_s19  ;;  %v1079_v62 = vld [vmem:[%s1395_s17 + $0x30] sm:$0xe] }
  0x4d   : > { %857 = vmatpush.bf16.msra.mxu0 %v1315_v48  ;;  %1322 = vmatpush.bf16.msra.mxu1 %v1315_v48 }
  0x50   : > { %397 = vrot.lane.b32.xlu2 %v383_v13, %s1356_s21 }
  0x54   : > { %422 = vrot.lane.b32.xlu0 %v414_v15, %s1353_s18  ;;  %492 = vrot.lane.b32.xlu1 %v478_v16, %s1359_s24 }
  0x58   : > { %517 = vrot.lane.b32.xlu2 %v509_v27, %s1355_s20 }
  0x5c   : > { %587 = vrot.lane.b32.xlu0 %v573_v32, %s1358_s23  ;;  %304 = vrot.lane.b32.xlu1 %v295_v33, %s1357_s22 }
  0x60   : > { %329 = vrot.lane.b32.xlu2 %v320_v43, %s1354_s19  ;;  %s1575_s19 = scalar_lea.vmem %s1698_s3, %s1290_s16 }
  0x64   : > { %399 = vrot.lane.b32.xlu0 %v390_v45, %s1356_s21  ;;  %424 = vrot.lane.b32.xlu1 %v415_v46, %s1353_s18 }
  0x68   : > { %494 = vrot.lane.b32.xlu2 %v485_v54, %s1359_s24 }
  0x6c   : > { %519 = vrot.lane.b32.xlu0 %v510_v55, %s1355_s20  ;;  %589 = vrot.lane.b32.xlu1 %v580_v56, %s1358_s23 }
  0x72   : > { %v512_v57 = vpop.permute.xlu2 %511 }
  0x7a   : > { %v324_v58 = vpop.permute.xlu2 %323 }
  0x82   : > { %v487_v61 = vpop.permute.xlu2 %486 }
  0x86   : > { %v417_v59 = vpop.permute.xlu1 %416  ;;  %v322_v60 = vpop.permute.xlu0 %321 }
  0x8a   : > { %v489_v4 = vpop.permute.xlu2 %488 }
  0x8e   : > { %v392_v63 = vpop.permute.xlu1 %391  ;;  %v297_v0 = vpop.permute.xlu0 %296 }
  0x8f   : > { %v594_v1 = vsel %vm591_vm0, %v1079_v62, %v297_v0  ;;  %v1083_v62 = vld [vmem:[%s1395_s17 + $0x70] sm:$0xe] }
  0x90   : > { %v609_v2 = vsel %vm607_vm1, %v594_v1, %v322_v60  ;;  %v1313_v60 = vld [vmem:[%s1696_s1 + $0x10] sm:$0xff] }
  0x91   : > { %v620_v3 = vsel %vm618_vm2, %v609_v2, %v392_v63 }
  0x92   : > { %v631_v5 = vsel %vm629_vm3, %v620_v3, %v417_v59  ;;  %v301_v12 = vpop.permute.xlu2 %300  ;;  %v1312_v3 = vld [vmem:[%s1696_s1 + $0x8] sm:$0xff] }
  0x93   : > { %v642_v6 = vsel %vm640_vm4, %v631_v5, %v487_v61  ;;  %v600_v29 = vsel %vm591_vm0, %v1081_v28, %v301_v12 }
  0x94   : > { %v653_v9 = vsel %vm651_vm5, %v642_v6, %v512_v57  ;;  %v1314_v57 = vld [vmem:[%s1696_s1 + $0x18] sm:$0xff] }
  0x95   : > { %858 = vmatpush.bf16.msra.mxu0 %v1314_v57  ;;  %1323 = vmatpush.bf16.msra.mxu1 %v1314_v57 }
  0x96   : > { %v299_v7 = vpop.permute.xlu1 %298  ;;  %v582_v8 = vpop.permute.xlu0 %581 }
  0x97   : > { %v664_v10 = vsel %vm662_vm6, %v653_v9, %v582_v8  ;;  %v597_v13 = vsel %vm591_vm0, %v1080_v11, %v299_v7 }
  0x98   : > { %673 = vst [vmem:[#allocation1] sm:$0xff] %v664_v10  ;;  %v611_v16 = vsel %vm607_vm1, %v597_v13, %v324_v58  ;;  %v1311_v10 = vld [vmem:[%s1696_s1] sm:$0xff] }
  0x99   : > { %859 = vmatpush.bf16.msra.mxu0 %v1313_v60  ;;  %1324 = vmatpush.bf16.msra.mxu1 %v1313_v60 }
  0x9a   : > { %v421_v19 = vpop.permute.xlu2 %420 }
  0x9d   : > { %860 = vmatpush.bf16.msra.mxu0 %v1312_v3  ;;  %1325 = vmatpush.bf16.msra.mxu1 %v1312_v3 }
  0x9e   : > { %v394_v14 = vpop.permute.xlu0 %393  ;;  %v419_v15 = vpop.permute.xlu1 %418 }
  0x9f   : > { %v622_v17 = vsel %vm618_vm2, %v611_v16, %v394_v14  ;;  %v1502_v24 = vld [vmem:[#allocation1 + $0x1] ss:$9 sm:$0xff]  ;;  %v1506_v26 = vld [vmem:[#allocation1 + $0x3] ss:$9 sm:$0xff] }
  0xa0   : > { %v633_v18 = vsel %vm629_vm3, %v622_v17, %v419_v15  ;;  %v1504_v25 = vld [vmem:[#allocation1 + $0x2] ss:$9 sm:$0xff]  ;;  %v711_v16 = vunpack.i.h.s16 %v1502_v24 }
  0xa1   : > { %v644_v20 = vsel %vm640_vm4, %v633_v18, %v489_v4  ;;  %861 = vmatpush.bf16.msra.mxu0 %v1311_v10  ;;  %1326 = vmatpush.bf16.msra.mxu1 %v1311_v10  ;;  %v713_v24 = vunpack.i.h.s16 %v1504_v25 }
  0xa2   : > { %v586_v32 = vpop.permute.xlu2 %585 }
  0xa6   : > { %v514_v21 = vpop.permute.xlu0 %513  ;;  %v584_v22 = vpop.permute.xlu1 %583 }
  0xa7   : > { %v655_v23 = vsel %vm651_vm5, %v644_v20, %v514_v21 }
  0xa8   : > { %v666_v27 = vsel %vm662_vm6, %v655_v23, %v584_v22 }
  0xa9   : > { %683 = vst [vmem:[#allocation1] sm:$0xff] %v666_v27  ;;  %v1219_v27 = vpack.i.b16 %v1504_v25, %v711_v16 }
  0xaa   : > { %v398_v47 = vpop.permute.xlu2 %397 }
  0xae   : > { %v326_v30 = vpop.permute.xlu0 %325  ;;  %v396_v31 = vpop.permute.xlu1 %395 }
  0xaf   : > { %v613_v33 = vsel %vm607_vm1, %v600_v29, %v326_v30 }
  0xb0   : > { %v624_v35 = vsel %vm618_vm2, %v613_v33, %v396_v31  ;;  %v1525_v43 = vld [vmem:[#allocation1 + $0x1] ss:$9 sm:$0xff]  ;;  %v1529_v45 = vld [vmem:[#allocation1 + $0x3] ss:$9 sm:$0xff] }
  0xb1   : > { %v635_v37 = vsel %vm629_vm3, %v624_v35, %v421_v19  ;;  %v1527_v44 = vld [vmem:[#allocation1 + $0x2] ss:$9 sm:$0xff]  ;;  %v716_v35 = vunpack.i.h.s16 %v1525_v43 }
  0xb2   : > { %v518_v53 = vpop.permute.xlu2 %517 }
  0xb6   : > { %v491_v38 = vpop.permute.xlu0 %490  ;;  %v516_v39 = vpop.permute.xlu1 %515 }
  0xb7   : > { %v646_v40 = vsel %vm640_vm4, %v635_v37, %v491_v38  ;;  %v715_v37 = vunpack.i.h.s16 %v1506_v26  ;;  %v1220_v38 = vpack.i.b16 %v1506_v26, %v713_v24 }
  0xb8   : > { %v657_v41 = vsel %vm651_vm5, %v646_v40, %v516_v39 }
  0xb9   : > { %v668_v46 = vsel %vm662_vm6, %v657_v41, %v586_v32  ;;  %v758_v39 = vpack.i.b16 %v716_v35, %v715_v37 }
  0xba   : > { %690 = vst [vmem:[#allocation1] sm:$0xff] %v668_v46  ;;  %v330_v63 = vpop.permute.xlu2 %329 }
  0xbe   : > { %v303_v49 = vpop.permute.xlu0 %302  ;;  %v328_v51 = vpop.permute.xlu1 %327 }
  0xbf   : > { %v603_v52 = vsel %vm591_vm0, %v1082_v50, %v303_v49  ;;  %v1268_v50 = vld [vmem:[%s1575_s19 + $0x44] sm:$0xc] }
  0xc0   : > { %v615_v54 = vsel %vm607_vm1, %v603_v52, %v328_v51  ;;  %v984_v51 = vsel %vm1582_vm9, 0, %v1268_v50 }
  0xc1   : > { %v626_v58 = vsel %vm618_vm2, %v615_v54, %v398_v47  ;;  %v691_v4 = vld [vmem:[#allocation1 + $0x1] ss:$9 sm:$0xff]  ;;  %v695_v6 = vld [vmem:[#allocation1 + $0x3] ss:$9 sm:$0xff]  ;;  %1269 = vst [vmem:[%s1575_s19 + $0x44] sm:$0xc] %v984_v51 }
  0xc2   : > { %v693_v5 = vld [vmem:[#allocation1 + $0x2] ss:$9 sm:$0xff]  ;;  %v495_v15 = vpop.permute.xlu2 %494  ;;  %v721_v18 = vunpack.i.h.s16 %v691_v4  ;;  %v725_v32 = vunpack.i.h.s16 %v695_v6 }
  0xc3   : > { %v723_v22 = vunpack.i.h.s16 %v693_v5 }
  0xc4   : > { %v1221_v33 = vpack.i.b16 %v693_v5, %v721_v18 }
  0xc5   : > { %v1222_v34 = vpack.i.b16 %v695_v6, %v723_v22 }
  0xc6   : > { %v423_v55 = vpop.permute.xlu0 %422  ;;  %v493_v56 = vpop.permute.xlu1 %492 }
  0xc7   : > { %v637_v59 = vsel %vm629_vm3, %v626_v58, %v423_v55 }
  0xc8   : > { %v648_v61 = vsel %vm640_vm4, %v637_v59, %v493_v56  ;;  %v1270_v56 = vld [vmem:[%s1575_s19 + $0x4c] sm:$0xc]  ;;  %v1278_v10 = vld [vmem:[%s1575_s19 + $0x44] sm:$0x7] }
  0xc9   : > { %v659_v0 = vsel %vm651_vm5, %v648_v61, %v518_v53 }
  0xce   : > { %v588_v1 = vpop.permute.xlu0 %587  ;;  %v305_v2 = vpop.permute.xlu1 %304 }
  0xcf   : > { %v670_v7 = vsel %vm662_vm6, %v659_v0, %v588_v1  ;;  %v606_v8 = vsel %vm591_vm0, %v1083_v62, %v305_v2  ;;  %v1272_v1 = vld [vmem:[%s1575_s19 + $0x54] sm:$0xc] }
  0xd0   : > { %697 = vst [vmem:[#allocation1] sm:$0xff] %v670_v7  ;;  %v617_v9 = vsel %vm607_vm1, %v606_v8, %v330_v63  ;;  %v987_v63 = vsel %vm1582_vm9, 0, %v1270_v56  ;;  %v990_v3 = vsel %vm1582_vm9, 0, %v1272_v1 }
  0xd1   : > { %1271 = vst [vmem:[%s1575_s19 + $0x4c] sm:$0xc] %v987_v63 }
  0xd2   : > { %1273 = vst [vmem:[%s1575_s19 + $0x54] sm:$0xc] %v990_v3 }
  0xd6   : > { %v400_v11 = vpop.permute.xlu0 %399  ;;  %v425_v12 = vpop.permute.xlu1 %424 }
  0xd7   : > { %v628_v13 = vsel %vm618_vm2, %v617_v9, %v400_v11  ;;  %v698_v17 = vld [vmem:[#allocation1 + $0x1] ss:$9 sm:$0xff]  ;;  %v702_v29 = vld [vmem:[#allocation1 + $0x3] ss:$9 sm:$0xff] }
  0xd8   : > { %v639_v14 = vsel %vm629_vm3, %v628_v13, %v425_v12  ;;  %v700_v28 = vld [vmem:[#allocation1 + $0x2] ss:$9 sm:$0xff]  ;;  %v726_v30 = vunpack.i.h.s16 %v698_v17  ;;  %v1274_v12 = vld [vmem:[%s1575_s19 + $0x5c] sm:$0xc] }
  0xd9   : > { %v650_v19 = vsel %vm640_vm4, %v639_v14, %v495_v15  ;;  %v993_v13 = vsel %vm1582_vm9, 0, %v1274_v12 }
  0xda   : > { %v763_v36 = vpack.i.b16 %v726_v30, %v725_v32  ;;  %1275 = vst [vmem:[%s1575_s19 + $0x5c] sm:$0xc] %v993_v13 }
  0xde   : > { %v520_v20 = vpop.permute.xlu0 %519  ;;  %v590_v21 = vpop.permute.xlu1 %589 }
  0xdf   : > { %v661_v23 = vsel %vm651_vm5, %v650_v19, %v520_v20 }
  0xe0   : > { %v672_v31 = vsel %vm662_vm6, %v661_v23, %v590_v21 }
  0xe1   : > { %704 = vst [vmem:[#allocation1] sm:$0xff] %v672_v31 }
  0xe2   : > { %770 = vst [vmem:[#allocation1] ss:$9 sm:$0xff] %v1219_v27  ;;  %v1360_v27 = vmov 0  }
  0xe3   : > { %782 = vst [vmem:[#allocation1 + $0x4] ss:$9 sm:$0xff] %v1529_v45 }
  0xe4   : > { %785 = vst [vmem:[#allocation1 + $0x5] ss:$9 sm:$0xff] %v1221_v33 }
  0xe5   : > { %788 = vst [vmem:[#allocation1 + $0x6] ss:$9 sm:$0xff] %v1222_v34 }
  0xe6   : > { %791 = vst [vmem:[#allocation1 + $0x7] ss:$9 sm:$0xff] %v763_v36 }
  0xe7   : > { %951 = vst.msk [vmem:[%s1575_s19] sm:$0xf] %vm950_vm13, %v1360_v27 }
  0xe8   : > { %v705_v40 = vld [vmem:[#allocation1 + $0x1] ss:$9 sm:$0xff]  ;;  %v709_v42 = vld [vmem:[#allocation1 + $0x3] ss:$9 sm:$0xff]  ;;  %952 = vst.msk [vmem:[%s1575_s19 + $0x4] sm:$0xf] %vm950_vm13, %v1360_v27 }
  0xe9   : > { %v707_v41 = vld [vmem:[#allocation1 + $0x2] ss:$9 sm:$0xff]  ;;  %773 = vst [vmem:[#allocation1 + $0x1] ss:$9 sm:$0xff] %v1220_v38  ;;  %v731_v25 = vunpack.i.h.s16 %v705_v40  ;;  %v735_v48 = vunpack.i.h.s16 %v709_v42 }
  0xea   : > { %776 = vst [vmem:[#allocation1 + $0x2] ss:$9 sm:$0xff] %v758_v39  ;;  %v733_v45 = vunpack.i.h.s16 %v707_v41 }
  0xeb   : > { %779 = vst [vmem:[#allocation1 + $0x3] ss:$9 sm:$0xff] %v1527_v44  ;;  %v1223_v46 = vpack.i.b16 %v707_v41, %v731_v25  ;;  %v1580_v44 = vld [vmem:[%s1697_s2] ss:$0 sm:$0xff]  ;;  %v1276_v25 = vld [vmem:[%s1575_s19 + $0x64] sm:$0xc] }
  0xec   : > { %v1224_v47 = vpack.i.b16 %v709_v42, %v733_v45  ;;  %953 = vst.msk [vmem:[%s1575_s19 + $0x8] sm:$0xf] %vm950_vm13, %v1360_v27 }
  0xed   : > { %954 = vst.msk [vmem:[%s1575_s19 + $0xc] sm:$0xf] %vm950_vm13, %v1360_v27 }
  0xee   : > { %955 = vst.msk [vmem:[%s1575_s19 + $0x10] sm:$0xf] %vm950_vm13, %v1360_v27 }
  0xef   : > { %956 = vst.msk [vmem:[%s1575_s19 + $0x14] sm:$0xf] %vm950_vm13, %v1360_v27 }
  0xf0   : > { %957 = vst.msk [vmem:[%s1575_s19 + $0x18] sm:$0xf] %vm950_vm13, %v1360_v27 }
  0xf1   : > { %958 = vst.msk [vmem:[%s1575_s19 + $0x1c] sm:$0xf] %vm950_vm13, %v1360_v27 }
  0xf2   : > { %v792_v43 = vld [vmem:[#allocation1] sm:$0xff]  ;;  %959 = vst.msk [vmem:[%s1575_s19 + $0x20] sm:$0xf] %vm950_vm13, %v1360_v27 }
  0xf3   : > { %794 = vst [vmem:[#allocation1] ss:$9 sm:$0xff] %v700_v28  ;;  %862 = vmatmul.bf16.vlgmr.msra.gmra.mxu0 %v792_v43  ;;  %v1280_v43 = vld [vmem:[%s1575_s19 + $0x4c] sm:$0x7] }
  0xf4   : > { %796 = vst [vmem:[#allocation1 + $0x1] ss:$9 sm:$0xff] %v702_v29 }
  0xf5   : > { %798 = vst [vmem:[#allocation1 + $0x2] ss:$9 sm:$0xff] %v1223_v46 }
  0xf6   : > { %800 = vst [vmem:[#allocation1 + $0x3] ss:$9 sm:$0xff] %v1224_v47  ;;  %v1282_v47 = vld [vmem:[%s1575_s19 + $0x54] sm:$0x7] }
  0xf7   : > { %802 = vst [vmem:[#allocation1 + $0x4] ss:$9 sm:$0xff] %v735_v48  ;;  %v996_v48 = vsel %vm1582_vm9, 0, %v1276_v25 }
  0xf8   : > { %960 = vst.msk [vmem:[%s1575_s19 + $0x24] sm:$0xf] %vm950_vm13, %v1360_v27 }
  0xf9   : > { %961 = vst.msk [vmem:[%s1575_s19 + $0x28] sm:$0xf] %vm950_vm13, %v1360_v27 }
  0xfa   : > { %962 = vst.msk [vmem:[%s1575_s19 + $0x2c] sm:$0xf] %vm950_vm13, %v1360_v27 }
  0xfb   : > { %963 = vst.msk [vmem:[%s1575_s19 + $0x30] sm:$0xf] %vm950_vm13, %v1360_v27 }
  0xfc   : > { %964 = vst.msk [vmem:[%s1575_s19 + $0x34] sm:$0xf] %vm950_vm13, %v1360_v27 }
  0xfd   : > { %965 = vst.msk [vmem:[%s1575_s19 + $0x38] sm:$0xf] %vm950_vm13, %v1360_v27 }
  0xfe   : > { %v803_v26 = vld [vmem:[#allocation1] sm:$0xff]  ;;  %966 = vst.msk [vmem:[%s1575_s19 + $0x3c] sm:$0xf] %vm950_vm13, %v1360_v27 }
  0xff   : > { %867 = vmatmul.bf16.vlgmr.msra.gmra.mxu1 %v803_v26  ;;  %1257 = vst.msk [vmem:[%s1575_s19 + $0x68] sm:$0xf] %vm950_vm13, %v1360_v27  ;;  %v1284_v26 = vld [vmem:[%s1575_s19 + $0x5c] sm:$0x7] }
 0x100   : > { %1258 = vst.msk [vmem:[%s1575_s19 + $0x6c] sm:$0xf] %vm950_vm13, %v1360_v27 }
 0x101   : > { %1259 = vst.msk [vmem:[%s1575_s19 + $0x70] sm:$0xf] %vm950_vm13, %v1360_v27 }
 0x102   : > { %1260 = vst.msk [vmem:[%s1575_s19 + $0x74] sm:$0xf] %vm950_vm13, %v1360_v27 }
 0x103   : > { %1261 = vst.msk [vmem:[%s1575_s19 + $0x78] sm:$0xf] %vm950_vm13, %v1360_v27 }
 0x104   : > { %1262 = vst.msk [vmem:[%s1575_s19 + $0x7c] sm:$0xf] %vm950_vm13, %v1360_v27 }
 0x105   : > { %1263 = vst.msk [vmem:[%s1575_s19 + $0x40] sm:$0xf] %vm950_vm13, %v1360_v27 }
 0x106   : > { %1264 = vst.msk [vmem:[%s1575_s19 + $0x48] sm:$0xf] %vm950_vm13, %v1360_v27 }
 0x107   : > { %1265 = vst.msk [vmem:[%s1575_s19 + $0x50] sm:$0xf] %vm950_vm13, %v1360_v27 }
 0x108   : > { %1266 = vst.msk [vmem:[%s1575_s19 + $0x58] sm:$0xf] %vm950_vm13, %v1360_v27 }
 0x109   : > { %1267 = vst.msk [vmem:[%s1575_s19 + $0x60] sm:$0xf] %vm950_vm13, %v1360_v27 }
 0x10a   : > { %1277 = vst [vmem:[%s1575_s19 + $0x64] sm:$0xc] %v996_v48 }
 0x170   : > { %v863_v52 = vpop.f32.mrf.mxu0 }
 0x171   : > { %v864_v53 = vadd.f32 %v1580_v44, %v863_v52 }
 0x173   : > { %v873_v54 = vmul.f32 0.2, %v864_v53 }
 0x175   : > { %v877_v55 = vmax.f32 %v864_v53, %v873_v54  ;;  %v1286_v53 = vld [vmem:[%s1575_s19 + $0x64] sm:$0x7] }
 0x177   : > { %v885_v57 = vrot.slane %v877_v55, 1  ;;  %v886_v58 = vrot.slane %v877_v55, 2  ;;  %v887_v59 = vrot.slane %v877_v55, 3  ;;  %906 = vst [vmem:[#allocation1] ss:$9 sm:$0xff] %v877_v55  ;;  %v888_v60 = vrot.slane %v877_v55, 4 }
 0x178   : > { %v865_v61 = vpop.f32.mrf.mxu0  ;;  %v889_v4 = vrot.slane %v877_v55, 5  ;;  %v890_v5 = vrot.slane %v877_v55, 6  ;;  %v891_v7 = vrot.slane %v877_v55, 7 }
 0x179   : > { %908 = vst [vmem:[#allocation1 + $0x1] ss:$9 sm:$0xff] %v885_v57  ;;  %v866_v62 = vadd.f32 %v1580_v44, %v865_v61 }
 0x17a   : > { %910 = vst [vmem:[#allocation1 + $0x2] ss:$9 sm:$0xff] %v886_v58 }
 0x17b   : > { %912 = vst [vmem:[#allocation1 + $0x3] ss:$9 sm:$0xff] %v887_v59  ;;  %v874_v0 = vmul.f32 0.2, %v866_v62 }
 0x17c   : > { %914 = vst [vmem:[#allocation1 + $0x4] ss:$9 sm:$0xff] %v888_v60  ;;  %v868_v15 = vpop.f32.mrf.mxu1 }
 0x17d   : > { %v878_v2 = vmax.f32 %v866_v62, %v874_v0  ;;  %v869_v20 = vadd.f32 %v1580_v44, %v868_v15 }
 0x17f   : > { %v892_v8 = vrot.slane %v878_v2, 1  ;;  %v893_v16 = vrot.slane %v878_v2, 2  ;;  %v894_v17 = vrot.slane %v878_v2, 3  ;;  %v895_v19 = vrot.slane %v878_v2, 4 }
 0x180   : > { %v896_v21 = vrot.slane %v878_v2, 5  ;;  %v897_v22 = vrot.slane %v878_v2, 6  ;;  %v875_v23 = vmul.f32 0.2, %v869_v20  ;;  %v898_v29 = vrot.slane %v878_v2, 7 }
 0x182   : > { %v879_v28 = vmax.f32 %v869_v20, %v875_v23 }
 0x183   : > { %v915_v6 = vld [vmem:[#allocation1] sm:$0xff] }
 0x184   : > { %916 = vst [vmem:[#allocation1] ss:$9 sm:$0xff] %v889_v4  ;;  %v945_v11 = vpack.c.bf16 %v915_v6, %v915_v6  ;;  %v899_v31 = vrot.slane %v879_v28, 1  ;;  %v900_v32 = vrot.slane %v879_v28, 2  ;;  %v901_v33 = vrot.slane %v879_v28, 3  ;;  %v870_v24 = vpop.f32.mrf.mxu1 }
 0x185   : > { %917 = vst [vmem:[#allocation1 + $0x1] ss:$9 sm:$0xff] %v890_v5  ;;  %v871_v34 = vadd.f32 %v1580_v44, %v870_v24  ;;  %v902_v35 = vrot.slane %v879_v28, 4  ;;  %v903_v37 = vrot.slane %v879_v28, 5  ;;  %v904_v39 = vrot.slane %v879_v28, 6 }
 0x186   : > { %918 = vst [vmem:[#allocation1 + $0x2] ss:$9 sm:$0xff] %v891_v7  ;;  %v1002_v14 = vsel %vm1600_vm12, %v945_v11, %v1278_v10  ;;  %v905_v40 = vrot.slane %v879_v28, 7 }
 0x187   : > { %919 = vst [vmem:[#allocation1 + $0x3] ss:$9 sm:$0xff] %v878_v2  ;;  %v876_v36 = vmul.f32 0.2, %v871_v34 }
 0x188   : > { %920 = vst [vmem:[#allocation1 + $0x4] ss:$9 sm:$0xff] %v892_v8 }
 0x189   : > { %1279 = vst [vmem:[%s1575_s19 + $0x44] sm:$0x7] %v1002_v14  ;;  %v880_v41 = vmax.f32 %v871_v34, %v876_v36 }
 0x18f   : > { %v1612_v18 = vld [vmem:[#allocation1] sm:$0xff] }
 0x190   : > { %922 = vst [vmem:[#allocation1] ss:$9 sm:$0xff] %v893_v16  ;;  %v946_v42 = vpack.c.bf16 %v1612_v18, %v1612_v18 }
 0x191   : > { %923 = vst [vmem:[#allocation1 + $0x1] ss:$9 sm:$0xff] %v894_v17 }
 0x192   : > { %924 = vst [vmem:[#allocation1 + $0x2] ss:$9 sm:$0xff] %v895_v19  ;;  %v1005_v44 = vsel %vm1600_vm12, %v946_v42, %v1280_v43 }
 0x193   : > { %925 = vst [vmem:[#allocation1 + $0x3] ss:$9 sm:$0xff] %v896_v21 }
 0x194   : > { %926 = vst [vmem:[#allocation1 + $0x4] ss:$9 sm:$0xff] %v897_v22 }
 0x195   : > { %1281 = vst [vmem:[%s1575_s19 + $0x4c] sm:$0x7] %v1005_v44 }
 0x19b   : > { %v927_v30 = vld [vmem:[#allocation1] sm:$0xff] }
 0x19c   : > { %928 = vst [vmem:[#allocation1] ss:$9 sm:$0xff] %v898_v29  ;;  %v947_v45 = vpack.c.bf16 %v927_v30, %v927_v30 }
 0x19d   : > { %929 = vst [vmem:[#allocation1 + $0x1] ss:$9 sm:$0xff] %v879_v28 }
 0x19e   : > { %930 = vst [vmem:[#allocation1 + $0x2] ss:$9 sm:$0xff] %v899_v31  ;;  %v1008_v50 = vsel %vm1600_vm12, %v947_v45, %v1282_v47 }
 0x19f   : > { %931 = vst [vmem:[#allocation1 + $0x3] ss:$9 sm:$0xff] %v900_v32 }
 0x1a0   : > { %932 = vst [vmem:[#allocation1 + $0x4] ss:$9 sm:$0xff] %v901_v33 }
 0x1a1   : > { %1283 = vst [vmem:[%s1575_s19 + $0x54] sm:$0x7] %v1008_v50 }
 0x1a7   : > { %v933_v38 = vld [vmem:[#allocation1] sm:$0xff] }
 0x1a8   : > { %934 = vst [vmem:[#allocation1] ss:$9 sm:$0xff] %v902_v35  ;;  %v948_v46 = vpack.c.bf16 %v933_v38, %v933_v38 }
 0x1a9   : > { %935 = vst [vmem:[#allocation1 + $0x1] ss:$9 sm:$0xff] %v903_v37 }
 0x1aa   : > { %936 = vst [vmem:[#allocation1 + $0x2] ss:$9 sm:$0xff] %v904_v39  ;;  %v1011_v51 = vsel %vm1600_vm12, %v948_v46, %v1284_v26 }
 0x1ab   : > { %937 = vst [vmem:[#allocation1 + $0x3] ss:$9 sm:$0xff] %v905_v40 }
 0x1ac   : > { %938 = vst [vmem:[#allocation1 + $0x4] ss:$9 sm:$0xff] %v880_v41 }
 0x1ad   : > { %1285 = vst [vmem:[%s1575_s19 + $0x5c] sm:$0x7] %v1011_v51 }
 0x1b3   : > { %v939_v52 = vld [vmem:[#allocation1] sm:$0xff] }
 0x1b4   : > { %v949_v49 = vpack.c.bf16 %v939_v52, %v939_v52 }
 0x1b6   : > { %v1014_v54 = vsel %vm1600_vm12, %v949_v49, %v1286_v53 }
 0x1b7   : > { %1287 = vst [vmem:[%s1575_s19 + $0x64] sm:$0x7] %v1014_v54 }
 0x1b8 PF: > { %s13_s12 = sadd.s32 1, %s1351_s12  }
 0x1b9   : > { %p10_p4 = scmp.ge.s32.totalorder %s13_s12, 4  }
 0x1bb   :  { %12 = sbr.rel (!%p10_p4) target bundleno = 1 (0x1), region = 82 }

// kernel: nonorm_discriminator_pallas.8
= control target key start
LH: loop header
LB: loop body
LE: loop exit
PB: predicated region body
PF: predicated region fallthrough
CT: control target
= control target key end

     0   :  { %s1858_s12 = smov 0   ;;  %s2423_s0 = inlined_call_operand.vmem [shape: bf16[2,14,14,32], index: 0, kind: input, shape index: {}]   ;;  %s2424_s1 = inlined_call_operand.vmem [shape: bf16[512,64], index: 1, kind: input, shape index: {}]   ;;  %s2425_s2 = inlined_call_operand.vmem [shape: f32[1,64], index: 2, kind: input, shape index: {}]   ;;  %s2426_s3 = inlined_call_operand.vmem [shape: bf16[2,14,14,64], index: 3, kind: output, shape index: {}]  }
   0x1 LB: > { %s1547_s13 = sadd.s32 4294967295, %s1832_s12   ;;  %p1551_p0 = scmp.ge.s32.totalorder %s1832_s12, 1  ;;  %s1832_s12 = sphi %s1858_s12, %s13_s12  }
   0x2   : > { %p137_p1 = scmp.lt.s32.totalorder %s1832_s12, 3 }
   0x4   : > { %p138_p2 = pnand %p1551_p0, %p137_p1 }
   0x5   : > { %p161_p3 = scmp.lt.s32.totalorder (!%p138_p2), %s1547_s13, 1  ;;  %s1834_s18 = smov (!%p138_p2), 64  }
   0x6   : > { %141 = sbr.rel (%p138_p2) target bundleno = 437 (0x1b5), region = 32  ;;  %s1835_s19 = smov (!%p138_p2), 32  }
   0x7   : > { %s1836_s20 = smov (!%p138_p2), 96  }
   0xb   : > { %s2430_s13 = smov (!%p161_p3, %s1547_s13), 1  ;;  %vm325_vm0 = vcmask 261120   ;;  %vm338_vm1 = vcmask 523264   ;;  %vm347_vm2 = vcmask 785408   ;;  %vm380_vm3 = vcmask 1040384  }
   0xc   : > { %s1812_s14 = smul.u32 112, %s2430_s13  ;;  %vm381_vm4 = vcmask 1042434   ;;  %vm383_vm6 = vcmask 1044484   ;;  %vm385_vm8 = vcmask 1046534   ;;  %vm1454_vm10 = vcmask 519168  }
   0xd   : > { %vm382_vm5 = vmor %vm380_vm3, %vm381_vm4  ;;  %vm1456_vm11 = vcmask 518144   ;;  %vm1482_vm12 = vcmask 518146   ;;  %vm1487_vm13 = vcmask 517120  }
   0xe   : > { %s1874_s17 = scalar_lea.vmem %s2423_s0, %s1812_s14  ;;  %vm384_vm7 = vmor %vm382_vm5, %vm383_vm6  ;;  %s2359_s16 = scalar_lea.vmem %s2426_s3, %s1812_s14 }
   0xf   : > { %v1562_v0 = vld [vmem:[%s1874_s17 + $0x34] sm:$0x3]  ;;  %v1878_v1 = vld [vmem:[%s1874_s17 + $0x30] sm:$0x8]  ;;  %v1563_v2 = vld [vmem:[%s1874_s17 + $0x3c] sm:$0x3] }
  0x10   : > { %v213_v3 = vunpack.c.l.b16 %v1562_v0  ;;  %v197_v4 = vunpack.c.l.b16 %v1878_v1  ;;  %v214_v5 = vunpack.c.l.b16 %v1563_v2  ;;  %v1883_v6 = vld [vmem:[%s1874_s17 + $0x38] sm:$0x8]  ;;  %v1886_v7 = vld [vmem:[%s1874_s17 + $0x48] sm:$0x8]  ;;  %v1565_v8 = vld [vmem:[%s1874_s17 + $0x4c] sm:$0x3] }
  0x11   : > { %v199_v9 = vunpack.c.l.b16 %v1883_v6  ;;  %v203_v10 = vunpack.c.l.b16 %v1886_v7  ;;  %v1891_v11 = vunpack.c.l.b16 %v1565_v8  ;;  %v1564_v12 = vld [vmem:[%s1874_s17 + $0x44] sm:$0x3]  ;;  %v1899_v16 = vld [vmem:[%s1874_s17 + $0x40] sm:$0x8]  ;;  %v1566_v21 = vld [vmem:[%s1874_s17 + $0x34] sm:$0x7] }
  0x12   : > { %v257_v13 = vpack.c.b16 %v213_v3, %v213_v3  ;;  %v217_v14 = vpack.c.b16 %v213_v3, %v197_v4  ;;  %v215_v20 = vunpack.c.l.b16 %v1564_v12  ;;  %v258_v22 = vpack.c.b16 %v214_v5, %v214_v5  ;;  %v1568_v28 = vld [vmem:[%s1874_s17 + $0x44] sm:$0x7]  ;;  %v1567_v39 = vld [vmem:[%s1874_s17 + $0x3c] sm:$0x7]  ;;  %v1915_v50 = vld [vmem:[%s1874_s17 + $0x40] sm:$0x8] }
  0x13   : > { %v218_v15 = vpack.c.b16 %v214_v5, %v199_v9  ;;  %v220_v23 = vpack.c.b16 %v1891_v11, %v203_v10  ;;  %v201_v26 = vunpack.c.l.b16 %v1899_v16  ;;  %v277_v29 = vunpack.c.l.b16 %v1566_v21  ;;  %v1583_v51 = vld [vmem:[%s1874_s17 + $0x44] sm:$0x3]  ;;  %v1919_v57 = vld [vmem:[%s1874_s17 + $0x38] sm:$0x8]  ;;  %v1582_v0 = vld [vmem:[%s1874_s17 + $0x3c] sm:$0x3] }
  0x14   : > { %v261_v17 = vrot.slane %v257_v13, 5  ;;  %v222_v18 = vshrl.u32 %v217_v14, 16  ;;  %v224_v19 = vshll.u32 %v217_v14, 16  ;;  %v259_v27 = vpack.c.b16 %v215_v20, %v215_v20  ;;  %v1569_v2 = vld [vmem:[%s1874_s17 + $0x4c] sm:$0x7]  ;;  %vm2206_vm9 = vmor %vm384_vm7, %vm385_vm8 }
  0x15   : > { %v231_v25 = vshll.u32 %v218_v15, 16  ;;  %v262_v32 = vrot.slane %v258_v22, 5  ;;  %v245_v33 = vshll.u32 %v220_v23, 16  ;;  %v279_v34 = vunpack.c.l.b16 %v1568_v28  ;;  %v1586_v14 = vld [vmem:[%s1874_s17 + $0x3c] sm:$0x7] }
  0x16   : > { %265 = vrot.lane.b32.xlu1 %v261_v17, %s1834_s18  ;;  %v226_v24 = vrot.slane %v224_v19, 1  ;;  %v263_v31 = vrot.slane %v259_v27, 5  ;;  %v229_v35 = vshrl.u32 %v218_v15, 16  ;;  %v219_v37 = vpack.c.b16 %v215_v20, %v201_v26 }
  0x17   : > { %v233_v36 = vrot.slane %v231_v25, 1  ;;  %v281_v38 = vpack.c.b16 %v277_v29, %v277_v29  ;;  %v243_v42 = vshrl.u32 %v220_v23, 16  ;;  %v247_v43 = vrot.slane %v245_v33, 1 }
  0x18   : > { %v227_v30 = vor.u32 %v226_v24, %v222_v18  ;;  %269 = vrot.lane.b32.xlu2 %v263_v31, %s1834_s18  ;;  %v283_v44 = vpack.c.b16 %v279_v34, %v279_v34  ;;  %v278_v45 = vunpack.c.l.b16 %v1567_v39  ;;  %v238_v47 = vshll.u32 %v219_v37, 16  ;;  %v1585_v39 = vld [vmem:[%s1874_s17 + $0x54] sm:$0x3] }
  0x19   : > { %v286_v40 = vshrl.u32 %v281_v38, 16  ;;  %v289_v41 = vshll.u32 %v281_v38, 16  ;;  %v234_v46 = vor.u32 %v233_v36, %v229_v35  ;;  %v236_v53 = vshrl.u32 %v219_v37, 16  ;;  %v1942_v38 = vld [vmem:[%s1874_s17 + $0x50] sm:$0x8] }
  0x1a   : > { %249 = vrot.lane.b32.xlu0 %v227_v30, %s1835_s19  ;;  %v282_v52 = vpack.c.b16 %v278_v45, %v278_v45  ;;  %v248_v55 = vor.u32 %v247_v43, %v243_v42  ;;  %v302_v56 = vshrl.u32 %v283_v44, 16  ;;  %v240_v60 = vrot.slane %v238_v47, 1 }
  0x1b   : > { %v288_v48 = vrot.slane %v286_v40, 5  ;;  %v291_v49 = vrot.slane %v289_v41, 6  ;;  %v305_v61 = vshll.u32 %v283_v44, 16  ;;  %v446_v62 = vunpack.c.l.b16 %v1915_v50  ;;  %v1579_v50 = vld [vmem:[%s1874_s17 + $0x4c] sm:$0x1] }
  0x1c   : > { %v294_v58 = vshrl.u32 %v282_v52, 16  ;;  %v297_v59 = vshll.u32 %v282_v52, 16  ;;  %v1924_v63 = vunpack.c.l.b16 %v1583_v51  ;;  %v304_v8 = vrot.slane %v302_v56, 5 }
  0x1d   : > { %v292_v54 = vor.u32 %v291_v49, %v288_v48  ;;  %v444_v12 = vunpack.c.l.b16 %v1919_v57  ;;  %v460_v13 = vunpack.c.l.b16 %v1582_v0  ;;  %v280_v15 = vunpack.c.l.b16 %v1569_v2  ;;  %v1951_v48 = vld [vmem:[%s1874_s17 + $0x48] sm:$0x8]  ;;  %v1584_v49 = vld [vmem:[%s1874_s17 + $0x4c] sm:$0x3]  ;;  %v1790_v57 = vld [vmem:[%s2424_s1 + $0x50] sm:$0xff] }
  0x1e   : > { %267 = vrot.lane.b32.xlu1 %v262_v32, %s1834_s18  ;;  %v296_v3 = vrot.slane %v294_v58, 5  ;;  %v299_v5 = vrot.slane %v297_v59, 6  ;;  %v241_v17 = vor.u32 %v240_v60, %v236_v53  ;;  %v307_v18 = vrot.slane %v305_v61, 6  ;;  %v1588_v59 = vld [vmem:[%s1874_s17 + $0x4c] sm:$0x7] }
  0x1f   : > { %v465_v19 = vpack.c.b16 %v1924_v63, %v446_v62  ;;  %v284_v21 = vpack.c.b16 %v280_v15, %v280_v15  ;;  %v524_v22 = vunpack.c.l.b16 %v1586_v14  ;;  %v464_v23 = vpack.c.b16 %v460_v13, %v444_v12 }
  0x20   : > { %317 = vrot.lane.b32.xlu2 %v292_v54, %s1836_s20  ;;  %v300_v20 = vor.u32 %v299_v5, %v296_v3  ;;  %v308_v27 = vor.u32 %v307_v18, %v304_v8  ;;  %v260_v28 = vpack.c.b16 %v1891_v11, %v1891_v11  ;;  %v1587_v11 = vld [vmem:[%s1874_s17 + $0x44] sm:$0x7]  ;;  %v1948_v47 = vunpack.c.l.b16 %v1585_v39 }
  0x21   : > { %v310_v24 = vshrl.u32 %v284_v21, 16  ;;  %v313_v25 = vshll.u32 %v284_v21, 16  ;;  %v478_v29 = vshll.u32 %v465_v19, 16  ;;  %v528_v32 = vpack.c.b16 %v524_v22, %v524_v22 }
  0x22   : > { %251 = vrot.lane.b32.xlu0 %v234_v46, %s1835_s19  ;;  %v471_v33 = vshll.u32 %v464_v23, 16  ;;  %v264_v34 = vrot.slane %v260_v28, 5  ;;  %v476_v35 = vshrl.u32 %v465_v19, 16  ;;  %v469_v41 = vshrl.u32 %v464_v23, 16  ;;  %v1969_v23 = vld [vmem:[%s1874_s17 + $0x48] sm:$0x8] }
  0x23   : > { %v312_v30 = vrot.slane %v310_v24, 5  ;;  %v315_v31 = vrot.slane %v313_v25, 6  ;;  %v480_v36 = vrot.slane %v478_v29, 1  ;;  %v533_v40 = vshrl.u32 %v528_v32, 16  ;;  %v1667_v24 = vld [vmem:[%s1874_s17 + $0x4c] sm:$0x3] }
  0x24   : > { %v473_v42 = vrot.slane %v471_v33, 1  ;;  %v536_v43 = vshll.u32 %v528_v32, 16  ;;  %v525_v44 = vunpack.c.l.b16 %v1587_v11  ;;  %v450_v46 = vunpack.c.l.b16 %v1942_v38  ;;  %v1589_v28 = vld [vmem:[%s1874_s17 + $0x54] sm:$0x7]  ;;  %v1666_v32 = vld [vmem:[%s1874_s17 + $0x44] sm:$0x3] }
  0x25   : > { %v316_v37 = vor.u32 %v315_v31, %v312_v30  ;;  %v481_v45 = vor.u32 %v480_v36, %v476_v35  ;;  %v504_v51 = vpack.c.b16 %v460_v13, %v460_v13  ;;  %v535_v53 = vrot.slane %v533_v40, 5  ;;  %v1974_v31 = vld [vmem:[%s1874_s17 + $0x40] sm:$0x8]  ;;  %v1802_v38 = vld [vmem:[%s2424_s1 + $0xb0] sm:$0xff] }
  0x26   : > { %255 = vrot.lane.b32.xlu1 %v248_v55, %s1835_s19  ;;  %v529_v52 = vpack.c.b16 %v525_v44, %v525_v44  ;;  %v474_v54 = vor.u32 %v473_v42, %v469_v41  ;;  %v538_v55 = vrot.slane %v536_v43, 6  ;;  %v448_v56 = vunpack.c.l.b16 %v1951_v48  ;;  %v1803_v48 = vld [vmem:[%s2424_s1 + $0xb8] sm:$0xff] }
  0x27   : > { %v462_v58 = vunpack.c.l.b16 %v1584_v49  ;;  %v467_v60 = vpack.c.b16 %v1948_v47, %v450_v46  ;;  %v508_v61 = vrot.slane %v504_v51, 5  ;;  %v526_v3 = vunpack.c.l.b16 %v1588_v59  ;;  %1104 = vmatpush.bf16.msra.mxu2 %v1803_v48  ;;  %v1798_v48 = vld [vmem:[%s2424_s1 + $0x90] sm:$0xff] }
  0x28   : > { %319 = vrot.lane.b32.xlu2 %v300_v20, %s1836_s20  ;;  %v541_v0 = vshrl.u32 %v529_v52, 16  ;;  %v544_v2 = vshll.u32 %v529_v52, 16  ;;  %v505_v5 = vpack.c.b16 %v1924_v63, %v1924_v63  ;;  %v539_v13 = vor.u32 %v538_v55, %v535_v53 }
  0x29   : > { %v466_v8 = vpack.c.b16 %v462_v58, %v448_v56  ;;  %v492_v14 = vshll.u32 %v467_v60, 16  ;;  %v530_v18 = vpack.c.b16 %v526_v3, %v526_v3  ;;  %v490_v20 = vshrl.u32 %v467_v60, 16 }
  0x2a   : > { %253 = vrot.lane.b32.xlu0 %v241_v17, %s1835_s19  ;;  %v543_v15 = vrot.slane %v541_v0, 5  ;;  %v546_v17 = vrot.slane %v544_v2, 6  ;;  %v509_v63 = vrot.slane %v505_v5, 5  ;;  %v527_v33 = vunpack.c.l.b16 %v1589_v28 }
  0x2b   : > { %v485_v19 = vshll.u32 %v466_v8, 16  ;;  %v494_v21 = vrot.slane %v492_v14, 1  ;;  %v483_v25 = vshrl.u32 %v466_v8, 16  ;;  %v552_v30 = vshll.u32 %v530_v18, 16  ;;  %v1996_v14 = vld [vmem:[%s1874_s17 + $0x58] sm:$0x8]  ;;  %1105 = vmatpush.bf16.msra.mxu2 %v1802_v38 }
  0x2c   : > { %v547_v22 = vor.u32 %v546_v17, %v543_v15  ;;  %v833_v35 = vunpack.c.l.b16 %v1969_v23  ;;  %v1979_v36 = vunpack.c.l.b16 %v1667_v24  ;;  %v531_v39 = vpack.c.b16 %v527_v33, %v527_v33  ;;  %v1669_v15 = vld [vmem:[%s1874_s17 + $0x5c] sm:$0x3] }
  0x2d   : > { %v487_v29 = vrot.slane %v485_v19, 1  ;;  %v831_v40 = vunpack.c.l.b16 %v1974_v31  ;;  %v847_v11 = vunpack.c.l.b16 %v1666_v32  ;;  %v554_v43 = vrot.slane %v552_v30, 6  ;;  %v1810_v31 = vld [vmem:[%s2424_s1 + $0xf0] sm:$0xff] }
  0x2e   : > { %321 = vrot.lane.b32.xlu1 %v308_v27, %s1836_s20  ;;  %v549_v27 = vshrl.u32 %v530_v18, 16  ;;  %v852_v44 = vpack.c.b16 %v1979_v36, %v833_v35  ;;  %v557_v51 = vshrl.u32 %v531_v39, 16  ;;  %v560_v52 = vshll.u32 %v531_v39, 16  ;;  %v1671_v18 = vld [vmem:[%s1874_s17 + $0x4c] sm:$0x7] }
  0x2f   : > { %v488_v41 = vor.u32 %v487_v29, %v483_v25  ;;  %v851_v53 = vpack.c.b16 %v847_v11, %v831_v40  ;;  %v837_v25 = vunpack.c.l.b16 %v1996_v14  ;;  %v891_v28 = vpack.c.b16 %v847_v11, %v847_v11 }
  0x30   : > { %323 = vrot.lane.b32.xlu2 %v316_v37, %s1836_s20  ;;  %v506_v37 = vpack.c.b16 %v462_v58, %v462_v58  ;;  %v551_v42 = vrot.slane %v549_v27, 5  ;;  %v507_v58 = vpack.c.b16 %v1948_v47, %v1948_v47  ;;  %v865_v59 = vshll.u32 %v852_v44, 16 }
  0x31   : > { %v559_v60 = vrot.slane %v557_v51, 5  ;;  %v858_v0 = vshll.u32 %v851_v53, 16  ;;  %v863_v5 = vshrl.u32 %v852_v44, 16  ;;  %v856_v47 = vshrl.u32 %v851_v53, 16 }
  0x32   : > { %271 = vrot.lane.b32.xlu0 %v264_v34, %s1834_s18  ;;  %v495_v34 = vor.u32 %v494_v21, %v490_v20  ;;  %v510_v49 = vrot.slane %v506_v37, 5  ;;  %v511_v3 = vrot.slane %v507_v58, 5  ;;  %v867_v8 = vrot.slane %v865_v59, 1  ;;  %v2001_v20 = vld [vmem:[%s1874_s17 + $0x50] sm:$0x8] }
  0x33   : > { %v860_v17 = vrot.slane %v858_v0, 1  ;;  %v1668_v21 = vld [vmem:[%s1874_s17 + $0x54] sm:$0x3]  ;;  %v2006_v27 = vunpack.c.l.b16 %v1669_v15  ;;  %v835_v30 = vunpack.c.l.b16 %v2001_v20  ;;  %v892_v51 = vpack.c.b16 %v1979_v36, %v1979_v36  ;;  %v1808_v20 = vld [vmem:[%s2424_s1 + $0xe0] sm:$0xff] }
  0x34   : > { %v868_v24 = vor.u32 %v867_v8, %v863_v5  ;;  %v849_v32 = vunpack.c.l.b16 %v1668_v21  ;;  %v1673_v8 = vld [vmem:[%s1874_s17 + $0x5c] sm:$0x7] }
  0x35   : > { %v861_v33 = vor.u32 %v860_v17, %v856_v47  ;;  %v854_v39 = vpack.c.b16 %v2006_v27, %v837_v25  ;;  %v896_v59 = vrot.slane %v892_v51, 5  ;;  %v2028_v47 = vld [vmem:[%s1874_s17 + $0x48] sm:$0x8]  ;;  %v1718_v17 = vld [vmem:[%s1874_s17 + $0x4c] sm:$0x3] }
  0x36   : > { %498 = vrot.lane.b32.xlu1 %v481_v45, %s1835_s19  ;;  %v1670_v45 = vld [vmem:[%s1874_s17 + $0x44] sm:$0x7]  ;;  %v853_v11 = vpack.c.b16 %v849_v32, %v835_v30 }
  0x37   : > { %v911_v55 = vunpack.c.l.b16 %v1670_v45 }
  0x38   : > { %512 = vrot.lane.b32.xlu2 %v508_v61, %s1834_s18  ;;  %v562_v61 = vrot.slane %v560_v52, 6  ;;  %v879_v52 = vshll.u32 %v854_v39, 16  ;;  %v870_v36 = vshrl.u32 %v853_v11, 16 }
  0x39   : > { %v915_v2 = vpack.c.b16 %v911_v55, %v911_v55  ;;  %v872_v55 = vshll.u32 %v853_v11, 16 }
  0x3a   : > { %496 = vrot.lane.b32.xlu0 %v474_v54, %s1835_s19  ;;  %v555_v54 = vor.u32 %v554_v43, %v551_v42  ;;  %v895_v42 = vrot.slane %v891_v28, 5  ;;  %v1145_v28 = vunpack.c.l.b16 %v2028_v47 }
  0x3b   : > { %v920_v19 = vshrl.u32 %v915_v2, 16  ;;  %v874_v5 = vrot.slane %v872_v55, 1 }
  0x3e   : > { %564 = vrot.lane.b32.xlu1 %v539_v13, %s1836_s20  ;;  %v563_v13 = vor.u32 %v562_v61, %v559_v60  ;;  %v877_v60 = vshrl.u32 %v854_v39, 16  ;;  %v881_v61 = vrot.slane %v879_v52, 1 }
  0x40   : > { %566 = vrot.lane.b32.xlu2 %v547_v22, %s1836_s20  ;;  %v912_v22 = vunpack.c.l.b16 %v1671_v18  ;;  %v914_v18 = vunpack.c.l.b16 %v1673_v8 }
  0x42   : > { %514 = vrot.lane.b32.xlu0 %v509_v63, %s1834_s18  ;;  %v923_v63 = vshll.u32 %v915_v2, 16  ;;  %v916_v29 = vpack.c.b16 %v912_v22, %v912_v22  ;;  %v2023_v2 = vld [vmem:[%s1874_s17 + $0x50] sm:$0x8]  ;;  %v893_v22 = vpack.c.b16 %v849_v32, %v849_v32 }
  0x44   : > { %v925_v37 = vrot.slane %v923_v63, 6  ;;  %v928_v43 = vshrl.u32 %v916_v29, 16  ;;  %v931_v44 = vshll.u32 %v916_v29, 16  ;;  %v1147_v63 = vunpack.c.l.b16 %v2023_v2 }
  0x45   : > { %v1161_v29 = vunpack.c.l.b16 %v1718_v17 }
  0x46   : > { %502 = vrot.lane.b32.xlu1 %v495_v34, %s1835_s19  ;;  %v922_v34 = vrot.slane %v920_v19, 5  ;;  %v930_v53 = vrot.slane %v928_v43, 5  ;;  %v882_v19 = vor.u32 %v881_v61, %v877_v60 }
  0x47   : > { %v1165_v32 = vpack.c.b16 %v1161_v29, %v1145_v28 }
  0x48   : > { %516 = vrot.lane.b32.xlu2 %v510_v49, %s1834_s18  ;;  %v926_v45 = vor.u32 %v925_v37, %v922_v34 }
  0x4a   : > { %500 = vrot.lane.b32.xlu0 %v488_v41, %s1835_s19  ;;  %v1672_v41 = vld [vmem:[%s1874_s17 + $0x54] sm:$0x7] }
  0x4b   : > { %v913_v49 = vunpack.c.l.b16 %v1672_v41  ;;  %v1722_v41 = vld [vmem:[%s1874_s17 + $0x4c] sm:$0x7] }
  0x4d   : > { %v917_v58 = vpack.c.b16 %v913_v49, %v913_v49  ;;  %v894_v49 = vpack.c.b16 %v2006_v27, %v2006_v27  ;;  %v1170_v27 = vshrl.u32 %v1165_v32, 16 }
  0x4e   : > { %568 = vrot.lane.b32.xlu1 %v555_v54, %s1836_s20  ;;  %v933_v54 = vrot.slane %v931_v44, 6 }
  0x4f   : > { %v939_v15 = vshll.u32 %v917_v58, 16 }
  0x50   : > { %570 = vrot.lane.b32.xlu2 %v563_v13, %s1836_s20  ;;  %v934_v0 = vor.u32 %v933_v54, %v930_v53  ;;  %v936_v13 = vshrl.u32 %v917_v58, 16  ;;  %v1172_v54 = vshll.u32 %v1165_v32, 16  ;;  %v898_v58 = vrot.slane %v894_v49, 5 }
  0x51   : > { %v941_v37 = vrot.slane %v939_v15, 6 }
  0x52   : > { %518 = vrot.lane.b32.xlu0 %v511_v3, %s1834_s18  ;;  %v1719_v3 = vld [vmem:[%s1874_s17 + $0x54] sm:$0x3]  ;;  %v938_v34 = vrot.slane %v936_v13, 5 }
  0x53   : > { %v2033_v21 = vunpack.c.l.b16 %v1719_v3  ;;  %v1721_v3 = vld [vmem:[%s1874_s17 + $0x64] sm:$0x3] }
  0x54   : > { %v942_v11 = vor.u32 %v941_v37, %v938_v34 }
  0x55   : > { %v1166_v39 = vpack.c.b16 %v2033_v21, %v1147_v63 }
  0x56   : > { %885 = vrot.lane.b32.xlu1 %v868_v24, %s1835_s19  ;;  %v918_v24 = vpack.c.b16 %v914_v18, %v914_v18 }
  0x57   : > { %v1179_v51 = vshll.u32 %v1166_v39, 16 }
  0x58   : > { %899 = vrot.lane.b32.xlu2 %v895_v42, %s1834_s18  ;;  %v897_v42 = vrot.slane %v893_v22, 5  ;;  %v944_v43 = vshrl.u32 %v918_v24, 16  ;;  %v947_v44 = vshll.u32 %v918_v24, 16  ;;  %v2059_v22 = vld [vmem:[%s1874_s17 + $0x58] sm:$0x8] }
  0x59   : > { %v1181_v60 = vrot.slane %v1179_v51, 1  ;;  %v1720_v24 = vld [vmem:[%s1874_s17 + $0x5c] sm:$0x3] }
  0x5a   : > { %883 = vrot.lane.b32.xlu0 %v861_v33, %s1835_s19  ;;  %v875_v33 = vor.u32 %v874_v5, %v870_v36  ;;  %v946_v52 = vrot.slane %v944_v43, 5  ;;  %v949_v53 = vrot.slane %v947_v44, 6  ;;  %v1174_v36 = vrot.slane %v1172_v54, 1  ;;  %v1723_v5 = vld [vmem:[%s1874_s17 + $0x54] sm:$0x7] }
  0x5b   : > { %v1226_v15 = vunpack.c.l.b16 %v1723_v5  ;;  %v1149_v43 = vunpack.c.l.b16 %v2059_v22  ;;  %v1163_v44 = vunpack.c.l.b16 %v1720_v24  ;;  %v1206_v54 = vpack.c.b16 %v2033_v21, %v2033_v21 }
  0x5c   : > { %v950_v61 = vor.u32 %v949_v53, %v946_v52  ;;  %v1175_v37 = vor.u32 %v1174_v36, %v1170_v27 }
  0x5d   : > { %v1230_v34 = vpack.c.b16 %v1226_v15, %v1226_v15  ;;  %v1167_v52 = vpack.c.b16 %v1163_v44, %v1149_v43  ;;  %v1210_v27 = vrot.slane %v1206_v54, 5 }
  0x5e   : > { %951 = vrot.lane.b32.xlu1 %v926_v45, %s1836_s20  ;;  %v1225_v45 = vunpack.c.l.b16 %v1722_v41 }
  0x5f   : > { %v1242_v49 = vshrl.u32 %v1230_v34, 16  ;;  %v1245_v51 = vshll.u32 %v1230_v34, 16  ;;  %v1184_v15 = vshrl.u32 %v1167_v52, 16  ;;  %v1555_v34 = vld [vmem:[%s1874_s17 + $0x34] sm:$0x1] }
  0x60   : > { %953 = vrot.lane.b32.xlu2 %v934_v0, %s1836_s20  ;;  %v1229_v55 = vpack.c.b16 %v1225_v45, %v1225_v45  ;;  %v2050_v0 = vld [vmem:[%s1874_s17 + $0x60] sm:$0x8] }
  0x61   : > { %v1151_v18 = vunpack.c.l.b16 %v2050_v0 }
  0x62   : > { %901 = vrot.lane.b32.xlu0 %v896_v59, %s1834_s18  ;;  %v1177_v59 = vshrl.u32 %v1166_v39, 16  ;;  %v1234_v8 = vshrl.u32 %v1229_v55, 16  ;;  %v1237_v13 = vshll.u32 %v1229_v55, 16 }
  0x64   : > { %v1182_v17 = vor.u32 %v1181_v60, %v1177_v59  ;;  %v1236_v41 = vrot.slane %v1234_v8, 5  ;;  %v1247_v59 = vrot.slane %v1245_v51, 6 }
  0x66   : > { %889 = vrot.lane.b32.xlu1 %v882_v19, %s1835_s19  ;;  %v2056_v19 = vunpack.c.l.b16 %v1721_v3 }
  0x68   : > { %903 = vrot.lane.b32.xlu2 %v897_v42, %s1834_s18  ;;  %v1239_v42 = vrot.slane %v1237_v13, 6  ;;  %v1168_v32 = vpack.c.b16 %v2056_v19, %v1151_v18  ;;  %v1725_v13 = vld [vmem:[%s1874_s17 + $0x64] sm:$0x7] }
  0x69   : > { %v1228_v21 = vunpack.c.l.b16 %v1725_v13 }
  0x6a   : > { %887 = vrot.lane.b32.xlu0 %v875_v33, %s1835_s19  ;;  %v1205_v33 = vpack.c.b16 %v1161_v29, %v1161_v29  ;;  %v1240_v29 = vor.u32 %v1239_v42, %v1236_v41  ;;  %v1193_v55 = vshll.u32 %v1168_v32, 16  ;;  %v1191_v36 = vshrl.u32 %v1168_v32, 16 }
  0x6b   : > { %v1207_v41 = vpack.c.b16 %v1163_v44, %v1163_v44  ;;  %v1232_v42 = vpack.c.b16 %v1228_v21, %v1228_v21  ;;  %v198_v32 = vunpack.c.l.b16 %v1555_v34 }
  0x6c   : > { %v1209_v45 = vrot.slane %v1205_v33, 5  ;;  %v1195_v5 = vrot.slane %v1193_v55, 1 }
  0x6d   : > { %v205_v55 = vpack.c.b16 %v198_v32, %v197_v4 }
  0x6e   : > { %955 = vrot.lane.b32.xlu1 %v942_v11, %s1836_s20  ;;  %v1724_v11 = vld [vmem:[%s1874_s17 + $0x5c] sm:$0x7]  ;;  %v1196_v33 = vor.u32 %v1195_v5, %v1191_v36 }
  0x6f   : > { %v1227_v53 = vunpack.c.l.b16 %v1724_v11 }
  0x70   : > { %957 = vrot.lane.b32.xlu2 %v950_v61, %s1836_s20  ;;  %v1186_v61 = vshll.u32 %v1167_v52, 16  ;;  %v1258_v52 = vshrl.u32 %v1232_v42, 16 }
  0x71   : > { %v1231_v3 = vpack.c.b16 %v1227_v53, %v1227_v53  ;;  %v1261_v53 = vshll.u32 %v1232_v42, 16 }
  0x72   : > { %905 = vrot.lane.b32.xlu0 %v898_v58, %s1834_s18  ;;  %v2063_v39 = vpop.permute.xlu2 %269  ;;  %v1244_v58 = vrot.slane %v1242_v49, 5 }
  0x73   : > { %v1250_v24 = vshrl.u32 %v1231_v3, 16 }
  0x74   : > { %v1248_v8 = vor.u32 %v1247_v59, %v1244_v58  ;;  %v1208_v58 = vpack.c.b16 %v2056_v19, %v2056_v19  ;;  %v1557_v59 = vld [vmem:[%s1874_s17 + $0x3c] sm:$0x1] }
  0x75   : > { %v1252_v49 = vrot.slane %v1250_v24, 5  ;;  %v200_v1 = vunpack.c.l.b16 %v1557_v59  ;;  %v1559_v24 = vld [vmem:[%s1874_s17 + $0x44] sm:$0x1]  ;;  %v1575_v59 = vld [vmem:[%s1874_s17 + $0x3c] sm:$0x1] }
  0x76   : > { %1199 = vrot.lane.b32.xlu1 %v1182_v17, %s1835_s19  ;;  %v1188_v17 = vrot.slane %v1186_v61, 1  ;;  %v1260_v61 = vrot.slane %v1258_v52, 5  ;;  %v202_v34 = vunpack.c.l.b16 %v1559_v24 }
  0x78   : > { %1213 = vrot.lane.b32.xlu2 %v1209_v45, %s1834_s18  ;;  %v1189_v45 = vor.u32 %v1188_v17, %v1184_v15  ;;  %v206_v17 = vpack.c.b16 %v200_v1, %v199_v9  ;;  %v207_v6 = vpack.c.b16 %v202_v34, %v201_v26  ;;  %v1795_v9 = vld [vmem:[%s2424_s1 + $0x78] sm:$0xff] }
  0x79   : > { %717 = vmatpush.bf16.msra.mxu0 %v1795_v9  ;;  %v1789_v9 = vld [vmem:[%s2424_s1 + $0x48] sm:$0xff] }
  0x7a   : > { %1197 = vrot.lane.b32.xlu0 %v1175_v37, %s1835_s19  ;;  %v318_v60 = vpop.permute.xlu2 %317  ;;  %v1253_v37 = vshll.u32 %v1231_v3, 16  ;;  %v1263_v3 = vrot.slane %v1261_v53, 6 }
  0x7c   : > { %v1255_v51 = vrot.slane %v1253_v37, 6  ;;  %v1264_v13 = vor.u32 %v1263_v3, %v1260_v61  ;;  %v445_v61 = vunpack.c.l.b16 %v1575_v59  ;;  %v1792_v3 = vld [vmem:[%s2424_s1 + $0x60] sm:$0xff]  ;;  %v1581_v59 = vld [vmem:[%s1874_s17 + $0x54] sm:$0x1] }
  0x7e   : > { %1265 = vrot.lane.b32.xlu1 %v1240_v29, %s1836_s20  ;;  %v1211_v29 = vrot.slane %v1207_v41, 5  ;;  %v1256_v44 = vor.u32 %v1255_v51, %v1252_v49 }
  0x80   : > { %1267 = vrot.lane.b32.xlu2 %v1248_v8, %s1836_s20  ;;  %v1212_v8 = vrot.slane %v1208_v58, 5  ;;  %v1787_v58 = vld [vmem:[%s2424_s1 + $0x38] sm:$0xff] }
  0x81   : > { %792 = vmatpush.bf16.msra.mxu1 %v1787_v58 }
  0x82   : > { %1215 = vrot.lane.b32.xlu0 %v1210_v27, %s1834_s18  ;;  %v320_v11 = vpop.permute.xlu2 %319 }
  0x86   : > { %1203 = vrot.lane.b32.xlu1 %v1196_v33, %s1835_s19 }
  0x88   : > { %v266_v54 = vpop.permute.xlu1 %265  ;;  %1217 = vrot.lane.b32.xlu2 %v1211_v29, %s1834_s18 }
  0x8a   : > { %1201 = vrot.lane.b32.xlu0 %v1189_v45, %s1835_s19  ;;  %v324_v36 = vpop.permute.xlu2 %323  ;;  %v1561_v45 = vld [vmem:[%s1874_s17 + $0x4c] sm:$0x1] }
  0x8b   : > { %v204_v32 = vunpack.c.l.b16 %v1561_v45 }
  0x8c   : > { %v250_v27 = vpop.permute.xlu0 %249 }
  0x8d   : > { %v328_v5 = vsel %vm325_vm0, %v205_v55, %v250_v27  ;;  %v208_v16 = vpack.c.b16 %v204_v32, %v203_v10  ;;  %v1786_v27 = vld [vmem:[%s2424_s1 + $0x30] sm:$0xff]  ;;  %v1783_v32 = vld [vmem:[%s2424_s1 + $0x18] sm:$0xff] }
  0x8e   : > { %v340_v4 = vsel %vm338_vm1, %v328_v5, %v266_v54  ;;  %1269 = vrot.lane.b32.xlu1 %v1256_v44, %s1836_s20  ;;  %v1793_v44 = vld [vmem:[%s2424_s1 + $0x68] sm:$0xff]  ;;  %793 = vmatpush.bf16.msra.mxu1 %v1786_v27 }
  0x8f   : > { %v349_v19 = vsel %vm347_vm2, %v340_v4, %v318_v60 }
  0x90   : > { %356 = vst.sshfl [vmem:[#allocation1] sm:$0xff pattern:$0x73625140] %v349_v19  ;;  %v268_v15 = vpop.permute.xlu1 %267  ;;  %1271 = vrot.lane.b32.xlu2 %v1264_v13, %s1836_s20  ;;  %v1577_v13 = vld [vmem:[%s1874_s17 + $0x44] sm:$0x1]  ;;  %v452_v19 = vpack.c.b16 %v445_v61, %v444_v12  ;;  %v451_v61 = vunpack.c.l.b16 %v1581_v59 }
  0x91   : > { %v447_v24 = vunpack.c.l.b16 %v1577_v13  ;;  %v1784_v12 = vld [vmem:[%s2424_s1 + $0x20] sm:$0xff] }
  0x92   : > { %1219 = vrot.lane.b32.xlu0 %v1212_v8, %s1834_s18  ;;  %v513_v37 = vpop.permute.xlu2 %512 }
  0x94   : > { %v252_v21 = vpop.permute.xlu0 %251 }
  0x95   : > { %v331_v33 = vsel %vm325_vm0, %v206_v17, %v252_v21  ;;  %v1791_v17 = vld [vmem:[%s2424_s1 + $0x58] sm:$0xff] }
  0x96   : > { %v342_v41 = vsel %vm338_vm1, %v331_v33, %v268_v15 }
  0x97   : > { %v351_v42 = vsel %vm347_vm2, %v342_v41, %v320_v11  ;;  %v1794_v11 = vld [vmem:[%s2424_s1 + $0x70] sm:$0xff]  ;;  %v453_v41 = vpack.c.b16 %v447_v24, %v446_v62 }
  0x98   : > { %363 = vst.sshfl [vmem:[#allocation1 + $0x20] sm:$0xff pattern:$0x73625140] %v351_v42  ;;  %v256_v60 = vpop.permute.xlu1 %255  ;;  %718 = vmatpush.bf16.msra.mxu0 %v1794_v11  ;;  %v2114_v52 = vld [vmem:[#allocation1 + $0x1] ss:$4 sm:$0xff]  ;;  %v449_v11 = vunpack.c.l.b16 %v1579_v50 }
  0x99   : > { %v2120_v54 = vld [vmem:[#allocation1 + $0x2] ss:$4 sm:$0xff]  ;;  %v337_v7 = vsel %vm325_vm0, %v208_v16, %v256_v60  ;;  %v1661_v50 = vld [vmem:[%s1874_s17 + $0x4c] sm:$0x1] }
  0x9a   : > { %v2112_v29 = vpop.permute.xlu2 %566  ;;  %v1788_v16 = vld [vmem:[%s2424_s1 + $0x40] sm:$0xff] }
  0x9c   : > { %v254_v49 = vpop.permute.xlu0 %253  ;;  %719 = vmatpush.bf16.msra.mxu0 %v1793_v44 }
  0x9d   : > { %v334_v51 = vsel %vm325_vm0, %v207_v6, %v254_v49 }
  0x9e   : > { %v344_v53 = vsel %vm338_vm1, %v334_v51, %v2063_v39 }
  0x9f   : > { %v2139_v1 = vld [vmem:[#allocation1 + $0x21] ss:$4 sm:$0xff]  ;;  %v2141_v4 = vld [vmem:[#allocation1 + $0x22] ss:$4 sm:$0xff] }
  0xa0   : > { %v322_v26 = vpop.permute.xlu1 %321  ;;  %720 = vmatpush.bf16.msra.mxu0 %v1792_v3 }
  0xa1   : > { %v353_v55 = vsel %vm347_vm2, %v344_v53, %v322_v26  ;;  %v1782_v26 = vld [vmem:[%s2424_s1 + $0x10] sm:$0xff] }
  0xa2   : > { %370 = vst.sshfl [vmem:[#allocation1] sm:$0xff pattern:$0x73625140] %v353_v55  ;;  %v517_v15 = vpop.permute.xlu2 %516 }
  0xa4   : > { %v272_v10 = vpop.permute.xlu0 %271  ;;  %721 = vmatpush.bf16.msra.mxu0 %v1791_v17 }
  0xa5   : > { %v346_v39 = vsel %vm338_vm1, %v337_v7, %v272_v10  ;;  %v454_v7 = vpack.c.b16 %v449_v11, %v448_v56  ;;  %v1780_v56 = vld [vmem:[%s2424_s1] sm:$0xff] }
  0xa6   : > { %v355_v5 = vsel %vm347_vm2, %v346_v39, %v324_v36  ;;  %v1785_v36 = vld [vmem:[%s2424_s1 + $0x28] sm:$0xff] }
  0xa7   : > { %375 = vst.sshfl [vmem:[#allocation1 + $0x20] sm:$0xff pattern:$0x73625140] %v355_v5  ;;  %794 = vmatpush.bf16.msra.mxu1 %v1785_v36 }
  0xa8   : > { %v499_v8 = vpop.permute.xlu1 %498  ;;  %722 = vmatpush.bf16.msra.mxu0 %v1790_v57 }
  0xa9   : > { %v2159_v34 = vld [vmem:[#allocation1 + $0x1] ss:$4 sm:$0xff]  ;;  %v2164_v45 = vld [vmem:[#allocation1 + $0x2] ss:$4 sm:$0xff] }
  0xaa   : > { %v571_v62 = vpop.permute.xlu2 %570  ;;  %v1572_v38 = vrot.slane %v2159_v34, 9  ;;  %v1811_v34 = vld [vmem:[%s2424_s1 + $0xf8] sm:$0xff] }
  0xab   : > { %795 = vmatpush.bf16.msra.mxu1 %v1784_v12  ;;  %1418 = vmatpush.bf16.msra.mxu3 %v1811_v34 }
  0xac   : > { %v497_v21 = vpop.permute.xlu0 %496  ;;  %723 = vmatpush.bf16.msra.mxu0 %v1789_v9 }
  0xad   : > { %v574_v33 = vsel %vm325_vm0, %v452_v19, %v497_v21  ;;  %v455_v19 = vpack.c.b16 %v451_v61, %v450_v46  ;;  %v1837_v21 = vmov 0  }
  0xae   : > { %v585_v42 = vsel %vm338_vm1, %v574_v33, %v513_v37  ;;  %v577_v37 = vsel %vm325_vm0, %v453_v41, %v499_v8  ;;  %v2182_v53 = vld [vmem:[#allocation1 + $0x21] ss:$4 sm:$0xff]  ;;  %v2184_v55 = vld [vmem:[#allocation1 + $0x22] ss:$4 sm:$0xff]  ;;  %1455 = vst.msk [vmem:[%s2359_s16] sm:$0xf] %vm1454_vm10, %v1837_v21 }
  0xaf   : > { %796 = vmatpush.bf16.msra.mxu1 %v1783_v32  ;;  %v1801_v32 = vld [vmem:[%s2424_s1 + $0xa8] sm:$0xff]  ;;  %1419 = vmatpush.bf16.msra.mxu3 %v1810_v31  ;;  %1457 = vst.msk [vmem:[%s2359_s16 + $0x4] sm:$0x7] %vm1456_vm11, %v1837_v21 }
  0xb0   : > { %v565_v60 = vpop.permute.xlu1 %564  ;;  %724 = vmatpush.bf16.msra.mxu0 %v1788_v16  ;;  %1106 = vmatpush.bf16.msra.mxu2 %v1801_v32  ;;  %v1800_v16 = vld [vmem:[%s2424_s1 + $0xa0] sm:$0xff]  ;;  %1458 = vst.msk [vmem:[%s2359_s16 + $0x8] sm:$0xf] %vm1454_vm10, %v1837_v21 }
  0xb1   : > { %v593_v6 = vsel %vm347_vm2, %v585_v42, %v565_v60  ;;  %1459 = vst.msk [vmem:[%s2359_s16 + $0xc] sm:$0x7] %vm1456_vm11, %v1837_v21 }
  0xb2   : > { %600 = vst.sshfl [vmem:[#allocation1] sm:$0xff pattern:$0x73625140] %v593_v6  ;;  %v2195_v5 = vpop.permute.xlu2 %899 }
  0xb3   : > { %797 = vmatpush.bf16.msra.mxu1 %v1782_v26  ;;  %1460 = vst.msk [vmem:[%s2359_s16 + $0x10] sm:$0xf] %vm1454_vm10, %v1837_v21 }
  0xb4   : > { %v515_v49 = vpop.permute.xlu0 %514  ;;  %1107 = vmatpush.bf16.msra.mxu2 %v1800_v16  ;;  %1461 = vst.msk [vmem:[%s2359_s16 + $0x14] sm:$0x7] %vm1456_vm11, %v1837_v21 }
  0xb5   : > { %v587_v51 = vsel %vm338_vm1, %v577_v37, %v515_v49  ;;  %1462 = vst.msk [vmem:[%s2359_s16 + $0x18] sm:$0xf] %vm1454_vm10, %v1837_v21 }
  0xb6   : > { %v595_v44 = vsel %vm347_vm2, %v587_v51, %v2112_v29  ;;  %v1781_v29 = vld [vmem:[%s2424_s1 + $0x8] sm:$0xff]  ;;  %1463 = vst.msk [vmem:[%s2359_s16 + $0x1c] sm:$0x7] %vm1456_vm11, %v1837_v21 }
  0xb7   : > { %607 = vst.sshfl [vmem:[#allocation1 + $0x20] sm:$0xff pattern:$0x73625140] %v595_v44  ;;  %798 = vmatpush.bf16.msra.mxu1 %v1781_v29 }
  0xb8   : > { %v503_v58 = vpop.permute.xlu1 %502  ;;  %1464 = vst.msk [vmem:[%s2359_s16 + $0x20] sm:$0xf] %vm1454_vm10, %v1837_v21 }
  0xb9   : > { %v602_v10 = vld [vmem:[#allocation1 + $0x1] ss:$4 sm:$0xff]  ;;  %v605_v39 = vld [vmem:[#allocation1 + $0x2] ss:$4 sm:$0xff]  ;;  %v583_v46 = vsel %vm325_vm0, %v455_v19, %v503_v58  ;;  %v834_v58 = vunpack.c.l.b16 %v1661_v50  ;;  %1465 = vst.msk [vmem:[%s2359_s16 + $0x24] sm:$0x7] %vm1456_vm11, %v1837_v21 }
  0xba   : > { %v1590_v8 = vrot.slane %v602_v10, 9  ;;  %v626_v13 = vrot.slane %v605_v39, 7  ;;  %v954_v9 = vpop.permute.xlu2 %953  ;;  %v1799_v39 = vld [vmem:[%s2424_s1 + $0x98] sm:$0xff]  ;;  %1466 = vst.msk [vmem:[%s2359_s16 + $0x28] sm:$0xf] %vm1454_vm10, %v1837_v21 }
  0xbb   : > { %799 = vmatpush.bf16.msra.mxu1 %v1780_v56  ;;  %v840_v29 = vpack.c.b16 %v834_v58, %v833_v35  ;;  %1108 = vmatpush.bf16.msra.mxu2 %v1799_v39  ;;  %v1570_v35 = vrot.slane %v2114_v52, 9  ;;  %v1665_v52 = vld [vmem:[%s1874_s17 + $0x5c] sm:$0x1]  ;;  %1467 = vst.msk [vmem:[%s2359_s16 + $0x2c] sm:$0x7] %vm1456_vm11, %v1837_v21 }
  0xbc   : > { %v501_v3 = vpop.permute.xlu0 %500  ;;  %v627_v12 = vsel %vm2206_vm9, %v1590_v8, %v626_v13  ;;  %1468 = vst.msk [vmem:[%s2359_s16 + $0x30] sm:$0xf] %vm1454_vm10, %v1837_v21 }
  0xbd   : > { %v580_v27 = vsel %vm325_vm0, %v454_v7, %v501_v3  ;;  %1469 = vst.msk [vmem:[%s2359_s16 + $0x34] sm:$0x7] %vm1456_vm11, %v1837_v21 }
  0xbe   : > { %v589_v17 = vsel %vm338_vm1, %v580_v27, %v517_v15  ;;  %v609_v24 = vld [vmem:[#allocation1 + $0x21] ss:$4 sm:$0xff]  ;;  %v612_v57 = vld [vmem:[#allocation1 + $0x22] ss:$4 sm:$0xff]  ;;  %1470 = vst.msk [vmem:[%s2359_s16 + $0x38] sm:$0xf] %vm1454_vm10, %v1837_v21 }
  0xbf   : > { %v1591_v41 = vrot.slane %v609_v24, 9  ;;  %v630_v42 = vrot.slane %v612_v57, 7  ;;  %1109 = vmatpush.bf16.msra.mxu2 %v1798_v48  ;;  %v393_v57 = vrot.slane %v2141_v4, 7  ;;  %1471 = vst.msk [vmem:[%s2359_s16 + $0x3c] sm:$0x7] %vm1456_vm11, %v1837_v21 }
  0xc0   : > { %v569_v36 = vpop.permute.xlu1 %568  ;;  %1762 = vst.msk [vmem:[%s2359_s16 + $0x60] sm:$0xf] %vm1454_vm10, %v1837_v21 }
  0xc1   : > { %v597_v33 = vsel %vm347_vm2, %v589_v17, %v569_v36  ;;  %v631_v11 = vsel %vm2206_vm9, %v1591_v41, %v630_v42  ;;  %v1659_v17 = vld [vmem:[%s1874_s17 + $0x44] sm:$0x1]  ;;  %v389_v36 = vrot.slane %v2120_v54, 7  ;;  %v1573_v54 = vrot.slane %v2182_v53, 9  ;;  %1763 = vst.msk [vmem:[%s2359_s16 + $0x64] sm:$0x7] %vm1456_vm11, %v1837_v21 }
  0xc2   : > { %614 = vst.sshfl [vmem:[#allocation1] sm:$0xff pattern:$0x73625140] %v597_v33  ;;  %v2237_v13 = vpop.permute.xlu2 %903  ;;  %v1571_v33 = vrot.slane %v2139_v1, 9  ;;  %v401_v42 = vrot.slane %v2184_v55, 7 }
  0xc3   : > { %657 = vst [vmem:[#allocation1] ss:$4 sm:$0xff] %v627_v12  ;;  %v1797_v12 = vld [vmem:[%s2424_s1 + $0x88] sm:$0xff]  ;;  %v390_v1 = vsel %vm2206_vm9, %v1570_v35, %v389_v36 }
  0xc4   : > { %v519_v15 = vpop.permute.xlu0 %518  ;;  %1110 = vmatpush.bf16.msra.mxu2 %v1797_v12  ;;  %v402_v32 = vsel %vm2206_vm9, %v1573_v54, %v401_v42  ;;  %1764 = vst.msk [vmem:[%s2359_s16 + $0x68] sm:$0xf] %vm1454_vm10, %v1837_v21 }
  0xc5   : > { %v591_v60 = vsel %vm338_vm1, %v583_v46, %v519_v15  ;;  %v397_v46 = vrot.slane %v2164_v45, 7  ;;  %v832_v15 = vunpack.c.l.b16 %v1659_v17  ;;  %v394_v45 = vsel %vm2206_vm9, %v1571_v33, %v393_v57  ;;  %v1806_v33 = vld [vmem:[%s2424_s1 + $0xd0] sm:$0xff]  ;;  %1765 = vst.msk [vmem:[%s2359_s16 + $0x6c] sm:$0x7] %vm1456_vm11, %v1837_v21 }
  0xc6   : > { %v599_v6 = vsel %vm347_vm2, %v591_v60, %v571_v62  ;;  %v1796_v60 = vld [vmem:[%s2424_s1 + $0x80] sm:$0xff]  ;;  %1766 = vst.msk [vmem:[%s2359_s16 + $0x40] sm:$0xf] %vm1454_vm10, %v1837_v21 }
  0xc7   : > { %619 = vst.sshfl [vmem:[#allocation1 + $0x20] sm:$0xff pattern:$0x73625140] %v599_v6  ;;  %v398_v53 = vsel %vm2206_vm9, %v1572_v38, %v397_v46  ;;  %v839_v6 = vpack.c.b16 %v832_v15, %v831_v40  ;;  %v1809_v40 = vld [vmem:[%s2424_s1 + $0xe8] sm:$0xff] }
  0xc8   : > { %v886_v37 = vpop.permute.xlu1 %885  ;;  %1111 = vmatpush.bf16.msra.mxu2 %v1796_v60  ;;  %1420 = vmatpush.bf16.msra.mxu3 %v1809_v40  ;;  %v1711_v15 = vld [vmem:[%s1874_s17 + $0x4c] sm:$0x1]  ;;  %1767 = vst.msk [vmem:[%s2359_s16 + $0x48] sm:$0xf] %vm1454_vm10, %v1837_v21 }
  0xc9   : > { %v615_v49 = vld [vmem:[#allocation1 + $0x1] ss:$4 sm:$0xff]  ;;  %v617_v51 = vld [vmem:[#allocation1 + $0x2] ss:$4 sm:$0xff]  ;;  %v964_v56 = vsel %vm325_vm0, %v840_v29, %v886_v37  ;;  %v1663_v37 = vld [vmem:[%s1874_s17 + $0x54] sm:$0x1] }
  0xca   : > { %v1592_v26 = vrot.slane %v615_v49, 9  ;;  %v634_v62 = vrot.slane %v617_v51, 7  ;;  %660 = vst [vmem:[#allocation1 + $0x1] ss:$4 sm:$0xff] %v631_v11  ;;  %v958_v55 = vpop.permute.xlu2 %957  ;;  %v836_v11 = vunpack.c.l.b16 %v1663_v37  ;;  %v1807_v29 = vld [vmem:[%s2424_s1 + $0xd8] sm:$0xff] }
  0xcb   : > { %1768 = vst.msk [vmem:[%s2359_s16 + $0x50] sm:$0xf] %vm1454_vm10, %v1837_v21 }
  0xcc   : > { %v635_v44 = vsel %vm2206_vm9, %v1592_v26, %v634_v62  ;;  %v884_v59 = vpop.permute.xlu0 %883  ;;  %v841_v14 = vpack.c.b16 %v836_v11, %v835_v30  ;;  %1421 = vmatpush.bf16.msra.mxu3 %v1808_v20  ;;  %1769 = vst.msk [vmem:[%s2359_s16 + $0x58] sm:$0xf] %vm1454_vm10, %v1837_v21 }
  0xcd   : > { %663 = vst [vmem:[#allocation1 + $0x2] ss:$4 sm:$0xff] %v635_v44  ;;  %v961_v49 = vsel %vm325_vm0, %v839_v6, %v884_v59 }
  0xce   : > { %v620_v7 = vld [vmem:[#allocation1 + $0x21] ss:$4 sm:$0xff]  ;;  %v622_v10 = vld [vmem:[#allocation1 + $0x22] ss:$4 sm:$0xff]  ;;  %v972_v26 = vsel %vm338_vm1, %v961_v49, %v2195_v5  ;;  %v1717_v49 = vld [vmem:[%s1874_s17 + $0x64] sm:$0x1] }
  0xcf   : > { %v1593_v61 = vrot.slane %v620_v7, 9  ;;  %v638_v3 = vrot.slane %v622_v10, 7  ;;  %v1152_v40 = vunpack.c.l.b16 %v1717_v49  ;;  %1770 = vst.msk [vmem:[%s2359_s16 + $0x44] sm:$0x4] %vm1482_vm12, %v1837_v21 }
  0xd0   : > { %v952_v27 = vpop.permute.xlu1 %951  ;;  %1422 = vmatpush.bf16.msra.mxu3 %v1807_v29  ;;  %1771 = vst.msk [vmem:[%s2359_s16 + $0x4c] sm:$0x4] %vm1482_vm12, %v1837_v21 }
  0xd1   : > { %v639_v8 = vsel %vm2206_vm9, %v1593_v61, %v638_v3  ;;  %v980_v62 = vsel %vm347_vm2, %v972_v26, %v952_v27  ;;  %v1713_v3 = vld [vmem:[%s1874_s17 + $0x54] sm:$0x1]  ;;  %1772 = vst.msk [vmem:[%s2359_s16 + $0x54] sm:$0x4] %vm1482_vm12, %v1837_v21 }
  0xd2   : > { %666 = vst [vmem:[#allocation1 + $0x3] ss:$4 sm:$0xff] %v639_v8  ;;  %v2291_v7 = vpop.permute.xlu2 %1213  ;;  %v1148_v48 = vunpack.c.l.b16 %v1713_v3 }
  0xd3   : > { %1773 = vst.msk [vmem:[%s2359_s16 + $0x5c] sm:$0x4] %vm1482_vm12, %v1837_v21 }
  0xd4   : > { %v902_v19 = vpop.permute.xlu0 %901  ;;  %v1154_v46 = vpack.c.b16 %v1148_v48, %v1147_v63  ;;  %1423 = vmatpush.bf16.msra.mxu3 %v1806_v33 }
  0xd5   : > { %v974_v23 = vsel %vm338_vm1, %v964_v56, %v902_v19 }
  0xd6   : > { %v982_v24 = vsel %vm347_vm2, %v974_v23, %v954_v9  ;;  %v838_v9 = vunpack.c.l.b16 %v1665_v52 }
  0xd7   : > { %994 = vst.sshfl [vmem:[#allocation1 + $0x20] sm:$0xff pattern:$0x73625140] %v982_v24 }
  0xd8   : > { %v890_v41 = vpop.permute.xlu1 %889  ;;  %v842_v51 = vpack.c.b16 %v838_v9, %v837_v25 }
  0xd9   : > { %v667_v4 = vld.sshfl [vmem:[#allocation1] sm:$0xff pattern:$0x73625140] }
  0xda   : > { %725 = vmatmul.bf16.vlgmr.msra.gmra.mxu0 %v667_v4  ;;  %732 = vst [vmem:[#allocation1] ss:$4 sm:$0xff] %v390_v1  ;;  %v970_v44 = vsel %vm325_vm0, %v842_v51, %v890_v41  ;;  %v1268_v57 = vpop.permute.xlu2 %1267  ;;  %v1805_v1 = vld [vmem:[%s2424_s1 + $0xc8] sm:$0xff]  ;;  %v1146_v4 = vunpack.c.l.b16 %v1711_v15  ;;  %v1715_v51 = vld [vmem:[%s1874_s17 + $0x5c] sm:$0x1] }
  0xdb   : > { %735 = vst [vmem:[#allocation1 + $0x1] ss:$4 sm:$0xff] %v394_v45  ;;  %1424 = vmatpush.bf16.msra.mxu3 %v1805_v1  ;;  %v1150_v26 = vunpack.c.l.b16 %v1715_v51 }
  0xdc   : > { %738 = vst [vmem:[#allocation1 + $0x2] ss:$4 sm:$0xff] %v398_v53  ;;  %v888_v50 = vpop.permute.xlu0 %887 }
  0xdd   : > { %741 = vst [vmem:[#allocation1 + $0x3] ss:$4 sm:$0xff] %v402_v32  ;;  %v967_v30 = vsel %vm325_vm0, %v841_v14, %v888_v50  ;;  %v1804_v32 = vld [vmem:[%s2424_s1 + $0xc0] sm:$0xff]  ;;  %v1153_v50 = vpack.c.b16 %v1146_v4, %v1145_v28  ;;  %v1156_v14 = vpack.c.b16 %v1152_v40, %v1151_v18 }
  0xde   : > { %v996_v10 = vld [vmem:[#allocation1 + $0x21] ss:$4 sm:$0xff]  ;;  %v999_v39 = vld [vmem:[#allocation1 + $0x22] ss:$4 sm:$0xff]  ;;  %v976_v27 = vsel %vm338_vm1, %v967_v30, %v2237_v13 }
  0xdf   : > { %v1675_v52 = vrot.slane %v996_v10, 9  ;;  %v1017_v41 = vrot.slane %v999_v39, 7  ;;  %1425 = vmatpush.bf16.msra.mxu3 %v1804_v32 }
  0xe0   : > { %v956_v16 = vpop.permute.xlu1 %955 }
  0xe1   : > { %v984_v8 = vsel %vm347_vm2, %v976_v27, %v956_v16  ;;  %v1018_v45 = vsel %vm2206_vm9, %v1675_v52, %v1017_v41 }
  0xe2   : > { %v1218_v11 = vpop.permute.xlu2 %1217 }
  0xe4   : > { %v742_v25 = vld.sshfl [vmem:[#allocation1] sm:$0xff pattern:$0x73625140]  ;;  %v906_v58 = vpop.permute.xlu0 %905 }
  0xe5   : > { %800 = vmatmul.bf16.vlgmr.msra.gmra.mxu1 %v742_v25  ;;  %987 = vst.sshfl [vmem:[#allocation1] sm:$0xff pattern:$0x73625140] %v980_v62  ;;  %v978_v59 = vsel %vm338_vm1, %v970_v44, %v906_v58  ;;  %v1155_v25 = vpack.c.b16 %v1150_v26, %v1149_v43 }
  0xe6   : > { %v986_v5 = vsel %vm347_vm2, %v978_v59, %v958_v55 }
  0xe7   : > { %1006 = vst.sshfl [vmem:[#allocation1 + $0x20] sm:$0xff pattern:$0x73625140] %v986_v5 }
  0xe8   : > { %v1200_v61 = vpop.permute.xlu1 %1199 }
  0xe9   : > { %v1278_v60 = vsel %vm325_vm0, %v1154_v46, %v1200_v61 }
  0xea   : > { %v1272_v58 = vpop.permute.xlu2 %1271 }
  0xec   : > { %v1198_v56 = vpop.permute.xlu0 %1197  ;;  %v989_v19 = vld [vmem:[#allocation1 + $0x1] ss:$4 sm:$0xff]  ;;  %v992_v17 = vld [vmem:[#allocation1 + $0x2] ss:$4 sm:$0xff] }
  0xed   : > { %1001 = vst.sshfl [vmem:[#allocation1] sm:$0xff pattern:$0x73625140] %v984_v8  ;;  %v1674_v23 = vrot.slane %v989_v19, 9  ;;  %v1013_v35 = vrot.slane %v992_v17, 7  ;;  %v1275_v16 = vsel %vm325_vm0, %v1153_v50, %v1198_v56 }
  0xee   : > { %v1007_v36 = vld [vmem:[#allocation1 + $0x21] ss:$4 sm:$0xff]  ;;  %v1009_v24 = vld [vmem:[#allocation1 + $0x22] ss:$4 sm:$0xff]  ;;  %v1286_v44 = vsel %vm338_vm1, %v1275_v16, %v2291_v7 }
  0xef   : > { %v1014_v13 = vsel %vm2206_vm9, %v1674_v23, %v1013_v35  ;;  %v1677_v12 = vrot.slane %v1007_v36, 9  ;;  %v1025_v38 = vrot.slane %v1009_v24, 7 }
  0xf0   : > { %1044 = vst [vmem:[#allocation1] ss:$4 sm:$0xff] %v1014_v13  ;;  %v1266_v54 = vpop.permute.xlu1 %1265 }
  0xf1   : > { %v1026_v42 = vsel %vm2206_vm9, %v1677_v12, %v1025_v38  ;;  %v1294_v47 = vsel %vm347_vm2, %v1286_v44, %v1266_v54 }
  0xf2   : > { %1053 = vst [vmem:[#allocation1 + $0x3] ss:$4 sm:$0xff] %v1026_v42  ;;  %v1825_v42 = vld [vmem:[%s2425_s2] ss:$0 sm:$0xff] }
  0xf4   : > { %v1216_v2 = vpop.permute.xlu0 %1215  ;;  %v1002_v63 = vld [vmem:[#allocation1 + $0x1] ss:$4 sm:$0xff]  ;;  %v1004_v34 = vld [vmem:[#allocation1 + $0x2] ss:$4 sm:$0xff] }
  0xf5   : > { %v1288_v53 = vsel %vm338_vm1, %v1278_v60, %v1216_v2  ;;  %v1676_v55 = vrot.slane %v1002_v63, 9  ;;  %v1021_v6 = vrot.slane %v1004_v34, 7  ;;  %1047 = vst [vmem:[#allocation1 + $0x1] ss:$4 sm:$0xff] %v1018_v45 }
  0xf6   : > { %v1296_v9 = vsel %vm347_vm2, %v1288_v53, %v1268_v57 }
  0xf7   : > { %v1022_v37 = vsel %vm2206_vm9, %v1676_v55, %v1021_v6  ;;  %1308 = vst.sshfl [vmem:[#allocation1 + $0x20] sm:$0xff pattern:$0x73625140] %v1296_v9 }
  0xf8   : > { %1050 = vst [vmem:[#allocation1 + $0x2] ss:$4 sm:$0xff] %v1022_v37  ;;  %v1204_v31 = vpop.permute.xlu1 %1203 }
  0xf9   : > { %v1284_v59 = vsel %vm325_vm0, %v1156_v14, %v1204_v31 }
  0xfc   : > { %v1202_v62 = vpop.permute.xlu0 %1201 }
  0xfd   : > { %v1281_v10 = vsel %vm325_vm0, %v1155_v25, %v1202_v62 }
  0xfe   : > { %v1310_v20 = vld [vmem:[#allocation1 + $0x21] ss:$4 sm:$0xff]  ;;  %v1313_v30 = vld [vmem:[#allocation1 + $0x22] ss:$4 sm:$0xff]  ;;  %v1290_v0 = vsel %vm338_vm1, %v1281_v10, %v1218_v11 }
  0xff   : > { %v1054_v28 = vld.sshfl [vmem:[#allocation1] sm:$0xff pattern:$0x73625140]  ;;  %v1727_v8 = vrot.slane %v1310_v20, 9  ;;  %v1331_v48 = vrot.slane %v1313_v30, 7 }
 0x100   : > { %1112 = vmatmul.bf16.vlgmr.msra.gmra.mxu2 %v1054_v28  ;;  %1301 = vst.sshfl [vmem:[#allocation1] sm:$0xff pattern:$0x73625140] %v1294_v47  ;;  %v1270_v5 = vpop.permute.xlu1 %1269 }
 0x101   : > { %v1298_v22 = vsel %vm347_vm2, %v1290_v0, %v1270_v5  ;;  %v1332_v24 = vsel %vm2206_vm9, %v1727_v8, %v1331_v48 }
 0x104   : > { %v1220_v39 = vpop.permute.xlu0 %1219 }
 0x105   : > { %v1292_v7 = vsel %vm338_vm1, %v1284_v59, %v1220_v39 }
 0x106   : > { %v1300_v61 = vsel %vm347_vm2, %v1292_v7, %v1272_v58 }
 0x107   : > { %1320 = vst.sshfl [vmem:[#allocation1 + $0x20] sm:$0xff pattern:$0x73625140] %v1300_v61  ;;  %v1303_v18 = vld [vmem:[#allocation1 + $0x1] ss:$4 sm:$0xff] }
 0x108   : > { %v1306_v43 = vld [vmem:[#allocation1 + $0x2] ss:$4 sm:$0xff]  ;;  %v1726_v3 = vrot.slane %v1303_v18, 9 }
 0x109   : > { %1315 = vst.sshfl [vmem:[#allocation1] sm:$0xff pattern:$0x73625140] %v1298_v22  ;;  %v1327_v29 = vrot.slane %v1306_v43, 7 }
 0x10b   : > { %v1328_v27 = vsel %vm2206_vm9, %v1726_v3, %v1327_v29 }
 0x10c   : > { %1358 = vst [vmem:[#allocation1] ss:$4 sm:$0xff] %v1328_v27 }
 0x10e   : > { %v1321_v56 = vld [vmem:[#allocation1 + $0x21] ss:$4 sm:$0xff]  ;;  %v1323_v19 = vld [vmem:[#allocation1 + $0x22] ss:$4 sm:$0xff] }
 0x10f   : > { %v1729_v17 = vrot.slane %v1321_v56, 9  ;;  %v1339_v23 = vrot.slane %v1323_v19, 7 }
 0x110   : > { %v1316_v35 = vld [vmem:[#allocation1 + $0x1] ss:$4 sm:$0xff]  ;;  %v1318_v36 = vld [vmem:[#allocation1 + $0x2] ss:$4 sm:$0xff] }
 0x111   : > { %v1728_v33 = vrot.slane %v1316_v35, 9  ;;  %v1335_v57 = vrot.slane %v1318_v36, 7  ;;  %v1340_v13 = vsel %vm2206_vm9, %v1729_v17, %v1339_v23  ;;  %1361 = vst [vmem:[#allocation1 + $0x1] ss:$4 sm:$0xff] %v1332_v24 }
 0x112   : > { %1367 = vst [vmem:[#allocation1 + $0x3] ss:$4 sm:$0xff] %v1340_v13 }
 0x113   : > { %v1336_v12 = vsel %vm2206_vm9, %v1728_v33, %v1335_v57 }
 0x114   : > { %1364 = vst [vmem:[#allocation1 + $0x2] ss:$4 sm:$0xff] %v1336_v12 }
 0x11b   : > { %v1368_v38 = vld.sshfl [vmem:[#allocation1] sm:$0xff pattern:$0x73625140] }
 0x11c   : > { %1426 = vmatmul.bf16.vlgmr.msra.gmra.mxu3 %v1368_v38 }
 0x157   : > { %v726_v15 = vpop.f32.mrf.mxu0 }
 0x15f   : > { %v728_v63 = vpop.f32.mrf.mxu0 }
 0x162   : > { %v801_v46 = vpop.f32.mrf.mxu1 }
 0x163   : > { %v802_v41 = vadd.f32 %v801_v46, %v726_v15 }
 0x16a   : > { %v803_v60 = vpop.f32.mrf.mxu1 }
 0x16b   : > { %v804_v45 = vadd.f32 %v803_v60, %v728_v63 }
 0x183   : > { %v1113_v52 = vpop.f32.mrf.mxu2 }
 0x184   : > { %v1118_v54 = vadd.f32 %v1113_v52, %v802_v41 }
 0x18b   : > { %v1115_v34 = vpop.f32.mrf.mxu2 }
 0x18c   : > { %v1119_v55 = vadd.f32 %v1115_v34, %v804_v45 }
 0x19f   : > { %v1427_v1 = vpop.f32.mrf.mxu3 }
 0x1a0   : > { %v1432_v4 = vadd.f32 %v1427_v1, %v1118_v54 }
 0x1a2   : > { %v1438_v2 = vadd.f32 %v1825_v42, %v1432_v4 }
 0x1a4   : > { %v1440_v53 = vmul.f32 0.2, %v1438_v2 }
 0x1a6   : > { %v1442_v6 = vmax.f32 %v1438_v2, %v1440_v53 }
 0x1a7   : > { %v1429_v9 = vpop.f32.mrf.mxu3 }
 0x1a8   : > { %v1446_v32 = vrot.slane %v1442_v6, 4  ;;  %v1450_v50 = vpack.c.bf16 %v1442_v6, %v1442_v6  ;;  %v1433_v37 = vadd.f32 %v1429_v9, %v1119_v55 }
 0x1aa   : > { %v1451_v49 = vpack.c.bf16 %v1446_v32, %v1446_v32  ;;  %1774 = vst.msk [vmem:[%s2359_s16 + $0x44] sm:$0x3] %vm1487_vm13, %v1450_v50  ;;  %v1439_v51 = vadd.f32 %v1825_v42, %v1433_v37 }
 0x1ac   : > { %1775 = vst.msk [vmem:[%s2359_s16 + $0x4c] sm:$0x3] %vm1487_vm13, %v1451_v49  ;;  %v1441_v11 = vmul.f32 0.2, %v1439_v51 }
 0x1ae   : > { %v1443_v16 = vmax.f32 %v1439_v51, %v1441_v11 }
 0x1b0   : > { %v1447_v31 = vrot.slane %v1443_v16, 4  ;;  %v1452_v40 = vpack.c.bf16 %v1443_v16, %v1443_v16 }
 0x1b2   : > { %v1453_v26 = vpack.c.bf16 %v1447_v31, %v1447_v31  ;;  %1776 = vst.msk [vmem:[%s2359_s16 + $0x54] sm:$0x3] %vm1487_vm13, %v1452_v40 }
 0x1b4   : > { %1777 = vst.msk [vmem:[%s2359_s16 + $0x5c] sm:$0x3] %vm1487_vm13, %v1453_v26 }
 0x1b5 PF: > { %s13_s12 = sadd.s32 1, %s1832_s12  }
 0x1b6   : > { %p10_p4 = scmp.ge.s32.totalorder %s13_s12, 4  }
 0x1b8   :  { %12 = sbr.rel (!%p10_p4) target bundleno = 1 (0x1), region = 96 }

// kernel: nonorm_discriminator_pallas.9
= control target key start
LH: loop header
LB: loop body
LE: loop exit
PB: predicated region body
PF: predicated region fallthrough
CT: control target
= control target key end

     0   :  { %s3072_s14 = smov 0   ;;  %s3686_s0 = inlined_call_operand.vmem [shape: bf16[2,14,14,64], index: 0, kind: input, shape index: {}]   ;;  %s3687_s1 = inlined_call_operand.vmem [shape: bf16[1024,1], index: 1, kind: input, shape index: {}]   ;;  %s3688_s2 = inlined_call_operand.<no memory space> [shape: f32[1,1], index: 2, kind: input, shape index: {}]   ;;  %s3689_s3 = inlined_call_operand.vmem [shape: f32[2,5,5,1], index: 3, kind: output, shape index: {}]  }
   0x1   :  { %v8_v0 = vstv %s3688_s2 }
   0x2   :  { %9 = vst [vmem:[#allocation2] sm:$0x1] %v8_v0 }
   0x3 LB: > { %s2491_s15 = sadd.s32 4294967295, %s3046_s14   ;;  %p2495_p0 = scmp.ge.s32.totalorder %s3046_s14, 1  ;;  %s3046_s14 = sphi %s3072_s14, %s15_s14  }
   0x4   : > { %p139_p1 = scmp.lt.s32.totalorder %s3046_s14, 3 }
   0x6   : > { %p140_p2 = pnand %p2495_p0, %p139_p1 }
   0x7   : > { %p163_p3 = scmp.lt.s32.totalorder (!%p140_p2), %s2491_s15, 1  ;;  %s3048_s19 = smov (!%p140_p2), 64  }
   0x8   : > { %143 = sbr.rel (%p140_p2) target bundleno = 701 (0x2bd), region = 32 }
   0xd   : > { %s3691_s15 = smov (!%p163_p3, %s2491_s15), 1  ;;  %vm254_vm0 = vcmask 523264   ;;  %vm2430_vm1 = vcmask 4096  }
   0xe   : > { %s3028_s2 = smul.u32 112, %s3691_s15 }
   0xf   : > { %s3029_s23 = smul.u32 40, %s3691_s15 }
  0x10   : > { %s3086_s18 = scalar_lea.vmem %s3686_s0, %s3028_s2 }
  0x11   : > { %v2510_v1 = vld [vmem:[%s3086_s18 + $0x30] sm:$0x8]  ;;  %v2944_v2 = vld [vmem:[%s3086_s18 + $0x30] sm:$0x30]  ;;  %v2514_v3 = vld [vmem:[%s3086_s18 + $0x38] sm:$0x8]  ;;  %s3665_s26 = scalar_lea.vmem %s3689_s3, %s3029_s23 }
  0x12   : > { %v3091_v4 = vor.u32 %v2944_v2, %v2510_v1  ;;  %v2945_v5 = vld [vmem:[%s3086_s18 + $0x38] sm:$0x30]  ;;  %v2518_v6 = vld [vmem:[%s3086_s18 + $0x40] sm:$0x8]  ;;  %v2946_v7 = vld [vmem:[%s3086_s18 + $0x40] sm:$0x30] }
  0x13   : > { %v3096_v8 = vor.u32 %v2945_v5, %v2514_v3  ;;  %v3098_v9 = vor.u32 %v2946_v7, %v2518_v6  ;;  %v2522_v10 = vld [vmem:[%s3086_s18 + $0x48] sm:$0x8]  ;;  %v2947_v11 = vld [vmem:[%s3086_s18 + $0x48] sm:$0x30]  ;;  %v3103_v12 = vld [vmem:[%s3086_s18 + $0x34] sm:$0x7] }
  0x14   : > { %v210_v13 = vshrl.u32 %v3091_v4, 16  ;;  %v212_v14 = vshll.u32 %v3091_v4, 16  ;;  %v3107_v15 = vor.u32 %v2947_v11, %v2522_v10  ;;  %v3110_v16 = vld [vmem:[%s3086_s18 + $0x44] sm:$0x7]  ;;  %v2526_v17 = vld [vmem:[%s3086_s18 + $0x50] sm:$0x8]  ;;  %v354_v23 = vunpack.c.l.b16 %v3103_v12 }
  0x15   : > { %v224_v18 = vshrl.u32 %v3098_v9, 16  ;;  %v226_v19 = vshll.u32 %v3098_v9, 16  ;;  %v2948_v20 = vld [vmem:[%s3086_s18 + $0x50] sm:$0x30]  ;;  %v219_v22 = vshll.u32 %v3096_v8, 16  ;;  %v356_v26 = vunpack.c.l.b16 %v3110_v16 }
  0x16   : > { %v214_v21 = vrot.slane %v212_v14, 1  ;;  %v233_v25 = vshll.u32 %v3107_v15, 16  ;;  %v3120_v27 = vor.u32 %v2948_v20, %v2526_v17  ;;  %v3123_v29 = vld [vmem:[%s3086_s18 + $0x3c] sm:$0x7]  ;;  %v217_v30 = vshrl.u32 %v3096_v8, 16 }
  0x17   : > { %v228_v24 = vrot.slane %v226_v19, 1  ;;  %v3127_v32 = vld [vmem:[%s3086_s18 + $0x4c] sm:$0x7]  ;;  %v221_v33 = vrot.slane %v219_v22, 1  ;;  %v359_v34 = vpack.c.b16 %v354_v23, %v354_v23  ;;  %v231_v37 = vshrl.u32 %v3107_v15, 16 }
  0x18   : > { %v215_v28 = vor.u32 %v214_v21, %v210_v13  ;;  %v238_v35 = vshrl.u32 %v3120_v27, 16  ;;  %v240_v36 = vshll.u32 %v3120_v27, 16  ;;  %v235_v38 = vrot.slane %v233_v25, 1  ;;  %v3135_v40 = vld [vmem:[%s3086_s18 + $0x54] sm:$0x7] }
  0x19   : > { %v229_v31 = vor.u32 %v228_v24, %v224_v18  ;;  %v361_v39 = vpack.c.b16 %v356_v26, %v356_v26  ;;  %v355_v41 = vunpack.c.l.b16 %v3123_v29  ;;  %v357_v43 = vunpack.c.l.b16 %v3127_v32  ;;  %v2621_v54 = vld [vmem:[%s3086_s18 + $0x38] sm:$0x8]  ;;  %v2965_v55 = vld [vmem:[%s3086_s18 + $0x38] sm:$0x30]  ;;  %v2625_v1 = vld [vmem:[%s3086_s18 + $0x40] sm:$0x8] }
  0x1a   : > { %244 = vrot.lane.b32.xlu0 %v215_v28, %s3048_s19  ;;  %v242_v42 = vrot.slane %v240_v36, 1  ;;  %v222_v45 = vor.u32 %v221_v33, %v217_v30  ;;  %v367_v46 = vshll.u32 %v359_v34, 16  ;;  %v358_v48 = vunpack.c.l.b16 %v3135_v40  ;;  %v2966_v2 = vld [vmem:[%s3086_s18 + $0x40] sm:$0x30]  ;;  %v2629_v10 = vld [vmem:[%s3086_s18 + $0x48] sm:$0x8] }
  0x1b   : > { %248 = vrot.lane.b32.xlu1 %v229_v31, %s3048_s19  ;;  %v360_v44 = vpack.c.b16 %v355_v41, %v355_v41  ;;  %v236_v49 = vor.u32 %v235_v38, %v231_v37  ;;  %v381_v50 = vshll.u32 %v361_v39, 16  ;;  %v362_v53 = vpack.c.b16 %v357_v43, %v357_v43  ;;  %v2967_v11 = vld [vmem:[%s3086_s18 + $0x48] sm:$0x30]  ;;  %v2633_v17 = vld [vmem:[%s3086_s18 + $0x50] sm:$0x8] }
  0x1c   : > { %v243_v47 = vor.u32 %v242_v42, %v238_v35  ;;  %v365_v57 = vshrl.u32 %v359_v34, 16  ;;  %v369_v58 = vrot.slane %v367_v46, 1  ;;  %v363_v59 = vpack.c.b16 %v358_v48, %v358_v48  ;;  %v2968_v18 = vld [vmem:[%s3086_s18 + $0x50] sm:$0x30]  ;;  %v3180_v46 = vld [vmem:[%s3086_s18 + $0x44] sm:$0x7] }
  0x1d   : > { %v374_v51 = vshll.u32 %v360_v44, 16  ;;  %v372_v52 = vshrl.u32 %v360_v44, 16  ;;  %v379_v60 = vshrl.u32 %v361_v39, 16  ;;  %v383_v61 = vrot.slane %v381_v50, 1 }
  0x1e   : > { %252 = vrot.lane.b32.xlu2 %v243_v47, %s3048_s19  ;;  %v3145_v62 = vor.u32 %v2965_v55, %v2621_v54  ;;  %v388_v0 = vshll.u32 %v362_v53, 16  ;;  %v370_v3 = vor.u32 %v369_v58, %v365_v57  ;;  %v395_v5 = vshll.u32 %v363_v59, 16  ;;  %v3185_v57 = vld [vmem:[%s3086_s18 + $0x54] sm:$0x7] }
  0x1f   : > { %v376_v56 = vrot.slane %v374_v51, 1  ;;  %v384_v6 = vor.u32 %v383_v61, %v379_v60  ;;  %v386_v13 = vshrl.u32 %v362_v53, 16  ;;  %v3155_v19 = vor.u32 %v2966_v2, %v2625_v1  ;;  %v2969_v1 = vld [vmem:[%s3086_s18 + $0x58] sm:$0x30] }
  0x20   : > { %v753_v7 = vshll.u32 %v3145_v62, 16  ;;  %v390_v14 = vrot.slane %v388_v0, 1  ;;  %v393_v20 = vshrl.u32 %v363_v59, 16  ;;  %v397_v21 = vrot.slane %v395_v5, 1  ;;  %v2637_v0 = vld [vmem:[%s3086_s18 + $0x58] sm:$0x8] }
  0x21   : > { %v377_v63 = vor.u32 %v376_v56, %v372_v52  ;;  %v3158_v22 = vor.u32 %v2967_v11, %v2629_v10  ;;  %v751_v23 = vshrl.u32 %v3145_v62, 16  ;;  %v3162_v25 = vor.u32 %v2968_v18, %v2633_v17 }
  0x22   : > { %246 = vrot.lane.b32.xlu0 %v222_v45, %s3048_s19  ;;  %v755_v24 = vrot.slane %v753_v7, 1  ;;  %v391_v26 = vor.u32 %v390_v14, %v386_v13  ;;  %v760_v28 = vshll.u32 %v3155_v19, 16  ;;  %v398_v30 = vor.u32 %v397_v21, %v393_v20  ;;  %v3177_v45 = vld [vmem:[%s3086_s18 + $0x3c] sm:$0x7] }
  0x23   : > { %250 = vrot.lane.b32.xlu1 %v236_v49, %s3048_s19  ;;  %v767_v31 = vshll.u32 %v3158_v22, 16  ;;  %v774_v34 = vshll.u32 %v3162_v25, 16  ;;  %v758_v35 = vshrl.u32 %v3155_v19, 16  ;;  %v765_v37 = vshrl.u32 %v3158_v22, 16 }
  0x24   : > { %v756_v33 = vor.u32 %v755_v24, %v751_v23  ;;  %v762_v36 = vrot.slane %v760_v28, 1  ;;  %v772_v39 = vshrl.u32 %v3162_v25, 16  ;;  %v1015_v47 = vunpack.c.l.b16 %v3177_v45  ;;  %v2963_v28 = vld [vmem:[%s3687_s1 + $0x70] sm:$0xff] }
  0x25   : > { %v769_v38 = vrot.slane %v767_v31, 1  ;;  %v776_v41 = vrot.slane %v774_v34, 1  ;;  %v1016_v48 = vunpack.c.l.b16 %v3180_v46  ;;  %v1018_v60 = vunpack.c.l.b16 %v3185_v57  ;;  %v3213_v31 = vld [vmem:[%s3086_s18 + $0x4c] sm:$0x7] }
  0x26   : > { %401 = vrot.lane.b32.xlu2 %v377_v63, %s3048_s19  ;;  %v763_v42 = vor.u32 %v762_v36, %v758_v35  ;;  %v1020_v49 = vpack.c.b16 %v1015_v47, %v1015_v47  ;;  %v3192_v5 = vor.u32 %v2969_v1, %v2637_v0  ;;  %v2961_v36 = vld [vmem:[%s3687_s1 + $0x60] sm:$0xff]  ;;  %v2958_v0 = vld [vmem:[%s3687_s1 + $0x48] sm:$0xff] }
  0x27   : > { %v770_v43 = vor.u32 %v769_v38, %v765_v37  ;;  %v777_v44 = vor.u32 %v776_v41, %v772_v39  ;;  %v1021_v50 = vpack.c.b16 %v1016_v48, %v1016_v48  ;;  %v1023_v61 = vpack.c.b16 %v1018_v60, %v1018_v60  ;;  %v2736_v37 = vld [vmem:[%s3086_s18 + $0x48] sm:$0x8]  ;;  %v2987_v38 = vld [vmem:[%s3086_s18 + $0x48] sm:$0x30]  ;;  %v2960_v48 = vld [vmem:[%s3687_s1 + $0x58] sm:$0xff] }
  0x28   : > { %v1028_v51 = vshll.u32 %v1020_v49, 16  ;;  %v1026_v53 = vshrl.u32 %v1020_v49, 16  ;;  %v781_v10 = vshll.u32 %v3192_v5, 16  ;;  %v779_v13 = vshrl.u32 %v3192_v5, 16  ;;  %v2956_v49 = vld [vmem:[%s3687_s1 + $0x38] sm:$0xff]  ;;  %v2954_v1 = vld [vmem:[%s3687_s1 + $0x28] sm:$0xff] }
  0x29   : > { %v1035_v52 = vshll.u32 %v1021_v50, 16  ;;  %v1033_v55 = vshrl.u32 %v1021_v50, 16  ;;  %v1049_v63 = vshll.u32 %v1023_v61, 16  ;;  %v1047_v2 = vshrl.u32 %v1023_v61, 16  ;;  %695 = vmatpush.bf16.msra.mxu1 %v2956_v49 }
  0x2a   : > { %399 = vrot.lane.b32.xlu0 %v370_v3, %s3048_s19  ;;  %v1030_v54 = vrot.slane %v1028_v51, 1  ;;  %v783_v14 = vrot.slane %v781_v10, 1 }
  0x2b   : > { %403 = vrot.lane.b32.xlu1 %v384_v6, %s3048_s19  ;;  %v1037_v56 = vrot.slane %v1035_v52, 1  ;;  %v1051_v3 = vrot.slane %v1049_v63, 1  ;;  %v3195_v6 = vld [vmem:[%s3086_s18 + $0x5c] sm:$0x7] }
  0x2c   : > { %v1031_v58 = vor.u32 %v1030_v54, %v1026_v53  ;;  %v1019_v11 = vunpack.c.l.b16 %v3195_v6  ;;  %v784_v18 = vor.u32 %v783_v14, %v779_v13  ;;  %v2959_v54 = vld [vmem:[%s3687_s1 + $0x50] sm:$0xff] }
  0x2d   : > { %v1038_v59 = vor.u32 %v1037_v56, %v1033_v55  ;;  %v1052_v7 = vor.u32 %v1051_v3, %v1047_v2  ;;  %v2955_v55 = vld [vmem:[%s3687_s1 + $0x30] sm:$0xff] }
  0x2e   : > { %405 = vrot.lane.b32.xlu2 %v391_v26, %s3048_s19  ;;  %v1024_v17 = vpack.c.b16 %v1019_v11, %v1019_v11  ;;  %v2964_v26 = vld [vmem:[%s3687_s1 + $0x78] sm:$0xff]  ;;  %696 = vmatpush.bf16.msra.mxu1 %v2955_v55  ;;  %v2988_v3 = vld [vmem:[%s3086_s18 + $0x50] sm:$0x30] }
  0x2f   : > { %578 = vmatpush.bf16.msra.mxu0 %v2964_v26  ;;  %v2957_v26 = vld [vmem:[%s3687_s1 + $0x40] sm:$0xff] }
  0x30   : > { %v1056_v20 = vshll.u32 %v1024_v17, 16  ;;  %v1054_v21 = vshrl.u32 %v1024_v17, 16 }
  0x32   : > { %407 = vrot.lane.b32.xlu0 %v398_v30, %s3048_s19  ;;  %v1058_v23 = vrot.slane %v1056_v20, 1  ;;  %v2962_v30 = vld [vmem:[%s3687_s1 + $0x68] sm:$0xff]  ;;  %697 = vmatpush.bf16.msra.mxu1 %v2954_v1 }
  0x33   : > { %785 = vrot.lane.b32.xlu1 %v756_v33, %s3048_s19  ;;  %579 = vmatpush.bf16.msra.mxu0 %v2963_v28  ;;  %v1017_v33 = vunpack.c.l.b16 %v3213_v31  ;;  %v2953_v28 = vld [vmem:[%s3687_s1 + $0x20] sm:$0xff] }
  0x34   : > { %v1059_v24 = vor.u32 %v1058_v23, %v1054_v21 }
  0x35   : > { %v1022_v34 = vpack.c.b16 %v1017_v33, %v1017_v33  ;;  %v2986_v33 = vld [vmem:[%s3086_s18 + $0x40] sm:$0x30] }
  0x36   : > { %787 = vrot.lane.b32.xlu2 %v763_v42, %s3048_s19  ;;  %698 = vmatpush.bf16.msra.mxu1 %v2953_v28 }
  0x37   : > { %580 = vmatpush.bf16.msra.mxu0 %v2962_v30  ;;  %v1042_v35 = vshll.u32 %v1022_v34, 16  ;;  %v1040_v41 = vshrl.u32 %v1022_v34, 16  ;;  %v2732_v30 = vld [vmem:[%s3086_s18 + $0x40] sm:$0x8] }
  0x3a   : > { %789 = vrot.lane.b32.xlu0 %v770_v43, %s3048_s19  ;;  %v1044_v43 = vrot.slane %v1042_v35, 1 }
  0x3b   : > { %791 = vrot.lane.b32.xlu1 %v777_v44, %s3048_s19  ;;  %581 = vmatpush.bf16.msra.mxu0 %v2961_v36  ;;  %v3223_v44 = vor.u32 %v2987_v38, %v2736_v37 }
  0x3c   : > { %v1045_v47 = vor.u32 %v1044_v43, %v1040_v41 }
  0x3d   : > { %v1308_v50 = vshll.u32 %v3223_v44, 16  ;;  %v1306_v51 = vshrl.u32 %v3223_v44, 16 }
  0x3e   : > { %793 = vrot.lane.b32.xlu2 %v784_v18, %s3048_s19 }
  0x3f   : > { %582 = vmatpush.bf16.msra.mxu0 %v2960_v48 }
  0x42   : > { %1062 = vrot.lane.b32.xlu0 %v1038_v59, %s3048_s19 }
  0x43   : > { %1060 = vrot.lane.b32.xlu1 %v1031_v58, %s3048_s19  ;;  %583 = vmatpush.bf16.msra.mxu0 %v2959_v54 }
  0x46   : > { %1064 = vrot.lane.b32.xlu2 %v1045_v47, %s3048_s19 }
  0x47   : > { %584 = vmatpush.bf16.msra.mxu0 %v2958_v0 }
  0x4a   : > { %1066 = vrot.lane.b32.xlu0 %v1052_v7, %s3048_s19 }
  0x4b   : > { %1068 = vrot.lane.b32.xlu1 %v1059_v24, %s3048_s19  ;;  %585 = vmatpush.bf16.msra.mxu0 %v2957_v26 }
  0x78   : > { %v253_v63 = vpop.permute.xlu2 %252 }
  0x80   : > { %v402_v20 = vpop.permute.xlu2 %401 }
  0x81   : > { %v414_v47 = vsel %vm254_vm0, %v3123_v29, %v402_v20 }
  0x82   : > { %v431_v54 = vrot.slane %v414_v47, 1  ;;  %v432_v20 = vrot.slane %v414_v47, 2 }
  0x8c   : > { %v245_v39 = vpop.permute.xlu0 %244 }
  0x8d   : > { %v256_v42 = vsel %vm254_vm0, %v3091_v4, %v245_v39  ;;  %v1310_v4 = vrot.slane %v1308_v50, 1  ;;  %v249_v52 = vpop.permute.xlu1 %248  ;;  %v2952_v39 = vld [vmem:[%s3687_s1 + $0x18] sm:$0xff]  ;;  %v406_v50 = vpop.permute.xlu2 %405 }
  0x8e   : > { %265 = vst [vmem:[#allocation1] sm:$0xff] %v256_v42  ;;  %v260_v2 = vsel %vm254_vm0, %v3098_v9, %v249_v52  ;;  %699 = vmatpush.bf16.msra.mxu1 %v2952_v39  ;;  %v2748_v52 = vld [vmem:[%s3086_s18 + $0x60] sm:$0x8] }
  0x8f   : > { %v1311_v53 = vor.u32 %v1310_v4, %v1306_v51  ;;  %v2951_v4 = vld [vmem:[%s3687_s1 + $0x10] sm:$0xff] }
  0x91   : > { %1335 = vrot.lane.b32.xlu0 %v1311_v53, %s3048_s19  ;;  %v2990_v53 = vld [vmem:[%s3086_s18 + $0x60] sm:$0x30] }
  0x92   : > { %700 = vmatpush.bf16.msra.mxu1 %v2951_v4  ;;  %v2989_v4 = vld [vmem:[%s3086_s18 + $0x58] sm:$0x30] }
  0x94   : > { %v247_v56 = vpop.permute.xlu0 %246 }
  0x95   : > { %v3240_v58 = vld [vmem:[#allocation1 + $0x3] ss:$9 sm:$0xff]  ;;  %v3244_v60 = vld [vmem:[#allocation1 + $0x5] ss:$9 sm:$0xff]  ;;  %v258_v61 = vsel %vm254_vm0, %v3096_v8, %v247_v56  ;;  %v2740_v8 = vld [vmem:[%s3086_s18 + $0x50] sm:$0x8]  ;;  %v251_v14 = vpop.permute.xlu1 %250  ;;  %v264_v56 = vsel %vm254_vm0, %v3120_v27, %v253_v63  ;;  %v445_v63 = vunpack.i.h.s16 %v414_v47 }
  0x96   : > { %v3242_v59 = vld [vmem:[#allocation1 + $0x4] ss:$9 sm:$0xff]  ;;  %v3259_v7 = vor.u32 %v2988_v3, %v2740_v8  ;;  %v262_v21 = vsel %vm254_vm0, %v3107_v15, %v251_v14  ;;  %v3286_v15 = vor.u32 %v2986_v33, %v2732_v30 }
  0x97   : > { %275 = vst [vmem:[#allocation1] sm:$0xff] %v258_v61  ;;  %v2950_v27 = vld [vmem:[%s3687_s1 + $0x8] sm:$0xff] }
  0x98   : > { %v1315_v17 = vshll.u32 %v3259_v7, 16  ;;  %v1313_v18 = vshrl.u32 %v3259_v7, 16  ;;  %v1301_v41 = vshll.u32 %v3286_v15, 16  ;;  %v1299_v43 = vshrl.u32 %v3286_v15, 16  ;;  %701 = vmatpush.bf16.msra.mxu1 %v2950_v27 }
  0x9a   : > { %v1317_v9 = vrot.slane %v1315_v17, 1  ;;  %v1303_v49 = vrot.slane %v1301_v41, 1 }
  0x9c   : > { %v400_v23 = vpop.permute.xlu0 %399  ;;  %v1318_v24 = vor.u32 %v1317_v9, %v1313_v18  ;;  %v1304_v51 = vor.u32 %v1303_v49, %v1299_v43  ;;  %v447_v9 = vunpack.i.h.s16 %v431_v54 }
  0x9d   : > { %v404_v37 = vpop.permute.xlu1 %403  ;;  %v411_v38 = vsel %vm254_vm0, %v3103_v12, %v400_v23  ;;  %v2534_v23 = vpack.i.b16 %v431_v54, %v445_v63 }
  0x9e   : > { %v3261_v10 = vld [vmem:[#allocation1 + $0x3] ss:$9 sm:$0xff]  ;;  %v3265_v13 = vld [vmem:[#allocation1 + $0x5] ss:$9 sm:$0xff]  ;;  %1337 = vrot.lane.b32.xlu1 %v1318_v24, %s3048_s19  ;;  %v417_v42 = vsel %vm254_vm0, %v3110_v16, %v404_v37  ;;  %v430_v48 = vrot.slane %v411_v38, 2  ;;  %v429_v55 = vrot.slane %v411_v38, 1  ;;  %v3304_v16 = vor.u32 %v2990_v53, %v2748_v52  ;;  %1333 = vrot.lane.b32.xlu2 %v1304_v51, %s3048_s19 }
  0x9f   : > { %v3263_v11 = vld [vmem:[#allocation1 + $0x4] ss:$9 sm:$0xff]  ;;  %v434_v12 = vrot.slane %v417_v42, 2  ;;  %v433_v8 = vrot.slane %v417_v42, 1  ;;  %v2535_v30 = vpack.i.b16 %v432_v20, %v447_v9  ;;  %v2744_v51 = vld [vmem:[%s3086_s18 + $0x58] sm:$0x8] }
  0xa0   : > { %282 = vst [vmem:[#allocation1] sm:$0xff] %v260_v2  ;;  %v2533_v1 = vpack.i.b16 %v414_v47, %v430_v48  ;;  %v420_v2 = vsel %vm254_vm0, %v3127_v32, %v406_v50  ;;  %v1329_v3 = vshll.u32 %v3304_v16, 16  ;;  %v1327_v17 = vshrl.u32 %v3304_v16, 16  ;;  %v3335_v47 = vld [vmem:[%s3086_s18 + $0x4c] sm:$0x7] }
  0xa1   : > { %v2536_v14 = vpack.i.b16 %v420_v2, %v434_v12  ;;  %v435_v37 = vrot.slane %v420_v2, 1  ;;  %v455_v39 = vunpack.i.h.s16 %v420_v2  ;;  %v436_v41 = vrot.slane %v420_v2, 2  ;;  %v3341_v52 = vld [vmem:[%s3086_s18 + $0x5c] sm:$0x7] }
  0xa2   : > { %v1331_v18 = vrot.slane %v1329_v3, 1  ;;  %v1564_v49 = vunpack.c.l.b16 %v3335_v47  ;;  %v3343_v54 = vor.u32 %v2989_v4, %v2744_v51  ;;  %v3007_v4 = vld [vmem:[%s3086_s18 + $0x48] sm:$0x30] }
  0xa3   : > { %v457_v43 = vunpack.i.h.s16 %v435_v37  ;;  %v2537_v50 = vpack.i.b16 %v435_v37, %v455_v39 }
  0xa4   : > { %v1332_v32 = vor.u32 %v1331_v18, %v1327_v17  ;;  %v408_v33 = vpop.permute.xlu0 %407  ;;  %v1569_v12 = vpack.c.b16 %v1564_v49, %v1564_v49  ;;  %v1322_v27 = vshll.u32 %v3343_v54, 16  ;;  %v309_v49 = vunpack.i.h.s16 %v3261_v10 }
  0xa5   : > { %v2538_v53 = vpack.i.b16 %v436_v41, %v457_v43 }
  0xa6   : > { %1341 = vrot.lane.b32.xlu0 %v1332_v32, %s3048_s19  ;;  %v1583_v2 = vshll.u32 %v1569_v12, 16  ;;  %v1324_v20 = vrot.slane %v1322_v27, 1 }
  0xa7   : > { %v3279_v34 = vld [vmem:[#allocation1 + $0x3] ss:$9 sm:$0xff]  ;;  %v3283_v36 = vld [vmem:[#allocation1 + $0x5] ss:$9 sm:$0xff] }
  0xa8   : > { %v3281_v35 = vld [vmem:[#allocation1 + $0x4] ss:$9 sm:$0xff]  ;;  %v1585_v17 = vrot.slane %v1583_v2, 1 }
  0xa9   : > { %289 = vst [vmem:[#allocation1] sm:$0xff] %v262_v21  ;;  %v2949_v21 = vld [vmem:[%s3687_s1] sm:$0xff] }
  0xaa   : > { %702 = vmatpush.bf16.msra.mxu1 %v2949_v21 }
  0xb0   : > { %v3308_v29 = vld [vmem:[#allocation1 + $0x3] ss:$9 sm:$0xff]  ;;  %v3312_v0 = vld [vmem:[#allocation1 + $0x5] ss:$9 sm:$0xff] }
  0xb1   : > { %v3310_v61 = vld [vmem:[#allocation1 + $0x4] ss:$9 sm:$0xff] }
  0xb2   : > { %296 = vst [vmem:[#allocation1] sm:$0xff] %v264_v56  ;;  %v321_v51 = vunpack.i.h.s16 %v3310_v61 }
  0xb3   : > { %494 = vst [vmem:[#allocation1] ss:$9 sm:$0xff] %v411_v38  ;;  %v423_v38 = vsel %vm254_vm0, %v3135_v40, %v408_v33  ;;  %v1566_v40 = vunpack.c.l.b16 %v3341_v52 }
  0xb4   : > { %497 = vst [vmem:[#allocation1 + $0x1] ss:$9 sm:$0xff] %v429_v55  ;;  %v438_v48 = vrot.slane %v423_v38, 2  ;;  %v3347_v55 = vld [vmem:[%s3086_s18 + $0x54] sm:$0x7]  ;;  %v437_v3 = vrot.slane %v423_v38, 1 }
  0xb5   : > { %500 = vst [vmem:[#allocation1 + $0x2] ss:$9 sm:$0xff] %v2533_v1  ;;  %v1581_v1 = vshrl.u32 %v1569_v12, 16  ;;  %v1571_v63 = vpack.c.b16 %v1566_v40, %v1566_v40  ;;  %v2574_v12 = vpack.i.b16 %v3308_v29, %v3283_v36  ;;  %v2976_v36 = vld [vmem:[%s3687_s1 + $0xb0] sm:$0xff] }
  0xb6   : > { %512 = vst [vmem:[#allocation1 + $0x6] ss:$9 sm:$0xff] %v433_v8  ;;  %v463_v56 = vunpack.i.l.s16 %v438_v48  ;;  %v1565_v8 = vunpack.c.l.b16 %v3347_v55 }
  0xb7   : > { %515 = vst [vmem:[#allocation1 + $0x7] ss:$9 sm:$0xff] %v2536_v14  ;;  %v1320_v14 = vshrl.u32 %v3343_v54, 16  ;;  %v1597_v9 = vshll.u32 %v1571_v63, 16  ;;  %v1586_v32 = vor.u32 %v1585_v17, %v1581_v1  ;;  %v1595_v33 = vshrl.u32 %v1571_v63, 16  ;;  %v2974_v17 = vld [vmem:[%s3687_s1 + $0xa0] sm:$0xff] }
  0xb8   : > { %v1570_v18 = vpack.c.b16 %v1565_v8, %v1565_v8 }
  0xb9   : > { %v3326_v24 = vld [vmem:[#allocation1 + $0x3] ss:$9 sm:$0xff]  ;;  %v3330_v28 = vld [vmem:[#allocation1 + $0x5] ss:$9 sm:$0xff]  ;;  %1610 = vrot.lane.b32.xlu1 %v1586_v32, %s3048_s19  ;;  %v1599_v37 = vrot.slane %v1597_v9, 1 }
  0xba   : > { %v3328_v26 = vld [vmem:[#allocation1 + $0x4] ss:$9 sm:$0xff]  ;;  %503 = vst [vmem:[#allocation1 + $0x3] ss:$9 sm:$0xff] %v2534_v23  ;;  %v1588_v21 = vshrl.u32 %v1570_v18, 16  ;;  %v1590_v23 = vshll.u32 %v1570_v18, 16  ;;  %v786_v18 = vpop.permute.xlu1 %785 }
  0xbb   : > { %506 = vst [vmem:[#allocation1 + $0x4] ss:$9 sm:$0xff] %v2535_v30  ;;  %v1325_v30 = vor.u32 %v1324_v20, %v1320_v14  ;;  %v1600_v43 = vor.u32 %v1599_v37, %v1595_v33  ;;  %v2975_v14 = vld [vmem:[%s3687_s1 + $0xa8] sm:$0xff]  ;;  %v3008_v20 = vld [vmem:[%s3086_s18 + $0x50] sm:$0x30]  ;;  %v788_v33 = vpop.permute.xlu2 %787 }
  0xbc   : > { %509 = vst [vmem:[#allocation1 + $0x5] ss:$9 sm:$0xff] %v417_v42  ;;  %v1592_v39 = vrot.slane %v1590_v23, 1  ;;  %v3406_v32 = vld [vmem:[%s3086_s18 + $0x64] sm:$0x7] }
  0xbd   : > { %1339 = vrot.lane.b32.xlu2 %v1325_v30, %s3048_s19  ;;  %v1567_v23 = vunpack.c.l.b16 %v3406_v32  ;;  %v2973_v30 = vld [vmem:[%s3687_s1 + $0x98] sm:$0xff] }
  0xbe   : > { %v1593_v41 = vor.u32 %v1592_v39, %v1588_v21 }
  0xc0   : > { %1612 = vrot.lane.b32.xlu0 %v1593_v41, %s3048_s19  ;;  %v1572_v41 = vpack.c.b16 %v1567_v23, %v1567_v23 }
  0xc1   : > { %1614 = vrot.lane.b32.xlu1 %v1600_v43, %s3048_s19 }
  0xc2   : > { %v1604_v43 = vshll.u32 %v1572_v41, 16 }
  0xc3   : > { %v516_v42 = vld [vmem:[#allocation1] sm:$0xff] }
  0xc4   : > { %518 = vst [vmem:[#allocation1] ss:$9 sm:$0xff] %v2537_v50  ;;  %586 = vmatmul.bf16.vlgmr.msra.gmra.mxu0 %v516_v42  ;;  %v311_v50 = vunpack.i.h.s16 %v3263_v11 }
  0xc5   : > { %520 = vst [vmem:[#allocation1 + $0x1] ss:$9 sm:$0xff] %v2538_v53 }
  0xc6   : > { %522 = vst [vmem:[#allocation1 + $0x2] ss:$9 sm:$0xff] %v423_v38  ;;  %v2571_v38 = vpack.i.b16 %v3261_v10, %v3244_v60  ;;  %v2572_v60 = vpack.i.b16 %v3263_v11, %v309_v49  ;;  %v2573_v10 = vpack.i.b16 %v3265_v13, %v311_v50  ;;  %v2977_v11 = vld [vmem:[%s3687_s1 + $0xb8] sm:$0xff]  ;;  %v2843_v13 = vld [vmem:[%s3086_s18 + $0x48] sm:$0x8]  ;;  %v2972_v49 = vld [vmem:[%s3687_s1 + $0x90] sm:$0xff] }
  0xc7   : > { %524 = vst [vmem:[#allocation1 + $0x3] ss:$9 sm:$0xff] %v437_v3  ;;  %982 = vmatpush.bf16.msra.mxu2 %v2977_v11  ;;  %v3382_v53 = vor.u32 %v3007_v4, %v2843_v13  ;;  %v2984_v50 = vld [vmem:[%s3687_s1 + $0xf0] sm:$0xff]  ;;  %v2983_v11 = vld [vmem:[%s3687_s1 + $0xe8] sm:$0xff] }
  0xc8   : > { %526 = vst [vmem:[#allocation1 + $0x4] ss:$9 sm:$0xff] %v463_v56  ;;  %v2576_v56 = vpack.i.b16 %v3312_v0, %v321_v51  ;;  %v327_v0 = vunpack.i.l.s16 %v3330_v28  ;;  %v2847_v28 = vld [vmem:[%s3086_s18 + $0x50] sm:$0x8] }
  0xc9   : > { %v1847_v2 = vshrl.u32 %v3382_v53, 16  ;;  %v1849_v8 = vshll.u32 %v3382_v53, 16  ;;  %v3403_v9 = vor.u32 %v3008_v20, %v2847_v28 }
  0xcb   : > { %983 = vmatpush.bf16.msra.mxu2 %v2976_v36  ;;  %v1856_v21 = vshll.u32 %v3403_v9, 16  ;;  %v1854_v37 = vshrl.u32 %v3403_v9, 16 }
  0xcd   : > { %v1858_v39 = vrot.slane %v1856_v21, 1  ;;  %v2980_v21 = vld [vmem:[%s3687_s1 + $0xd0] sm:$0xff] }
  0xcf   : > { %v527_v48 = vld [vmem:[#allocation1] sm:$0xff]  ;;  %984 = vmatpush.bf16.msra.mxu2 %v2975_v14 }
  0xd0   : > { %617 = vst [vmem:[#allocation1 + $0x2] ss:$9 sm:$0xff] %v2571_v38  ;;  %v1859_v38 = vor.u32 %v1858_v39, %v1854_v37  ;;  %v3010_v14 = vld [vmem:[%s3086_s18 + $0x60] sm:$0x30]  ;;  %v2859_v37 = vld [vmem:[%s3086_s18 + $0x68] sm:$0x8] }
  0xd1   : > { %611 = vst [vmem:[#allocation1] ss:$9 sm:$0xff] %v3240_v58  ;;  %v3369_v58 = vld [vmem:[%s3086_s18 + $0x44] sm:$0x7]  ;;  %v3011_v39 = vld [vmem:[%s3086_s18 + $0x68] sm:$0x30] }
  0xd2   : > { %614 = vst [vmem:[#allocation1 + $0x1] ss:$9 sm:$0xff] %v3242_v59  ;;  %v319_v59 = vunpack.i.h.s16 %v3308_v29  ;;  %1883 = vrot.lane.b32.xlu1 %v1859_v38, %s3048_s19  ;;  %v3463_v38 = vor.u32 %v3011_v39, %v2859_v37 }
  0xd3   : > { %626 = vst [vmem:[#allocation1 + $0x5] ss:$9 sm:$0xff] %v3279_v34  ;;  %v1563_v34 = vunpack.c.l.b16 %v3369_v58  ;;  %985 = vmatpush.bf16.msra.mxu2 %v2974_v17 }
  0xd4   : > { %629 = vst [vmem:[#allocation1 + $0x6] ss:$9 sm:$0xff] %v3281_v35  ;;  %591 = vmatmul.bf16.gmra.mxu0 %v527_v48  ;;  %v2575_v29 = vpack.i.b16 %v3310_v61, %v319_v59  ;;  %v1851_v61 = vrot.slane %v1849_v8, 1  ;;  %v798_v48 = vsel %vm254_vm0, %v3155_v19, %v788_v33  ;;  %v2971_v19 = vld [vmem:[%s3687_s1 + $0x88] sm:$0xff] }
  0xd5   : > { %620 = vst [vmem:[#allocation1 + $0x3] ss:$9 sm:$0xff] %v2572_v60  ;;  %v1568_v35 = vpack.c.b16 %v1563_v34, %v1563_v34  ;;  %v1602_v60 = vshrl.u32 %v1572_v41, 16  ;;  %v2979_v33 = vld [vmem:[%s3687_s1 + $0xc8] sm:$0xff] }
  0xd6   : > { %623 = vst [vmem:[#allocation1 + $0x4] ss:$9 sm:$0xff] %v2573_v10  ;;  %v1852_v63 = vor.u32 %v1851_v61, %v1847_v2  ;;  %v1606_v10 = vrot.slane %v1604_v43, 1 }
  0xd7   : > { %632 = vst [vmem:[#allocation1 + $0x7] ss:$9 sm:$0xff] %v2574_v12  ;;  %v1574_v42 = vshrl.u32 %v1568_v35, 16  ;;  %v1576_v40 = vshll.u32 %v1568_v35, 16  ;;  %986 = vmatpush.bf16.msra.mxu2 %v2973_v30  ;;  %v790_v35 = vpop.permute.xlu0 %789 }
  0xd8   : > { %1881 = vrot.lane.b32.xlu0 %v1852_v63, %s3048_s19  ;;  %v1607_v51 = vor.u32 %v1606_v10, %v1602_v60  ;;  %v800_v13 = vsel %vm254_vm0, %v3158_v22, %v790_v35  ;;  %v1877_v60 = vshll.u32 %v3463_v38, 16  ;;  %v1875_v10 = vshrl.u32 %v3463_v38, 16 }
  0xd9   : > { %v1578_v3 = vrot.slane %v1576_v40, 1 }
  0xdb   : > { %v1579_v27 = vor.u32 %v1578_v3, %v1574_v42  ;;  %987 = vmatpush.bf16.msra.mxu2 %v2972_v49  ;;  %v792_v42 = vpop.permute.xlu1 %791  ;;  %v2855_v3 = vld [vmem:[%s3086_s18 + $0x60] sm:$0x8] }
  0xdc   : > { %v802_v40 = vsel %vm254_vm0, %v3162_v25, %v792_v42  ;;  %v2981_v25 = vld [vmem:[%s3687_s1 + $0xd8] sm:$0xff]  ;;  %v3448_v61 = vor.u32 %v3010_v14, %v2855_v3 }
  0xdd   : > { %1608 = vrot.lane.b32.xlu2 %v1579_v27, %s3048_s19 }
  0xde   : > { %v633_v1 = vld [vmem:[#allocation1] sm:$0xff]  ;;  %v1870_v27 = vshll.u32 %v3448_v61, 16  ;;  %v1868_v17 = vshrl.u32 %v3448_v61, 16 }
  0xdf   : > { %635 = vst [vmem:[#allocation1] ss:$9 sm:$0xff] %v2575_v29  ;;  %703 = vmatmul.bf16.vlgmr.msra.gmra.mxu1 %v633_v1  ;;  %988 = vmatpush.bf16.msra.mxu2 %v2971_v19  ;;  %v2982_v1 = vld [vmem:[%s3687_s1 + $0xe0] sm:$0xff]  ;;  %v2851_v19 = vld [vmem:[%s3086_s18 + $0x58] sm:$0x8]  ;;  %v1063_v3 = vpop.permute.xlu0 %1062 }
  0xe0   : > { %637 = vst [vmem:[#allocation1 + $0x1] ss:$9 sm:$0xff] %v2576_v56  ;;  %v2970_v56 = vld [vmem:[%s3687_s1 + $0x80] sm:$0xff] }
  0xe1   : > { %639 = vst [vmem:[#allocation1 + $0x2] ss:$9 sm:$0xff] %v3326_v24  ;;  %v796_v24 = vsel %vm254_vm0, %v3145_v62, %v786_v18  ;;  %v2985_v62 = vld [vmem:[%s3687_s1 + $0xf8] sm:$0xff]  ;;  %v1872_v18 = vrot.slane %v1870_v27, 1 }
  0xe2   : > { %641 = vst [vmem:[#allocation1 + $0x3] ss:$9 sm:$0xff] %v3328_v26  ;;  %1239 = vmatpush.bf16.msra.mxu3 %v2985_v62 }
  0xe3   : > { %643 = vst [vmem:[#allocation1 + $0x4] ss:$9 sm:$0xff] %v327_v0  ;;  %989 = vmatpush.bf16.msra.mxu2 %v2970_v56  ;;  %v794_v0 = vpop.permute.xlu2 %793 }
  0xe4   : > { %v804_v63 = vsel %vm254_vm0, %v3192_v5, %v794_v0 }
  0xe5   : > { %1616 = vrot.lane.b32.xlu2 %v1607_v51, %s3048_s19  ;;  %v2978_v51 = vld [vmem:[%s3687_s1 + $0xc0] sm:$0xff] }
  0xe6   : > { %1240 = vmatpush.bf16.msra.mxu3 %v2984_v50 }
  0xea   : > { %v644_v26 = vld [vmem:[#allocation1] sm:$0xff]  ;;  %1241 = vmatpush.bf16.msra.mxu3 %v2983_v11  ;;  %v3009_v11 = vld [vmem:[%s3086_s18 + $0x58] sm:$0x30] }
  0xeb   : > { %805 = vst [vmem:[#allocation1] sm:$0xff] %v796_v24 }
  0xee   : > { %1242 = vmatpush.bf16.msra.mxu3 %v2982_v1 }
  0xef   : > { %708 = vmatmul.bf16.gmra.mxu1 %v644_v26  ;;  %v1873_v26 = vor.u32 %v1872_v18, %v1868_v17 }
  0xf1   : > { %1887 = vrot.lane.b32.xlu0 %v1873_v26, %s3048_s19 }
  0xf2   : > { %v807_v12 = vld [vmem:[#allocation1 + $0x3] ss:$9 sm:$0xff]  ;;  %v813_v34 = vld [vmem:[#allocation1 + $0x5] ss:$9 sm:$0xff]  ;;  %1243 = vmatpush.bf16.msra.mxu3 %v2981_v25 }
  0xf3   : > { %v810_v59 = vld [vmem:[#allocation1 + $0x4] ss:$9 sm:$0xff] }
  0xf4   : > { %815 = vst [vmem:[#allocation1] sm:$0xff] %v798_v48 }
  0xf6   : > { %1244 = vmatpush.bf16.msra.mxu3 %v2980_v21 }
  0xfa   : > { %1245 = vmatpush.bf16.msra.mxu3 %v2979_v33 }
  0xfb   : > { %v816_v4 = vld [vmem:[#allocation1 + $0x3] ss:$9 sm:$0xff]  ;;  %v820_v29 = vld [vmem:[#allocation1 + $0x5] ss:$9 sm:$0xff] }
  0xfc   : > { %v818_v36 = vld [vmem:[#allocation1 + $0x4] ss:$9 sm:$0xff]  ;;  %v849_v5 = vunpack.i.h.s16 %v816_v4  ;;  %v2639_v30 = vpack.i.b16 %v816_v4, %v813_v34 }
  0xfd   : > { %822 = vst [vmem:[#allocation1] sm:$0xff] %v800_v13  ;;  %v851_v62 = vunpack.i.h.s16 %v818_v36  ;;  %v3472_v13 = vor.u32 %v3009_v11, %v2851_v19  ;;  %v3476_v4 = vld [vmem:[%s3086_s18 + $0x4c] sm:$0x7] }
  0xfe   : > { %v2640_v41 = vpack.i.b16 %v818_v36, %v849_v5  ;;  %1246 = vmatpush.bf16.msra.mxu3 %v2978_v51 }
  0xff   : > { %v2641_v50 = vpack.i.b16 %v820_v29, %v851_v62  ;;  %v1863_v36 = vshll.u32 %v3472_v13, 16  ;;  %v2111_v29 = vunpack.c.l.b16 %v3476_v4  ;;  %v1861_v1 = vshrl.u32 %v3472_v13, 16 }
 0x104   : > { %v823_v2 = vld [vmem:[#allocation1 + $0x3] ss:$9 sm:$0xff]  ;;  %v827_v22 = vld [vmem:[#allocation1 + $0x5] ss:$9 sm:$0xff] }
 0x105   : > { %v825_v8 = vld [vmem:[#allocation1 + $0x4] ss:$9 sm:$0xff] }
 0x106   : > { %829 = vst [vmem:[#allocation1] sm:$0xff] %v802_v40 }
 0x10d   : > { %v830_v24 = vld [vmem:[#allocation1 + $0x3] ss:$9 sm:$0xff]  ;;  %v834_v20 = vld [vmem:[#allocation1 + $0x5] ss:$9 sm:$0xff] }
 0x10e   : > { %v832_v28 = vld [vmem:[#allocation1 + $0x4] ss:$9 sm:$0xff]  ;;  %v2642_v23 = vpack.i.b16 %v830_v24, %v827_v22  ;;  %v3482_v22 = vld [vmem:[%s3086_s18 + $0x5c] sm:$0x7] }
 0x10f   : > { %836 = vst [vmem:[#allocation1] sm:$0xff] %v804_v63  ;;  %v861_v35 = vunpack.i.h.s16 %v832_v28  ;;  %v2113_v14 = vunpack.c.l.b16 %v3482_v22  ;;  %v1061_v63 = vpop.permute.xlu1 %1060 }
 0x110   : > { %898 = vst [vmem:[#allocation1] ss:$9 sm:$0xff] %v807_v12  ;;  %v1879_v12 = vrot.slane %v1877_v60, 1  ;;  %v1072_v21 = vsel %vm254_vm0, %v3177_v45, %v1061_v63 }
 0x111   : > { %901 = vst [vmem:[#allocation1 + $0x1] ss:$9 sm:$0xff] %v810_v59  ;;  %v859_v59 = vunpack.i.h.s16 %v830_v24  ;;  %v2644_v40 = vpack.i.b16 %v834_v20, %v861_v35  ;;  %v2118_v18 = vpack.c.b16 %v2113_v14, %v2113_v14  ;;  %v1075_v24 = vsel %vm254_vm0, %v3180_v46, %v1063_v3  ;;  %v2998_v3 = vld [vmem:[%s3687_s1 + $0x138] sm:$0xff] }
 0x112   : > { %916 = vst [vmem:[#allocation1 + $0x6] ss:$9 sm:$0xff] %v825_v8  ;;  %v1880_v34 = vor.u32 %v1879_v12, %v1875_v10  ;;  %v2116_v8 = vpack.c.b16 %v2111_v29, %v2111_v29  ;;  %v1091_v33 = vrot.slane %v1072_v21, 2  ;;  %v1106_v39 = vunpack.i.h.s16 %v1075_v24  ;;  %v3495_v10 = vld [vmem:[%s3086_s18 + $0x6c] sm:$0x7]  ;;  %1530 = vmatpush.bf16.msrb.mxu0 %v2998_v3 }
 0x113   : > { %904 = vst [vmem:[#allocation1 + $0x2] ss:$9 sm:$0xff] %v2639_v30  ;;  %v2643_v42 = vpack.i.b16 %v832_v28, %v859_v59  ;;  %v2136_v20 = vshrl.u32 %v2118_v18, 16  ;;  %v2138_v26 = vshll.u32 %v2118_v18, 16  ;;  %v1092_v30 = vrot.slane %v1075_v24, 1 }
 0x114   : > { %919 = vst [vmem:[#allocation1 + $0x7] ss:$9 sm:$0xff] %v2642_v23  ;;  %1889 = vrot.lane.b32.xlu1 %v1880_v34, %s3048_s19  ;;  %v2122_v0 = vshrl.u32 %v2116_v8, 16  ;;  %v2124_v27 = vshll.u32 %v2116_v8, 16  ;;  %v1065_v23 = vpop.permute.xlu2 %1064  ;;  %v2682_v60 = vpack.i.b16 %v1075_v24, %v1091_v33  ;;  %v2115_v59 = vunpack.c.l.b16 %v3495_v10 }
 0x115   : > { %v2140_v62 = vrot.slane %v2138_v26, 1  ;;  %v1078_v46 = vsel %vm254_vm0, %v3213_v31, %v1065_v23  ;;  %v2683_v12 = vpack.i.b16 %v1092_v30, %v1106_v39 }
 0x116   : > { %v837_v43 = vld [vmem:[#allocation1 + $0x3] ss:$9 sm:$0xff]  ;;  %v841_v49 = vld [vmem:[#allocation1 + $0x5] ss:$9 sm:$0xff]  ;;  %v2126_v28 = vrot.slane %v2124_v27, 1  ;;  %v1095_v45 = vrot.slane %v1078_v46, 2  ;;  %v2120_v19 = vpack.c.b16 %v2115_v59, %v2115_v59 }
 0x117   : > { %v839_v48 = vld [vmem:[#allocation1 + $0x4] ss:$9 sm:$0xff]  ;;  %907 = vst [vmem:[#allocation1 + $0x3] ss:$9 sm:$0xff] %v2640_v41  ;;  %v867_v17 = vunpack.i.l.s16 %v841_v49  ;;  %v2141_v37 = vor.u32 %v2140_v62, %v2136_v20  ;;  %v1093_v41 = vrot.slane %v1075_v24, 2  ;;  %v1090_v49 = vrot.slane %v1072_v21, 1  ;;  %v1069_v35 = vpop.permute.xlu1 %1068 }
 0x118   : > { %910 = vst [vmem:[#allocation1 + $0x4] ss:$9 sm:$0xff] %v2641_v50  ;;  %v2127_v5 = vor.u32 %v2126_v28, %v2122_v0  ;;  %v1067_v50 = vpop.permute.xlu0 %1066  ;;  %v1094_v11 = vrot.slane %v1078_v46, 1  ;;  %v3514_v28 = vld [vmem:[%s3086_s18 + $0x64] sm:$0x7]  ;;  %v2996_v62 = vld [vmem:[%s3687_s1 + $0x128] sm:$0xff] }
 0x119   : > { %913 = vst [vmem:[#allocation1 + $0x5] ss:$9 sm:$0xff] %v823_v2  ;;  %v1865_v2 = vrot.slane %v1863_v36, 1  ;;  %v1081_v31 = vsel %vm254_vm0, %v3185_v57, %v1067_v50  ;;  %v2152_v36 = vshll.u32 %v2120_v19, 16  ;;  %v2114_v23 = vunpack.c.l.b16 %v3514_v28 }
 0x11a   : > { %2156 = vrot.lane.b32.xlu0 %v2127_v5, %s3048_s19  ;;  %v2685_v51 = vpack.i.b16 %v1081_v31, %v1095_v45  ;;  %v1096_v29 = vrot.slane %v1081_v31, 1  ;;  %v1116_v8 = vunpack.i.h.s16 %v1081_v31  ;;  %v1097_v14 = vrot.slane %v1081_v31, 2  ;;  %v3006_v5 = vld [vmem:[%s3687_s1 + $0x178] sm:$0xff]  ;;  %v3004_v45 = vld [vmem:[%s3687_s1 + $0x168] sm:$0xff] }
 0x11b   : > { %v1866_v25 = vor.u32 %v1865_v2, %v1861_v1  ;;  %v3503_v1 = vld [vmem:[%s3086_s18 + $0x54] sm:$0x7]  ;;  %1787 = vmatpush.bf16.msrb.mxu1 %v3006_v5 }
 0x11c   : > { %2160 = vrot.lane.b32.xlu1 %v2141_v37, %s3048_s19  ;;  %v2112_v2 = vunpack.c.l.b16 %v3503_v1  ;;  %v2686_v18 = vpack.i.b16 %v1096_v29, %v1116_v8  ;;  %v3005_v37 = vld [vmem:[%s3687_s1 + $0x170] sm:$0xff]  ;;  %v3003_v8 = vld [vmem:[%s3687_s1 + $0x160] sm:$0xff] }
 0x11d   : > { %1885 = vrot.lane.b32.xlu2 %v1866_v25, %s3048_s19  ;;  %v1118_v25 = vunpack.i.h.s16 %v1096_v29 }
 0x11e   : > { %v2117_v27 = vpack.c.b16 %v2112_v2, %v2112_v2  ;;  %v2991_v2 = vld [vmem:[%s3687_s1 + $0x100] sm:$0xff] }
 0x11f   : > { %v2687_v20 = vpack.i.b16 %v1097_v14, %v1118_v25  ;;  %1788 = vmatpush.bf16.msrb.mxu1 %v3005_v37 }
 0x120   : > { %v920_v56 = vld [vmem:[#allocation1] sm:$0xff]  ;;  %v2129_v63 = vshrl.u32 %v2117_v27, 16  ;;  %v1336_v31 = vpop.permute.xlu0 %1335 }
 0x121   : > { %922 = vst [vmem:[#allocation1] ss:$9 sm:$0xff] %v2643_v42  ;;  %990 = vmatmul.bf16.vlgmr.msra.gmra.mxu2 %v920_v56  ;;  %v2150_v42 = vshrl.u32 %v2120_v19, 16  ;;  %v1084_v56 = vsel %vm254_vm0, %v3195_v6, %v1069_v35  ;;  %v2997_v6 = vld [vmem:[%s3687_s1 + $0x130] sm:$0xff] }
 0x122   : > { %924 = vst [vmem:[#allocation1 + $0x1] ss:$9 sm:$0xff] %v2644_v40  ;;  %v2154_v40 = vrot.slane %v2152_v36, 1  ;;  %v1099_v0 = vrot.slane %v1084_v56, 2  ;;  %1531 = vmatpush.bf16.msrb.mxu0 %v2997_v6  ;;  %v1338_v36 = vpop.permute.xlu1 %1337 }
 0x123   : > { %926 = vst [vmem:[#allocation1 + $0x2] ss:$9 sm:$0xff] %v837_v43  ;;  %v1108_v43 = vunpack.i.h.s16 %v1092_v30  ;;  %v1098_v30 = vrot.slane %v1084_v56, 1  ;;  %1789 = vmatpush.bf16.msrb.mxu1 %v3004_v45  ;;  %v1348_v29 = vsel %vm254_vm0, %v3259_v7, %v1338_v36  ;;  %v3002_v7 = vld [vmem:[%s3687_s1 + $0x158] sm:$0xff] }
 0x124   : > { %928 = vst [vmem:[#allocation1 + $0x3] ss:$9 sm:$0xff] %v839_v48  ;;  %v2155_v57 = vor.u32 %v2154_v40, %v2150_v42  ;;  %v1124_v26 = vunpack.i.l.s16 %v1099_v0 }
 0x125   : > { %930 = vst [vmem:[#allocation1 + $0x4] ss:$9 sm:$0xff] %v867_v17  ;;  %v2684_v34 = vpack.i.b16 %v1093_v41, %v1108_v43  ;;  %v2131_v17 = vshll.u32 %v2117_v27, 16  ;;  %v2995_v43 = vld [vmem:[%s3687_s1 + $0x120] sm:$0xff] }
 0x126   : > { %2164 = vrot.lane.b32.xlu0 %v2155_v57, %s3048_s19  ;;  %1532 = vmatpush.bf16.msrb.mxu0 %v2996_v62 }
 0x127   : > { %1790 = vmatpush.bf16.msrb.mxu1 %v3003_v8 }
 0x128   : > { %v1342_v0 = vpop.permute.xlu0 %1341 }
 0x12a   : > { %1533 = vmatpush.bf16.msrb.mxu0 %v2995_v43 }
 0x12b   : > { %1791 = vmatpush.bf16.msrb.mxu1 %v3002_v7 }
 0x12c   : > { %v931_v48 = vld [vmem:[#allocation1] sm:$0xff] }
 0x12d   : > { %1155 = vst [vmem:[#allocation1] ss:$9 sm:$0xff] %v1072_v21  ;;  %v2133_v21 = vrot.slane %v2131_v17, 1  ;;  %v3001_v17 = vld [vmem:[%s3687_s1 + $0x150] sm:$0xff] }
 0x12e   : > { %1158 = vst [vmem:[#allocation1 + $0x1] ss:$9 sm:$0xff] %v1090_v49 }
 0x12f   : > { %1161 = vst [vmem:[#allocation1 + $0x2] ss:$9 sm:$0xff] %v2682_v60  ;;  %v2134_v33 = vor.u32 %v2133_v21, %v2129_v63  ;;  %1792 = vmatpush.bf16.msrb.mxu1 %v3001_v17  ;;  %v3015_v17 = vld [vmem:[%s3687_s1 + $0x198] sm:$0xff] }
 0x130   : > { %1164 = vst [vmem:[#allocation1 + $0x3] ss:$9 sm:$0xff] %v2683_v12  ;;  %v2994_v12 = vld [vmem:[%s3687_s1 + $0x118] sm:$0xff] }
 0x131   : > { %1167 = vst [vmem:[#allocation1 + $0x4] ss:$9 sm:$0xff] %v2684_v34  ;;  %995 = vmatmul.bf16.gmra.mxu2 %v931_v48  ;;  %2158 = vrot.lane.b32.xlu2 %v2134_v33, %s3048_s19  ;;  %v1334_v48 = vpop.permute.xlu2 %1333  ;;  %v2993_v34 = vld [vmem:[%s3687_s1 + $0x110] sm:$0xff] }
 0x132   : > { %1170 = vst [vmem:[#allocation1 + $0x5] ss:$9 sm:$0xff] %v1078_v46  ;;  %v2119_v46 = vpack.c.b16 %v2114_v23, %v2114_v23  ;;  %v1344_v60 = vsel %vm254_vm0, %v3286_v15, %v1334_v48  ;;  %1534 = vmatpush.bf16.msrb.mxu0 %v2994_v12  ;;  %v1346_v15 = vsel %vm254_vm0, %v3223_v44, %v1336_v31  ;;  %v1611_v48 = vpop.permute.xlu1 %1610 }
 0x133   : > { %1173 = vst [vmem:[#allocation1 + $0x6] ss:$9 sm:$0xff] %v1094_v11 }
 0x134   : > { %1176 = vst [vmem:[#allocation1 + $0x7] ss:$9 sm:$0xff] %v2685_v51  ;;  %v2143_v39 = vshrl.u32 %v2119_v46, 16  ;;  %v2145_v41 = vshll.u32 %v2119_v46, 16  ;;  %v2992_v51 = vld [vmem:[%s3687_s1 + $0x108] sm:$0xff]  ;;  %v2999_v46 = vld [vmem:[%s3687_s1 + $0x140] sm:$0xff] }
 0x136   : > { %v2147_v49 = vrot.slane %v2145_v41, 1  ;;  %1535 = vmatpush.bf16.msrb.mxu0 %v2993_v34 }
 0x138   : > { %v2148_v50 = vor.u32 %v2147_v49, %v2143_v39 }
 0x139   : > { %v1340_v57 = vpop.permute.xlu2 %1339 }
 0x13a   : > { %2162 = vrot.lane.b32.xlu2 %v2148_v50, %s3048_s19  ;;  %1536 = vmatpush.bf16.msrb.mxu0 %v2992_v51  ;;  %v1350_v44 = vsel %vm254_vm0, %v3343_v54, %v1340_v57  ;;  %v1352_v54 = vsel %vm254_vm0, %v3304_v16, %v1342_v0  ;;  %v3000_v16 = vld [vmem:[%s3687_s1 + $0x148] sm:$0xff]  ;;  %v1623_v50 = vsel %vm254_vm0, %v3335_v47, %v1611_v48  ;;  %v3019_v47 = vld [vmem:[%s3687_s1 + $0x1b8] sm:$0xff]  ;;  %v3016_v0 = vld [vmem:[%s3687_s1 + $0x1a0] sm:$0xff] }
 0x13b   : > { %v1177_v24 = vld [vmem:[#allocation1] sm:$0xff]  ;;  %1793 = vmatpush.bf16.msrb.mxu1 %v3000_v16  ;;  %v1641_v51 = vrot.slane %v1623_v50, 2  ;;  %2078 = vmatpush.bf16.msrb.mxu2 %v3019_v47  ;;  %v3014_v16 = vld [vmem:[%s3687_s1 + $0x190] sm:$0xff] }
 0x13c   : > { %1183 = vst [vmem:[#allocation1 + $0x2] ss:$9 sm:$0xff] %v1084_v56  ;;  %1247 = vmatmul.bf16.vlgmr.msra.gmra.mxu3 %v1177_v24 }
 0x13d   : > { %1179 = vst [vmem:[#allocation1] ss:$9 sm:$0xff] %v2686_v18 }
 0x13e   : > { %1181 = vst [vmem:[#allocation1 + $0x1] ss:$9 sm:$0xff] %v2687_v20  ;;  %1537 = vmatpush.bf16.msrb.mxu0 %v2991_v2  ;;  %v3026_v2 = vld [vmem:[%s3687_s1 + $0x1f0] sm:$0xff] }
 0x13f   : > { %1185 = vst [vmem:[#allocation1 + $0x3] ss:$9 sm:$0xff] %v1098_v30  ;;  %1794 = vmatpush.bf16.msrb.mxu1 %v2999_v46 }
 0x140   : > { %1187 = vst [vmem:[#allocation1 + $0x4] ss:$9 sm:$0xff] %v1124_v26 }
 0x141   : > { %v1609_v49 = vpop.permute.xlu2 %1608 }
 0x142   : > { %v1620_v12 = vsel %vm254_vm0, %v3369_v58, %v1609_v49  ;;  %v3027_v58 = vld [vmem:[%s3687_s1 + $0x1f8] sm:$0xff] }
 0x143   : > { %v1639_v31 = vrot.slane %v1620_v12, 2  ;;  %2335 = vmatpush.bf16.msrb.mxu3 %v3027_v58 }
 0x147   : > { %v1188_v59 = vld [vmem:[#allocation1] sm:$0xff]  ;;  %2336 = vmatpush.bf16.msrb.mxu3 %v3026_v2 }
 0x148   : > { %1353 = vst [vmem:[#allocation1] sm:$0xff] %v1344_v60  ;;  %v1613_v60 = vpop.permute.xlu0 %1612 }
 0x149   : > { %v1626_v34 = vsel %vm254_vm0, %v3347_v55, %v1613_v60  ;;  %v3012_v60 = vld [vmem:[%s3687_s1 + $0x180] sm:$0xff] }
 0x14a   : > { %v1642_v8 = vrot.slane %v1626_v34, 1 }
 0x14c   : > { %1252 = vmatmul.bf16.gmra.mxu3 %v1188_v59  ;;  %v1640_v59 = vrot.slane %v1623_v50, 1 }
 0x14f   : > { %v1355_v19 = vld [vmem:[#allocation1 + $0x3] ss:$9 sm:$0xff]  ;;  %v1361_v35 = vld [vmem:[#allocation1 + $0x5] ss:$9 sm:$0xff] }
 0x150   : > { %v1358_v11 = vld [vmem:[#allocation1 + $0x4] ss:$9 sm:$0xff] }
 0x151   : > { %1363 = vst [vmem:[#allocation1] sm:$0xff] %v1346_v15  ;;  %v1654_v15 = vunpack.i.h.s16 %v1623_v50 }
 0x153   : > { %v2794_v55 = vpack.i.b16 %v1640_v59, %v1654_v15 }
 0x158   : > { %v1364_v42 = vld [vmem:[#allocation1 + $0x3] ss:$9 sm:$0xff]  ;;  %v1368_v56 = vld [vmem:[#allocation1 + $0x5] ss:$9 sm:$0xff] }
 0x159   : > { %v1366_v40 = vld [vmem:[#allocation1 + $0x4] ss:$9 sm:$0xff]  ;;  %v2750_v18 = vpack.i.b16 %v1364_v42, %v1361_v35  ;;  %v1397_v20 = vunpack.i.h.s16 %v1364_v42  ;;  %v1643_v35 = vrot.slane %v1626_v34, 2  ;;  %v2793_v42 = vpack.i.b16 %v1623_v50, %v1639_v31 }
 0x15a   : > { %1370 = vst [vmem:[#allocation1] sm:$0xff] %v1348_v29  ;;  %v1399_v26 = vunpack.i.h.s16 %v1366_v40  ;;  %v1638_v29 = vrot.slane %v1620_v12, 1 }
 0x15b   : > { %v2751_v21 = vpack.i.b16 %v1366_v40, %v1397_v20 }
 0x15c   : > { %v2752_v62 = vpack.i.b16 %v1368_v56, %v1399_v26  ;;  %v3018_v56 = vld [vmem:[%s3687_s1 + $0x1b0] sm:$0xff] }
 0x15d   : > { %2079 = vmatpush.bf16.msrb.mxu2 %v3018_v56 }
 0x161   : > { %v1371_v3 = vld [vmem:[#allocation1 + $0x3] ss:$9 sm:$0xff]  ;;  %v1375_v25 = vld [vmem:[#allocation1 + $0x5] ss:$9 sm:$0xff] }
 0x162   : > { %v1373_v14 = vld [vmem:[#allocation1 + $0x4] ss:$9 sm:$0xff] }
 0x163   : > { %1377 = vst [vmem:[#allocation1] sm:$0xff] %v1350_v44 }
 0x16a   : > { %v1378_v27 = vld [vmem:[#allocation1 + $0x3] ss:$9 sm:$0xff]  ;;  %v1382_v63 = vld [vmem:[#allocation1 + $0x5] ss:$9 sm:$0xff] }
 0x16b   : > { %v1380_v6 = vld [vmem:[#allocation1 + $0x4] ss:$9 sm:$0xff]  ;;  %v2753_v24 = vpack.i.b16 %v1378_v27, %v1375_v25  ;;  %v1407_v33 = vunpack.i.h.s16 %v1378_v27 }
 0x16c   : > { %1384 = vst [vmem:[#allocation1] sm:$0xff] %v1352_v54  ;;  %v1409_v37 = vunpack.i.h.s16 %v1380_v6 }
 0x16d   : > { %1446 = vst [vmem:[#allocation1] ss:$9 sm:$0xff] %v1355_v19  ;;  %v2754_v39 = vpack.i.b16 %v1380_v6, %v1407_v33  ;;  %v1656_v19 = vunpack.i.h.s16 %v1640_v59 }
 0x16e   : > { %1449 = vst [vmem:[#allocation1 + $0x1] ss:$9 sm:$0xff] %v1358_v11  ;;  %v2755_v41 = vpack.i.b16 %v1382_v63, %v1409_v37  ;;  %v1615_v11 = vpop.permute.xlu1 %1614 }
 0x16f   : > { %1452 = vst [vmem:[#allocation1 + $0x2] ss:$9 sm:$0xff] %v2750_v18  ;;  %v1629_v40 = vsel %vm254_vm0, %v3341_v52, %v1615_v11  ;;  %v2795_v57 = vpack.i.b16 %v1641_v51, %v1656_v19  ;;  %v3017_v52 = vld [vmem:[%s3687_s1 + $0x1a8] sm:$0xff] }
 0x170   : > { %1464 = vst [vmem:[#allocation1 + $0x6] ss:$9 sm:$0xff] %v1373_v14  ;;  %v2796_v44 = vpack.i.b16 %v1629_v40, %v1643_v35  ;;  %v3025_v14 = vld [vmem:[%s3687_s1 + $0x1e8] sm:$0xff]  ;;  %v1644_v25 = vrot.slane %v1629_v40, 1  ;;  %2080 = vmatpush.bf16.msrb.mxu2 %v3017_v52  ;;  %v1664_v54 = vunpack.i.h.s16 %v1629_v40  ;;  %v1645_v27 = vrot.slane %v1629_v40, 2 }
 0x171   : > { %1467 = vst [vmem:[#allocation1 + $0x7] ss:$9 sm:$0xff] %v2753_v24  ;;  %2337 = vmatpush.bf16.msrb.mxu3 %v3025_v14 }
 0x172   : > { %v1666_v6 = vunpack.i.h.s16 %v1644_v25  ;;  %v2797_v18 = vpack.i.b16 %v1644_v25, %v1664_v54 }
 0x173   : > { %v1385_v23 = vld [vmem:[#allocation1 + $0x3] ss:$9 sm:$0xff]  ;;  %v1389_v30 = vld [vmem:[#allocation1 + $0x5] ss:$9 sm:$0xff] }
 0x174   : > { %v1387_v5 = vld [vmem:[#allocation1 + $0x4] ss:$9 sm:$0xff]  ;;  %1455 = vst [vmem:[#allocation1 + $0x3] ss:$9 sm:$0xff] %v2751_v21  ;;  %v1415_v45 = vunpack.i.l.s16 %v1389_v30  ;;  %2081 = vmatpush.bf16.msrb.mxu2 %v3016_v0  ;;  %v2798_v20 = vpack.i.b16 %v1645_v27, %v1666_v6  ;;  %v1882_v21 = vpop.permute.xlu0 %1881 }
 0x175   : > { %1458 = vst [vmem:[#allocation1 + $0x4] ss:$9 sm:$0xff] %v2752_v62 }
 0x176   : > { %1461 = vst [vmem:[#allocation1 + $0x5] ss:$9 sm:$0xff] %v1371_v3  ;;  %v1617_v3 = vpop.permute.xlu2 %1616  ;;  %v1884_v62 = vpop.permute.xlu1 %1883 }
 0x177   : > { %v1632_v7 = vsel %vm254_vm0, %v3406_v32, %v1617_v3  ;;  %v1894_v33 = vsel %vm254_vm0, %v3403_v9, %v1884_v62  ;;  %v3024_v9 = vld [vmem:[%s3687_s1 + $0x1e0] sm:$0xff] }
 0x178   : > { %v1647_v63 = vrot.slane %v1632_v7, 2  ;;  %v1646_v32 = vrot.slane %v1632_v7, 1  ;;  %2082 = vmatpush.bf16.msrb.mxu2 %v3015_v17  ;;  %2338 = vmatpush.bf16.msrb.mxu3 %v3024_v9  ;;  %v587_v9 = vpop.f32.mrf.mxu0 }
 0x17a   : > { %v1672_v26 = vunpack.i.l.s16 %v1647_v63 }
 0x17c   : > { %2083 = vmatpush.bf16.msrb.mxu2 %v3014_v16 }
 0x17d   : > { %v1468_v43 = vld [vmem:[#allocation1] sm:$0xff] }
 0x17e   : > { %1470 = vst [vmem:[#allocation1] ss:$9 sm:$0xff] %v2754_v39  ;;  %1538 = vmatmul.bf16.vlgmr.msrb.gmra.mxu0 %v1468_v43 }
 0x17f   : > { %1472 = vst [vmem:[#allocation1 + $0x1] ss:$9 sm:$0xff] %v2755_v41  ;;  %v1886_v41 = vpop.permute.xlu2 %1885 }
 0x180   : > { %1474 = vst [vmem:[#allocation1 + $0x2] ss:$9 sm:$0xff] %v1385_v23  ;;  %v3013_v23 = vld [vmem:[%s3687_s1 + $0x188] sm:$0xff]  ;;  %v1896_v43 = vsel %vm254_vm0, %v3472_v13, %v1886_v41  ;;  %v3023_v13 = vld [vmem:[%s3687_s1 + $0x1d8] sm:$0xff] }
 0x181   : > { %1476 = vst [vmem:[#allocation1 + $0x3] ss:$9 sm:$0xff] %v1387_v5  ;;  %v1892_v5 = vsel %vm254_vm0, %v3382_v53, %v1882_v21  ;;  %2084 = vmatpush.bf16.msrb.mxu2 %v3013_v23  ;;  %v1888_v53 = vpop.permute.xlu0 %1887  ;;  %2339 = vmatpush.bf16.msrb.mxu3 %v3023_v13 }
 0x182   : > { %1478 = vst [vmem:[#allocation1 + $0x4] ss:$9 sm:$0xff] %v1415_v45  ;;  %v1898_v50 = vsel %vm254_vm0, %v3448_v61, %v1888_v53 }
 0x185   : > { %2085 = vmatpush.bf16.msrb.mxu2 %v3012_v60  ;;  %v704_v60 = vpop.f32.mrf.mxu1 }
 0x186   : > { %v1890_v31 = vpop.permute.xlu1 %1889 }
 0x187   : > { %v1900_v61 = vsel %vm254_vm0, %v3463_v38, %v1890_v31  ;;  %v3021_v38 = vld [vmem:[%s3687_s1 + $0x1c8] sm:$0xff] }
 0x189   : > { %v1479_v36 = vld [vmem:[#allocation1] sm:$0xff] }
 0x18a   : > { %1703 = vst [vmem:[#allocation1] ss:$9 sm:$0xff] %v1620_v12 }
 0x18b   : > { %1706 = vst [vmem:[#allocation1 + $0x1] ss:$9 sm:$0xff] %v1638_v29 }
 0x18c   : > { %1709 = vst [vmem:[#allocation1 + $0x2] ss:$9 sm:$0xff] %v2793_v42  ;;  %v2157_v54 = vpop.permute.xlu0 %2156 }
 0x18d   : > { %1712 = vst [vmem:[#allocation1 + $0x3] ss:$9 sm:$0xff] %v2794_v55 }
 0x18e   : > { %1715 = vst [vmem:[#allocation1 + $0x4] ss:$9 sm:$0xff] %v2795_v57  ;;  %1543 = vmatmul.bf16.gmra.mxu0 %v1479_v36  ;;  %v3022_v36 = vld [vmem:[%s3687_s1 + $0x1d0] sm:$0xff]  ;;  %v2161_v27 = vpop.permute.xlu1 %2160 }
 0x18f   : > { %1721 = vst [vmem:[#allocation1 + $0x6] ss:$9 sm:$0xff] %v1642_v8  ;;  %2340 = vmatpush.bf16.msrb.mxu3 %v3022_v36  ;;  %v2159_v8 = vpop.permute.xlu2 %2158 }
 0x190   : > { %1724 = vst [vmem:[#allocation1 + $0x7] ss:$9 sm:$0xff] %v2796_v44  ;;  %v3020_v44 = vld [vmem:[%s3687_s1 + $0x1c0] sm:$0xff]  ;;  %v2171_v25 = vsel %vm254_vm0, %v3503_v1, %v2159_v8  ;;  %v3657_v8 = vld [vmem:[#allocation2] ss:$0 sm:$0xff] }
 0x191   : > { %1718 = vst [vmem:[#allocation1 + $0x5] ss:$9 sm:$0xff] %v1626_v34  ;;  %v2188_v0 = vrot.slane %v2171_v25, 1  ;;  %v2202_v6 = vunpack.i.h.s16 %v2171_v25  ;;  %v2189_v63 = vrot.slane %v2171_v25, 2 }
 0x193   : > { %2341 = vmatpush.bf16.msrb.mxu3 %v3021_v38  ;;  %v2204_v17 = vunpack.i.h.s16 %v2188_v0  ;;  %v2905_v1 = vpack.i.b16 %v2188_v0, %v2202_v6 }
 0x197   : > { %2342 = vmatpush.bf16.msrb.mxu3 %v3020_v44  ;;  %v2163_v16 = vpop.permute.xlu2 %2162 }
 0x198   : > { %v1725_v24 = vld [vmem:[#allocation1] sm:$0xff] }
 0x199   : > { %1731 = vst [vmem:[#allocation1 + $0x2] ss:$9 sm:$0xff] %v1632_v7  ;;  %1795 = vmatmul.bf16.vlgmr.msrb.gmra.mxu1 %v1725_v24  ;;  %v2174_v24 = vsel %vm254_vm0, %v3482_v22, %v2161_v27  ;;  %v2165_v22 = vpop.permute.xlu0 %2164 }
 0x19a   : > { %1727 = vst [vmem:[#allocation1] ss:$9 sm:$0xff] %v2797_v18  ;;  %v2168_v18 = vsel %vm254_vm0, %v3476_v4, %v2157_v54  ;;  %v2191_v21 = vrot.slane %v2174_v24, 2  ;;  %v2190_v4 = vrot.slane %v2174_v24, 1 }
 0x19b   : > { %1729 = vst [vmem:[#allocation1 + $0x1] ss:$9 sm:$0xff] %v2798_v20  ;;  %v2187_v20 = vrot.slane %v2168_v18, 2  ;;  %v2186_v23 = vrot.slane %v2168_v18, 1 }
 0x19c   : > { %1733 = vst [vmem:[#allocation1 + $0x3] ss:$9 sm:$0xff] %v1646_v32 }
 0x19d   : > { %1735 = vst [vmem:[#allocation1 + $0x4] ss:$9 sm:$0xff] %v1672_v26  ;;  %v2906_v26 = vpack.i.b16 %v2189_v63, %v2204_v17 }
 0x1a4   : > { %v1736_v30 = vld [vmem:[#allocation1] sm:$0xff] }
 0x1a5   : > { %1901 = vst [vmem:[#allocation1] sm:$0xff] %v1892_v5  ;;  %v2904_v5 = vpack.i.b16 %v2171_v25, %v2187_v20 }
 0x1a9   : > { %1800 = vmatmul.bf16.gmra.mxu1 %v1736_v30  ;;  %v2177_v30 = vsel %vm254_vm0, %v3514_v28, %v2163_v16 }
 0x1aa   : > { %v2907_v62 = vpack.i.b16 %v2177_v30, %v2191_v21 }
 0x1ac   : > { %v1903_v46 = vld [vmem:[#allocation1 + $0x3] ss:$9 sm:$0xff]  ;;  %v1909_v39 = vld [vmem:[#allocation1 + $0x5] ss:$9 sm:$0xff] }
 0x1ad   : > { %v1906_v37 = vld [vmem:[#allocation1 + $0x4] ss:$9 sm:$0xff] }
 0x1ae   : > { %1911 = vst [vmem:[#allocation1] sm:$0xff] %v1894_v33  ;;  %v2192_v33 = vrot.slane %v2177_v30, 1 }
 0x1b0   : > { %v2214_v41 = vunpack.i.h.s16 %v2192_v33 }
 0x1b5   : > { %v1912_v48 = vld [vmem:[#allocation1 + $0x3] ss:$9 sm:$0xff]  ;;  %v1916_v45 = vld [vmem:[#allocation1 + $0x5] ss:$9 sm:$0xff] }
 0x1b6   : > { %v1914_v49 = vld [vmem:[#allocation1 + $0x4] ss:$9 sm:$0xff]  ;;  %v2861_v11 = vpack.i.b16 %v1912_v48, %v1909_v39  ;;  %v1945_v29 = vunpack.i.h.s16 %v1912_v48  ;;  %v2193_v39 = vrot.slane %v2177_v30, 2 }
 0x1b7   : > { %1918 = vst [vmem:[#allocation1] sm:$0xff] %v1896_v43  ;;  %v1947_v47 = vunpack.i.h.s16 %v1914_v49 }
 0x1b8   : > { %v2862_v42 = vpack.i.b16 %v1914_v49, %v1945_v29  ;;  %v2909_v49 = vpack.i.b16 %v2193_v39, %v2214_v41  ;;  %v705_v29 = vadd.f32 %v704_v60, %v587_v9 }
 0x1b9   : > { %v2863_v56 = vpack.i.b16 %v1916_v45, %v1947_v47 }
 0x1be   : > { %v1919_v12 = vld [vmem:[#allocation1 + $0x3] ss:$9 sm:$0xff]  ;;  %v1923_v34 = vld [vmem:[#allocation1 + $0x5] ss:$9 sm:$0xff] }
 0x1bf   : > { %v1921_v59 = vld [vmem:[#allocation1 + $0x4] ss:$9 sm:$0xff] }
 0x1c0   : > { %1925 = vst [vmem:[#allocation1] sm:$0xff] %v1898_v50 }
 0x1c7   : > { %v1926_v15 = vld [vmem:[#allocation1 + $0x3] ss:$9 sm:$0xff]  ;;  %v1930_v19 = vld [vmem:[#allocation1 + $0x5] ss:$9 sm:$0xff] }
 0x1c8   : > { %v1928_v51 = vld [vmem:[#allocation1 + $0x4] ss:$9 sm:$0xff]  ;;  %v2864_v35 = vpack.i.b16 %v1926_v15, %v1923_v34  ;;  %v1955_v57 = vunpack.i.h.s16 %v1926_v15  ;;  %v706_v34 = vpop.f32.mrf.mxu1 }
 0x1c9   : > { %1932 = vst [vmem:[#allocation1] sm:$0xff] %v1900_v61  ;;  %v1957_v2 = vunpack.i.h.s16 %v1928_v51 }
 0x1ca   : > { %1994 = vst [vmem:[#allocation1] ss:$9 sm:$0xff] %v1903_v46  ;;  %v2865_v3 = vpack.i.b16 %v1928_v51, %v1955_v57  ;;  %v2180_v46 = vsel %vm254_vm0, %v3495_v10, %v2165_v22  ;;  %v991_v10 = vpop.f32.mrf.mxu2 }
 0x1cb   : > { %1997 = vst [vmem:[#allocation1 + $0x1] ss:$9 sm:$0xff] %v1906_v37  ;;  %v2866_v52 = vpack.i.b16 %v1930_v19, %v1957_v2  ;;  %v2212_v37 = vunpack.i.h.s16 %v2177_v30  ;;  %v2195_v43 = vrot.slane %v2180_v46, 2  ;;  %v2194_v45 = vrot.slane %v2180_v46, 1 }
 0x1cc   : > { %2000 = vst [vmem:[#allocation1 + $0x2] ss:$9 sm:$0xff] %v2861_v11  ;;  %v1001_v47 = vadd.f32 %v991_v10, %v705_v29 }
 0x1cd   : > { %2012 = vst [vmem:[#allocation1 + $0x6] ss:$9 sm:$0xff] %v1921_v59  ;;  %v2908_v48 = vpack.i.b16 %v2192_v33, %v2212_v37  ;;  %v2220_v53 = vunpack.i.l.s16 %v2195_v43  ;;  %v589_v59 = vpop.f32.mrf.mxu0 }
 0x1ce   : > { %2015 = vst [vmem:[#allocation1 + $0x7] ss:$9 sm:$0xff] %v2864_v35  ;;  %v707_v44 = vadd.f32 %v706_v34, %v589_v59 }
 0x1d0   : > { %v1933_v58 = vld [vmem:[#allocation1 + $0x3] ss:$9 sm:$0xff]  ;;  %v1937_v40 = vld [vmem:[#allocation1 + $0x5] ss:$9 sm:$0xff]  ;;  %v709_v15 = vpop.f32.mrf.mxu1 }
 0x1d1   : > { %v1935_v55 = vld [vmem:[#allocation1 + $0x4] ss:$9 sm:$0xff]  ;;  %2003 = vst [vmem:[#allocation1 + $0x3] ss:$9 sm:$0xff] %v2862_v42  ;;  %v1963_v7 = vunpack.i.l.s16 %v1937_v40 }
 0x1d2   : > { %2006 = vst [vmem:[#allocation1 + $0x4] ss:$9 sm:$0xff] %v2863_v56  ;;  %v993_v13 = vpop.f32.mrf.mxu2 }
 0x1d3   : > { %2009 = vst [vmem:[#allocation1 + $0x5] ss:$9 sm:$0xff] %v1919_v12  ;;  %v1248_v12 = vpop.f32.mrf.mxu3 }
 0x1d5   : > { %v592_v61 = vpop.f32.mrf.mxu0 }
 0x1d8   : > { %v3651_v35 = vpop.f32.mrf.mxu1 }
 0x1da   : > { %v2016_v14 = vld [vmem:[#allocation1] sm:$0xff]  ;;  %v996_v51 = vpop.f32.mrf.mxu2 }
 0x1db   : > { %2018 = vst [vmem:[#allocation1] ss:$9 sm:$0xff] %v2865_v3  ;;  %2086 = vmatmul.bf16.vlgmr.msrb.gmra.mxu2 %v2016_v14  ;;  %v1250_v31 = vpop.f32.mrf.mxu3  ;;  %v1002_v3 = vadd.f32 %v993_v13, %v707_v44 }
 0x1dc   : > { %2020 = vst [vmem:[#allocation1 + $0x1] ss:$9 sm:$0xff] %v2866_v52 }
 0x1dd   : > { %2022 = vst [vmem:[#allocation1 + $0x2] ss:$9 sm:$0xff] %v1933_v58  ;;  %v3649_v11 = vpop.f32.mrf.mxu0  ;;  %v1258_v58 = vadd.f32 %v1248_v12, %v1001_v47 }
 0x1de   : > { %2024 = vst [vmem:[#allocation1 + $0x3] ss:$9 sm:$0xff] %v1935_v55  ;;  %v712_v34 = vadd.f32 %v3651_v35, %v3649_v11 }
 0x1df   : > { %2026 = vst [vmem:[#allocation1 + $0x4] ss:$9 sm:$0xff] %v1963_v7  ;;  %v1259_v7 = vadd.f32 %v1250_v31, %v1002_v3 }
 0x1e2   : > { %v3653_v36 = vpop.f32.mrf.mxu2 }
 0x1e3   : > { %v1253_v19 = vpop.f32.mrf.mxu3 }
 0x1e6   : > { %v2027_v32 = vld [vmem:[#allocation1] sm:$0xff] }
 0x1e7   : > { %2260 = vst [vmem:[#allocation1 + $0x3] ss:$9 sm:$0xff] %v2905_v1 }
 0x1e8   : > { %2263 = vst [vmem:[#allocation1 + $0x4] ss:$9 sm:$0xff] %v2906_v26 }
 0x1e9   : > { %2251 = vst [vmem:[#allocation1] ss:$9 sm:$0xff] %v2168_v18 }
 0x1ea   : > { %2254 = vst [vmem:[#allocation1 + $0x1] ss:$9 sm:$0xff] %v2186_v23 }
 0x1eb   : > { %2257 = vst [vmem:[#allocation1 + $0x2] ss:$9 sm:$0xff] %v2904_v5  ;;  %2091 = vmatmul.bf16.gmra.mxu2 %v2027_v32  ;;  %v3655_v42 = vpop.f32.mrf.mxu3 }
 0x1ec   : > { %2266 = vst [vmem:[#allocation1 + $0x5] ss:$9 sm:$0xff] %v2174_v24 }
 0x1ed   : > { %2269 = vst [vmem:[#allocation1 + $0x6] ss:$9 sm:$0xff] %v2190_v4  ;;  %v710_v4 = vadd.f32 %v709_v15, %v592_v61  ;;  %v1004_v61 = vadd.f32 %v3653_v36, %v712_v34 }
 0x1ee   : > { %2272 = vst [vmem:[#allocation1 + $0x7] ss:$9 sm:$0xff] %v2907_v62 }
 0x1ef   : > { %v1003_v22 = vadd.f32 %v996_v51, %v710_v4  ;;  %v1261_v29 = vadd.f32 %v3655_v42, %v1004_v61 }
 0x1f5   : > { %v2273_v28 = vld [vmem:[#allocation1] sm:$0xff] }
 0x1f6   : > { %2275 = vst [vmem:[#allocation1] ss:$9 sm:$0xff] %v2908_v48  ;;  %2343 = vmatmul.bf16.vlgmr.msrb.gmra.mxu3 %v2273_v28 }
 0x1f7   : > { %2277 = vst [vmem:[#allocation1 + $0x1] ss:$9 sm:$0xff] %v2909_v49 }
 0x1f8   : > { %2279 = vst [vmem:[#allocation1 + $0x2] ss:$9 sm:$0xff] %v2180_v46  ;;  %v1260_v46 = vadd.f32 %v1253_v19, %v1003_v22 }
 0x1f9   : > { %2281 = vst [vmem:[#allocation1 + $0x3] ss:$9 sm:$0xff] %v2194_v45 }
 0x1fa   : > { %2283 = vst [vmem:[#allocation1 + $0x4] ss:$9 sm:$0xff] %v2220_v53 }
 0x1fb   : > { %v1539_v38 = vpop.f32.mrf.mxu0 }
 0x1fc   : > { %v1549_v40 = vadd.f32 %v1539_v38, %v1258_v58 }
 0x201   : > { %v2284_v50 = vld [vmem:[#allocation1] sm:$0xff] }
 0x203   : > { %v1541_v14 = vpop.f32.mrf.mxu0 }
 0x204   : > { %v1550_v27 = vadd.f32 %v1541_v14, %v1259_v7 }
 0x206   : > { %2348 = vmatmul.bf16.gmra.mxu3 %v2284_v50 }
 0x20b   : > { %v1544_v33 = vpop.f32.mrf.mxu0 }
 0x20c   : > { %v1551_v39 = vadd.f32 %v1544_v33, %v1260_v46 }
 0x213   : > { %v1546_v51 = vpop.f32.mrf.mxu0 }
 0x214   : > { %v1552_v38 = vadd.f32 %v1546_v51, %v1261_v29 }
 0x216   : > { %v1796_v55 = vpop.f32.mrf.mxu1 }
 0x217   : > { %v1806_v57 = vadd.f32 %v1796_v55, %v1549_v40 }
 0x21e   : > { %v1798_v0 = vpop.f32.mrf.mxu1 }
 0x21f   : > { %v1807_v24 = vadd.f32 %v1798_v0, %v1550_v27 }
 0x226   : > { %v1801_v37 = vpop.f32.mrf.mxu1 }
 0x227   : > { %v1808_v28 = vadd.f32 %v1801_v37, %v1551_v39 }
 0x22e   : > { %v1803_v47 = vpop.f32.mrf.mxu1 }
 0x22f   : > { %v1809_v35 = vadd.f32 %v1803_v47, %v1552_v38 }
 0x25e   : > { %v2087_v56 = vpop.f32.mrf.mxu2 }
 0x25f   : > { %v2097_v2 = vadd.f32 %v2087_v56, %v1806_v57 }
 0x266   : > { %v2089_v6 = vpop.f32.mrf.mxu2 }
 0x267   : > { %v2098_v20 = vadd.f32 %v2089_v6, %v1807_v24 }
 0x26e   : > { %v2092_v43 = vpop.f32.mrf.mxu2 }
 0x26f   : > { %v2099_v9 = vadd.f32 %v2092_v43, %v1808_v28 }
 0x276   : > { %v2094_v11 = vpop.f32.mrf.mxu2 }
 0x277   : > { %v2100_v55 = vadd.f32 %v2094_v11, %v1809_v35 }
 0x279   : > { %v2344_v52 = vpop.f32.mrf.mxu3 }
 0x27a   : > { %v2354_v25 = vadd.f32 %v2344_v52, %v2097_v2 }
 0x27c   : > { %v2362_v54 = vadd.f32 %v3657_v8, %v2354_v25 }
 0x27e   : > { %v2370_v63 = vrot.slane %v2362_v54, 1  ;;  %v2371_v17 = vrot.slane %v2362_v54, 2  ;;  %v2372_v18 = vrot.slane %v2362_v54, 3  ;;  %2391 = vst [vmem:[#allocation1] ss:$9 sm:$0xff] %v2362_v54  ;;  %v2373_v1 = vrot.slane %v2362_v54, 4 }
 0x27f   : > { %v2374_v21 = vrot.slane %v2362_v54, 5  ;;  %v2375_v23 = vrot.slane %v2362_v54, 6  ;;  %v2376_v30 = vrot.slane %v2362_v54, 7 }
 0x280   : > { %2393 = vst [vmem:[#allocation1 + $0x1] ss:$9 sm:$0xff] %v2370_v63 }
 0x281   : > { %2395 = vst [vmem:[#allocation1 + $0x2] ss:$9 sm:$0xff] %v2371_v17  ;;  %v2346_v26 = vpop.f32.mrf.mxu3 }
 0x282   : > { %2397 = vst [vmem:[#allocation1 + $0x3] ss:$9 sm:$0xff] %v2372_v18  ;;  %v2355_v32 = vadd.f32 %v2346_v26, %v2098_v20 }
 0x283   : > { %2399 = vst [vmem:[#allocation1 + $0x4] ss:$9 sm:$0xff] %v2373_v1 }
 0x284   : > { %v2363_v16 = vadd.f32 %v3657_v8, %v2355_v32 }
 0x286   : > { %v2377_v62 = vrot.slane %v2363_v16, 1  ;;  %v2378_v41 = vrot.slane %v2363_v16, 2  ;;  %v2380_v48 = vrot.slane %v2363_v16, 4  ;;  %v2379_v45 = vrot.slane %v2363_v16, 3 }
 0x287   : > { %v2381_v53 = vrot.slane %v2363_v16, 5  ;;  %v2382_v60 = vrot.slane %v2363_v16, 6  ;;  %v2383_v59 = vrot.slane %v2363_v16, 7 }
 0x289   : > { %v2349_v50 = vpop.f32.mrf.mxu3 }
 0x28a   : > { %v2400_v5 = vld [vmem:[#allocation1] sm:$0xff]  ;;  %v2356_v10 = vadd.f32 %v2349_v50, %v2099_v9 }
 0x28b   : > { %2401 = vst [vmem:[#allocation1] ss:$9 sm:$0xff] %v2374_v21 }
 0x28c   : > { %2402 = vst [vmem:[#allocation1 + $0x1] ss:$9 sm:$0xff] %v2375_v23  ;;  %v2364_v12 = vadd.f32 %v3657_v8, %v2356_v10 }
 0x28d   : > { %2403 = vst [vmem:[#allocation1 + $0x2] ss:$9 sm:$0xff] %v2376_v30 }
 0x28e   : > { %2404 = vst [vmem:[#allocation1 + $0x3] ss:$9 sm:$0xff] %v2363_v16  ;;  %v2384_v31 = vrot.slane %v2364_v12, 1  ;;  %v2385_v15 = vrot.slane %v2364_v12, 2  ;;  %v2386_v19 = vrot.slane %v2364_v12, 3  ;;  %v2387_v36 = vrot.slane %v2364_v12, 4 }
 0x28f   : > { %2405 = vst [vmem:[#allocation1 + $0x4] ss:$9 sm:$0xff] %v2377_v62  ;;  %v2388_v40 = vrot.slane %v2364_v12, 5  ;;  %v2389_v44 = vrot.slane %v2364_v12, 6  ;;  %v2390_v2 = vrot.slane %v2364_v12, 7 }
 0x290   : > { %2431 = vst.msk [vmem:[%s3665_s26] sm:$0x1f] %vm2430_vm1, %v2400_v5 }
 0x291   : > { %v2351_v58 = vpop.f32.mrf.mxu3 }
 0x292   : > { %v2357_v57 = vadd.f32 %v2351_v58, %v2100_v55 }
 0x294   : > { %v2365_v42 = vadd.f32 %v3657_v8, %v2357_v57 }
 0x296   : > { %v2406_v49 = vld [vmem:[#allocation1] sm:$0xff] }
 0x297   : > { %2407 = vst [vmem:[#allocation1] ss:$9 sm:$0xff] %v2378_v41 }
 0x298   : > { %2409 = vst [vmem:[#allocation1 + $0x2] ss:$9 sm:$0xff] %v2380_v48 }
 0x299   : > { %2408 = vst [vmem:[#allocation1 + $0x1] ss:$9 sm:$0xff] %v2379_v45 }
 0x29a   : > { %2410 = vst [vmem:[#allocation1 + $0x3] ss:$9 sm:$0xff] %v2381_v53 }
 0x29b   : > { %2411 = vst [vmem:[#allocation1 + $0x4] ss:$9 sm:$0xff] %v2382_v60 }
 0x29c   : > { %2432 = vst.msk [vmem:[%s3665_s26 + $0x8] sm:$0x1f] %vm2430_vm1, %v2406_v49 }
 0x2a2   : > { %v2412_v13 = vld [vmem:[#allocation1] sm:$0xff] }
 0x2a3   : > { %2413 = vst [vmem:[#allocation1] ss:$9 sm:$0xff] %v2383_v59 }
 0x2a4   : > { %2414 = vst [vmem:[#allocation1 + $0x1] ss:$9 sm:$0xff] %v2364_v12 }
 0x2a5   : > { %2415 = vst [vmem:[#allocation1 + $0x2] ss:$9 sm:$0xff] %v2384_v31 }
 0x2a6   : > { %2416 = vst [vmem:[#allocation1 + $0x3] ss:$9 sm:$0xff] %v2385_v15 }
 0x2a7   : > { %2417 = vst [vmem:[#allocation1 + $0x4] ss:$9 sm:$0xff] %v2386_v19 }
 0x2a8   : > { %2433 = vst.msk [vmem:[%s3665_s26 + $0x10] sm:$0x1f] %vm2430_vm1, %v2412_v13 }
 0x2ae   : > { %v2418_v56 = vld [vmem:[#allocation1] sm:$0xff] }
 0x2af   : > { %2419 = vst [vmem:[#allocation1] ss:$9 sm:$0xff] %v2387_v36 }
 0x2b0   : > { %2420 = vst [vmem:[#allocation1 + $0x1] ss:$9 sm:$0xff] %v2388_v40 }
 0x2b1   : > { %2421 = vst [vmem:[#allocation1 + $0x2] ss:$9 sm:$0xff] %v2389_v44 }
 0x2b2   : > { %2422 = vst [vmem:[#allocation1 + $0x3] ss:$9 sm:$0xff] %v2390_v2 }
 0x2b3   : > { %2434 = vst.msk [vmem:[%s3665_s26 + $0x18] sm:$0x1f] %vm2430_vm1, %v2418_v56 }
 0x2b4   : > { %2423 = vst [vmem:[#allocation1 + $0x4] ss:$9 sm:$0xff] %v2365_v42 }
 0x2bb   : > { %v2424_v3 = vld [vmem:[#allocation1] sm:$0xff] }
 0x2bc   : > { %2435 = vst.msk [vmem:[%s3665_s26 + $0x20] sm:$0x1f] %vm2430_vm1, %v2424_v3 }
 0x2bd PF: > { %s15_s14 = sadd.s32 1, %s3046_s14  }
 0x2be   : > { %p12_p4 = scmp.ge.s32.totalorder %s15_s14, 4  }
 0x2c0   :  { %14 = sbr.rel (!%p12_p4) target bundleno = 3 (0x3), region = 138 }

</bundles_post_ra>
